<compile_context>
chip_gen: v5e
topology: v5e:2x2
jax: 0.10.0
libtpu: 0.0.40
codegen_flags: <defaults>
</compile_context>

<pallas_src>
import math

import jax
import jax.numpy as jnp
from jax.experimental import pallas as pl
from jax.experimental.pallas import tpu as pltpu

# ---- model hyperparameters (small, deterministic) ----
B = 2        # batch
SQ = 8       # query sequence length
SM = 64      # number of memory slots (key/value length)
D = 32       # d_model
H = 4        # heads
DK = D // H  # per-head dim
TOPK = 32    # module default topk

_MASK_NEG = 1e9      # additive bias magnitude for masked slots
_REMOVED = -1.0e30   # sentinel used while peeling off row maxima


def mtm_kernel(q_ref, k_ref, v_ref, bias_ref, w_ref, b_ref, out_ref):
    """Fused MultiThreadMemory forward; all batches in one invocation.

    q_ref   : (B*SQ, D)     flattened query rows
    k_ref   : (B*SM, D)     flattened key rows
    v_ref   : (B*SM, D)     flattened value rows
    bias_ref: (B, SQ, SM)   additive mask bias (0 keep / -1e9 masked)
    w_ref   : (4, D, D)     packed Wq|Wk|Wv|Wo, stored (in, out): y = x @ W + b
    b_ref   : (4, 1, D)     packed bq|bk|bv|bo
    out_ref : (B*SQ, D)
    """
    inv_sqrt_dk = 1.0 / math.sqrt(DK)

    wq, wk, wv, wo = w_ref[0], w_ref[1], w_ref[2], w_ref[3]   # (D, D) each
    bq, bk, bv, bo = b_ref[0], b_ref[1], b_ref[2], b_ref[3]   # (1, D) each

    # ---- fused projections over all rows (batch folded into sublanes) ----
    qp = jnp.dot(q_ref[...], wq, preferred_element_type=jnp.float32) + bq   # (B*SQ, D)
    kp = jnp.dot(k_ref[...], wk, preferred_element_type=jnp.float32) + bk   # (B*SM, D)
    vp = jnp.dot(v_ref[...], wv, preferred_element_type=jnp.float32) + bv   # (B*SM, D)

    # ---- scores for every (batch, head), stacked along the sublane axis ----
    blocks = []
    for b in range(B):
        bias_b = bias_ref[b]                                   # (SQ, SM)
        qb = qp[b * SQ:(b + 1) * SQ, :]
        kb = kp[b * SM:(b + 1) * SM, :]
        for h in range(H):
            qh = qb[:, h * DK:(h + 1) * DK]                    # (SQ, DK)
            kh = kb[:, h * DK:(h + 1) * DK]                    # (SM, DK)
            s = jax.lax.dot_general(qh, kh, (((1,), (1,)), ((), ())),
                                    preferred_element_type=jnp.float32)
            blocks.append(s * inv_sqrt_dk + bias_b)            # (SQ, SM)
    s_all = jnp.concatenate(blocks, axis=0)                    # (B*H*SQ, SM)

    # ---- per-row top-k threshold: TOPK-th largest score of each row ----
    rem = s_all
    for _ in range(TOPK - 1):
        m = jnp.max(rem, axis=-1, keepdims=True)
        rem = jnp.where(rem >= m, _REMOVED, rem)
    thresh = jnp.max(rem, axis=-1, keepdims=True)              # (B*H*SQ, 1)
    keep = s_all >= thresh                                     # exactly TOPK per row

    # ---- softmax restricted to the selected slots ----
    rowmax = jnp.max(s_all, axis=-1, keepdims=True)
    e = jnp.where(keep, jnp.exp(s_all - rowmax), 0.0)
    denom = jnp.sum(e, axis=-1, keepdims=True)                 # >= 1
    p = e * pl.reciprocal(denom, approx=False)                 # (B*H*SQ, SM)

    # ---- weighted memory read; heads folded straight into Wo (no concat) ----
    for b in range(B):
        vb = vp[b * SM:(b + 1) * SM, :]
        acc = jnp.zeros((SQ, D), jnp.float32)
        for h in range(H):
            r0 = (b * H + h) * SQ
            p_bh = p[r0:r0 + SQ, :]                            # (SQ, SM)
            vh = vb[:, h * DK:(h + 1) * DK]                    # (SM, DK)
            head = jnp.dot(p_bh, vh, preferred_element_type=jnp.float32)
            acc = acc + jnp.dot(head, wo[h * DK:(h + 1) * DK, :],
                                preferred_element_type=jnp.float32)
        out_ref[b * SQ:(b + 1) * SQ, :] = (acc + bo).astype(out_ref.dtype)


def multi_thread_memory(query, key, value, mask, w_pack, b_pack):
    """Wrapper: flattens batch, precomputes the additive mask bias, one kernel call."""
    if mask is None:
        mask_bias = jnp.zeros((B, SQ, SM), jnp.float32)
    else:
        # 1.0 -> 0.0 (keep), 0.0 -> -1e9 (masked); hoisted out of the kernel loops.
        mask_bias = (mask.astype(jnp.float32) - 1.0) * _MASK_NEG

    q2 = query.reshape(B * SQ, D)
    k2 = key.reshape(B * SM, D)
    v2 = value.reshape(B * SM, D)

    vmem = pltpu.MemorySpace.VMEM
    out2 = pl.pallas_call(
        mtm_kernel,
        out_shape=jax.ShapeDtypeStruct((B * SQ, D), jnp.float32),
        in_specs=[pl.BlockSpec(memory_space=vmem)] * 6,
        out_specs=pl.BlockSpec(memory_space=vmem),
    )(q2, k2, v2, mask_bias, w_pack, b_pack)
    return out2.reshape(B, SQ, D)


# ---------------- pure-JAX reference (mirrors the PyTorch module) ----------------
def multi_thread_memory_ref(query, key, value, mask, w_pack, b_pack):
    wq, wk, wv, wo = (w_pack[i] for i in range(4))
    bq, bk, bv, bo = (b_pack[i, 0] for i in range(4))

    q = query @ wq + bq
    k = key @ wk + bk
    v = value @ wv + bv
    q = q.reshape(B, SQ, H, DK).transpose(0, 2, 1, 3)           # (B,H,SQ,DK)
    k = k.reshape(B, SM, H, DK).transpose(0, 2, 1, 3)           # (B,H,SM,DK)
    v = v.reshape(B, SM, H, DK).transpose(0, 2, 1, 3)           # (B,H,SM,DK)

    scores = jnp.einsum("bhqd,bhmd->bhqm", q, k) / math.sqrt(DK)
    if mask is not None:
        scores = jnp.where(mask[:, None, :, :] == 0, -_MASK_NEG, scores)

    sel_scores, idx = jax.lax.top_k(scores, TOPK)               # (B,H,SQ,TOPK)
    p_attn = jax.nn.softmax(sel_scores, axis=-1)

    dummy_value = jnp.broadcast_to(v[:, :, None, :, :], (B, H, SQ, SM, DK))
    dummy_idx = jnp.broadcast_to(idx[..., None], (B, H, SQ, TOPK, DK))
    sel_value = jnp.take_along_axis(dummy_value, dummy_idx, axis=3)  # (B,H,SQ,TOPK,DK)

    x = jnp.einsum("bhqt,bhqtd->bhqd", p_attn, sel_value)       # (B,H,SQ,DK)
    x = x.transpose(0, 2, 1, 3).reshape(B, SQ, H * DK)
    return x @ wo + bo


def make_params(key):
    kw, kb = jax.random.split(key)
    ws = jax.random.split(kw, 4)
    bs = jax.random.split(kb, 4)
    w_pack = jnp.stack(
        [0.08 * jax.random.normal(ws[i], (D, D), jnp.float32) for i in range(4)])
    b_pack = jnp.stack(
        [0.02 * jax.random.normal(bs[i], (1, D), jnp.float32) for i in range(4)])
    return w_pack, b_pack


if __name__ == "__main__":
    jax.config.update("jax_default_matmul_precision", "highest")

    root = jax.random.PRNGKey(0)
    kq, km, kp = jax.random.split(root, 3)

    query = jax.random.normal(kq, (B, SQ, D), jnp.float32)
    memory = jax.random.normal(km, (B, SM, D), jnp.float32)   # key == value == memory slots

    # memory-slot mask: 1.0 = usable slot, 0.0 = masked; every batch keeps >= TOPK slots.
    lengths = jnp.array([SM, SM - 16], dtype=jnp.int32)
    col = jnp.arange(SM)[None, None, :]
    mask = (col < lengths[:, None, None]).astype(jnp.float32)  # (B, 1, SM)
    mask = jnp.broadcast_to(mask, (B, SQ, SM)).astype(jnp.float32)

    w_pack, b_pack = make_params(kp)

    out = multi_thread_memory(query, memory, memory, mask, w_pack, b_pack)
    out = jax.block_until_ready(out)

    ref = multi_thread_memory_ref(query, memory, memory, mask, w_pack, b_pack)
    assert out.shape == (B, SQ, D)
    assert jnp.allclose(out, ref, atol=2e-4, rtol=2e-4), (
        float(jnp.max(jnp.abs(out - ref))))

    print("KERNEL_OK")
</pallas_src>

<mosaic_0001>
module attributes {stable_mosaic.version = 11 : i64} {
  func.func @mtm_kernel(%arg0: memref<16x32xf32, #tpu.memory_space<vmem>>, %arg1: memref<128x32xf32, #tpu.memory_space<vmem>>, %arg2: memref<128x32xf32, #tpu.memory_space<vmem>>, %arg3: memref<2x8x64xf32, #tpu.memory_space<vmem>>, %arg4: memref<4x32x32xf32, #tpu.memory_space<vmem>>, %arg5: memref<4x1x32xf32, #tpu.memory_space<vmem>>, %arg6: memref<16x32xf32, #tpu.memory_space<vmem>>) attributes {dimension_semantics = [], scalar_prefetch = 0 : i64, scratch_operands = 0 : i64, tpu.core_type = #tpu.core_type<tc>} {
    %c0 = arith.constant 0 : index
    %c0_0 = arith.constant 0 : index
    %c0_1 = arith.constant 0 : index
    %0 = vector.load %arg4[%c0, %c0_0, %c0_1] : memref<4x32x32xf32, #tpu.memory_space<vmem>>, vector<1x32x32xf32>
    %1 = vector.shape_cast %0 : vector<1x32x32xf32> to vector<32x32xf32>
    %c1 = arith.constant 1 : index
    %c0_2 = arith.constant 0 : index
    %c0_3 = arith.constant 0 : index
    %2 = vector.load %arg4[%c1, %c0_2, %c0_3] : memref<4x32x32xf32, #tpu.memory_space<vmem>>, vector<1x32x32xf32>
    %3 = vector.shape_cast %2 : vector<1x32x32xf32> to vector<32x32xf32>
    %c2 = arith.constant 2 : index
    %c0_4 = arith.constant 0 : index
    %c0_5 = arith.constant 0 : index
    %4 = vector.load %arg4[%c2, %c0_4, %c0_5] : memref<4x32x32xf32, #tpu.memory_space<vmem>>, vector<1x32x32xf32>
    %5 = vector.shape_cast %4 : vector<1x32x32xf32> to vector<32x32xf32>
    %c3 = arith.constant 3 : index
    %c0_6 = arith.constant 0 : index
    %c0_7 = arith.constant 0 : index
    %6 = vector.load %arg4[%c3, %c0_6, %c0_7] : memref<4x32x32xf32, #tpu.memory_space<vmem>>, vector<1x32x32xf32>
    %7 = vector.shape_cast %6 : vector<1x32x32xf32> to vector<32x32xf32>
    %c0_8 = arith.constant 0 : index
    %c0_9 = arith.constant 0 : index
    %c0_10 = arith.constant 0 : index
    %8 = vector.load %arg5[%c0_8, %c0_9, %c0_10] : memref<4x1x32xf32, #tpu.memory_space<vmem>>, vector<1x1x32xf32>
    %9 = vector.shape_cast %8 : vector<1x1x32xf32> to vector<1x32xf32>
    %c1_11 = arith.constant 1 : index
    %c0_12 = arith.constant 0 : index
    %c0_13 = arith.constant 0 : index
    %10 = vector.load %arg5[%c1_11, %c0_12, %c0_13] : memref<4x1x32xf32, #tpu.memory_space<vmem>>, vector<1x1x32xf32>
    %11 = vector.shape_cast %10 : vector<1x1x32xf32> to vector<1x32xf32>
    %c2_14 = arith.constant 2 : index
    %c0_15 = arith.constant 0 : index
    %c0_16 = arith.constant 0 : index
    %12 = vector.load %arg5[%c2_14, %c0_15, %c0_16] : memref<4x1x32xf32, #tpu.memory_space<vmem>>, vector<1x1x32xf32>
    %13 = vector.shape_cast %12 : vector<1x1x32xf32> to vector<1x32xf32>
    %c3_17 = arith.constant 3 : index
    %c0_18 = arith.constant 0 : index
    %c0_19 = arith.constant 0 : index
    %14 = vector.load %arg5[%c3_17, %c0_18, %c0_19] : memref<4x1x32xf32, #tpu.memory_space<vmem>>, vector<1x1x32xf32>
    %15 = vector.shape_cast %14 : vector<1x1x32xf32> to vector<1x32xf32>
    %c0_20 = arith.constant 0 : index
    %c0_21 = arith.constant 0 : index
    %16 = vector.load %arg0[%c0_20, %c0_21] : memref<16x32xf32, #tpu.memory_space<vmem>>, vector<16x32xf32>
    %cst = arith.constant dense<0.000000e+00> : vector<16x32xf32>
    %17 = tpu.matmul %16, %1, %cst {dimension_numbers = #tpu.dot_dimension_numbers<[1], [0], [0], [1], [0, 0, 1, 1], [], []>, precision = #tpu.contract_precision<fp32>} : vector<16x32xf32>, vector<32x32xf32>, vector<16x32xf32> -> vector<16x32xf32>
    %18 = vector.broadcast %9 : vector<1x32xf32> to vector<16x32xf32>
    %19 = arith.addf %17, %18 : vector<16x32xf32>
    %c0_22 = arith.constant 0 : index
    %c0_23 = arith.constant 0 : index
    %20 = vector.load %arg1[%c0_22, %c0_23] : memref<128x32xf32, #tpu.memory_space<vmem>>, vector<128x32xf32>
    %cst_24 = arith.constant dense<0.000000e+00> : vector<128x32xf32>
    %21 = tpu.matmul %20, %3, %cst_24 {dimension_numbers = #tpu.dot_dimension_numbers<[1], [0], [0], [1], [0, 0, 1, 1], [], []>, precision = #tpu.contract_precision<fp32>} : vector<128x32xf32>, vector<32x32xf32>, vector<128x32xf32> -> vector<128x32xf32>
    %22 = vector.broadcast %11 : vector<1x32xf32> to vector<128x32xf32>
    %23 = arith.addf %21, %22 : vector<128x32xf32>
    %c0_25 = arith.constant 0 : index
    %c0_26 = arith.constant 0 : index
    %24 = vector.load %arg2[%c0_25, %c0_26] : memref<128x32xf32, #tpu.memory_space<vmem>>, vector<128x32xf32>
    %cst_27 = arith.constant dense<0.000000e+00> : vector<128x32xf32>
    %25 = tpu.matmul %24, %5, %cst_27 {dimension_numbers = #tpu.dot_dimension_numbers<[1], [0], [0], [1], [0, 0, 1, 1], [], []>, precision = #tpu.contract_precision<fp32>} : vector<128x32xf32>, vector<32x32xf32>, vector<128x32xf32> -> vector<128x32xf32>
    %26 = vector.broadcast %13 : vector<1x32xf32> to vector<128x32xf32>
    %27 = arith.addf %25, %26 : vector<128x32xf32>
    %c0_28 = arith.constant 0 : index
    %c0_29 = arith.constant 0 : index
    %c0_30 = arith.constant 0 : index
    %28 = vector.load %arg3[%c0_28, %c0_29, %c0_30] : memref<2x8x64xf32, #tpu.memory_space<vmem>>, vector<1x8x64xf32>
    %29 = vector.shape_cast %28 : vector<1x8x64xf32> to vector<8x64xf32>
    %30 = vector.extract_strided_slice %19 {offsets = [0, 0], sizes = [8, 32], strides = [1, 1]} : vector<16x32xf32> to vector<8x32xf32>
    %31 = vector.extract_strided_slice %23 {offsets = [0, 0], sizes = [64, 32], strides = [1, 1]} : vector<128x32xf32> to vector<64x32xf32>
    %32 = vector.extract_strided_slice %30 {offsets = [0, 0], sizes = [8, 8], strides = [1, 1]} : vector<8x32xf32> to vector<8x8xf32>
    %33 = vector.extract_strided_slice %31 {offsets = [0, 0], sizes = [64, 8], strides = [1, 1]} : vector<64x32xf32> to vector<64x8xf32>
    %cst_31 = arith.constant dense<0.000000e+00> : vector<8x64xf32>
    %34 = tpu.matmul %32, %33, %cst_31 {dimension_numbers = #tpu.dot_dimension_numbers<[1], [1], [0], [0], [0, 0, 1, 0], [], []>, precision = #tpu.contract_precision<fp32>} : vector<8x8xf32>, vector<64x8xf32>, vector<8x64xf32> -> vector<8x64xf32>
    %cst_32 = arith.constant 0.353553385 : f32
    %35 = vector.broadcast %cst_32 : f32 to vector<8x64xf32>
    %36 = arith.mulf %34, %35 : vector<8x64xf32>
    %37 = arith.addf %36, %29 : vector<8x64xf32>
    %38 = vector.extract_strided_slice %30 {offsets = [0, 8], sizes = [8, 8], strides = [1, 1]} : vector<8x32xf32> to vector<8x8xf32>
    %39 = vector.extract_strided_slice %31 {offsets = [0, 8], sizes = [64, 8], strides = [1, 1]} : vector<64x32xf32> to vector<64x8xf32>
    %cst_33 = arith.constant dense<0.000000e+00> : vector<8x64xf32>
    %40 = tpu.matmul %38, %39, %cst_33 {dimension_numbers = #tpu.dot_dimension_numbers<[1], [1], [0], [0], [0, 0, 1, 0], [], []>, precision = #tpu.contract_precision<fp32>} : vector<8x8xf32>, vector<64x8xf32>, vector<8x64xf32> -> vector<8x64xf32>
    %cst_34 = arith.constant 0.353553385 : f32
    %41 = vector.broadcast %cst_34 : f32 to vector<8x64xf32>
    %42 = arith.mulf %40, %41 : vector<8x64xf32>
    %43 = arith.addf %42, %29 : vector<8x64xf32>
    %44 = vector.extract_strided_slice %30 {offsets = [0, 16], sizes = [8, 8], strides = [1, 1]} : vector<8x32xf32> to vector<8x8xf32>
    %45 = vector.extract_strided_slice %31 {offsets = [0, 16], sizes = [64, 8], strides = [1, 1]} : vector<64x32xf32> to vector<64x8xf32>
    %cst_35 = arith.constant dense<0.000000e+00> : vector<8x64xf32>
    %46 = tpu.matmul %44, %45, %cst_35 {dimension_numbers = #tpu.dot_dimension_numbers<[1], [1], [0], [0], [0, 0, 1, 0], [], []>, precision = #tpu.contract_precision<fp32>} : vector<8x8xf32>, vector<64x8xf32>, vector<8x64xf32> -> vector<8x64xf32>
    %cst_36 = arith.constant 0.353553385 : f32
    %47 = vector.broadcast %cst_36 : f32 to vector<8x64xf32>
    %48 = arith.mulf %46, %47 : vector<8x64xf32>
    %49 = arith.addf %48, %29 : vector<8x64xf32>
    %50 = vector.extract_strided_slice %30 {offsets = [0, 24], sizes = [8, 8], strides = [1, 1]} : vector<8x32xf32> to vector<8x8xf32>
    %51 = vector.extract_strided_slice %31 {offsets = [0, 24], sizes = [64, 8], strides = [1, 1]} : vector<64x32xf32> to vector<64x8xf32>
    %cst_37 = arith.constant dense<0.000000e+00> : vector<8x64xf32>
    %52 = tpu.matmul %50, %51, %cst_37 {dimension_numbers = #tpu.dot_dimension_numbers<[1], [1], [0], [0], [0, 0, 1, 0], [], []>, precision = #tpu.contract_precision<fp32>} : vector<8x8xf32>, vector<64x8xf32>, vector<8x64xf32> -> vector<8x64xf32>
    %cst_38 = arith.constant 0.353553385 : f32
    %53 = vector.broadcast %cst_38 : f32 to vector<8x64xf32>
    %54 = arith.mulf %52, %53 : vector<8x64xf32>
    %55 = arith.addf %54, %29 : vector<8x64xf32>
    %c1_39 = arith.constant 1 : index
    %c0_40 = arith.constant 0 : index
    %c0_41 = arith.constant 0 : index
    %56 = vector.load %arg3[%c1_39, %c0_40, %c0_41] : memref<2x8x64xf32, #tpu.memory_space<vmem>>, vector<1x8x64xf32>
    %57 = vector.shape_cast %56 : vector<1x8x64xf32> to vector<8x64xf32>
    %58 = vector.extract_strided_slice %19 {offsets = [8, 0], sizes = [8, 32], strides = [1, 1]} : vector<16x32xf32> to vector<8x32xf32>
    %59 = vector.extract_strided_slice %23 {offsets = [64, 0], sizes = [64, 32], strides = [1, 1]} : vector<128x32xf32> to vector<64x32xf32>
    %60 = vector.extract_strided_slice %58 {offsets = [0, 0], sizes = [8, 8], strides = [1, 1]} : vector<8x32xf32> to vector<8x8xf32>
    %61 = vector.extract_strided_slice %59 {offsets = [0, 0], sizes = [64, 8], strides = [1, 1]} : vector<64x32xf32> to vector<64x8xf32>
    %cst_42 = arith.constant dense<0.000000e+00> : vector<8x64xf32>
    %62 = tpu.matmul %60, %61, %cst_42 {dimension_numbers = #tpu.dot_dimension_numbers<[1], [1], [0], [0], [0, 0, 1, 0], [], []>, precision = #tpu.contract_precision<fp32>} : vector<8x8xf32>, vector<64x8xf32>, vector<8x64xf32> -> vector<8x64xf32>
    %cst_43 = arith.constant 0.353553385 : f32
    %63 = vector.broadcast %cst_43 : f32 to vector<8x64xf32>
    %64 = arith.mulf %62, %63 : vector<8x64xf32>
    %65 = arith.addf %64, %57 : vector<8x64xf32>
    %66 = vector.extract_strided_slice %58 {offsets = [0, 8], sizes = [8, 8], strides = [1, 1]} : vector<8x32xf32> to vector<8x8xf32>
    %67 = vector.extract_strided_slice %59 {offsets = [0, 8], sizes = [64, 8], strides = [1, 1]} : vector<64x32xf32> to vector<64x8xf32>
    %cst_44 = arith.constant dense<0.000000e+00> : vector<8x64xf32>
    %68 = tpu.matmul %66, %67, %cst_44 {dimension_numbers = #tpu.dot_dimension_numbers<[1], [1], [0], [0], [0, 0, 1, 0], [], []>, precision = #tpu.contract_precision<fp32>} : vector<8x8xf32>, vector<64x8xf32>, vector<8x64xf32> -> vector<8x64xf32>
    %cst_45 = arith.constant 0.353553385 : f32
    %69 = vector.broadcast %cst_45 : f32 to vector<8x64xf32>
    %70 = arith.mulf %68, %69 : vector<8x64xf32>
    %71 = arith.addf %70, %57 : vector<8x64xf32>
    %72 = vector.extract_strided_slice %58 {offsets = [0, 16], sizes = [8, 8], strides = [1, 1]} : vector<8x32xf32> to vector<8x8xf32>
    %73 = vector.extract_strided_slice %59 {offsets = [0, 16], sizes = [64, 8], strides = [1, 1]} : vector<64x32xf32> to vector<64x8xf32>
    %cst_46 = arith.constant dense<0.000000e+00> : vector<8x64xf32>
    %74 = tpu.matmul %72, %73, %cst_46 {dimension_numbers = #tpu.dot_dimension_numbers<[1], [1], [0], [0], [0, 0, 1, 0], [], []>, precision = #tpu.contract_precision<fp32>} : vector<8x8xf32>, vector<64x8xf32>, vector<8x64xf32> -> vector<8x64xf32>
    %cst_47 = arith.constant 0.353553385 : f32
    %75 = vector.broadcast %cst_47 : f32 to vector<8x64xf32>
    %76 = arith.mulf %74, %75 : vector<8x64xf32>
    %77 = arith.addf %76, %57 : vector<8x64xf32>
    %78 = vector.extract_strided_slice %58 {offsets = [0, 24], sizes = [8, 8], strides = [1, 1]} : vector<8x32xf32> to vector<8x8xf32>
    %79 = vector.extract_strided_slice %59 {offsets = [0, 24], sizes = [64, 8], strides = [1, 1]} : vector<64x32xf32> to vector<64x8xf32>
    %cst_48 = arith.constant dense<0.000000e+00> : vector<8x64xf32>
    %80 = tpu.matmul %78, %79, %cst_48 {dimension_numbers = #tpu.dot_dimension_numbers<[1], [1], [0], [0], [0, 0, 1, 0], [], []>, precision = #tpu.contract_precision<fp32>} : vector<8x8xf32>, vector<64x8xf32>, vector<8x64xf32> -> vector<8x64xf32>
    %cst_49 = arith.constant 0.353553385 : f32
    %81 = vector.broadcast %cst_49 : f32 to vector<8x64xf32>
    %82 = arith.mulf %80, %81 : vector<8x64xf32>
    %83 = arith.addf %82, %57 : vector<8x64xf32>
    %84 = tpu.concatenate %37, %43, %49, %55, %65, %71, %77, %83 in 0 : vector<8x64xf32>, vector<8x64xf32>, vector<8x64xf32>, vector<8x64xf32>, vector<8x64xf32>, vector<8x64xf32>, vector<8x64xf32>, vector<8x64xf32> -> vector<64x64xf32>
    %cst_50 = arith.constant dense<0xFF800000> : vector<64xf32>
    %85 = vector.multi_reduction <maximumf>, %84, %cst_50 [1] : vector<64x64xf32> to vector<64xf32>
    %86 = vector.shape_cast %85 : vector<64xf32> to vector<64x1xf32>
    %87 = vector.broadcast %86 : vector<64x1xf32> to vector<64x64xf32>
    %88 = arith.cmpf oge, %84, %87 : vector<64x64xf32>
    %cst_51 = arith.constant -1.000000e+30 : f32
    %89 = vector.broadcast %cst_51 : f32 to vector<64x64xf32>
    %90 = arith.select %88, %89, %84 : vector<64x64xi1>, vector<64x64xf32>
    %cst_52 = arith.constant dense<0xFF800000> : vector<64xf32>
    %91 = vector.multi_reduction <maximumf>, %90, %cst_52 [1] : vector<64x64xf32> to vector<64xf32>
    %92 = vector.shape_cast %91 : vector<64xf32> to vector<64x1xf32>
    %93 = vector.broadcast %92 : vector<64x1xf32> to vector<64x64xf32>
    %94 = arith.cmpf oge, %90, %93 : vector<64x64xf32>
    %cst_53 = arith.constant -1.000000e+30 : f32
    %95 = vector.broadcast %cst_53 : f32 to vector<64x64xf32>
    %96 = arith.select %94, %95, %90 : vector<64x64xi1>, vector<64x64xf32>
    %cst_54 = arith.constant dense<0xFF800000> : vector<64xf32>
    %97 = vector.multi_reduction <maximumf>, %96, %cst_54 [1] : vector<64x64xf32> to vector<64xf32>
    %98 = vector.shape_cast %97 : vector<64xf32> to vector<64x1xf32>
    %99 = vector.broadcast %98 : vector<64x1xf32> to vector<64x64xf32>
    %100 = arith.cmpf oge, %96, %99 : vector<64x64xf32>
    %cst_55 = arith.constant -1.000000e+30 : f32
    %101 = vector.broadcast %cst_55 : f32 to vector<64x64xf32>
    %102 = arith.select %100, %101, %96 : vector<64x64xi1>, vector<64x64xf32>
    %cst_56 = arith.constant dense<0xFF800000> : vector<64xf32>
    %103 = vector.multi_reduction <maximumf>, %102, %cst_56 [1] : vector<64x64xf32> to vector<64xf32>
    %104 = vector.shape_cast %103 : vector<64xf32> to vector<64x1xf32>
    %105 = vector.broadcast %104 : vector<64x1xf32> to vector<64x64xf32>
    %106 = arith.cmpf oge, %102, %105 : vector<64x64xf32>
    %cst_57 = arith.constant -1.000000e+30 : f32
    %107 = vector.broadcast %cst_57 : f32 to vector<64x64xf32>
    %108 = arith.select %106, %107, %102 : vector<64x64xi1>, vector<64x64xf32>
    %cst_58 = arith.constant dense<0xFF800000> : vector<64xf32>
    %109 = vector.multi_reduction <maximumf>, %108, %cst_58 [1] : vector<64x64xf32> to vector<64xf32>
    %110 = vector.shape_cast %109 : vector<64xf32> to vector<64x1xf32>
    %111 = vector.broadcast %110 : vector<64x1xf32> to vector<64x64xf32>
    %112 = arith.cmpf oge, %108, %111 : vector<64x64xf32>
    %cst_59 = arith.constant -1.000000e+30 : f32
    %113 = vector.broadcast %cst_59 : f32 to vector<64x64xf32>
    %114 = arith.select %112, %113, %108 : vector<64x64xi1>, vector<64x64xf32>
    %cst_60 = arith.constant dense<0xFF800000> : vector<64xf32>
    %115 = vector.multi_reduction <maximumf>, %114, %cst_60 [1] : vector<64x64xf32> to vector<64xf32>
    %116 = vector.shape_cast %115 : vector<64xf32> to vector<64x1xf32>
    %117 = vector.broadcast %116 : vector<64x1xf32> to vector<64x64xf32>
    %118 = arith.cmpf oge, %114, %117 : vector<64x64xf32>
    %cst_61 = arith.constant -1.000000e+30 : f32
    %119 = vector.broadcast %cst_61 : f32 to vector<64x64xf32>
    %120 = arith.select %118, %119, %114 : vector<64x64xi1>, vector<64x64xf32>
    %cst_62 = arith.constant dense<0xFF800000> : vector<64xf32>
    %121 = vector.multi_reduction <maximumf>, %120, %cst_62 [1] : vector<64x64xf32> to vector<64xf32>
    %122 = vector.shape_cast %121 : vector<64xf32> to vector<64x1xf32>
    %123 = vector.broadcast %122 : vector<64x1xf32> to vector<64x64xf32>
    %124 = arith.cmpf oge, %120, %123 : vector<64x64xf32>
    %cst_63 = arith.constant -1.000000e+30 : f32
    %125 = vector.broadcast %cst_63 : f32 to vector<64x64xf32>
    %126 = arith.select %124, %125, %120 : vector<64x64xi1>, vector<64x64xf32>
    %cst_64 = arith.constant dense<0xFF800000> : vector<64xf32>
    %127 = vector.multi_reduction <maximumf>, %126, %cst_64 [1] : vector<64x64xf32> to vector<64xf32>
    %128 = vector.shape_cast %127 : vector<64xf32> to vector<64x1xf32>
    %129 = vector.broadcast %128 : vector<64x1xf32> to vector<64x64xf32>
    %130 = arith.cmpf oge, %126, %129 : vector<64x64xf32>
    %cst_65 = arith.constant -1.000000e+30 : f32
    %131 = vector.broadcast %cst_65 : f32 to vector<64x64xf32>
    %132 = arith.select %130, %131, %126 : vector<64x64xi1>, vector<64x64xf32>
    %cst_66 = arith.constant dense<0xFF800000> : vector<64xf32>
    %133 = vector.multi_reduction <maximumf>, %132, %cst_66 [1] : vector<64x64xf32> to vector<64xf32>
    %134 = vector.shape_cast %133 : vector<64xf32> to vector<64x1xf32>
    %135 = vector.broadcast %134 : vector<64x1xf32> to vector<64x64xf32>
    %136 = arith.cmpf oge, %132, %135 : vector<64x64xf32>
    %cst_67 = arith.constant -1.000000e+30 : f32
    %137 = vector.broadcast %cst_67 : f32 to vector<64x64xf32>
    %138 = arith.select %136, %137, %132 : vector<64x64xi1>, vector<64x64xf32>
    %cst_68 = arith.constant dense<0xFF800000> : vector<64xf32>
    %139 = vector.multi_reduction <maximumf>, %138, %cst_68 [1] : vector<64x64xf32> to vector<64xf32>
    %140 = vector.shape_cast %139 : vector<64xf32> to vector<64x1xf32>
    %141 = vector.broadcast %140 : vector<64x1xf32> to vector<64x64xf32>
    %142 = arith.cmpf oge, %138, %141 : vector<64x64xf32>
    %cst_69 = arith.constant -1.000000e+30 : f32
    %143 = vector.broadcast %cst_69 : f32 to vector<64x64xf32>
    %144 = arith.select %142, %143, %138 : vector<64x64xi1>, vector<64x64xf32>
    %cst_70 = arith.constant dense<0xFF800000> : vector<64xf32>
    %145 = vector.multi_reduction <maximumf>, %144, %cst_70 [1] : vector<64x64xf32> to vector<64xf32>
    %146 = vector.shape_cast %145 : vector<64xf32> to vector<64x1xf32>
    %147 = vector.broadcast %146 : vector<64x1xf32> to vector<64x64xf32>
    %148 = arith.cmpf oge, %144, %147 : vector<64x64xf32>
    %cst_71 = arith.constant -1.000000e+30 : f32
    %149 = vector.broadcast %cst_71 : f32 to vector<64x64xf32>
    %150 = arith.select %148, %149, %144 : vector<64x64xi1>, vector<64x64xf32>
    %cst_72 = arith.constant dense<0xFF800000> : vector<64xf32>
    %151 = vector.multi_reduction <maximumf>, %150, %cst_72 [1] : vector<64x64xf32> to vector<64xf32>
    %152 = vector.shape_cast %151 : vector<64xf32> to vector<64x1xf32>
    %153 = vector.broadcast %152 : vector<64x1xf32> to vector<64x64xf32>
    %154 = arith.cmpf oge, %150, %153 : vector<64x64xf32>
    %cst_73 = arith.constant -1.000000e+30 : f32
    %155 = vector.broadcast %cst_73 : f32 to vector<64x64xf32>
    %156 = arith.select %154, %155, %150 : vector<64x64xi1>, vector<64x64xf32>
    %cst_74 = arith.constant dense<0xFF800000> : vector<64xf32>
    %157 = vector.multi_reduction <maximumf>, %156, %cst_74 [1] : vector<64x64xf32> to vector<64xf32>
    %158 = vector.shape_cast %157 : vector<64xf32> to vector<64x1xf32>
    %159 = vector.broadcast %158 : vector<64x1xf32> to vector<64x64xf32>
    %160 = arith.cmpf oge, %156, %159 : vector<64x64xf32>
    %cst_75 = arith.constant -1.000000e+30 : f32
    %161 = vector.broadcast %cst_75 : f32 to vector<64x64xf32>
    %162 = arith.select %160, %161, %156 : vector<64x64xi1>, vector<64x64xf32>
    %cst_76 = arith.constant dense<0xFF800000> : vector<64xf32>
    %163 = vector.multi_reduction <maximumf>, %162, %cst_76 [1] : vector<64x64xf32> to vector<64xf32>
    %164 = vector.shape_cast %163 : vector<64xf32> to vector<64x1xf32>
    %165 = vector.broadcast %164 : vector<64x1xf32> to vector<64x64xf32>
    %166 = arith.cmpf oge, %162, %165 : vector<64x64xf32>
    %cst_77 = arith.constant -1.000000e+30 : f32
    %167 = vector.broadcast %cst_77 : f32 to vector<64x64xf32>
    %168 = arith.select %166, %167, %162 : vector<64x64xi1>, vector<64x64xf32>
    %cst_78 = arith.constant dense<0xFF800000> : vector<64xf32>
    %169 = vector.multi_reduction <maximumf>, %168, %cst_78 [1] : vector<64x64xf32> to vector<64xf32>
    %170 = vector.shape_cast %169 : vector<64xf32> to vector<64x1xf32>
    %171 = vector.broadcast %170 : vector<64x1xf32> to vector<64x64xf32>
    %172 = arith.cmpf oge, %168, %171 : vector<64x64xf32>
    %cst_79 = arith.constant -1.000000e+30 : f32
    %173 = vector.broadcast %cst_79 : f32 to vector<64x64xf32>
    %174 = arith.select %172, %173, %168 : vector<64x64xi1>, vector<64x64xf32>
    %cst_80 = arith.constant dense<0xFF800000> : vector<64xf32>
    %175 = vector.multi_reduction <maximumf>, %174, %cst_80 [1] : vector<64x64xf32> to vector<64xf32>
    %176 = vector.shape_cast %175 : vector<64xf32> to vector<64x1xf32>
    %177 = vector.broadcast %176 : vector<64x1xf32> to vector<64x64xf32>
    %178 = arith.cmpf oge, %174, %177 : vector<64x64xf32>
    %cst_81 = arith.constant -1.000000e+30 : f32
    %179 = vector.broadcast %cst_81 : f32 to vector<64x64xf32>
    %180 = arith.select %178, %179, %174 : vector<64x64xi1>, vector<64x64xf32>
    %cst_82 = arith.constant dense<0xFF800000> : vector<64xf32>
    %181 = vector.multi_reduction <maximumf>, %180, %cst_82 [1] : vector<64x64xf32> to vector<64xf32>
    %182 = vector.shape_cast %181 : vector<64xf32> to vector<64x1xf32>
    %183 = vector.broadcast %182 : vector<64x1xf32> to vector<64x64xf32>
    %184 = arith.cmpf oge, %180, %183 : vector<64x64xf32>
    %cst_83 = arith.constant -1.000000e+30 : f32
    %185 = vector.broadcast %cst_83 : f32 to vector<64x64xf32>
    %186 = arith.select %184, %185, %180 : vector<64x64xi1>, vector<64x64xf32>
    %cst_84 = arith.constant dense<0xFF800000> : vector<64xf32>
    %187 = vector.multi_reduction <maximumf>, %186, %cst_84 [1] : vector<64x64xf32> to vector<64xf32>
    %188 = vector.shape_cast %187 : vector<64xf32> to vector<64x1xf32>
    %189 = vector.broadcast %188 : vector<64x1xf32> to vector<64x64xf32>
    %190 = arith.cmpf oge, %186, %189 : vector<64x64xf32>
    %cst_85 = arith.constant -1.000000e+30 : f32
    %191 = vector.broadcast %cst_85 : f32 to vector<64x64xf32>
    %192 = arith.select %190, %191, %186 : vector<64x64xi1>, vector<64x64xf32>
    %cst_86 = arith.constant dense<0xFF800000> : vector<64xf32>
    %193 = vector.multi_reduction <maximumf>, %192, %cst_86 [1] : vector<64x64xf32> to vector<64xf32>
    %194 = vector.shape_cast %193 : vector<64xf32> to vector<64x1xf32>
    %195 = vector.broadcast %194 : vector<64x1xf32> to vector<64x64xf32>
    %196 = arith.cmpf oge, %192, %195 : vector<64x64xf32>
    %cst_87 = arith.constant -1.000000e+30 : f32
    %197 = vector.broadcast %cst_87 : f32 to vector<64x64xf32>
    %198 = arith.select %196, %197, %192 : vector<64x64xi1>, vector<64x64xf32>
    %cst_88 = arith.constant dense<0xFF800000> : vector<64xf32>
    %199 = vector.multi_reduction <maximumf>, %198, %cst_88 [1] : vector<64x64xf32> to vector<64xf32>
    %200 = vector.shape_cast %199 : vector<64xf32> to vector<64x1xf32>
    %201 = vector.broadcast %200 : vector<64x1xf32> to vector<64x64xf32>
    %202 = arith.cmpf oge, %198, %201 : vector<64x64xf32>
    %cst_89 = arith.constant -1.000000e+30 : f32
    %203 = vector.broadcast %cst_89 : f32 to vector<64x64xf32>
    %204 = arith.select %202, %203, %198 : vector<64x64xi1>, vector<64x64xf32>
    %cst_90 = arith.constant dense<0xFF800000> : vector<64xf32>
    %205 = vector.multi_reduction <maximumf>, %204, %cst_90 [1] : vector<64x64xf32> to vector<64xf32>
    %206 = vector.shape_cast %205 : vector<64xf32> to vector<64x1xf32>
    %207 = vector.broadcast %206 : vector<64x1xf32> to vector<64x64xf32>
    %208 = arith.cmpf oge, %204, %207 : vector<64x64xf32>
    %cst_91 = arith.constant -1.000000e+30 : f32
    %209 = vector.broadcast %cst_91 : f32 to vector<64x64xf32>
    %210 = arith.select %208, %209, %204 : vector<64x64xi1>, vector<64x64xf32>
    %cst_92 = arith.constant dense<0xFF800000> : vector<64xf32>
    %211 = vector.multi_reduction <maximumf>, %210, %cst_92 [1] : vector<64x64xf32> to vector<64xf32>
    %212 = vector.shape_cast %211 : vector<64xf32> to vector<64x1xf32>
    %213 = vector.broadcast %212 : vector<64x1xf32> to vector<64x64xf32>
    %214 = arith.cmpf oge, %210, %213 : vector<64x64xf32>
    %cst_93 = arith.constant -1.000000e+30 : f32
    %215 = vector.broadcast %cst_93 : f32 to vector<64x64xf32>
    %216 = arith.select %214, %215, %210 : vector<64x64xi1>, vector<64x64xf32>
    %cst_94 = arith.constant dense<0xFF800000> : vector<64xf32>
    %217 = vector.multi_reduction <maximumf>, %216, %cst_94 [1] : vector<64x64xf32> to vector<64xf32>
    %218 = vector.shape_cast %217 : vector<64xf32> to vector<64x1xf32>
    %219 = vector.broadcast %218 : vector<64x1xf32> to vector<64x64xf32>
    %220 = arith.cmpf oge, %216, %219 : vector<64x64xf32>
    %cst_95 = arith.constant -1.000000e+30 : f32
    %221 = vector.broadcast %cst_95 : f32 to vector<64x64xf32>
    %222 = arith.select %220, %221, %216 : vector<64x64xi1>, vector<64x64xf32>
    %cst_96 = arith.constant dense<0xFF800000> : vector<64xf32>
    %223 = vector.multi_reduction <maximumf>, %222, %cst_96 [1] : vector<64x64xf32> to vector<64xf32>
    %224 = vector.shape_cast %223 : vector<64xf32> to vector<64x1xf32>
    %225 = vector.broadcast %224 : vector<64x1xf32> to vector<64x64xf32>
    %226 = arith.cmpf oge, %222, %225 : vector<64x64xf32>
    %cst_97 = arith.constant -1.000000e+30 : f32
    %227 = vector.broadcast %cst_97 : f32 to vector<64x64xf32>
    %228 = arith.select %226, %227, %222 : vector<64x64xi1>, vector<64x64xf32>
    %cst_98 = arith.constant dense<0xFF800000> : vector<64xf32>
    %229 = vector.multi_reduction <maximumf>, %228, %cst_98 [1] : vector<64x64xf32> to vector<64xf32>
    %230 = vector.shape_cast %229 : vector<64xf32> to vector<64x1xf32>
    %231 = vector.broadcast %230 : vector<64x1xf32> to vector<64x64xf32>
    %232 = arith.cmpf oge, %228, %231 : vector<64x64xf32>
    %cst_99 = arith.constant -1.000000e+30 : f32
    %233 = vector.broadcast %cst_99 : f32 to vector<64x64xf32>
    %234 = arith.select %232, %233, %228 : vector<64x64xi1>, vector<64x64xf32>
    %cst_100 = arith.constant dense<0xFF800000> : vector<64xf32>
    %235 = vector.multi_reduction <maximumf>, %234, %cst_100 [1] : vector<64x64xf32> to vector<64xf32>
    %236 = vector.shape_cast %235 : vector<64xf32> to vector<64x1xf32>
    %237 = vector.broadcast %236 : vector<64x1xf32> to vector<64x64xf32>
    %238 = arith.cmpf oge, %234, %237 : vector<64x64xf32>
    %cst_101 = arith.constant -1.000000e+30 : f32
    %239 = vector.broadcast %cst_101 : f32 to vector<64x64xf32>
    %240 = arith.select %238, %239, %234 : vector<64x64xi1>, vector<64x64xf32>
    %cst_102 = arith.constant dense<0xFF800000> : vector<64xf32>
    %241 = vector.multi_reduction <maximumf>, %240, %cst_102 [1] : vector<64x64xf32> to vector<64xf32>
    %242 = vector.shape_cast %241 : vector<64xf32> to vector<64x1xf32>
    %243 = vector.broadcast %242 : vector<64x1xf32> to vector<64x64xf32>
    %244 = arith.cmpf oge, %240, %243 : vector<64x64xf32>
    %cst_103 = arith.constant -1.000000e+30 : f32
    %245 = vector.broadcast %cst_103 : f32 to vector<64x64xf32>
    %246 = arith.select %244, %245, %240 : vector<64x64xi1>, vector<64x64xf32>
    %cst_104 = arith.constant dense<0xFF800000> : vector<64xf32>
    %247 = vector.multi_reduction <maximumf>, %246, %cst_104 [1] : vector<64x64xf32> to vector<64xf32>
    %248 = vector.shape_cast %247 : vector<64xf32> to vector<64x1xf32>
    %249 = vector.broadcast %248 : vector<64x1xf32> to vector<64x64xf32>
    %250 = arith.cmpf oge, %246, %249 : vector<64x64xf32>
    %cst_105 = arith.constant -1.000000e+30 : f32
    %251 = vector.broadcast %cst_105 : f32 to vector<64x64xf32>
    %252 = arith.select %250, %251, %246 : vector<64x64xi1>, vector<64x64xf32>
    %cst_106 = arith.constant dense<0xFF800000> : vector<64xf32>
    %253 = vector.multi_reduction <maximumf>, %252, %cst_106 [1] : vector<64x64xf32> to vector<64xf32>
    %254 = vector.shape_cast %253 : vector<64xf32> to vector<64x1xf32>
    %255 = vector.broadcast %254 : vector<64x1xf32> to vector<64x64xf32>
    %256 = arith.cmpf oge, %252, %255 : vector<64x64xf32>
    %cst_107 = arith.constant -1.000000e+30 : f32
    %257 = vector.broadcast %cst_107 : f32 to vector<64x64xf32>
    %258 = arith.select %256, %257, %252 : vector<64x64xi1>, vector<64x64xf32>
    %cst_108 = arith.constant dense<0xFF800000> : vector<64xf32>
    %259 = vector.multi_reduction <maximumf>, %258, %cst_108 [1] : vector<64x64xf32> to vector<64xf32>
    %260 = vector.shape_cast %259 : vector<64xf32> to vector<64x1xf32>
    %261 = vector.broadcast %260 : vector<64x1xf32> to vector<64x64xf32>
    %262 = arith.cmpf oge, %258, %261 : vector<64x64xf32>
    %cst_109 = arith.constant -1.000000e+30 : f32
    %263 = vector.broadcast %cst_109 : f32 to vector<64x64xf32>
    %264 = arith.select %262, %263, %258 : vector<64x64xi1>, vector<64x64xf32>
    %cst_110 = arith.constant dense<0xFF800000> : vector<64xf32>
    %265 = vector.multi_reduction <maximumf>, %264, %cst_110 [1] : vector<64x64xf32> to vector<64xf32>
    %266 = vector.shape_cast %265 : vector<64xf32> to vector<64x1xf32>
    %267 = vector.broadcast %266 : vector<64x1xf32> to vector<64x64xf32>
    %268 = arith.cmpf oge, %264, %267 : vector<64x64xf32>
    %cst_111 = arith.constant -1.000000e+30 : f32
    %269 = vector.broadcast %cst_111 : f32 to vector<64x64xf32>
    %270 = arith.select %268, %269, %264 : vector<64x64xi1>, vector<64x64xf32>
    %cst_112 = arith.constant dense<0xFF800000> : vector<64xf32>
    %271 = vector.multi_reduction <maximumf>, %270, %cst_112 [1] : vector<64x64xf32> to vector<64xf32>
    %272 = vector.shape_cast %271 : vector<64xf32> to vector<64x1xf32>
    %273 = vector.broadcast %272 : vector<64x1xf32> to vector<64x64xf32>
    %274 = arith.cmpf oge, %84, %273 : vector<64x64xf32>
    %cst_113 = arith.constant dense<0xFF800000> : vector<64xf32>
    %275 = vector.multi_reduction <maximumf>, %84, %cst_113 [1] : vector<64x64xf32> to vector<64xf32>
    %276 = vector.shape_cast %275 : vector<64xf32> to vector<64x1xf32>
    %277 = vector.broadcast %276 : vector<64x1xf32> to vector<64x64xf32>
    %278 = arith.subf %84, %277 : vector<64x64xf32>
    %279 = math.exp %278 : vector<64x64xf32>
    %cst_114 = arith.constant 0.000000e+00 : f32
    %280 = vector.broadcast %cst_114 : f32 to vector<64x64xf32>
    %281 = arith.select %274, %279, %280 : vector<64x64xi1>, vector<64x64xf32>
    %cst_115 = arith.constant dense<0.000000e+00> : vector<64xf32>
    %282 = vector.multi_reduction <add>, %281, %cst_115 [1] : vector<64x64xf32> to vector<64xf32>
    %283 = vector.shape_cast %282 : vector<64xf32> to vector<64x1xf32>
    %284 = tpu.reciprocal %283 : vector<64x1xf32> -> vector<64x1xf32>
    %285 = vector.broadcast %284 : vector<64x1xf32> to vector<64x64xf32>
    %286 = arith.mulf %281, %285 : vector<64x64xf32>
    %287 = vector.extract_strided_slice %27 {offsets = [0, 0], sizes = [64, 32], strides = [1, 1]} : vector<128x32xf32> to vector<64x32xf32>
    %cst_116 = arith.constant 0.000000e+00 : f32
    %288 = vector.broadcast %cst_116 : f32 to vector<8x32xf32>
    %289 = vector.extract_strided_slice %286 {offsets = [0, 0], sizes = [8, 64], strides = [1, 1]} : vector<64x64xf32> to vector<8x64xf32>
    %290 = vector.extract_strided_slice %287 {offsets = [0, 0], sizes = [64, 8], strides = [1, 1]} : vector<64x32xf32> to vector<64x8xf32>
    %cst_117 = arith.constant dense<0.000000e+00> : vector<8x8xf32>
    %291 = tpu.matmul %289, %290, %cst_117 {dimension_numbers = #tpu.dot_dimension_numbers<[1], [0], [0], [1], [0, 0, 1, 1], [], []>, precision = #tpu.contract_precision<fp32>} : vector<8x64xf32>, vector<64x8xf32>, vector<8x8xf32> -> vector<8x8xf32>
    %292 = vector.extract_strided_slice %7 {offsets = [0, 0], sizes = [8, 32], strides = [1, 1]} : vector<32x32xf32> to vector<8x32xf32>
    %cst_118 = arith.constant dense<0.000000e+00> : vector<8x32xf32>
    %293 = tpu.matmul %291, %292, %cst_118 {dimension_numbers = #tpu.dot_dimension_numbers<[1], [0], [0], [1], [0, 0, 1, 1], [], []>, precision = #tpu.contract_precision<fp32>} : vector<8x8xf32>, vector<8x32xf32>, vector<8x32xf32> -> vector<8x32xf32>
    %294 = arith.addf %288, %293 : vector<8x32xf32>
    %295 = vector.extract_strided_slice %286 {offsets = [8, 0], sizes = [8, 64], strides = [1, 1]} : vector<64x64xf32> to vector<8x64xf32>
    %296 = vector.extract_strided_slice %287 {offsets = [0, 8], sizes = [64, 8], strides = [1, 1]} : vector<64x32xf32> to vector<64x8xf32>
    %cst_119 = arith.constant dense<0.000000e+00> : vector<8x8xf32>
    %297 = tpu.matmul %295, %296, %cst_119 {dimension_numbers = #tpu.dot_dimension_numbers<[1], [0], [0], [1], [0, 0, 1, 1], [], []>, precision = #tpu.contract_precision<fp32>} : vector<8x64xf32>, vector<64x8xf32>, vector<8x8xf32> -> vector<8x8xf32>
    %298 = vector.extract_strided_slice %7 {offsets = [8, 0], sizes = [8, 32], strides = [1, 1]} : vector<32x32xf32> to vector<8x32xf32>
    %cst_120 = arith.constant dense<0.000000e+00> : vector<8x32xf32>
    %299 = tpu.matmul %297, %298, %cst_120 {dimension_numbers = #tpu.dot_dimension_numbers<[1], [0], [0], [1], [0, 0, 1, 1], [], []>, precision = #tpu.contract_precision<fp32>} : vector<8x8xf32>, vector<8x32xf32>, vector<8x32xf32> -> vector<8x32xf32>
    %300 = arith.addf %294, %299 : vector<8x32xf32>
    %301 = vector.extract_strided_slice %286 {offsets = [16, 0], sizes = [8, 64], strides = [1, 1]} : vector<64x64xf32> to vector<8x64xf32>
    %302 = vector.extract_strided_slice %287 {offsets = [0, 16], sizes = [64, 8], strides = [1, 1]} : vector<64x32xf32> to vector<64x8xf32>
    %cst_121 = arith.constant dense<0.000000e+00> : vector<8x8xf32>
    %303 = tpu.matmul %301, %302, %cst_121 {dimension_numbers = #tpu.dot_dimension_numbers<[1], [0], [0], [1], [0, 0, 1, 1], [], []>, precision = #tpu.contract_precision<fp32>} : vector<8x64xf32>, vector<64x8xf32>, vector<8x8xf32> -> vector<8x8xf32>
    %304 = vector.extract_strided_slice %7 {offsets = [16, 0], sizes = [8, 32], strides = [1, 1]} : vector<32x32xf32> to vector<8x32xf32>
    %cst_122 = arith.constant dense<0.000000e+00> : vector<8x32xf32>
    %305 = tpu.matmul %303, %304, %cst_122 {dimension_numbers = #tpu.dot_dimension_numbers<[1], [0], [0], [1], [0, 0, 1, 1], [], []>, precision = #tpu.contract_precision<fp32>} : vector<8x8xf32>, vector<8x32xf32>, vector<8x32xf32> -> vector<8x32xf32>
    %306 = arith.addf %300, %305 : vector<8x32xf32>
    %307 = vector.extract_strided_slice %286 {offsets = [24, 0], sizes = [8, 64], strides = [1, 1]} : vector<64x64xf32> to vector<8x64xf32>
    %308 = vector.extract_strided_slice %287 {offsets = [0, 24], sizes = [64, 8], strides = [1, 1]} : vector<64x32xf32> to vector<64x8xf32>
    %cst_123 = arith.constant dense<0.000000e+00> : vector<8x8xf32>
    %309 = tpu.matmul %307, %308, %cst_123 {dimension_numbers = #tpu.dot_dimension_numbers<[1], [0], [0], [1], [0, 0, 1, 1], [], []>, precision = #tpu.contract_precision<fp32>} : vector<8x64xf32>, vector<64x8xf32>, vector<8x8xf32> -> vector<8x8xf32>
    %310 = vector.extract_strided_slice %7 {offsets = [24, 0], sizes = [8, 32], strides = [1, 1]} : vector<32x32xf32> to vector<8x32xf32>
    %cst_124 = arith.constant dense<0.000000e+00> : vector<8x32xf32>
    %311 = tpu.matmul %309, %310, %cst_124 {dimension_numbers = #tpu.dot_dimension_numbers<[1], [0], [0], [1], [0, 0, 1, 1], [], []>, precision = #tpu.contract_precision<fp32>} : vector<8x8xf32>, vector<8x32xf32>, vector<8x32xf32> -> vector<8x32xf32>
    %312 = arith.addf %306, %311 : vector<8x32xf32>
    %313 = vector.broadcast %15 : vector<1x32xf32> to vector<8x32xf32>
    %314 = arith.addf %312, %313 : vector<8x32xf32>
    %c0_125 = arith.constant 0 : index
    %c0_126 = arith.constant 0 : index
    %315 = vector.load %arg6[%c0_125, %c0_126] : memref<16x32xf32, #tpu.memory_space<vmem>>, vector<8x32xf32>
    tpu.vector_store %arg6[%c0_125, %c0_126], %314 {strides = array<i32>} : memref<16x32xf32, #tpu.memory_space<vmem>>, vector<8x32xf32>,
    %316 = vector.extract_strided_slice %27 {offsets = [64, 0], sizes = [64, 32], strides = [1, 1]} : vector<128x32xf32> to vector<64x32xf32>
    %cst_127 = arith.constant 0.000000e+00 : f32
    %317 = vector.broadcast %cst_127 : f32 to vector<8x32xf32>
    %318 = vector.extract_strided_slice %286 {offsets = [32, 0], sizes = [8, 64], strides = [1, 1]} : vector<64x64xf32> to vector<8x64xf32>
    %319 = vector.extract_strided_slice %316 {offsets = [0, 0], sizes = [64, 8], strides = [1, 1]} : vector<64x32xf32> to vector<64x8xf32>
    %cst_128 = arith.constant dense<0.000000e+00> : vector<8x8xf32>
    %320 = tpu.matmul %318, %319, %cst_128 {dimension_numbers = #tpu.dot_dimension_numbers<[1], [0], [0], [1], [0, 0, 1, 1], [], []>, precision = #tpu.contract_precision<fp32>} : vector<8x64xf32>, vector<64x8xf32>, vector<8x8xf32> -> vector<8x8xf32>
    %321 = vector.extract_strided_slice %7 {offsets = [0, 0], sizes = [8, 32], strides = [1, 1]} : vector<32x32xf32> to vector<8x32xf32>
    %cst_129 = arith.constant dense<0.000000e+00> : vector<8x32xf32>
    %322 = tpu.matmul %320, %321, %cst_129 {dimension_numbers = #tpu.dot_dimension_numbers<[1], [0], [0], [1], [0, 0, 1, 1], [], []>, precision = #tpu.contract_precision<fp32>} : vector<8x8xf32>, vector<8x32xf32>, vector<8x32xf32> -> vector<8x32xf32>
    %323 = arith.addf %317, %322 : vector<8x32xf32>
    %324 = vector.extract_strided_slice %286 {offsets = [40, 0], sizes = [8, 64], strides = [1, 1]} : vector<64x64xf32> to vector<8x64xf32>
    %325 = vector.extract_strided_slice %316 {offsets = [0, 8], sizes = [64, 8], strides = [1, 1]} : vector<64x32xf32> to vector<64x8xf32>
    %cst_130 = arith.constant dense<0.000000e+00> : vector<8x8xf32>
    %326 = tpu.matmul %324, %325, %cst_130 {dimension_numbers = #tpu.dot_dimension_numbers<[1], [0], [0], [1], [0, 0, 1, 1], [], []>, precision = #tpu.contract_precision<fp32>} : vector<8x64xf32>, vector<64x8xf32>, vector<8x8xf32> -> vector<8x8xf32>
    %327 = vector.extract_strided_slice %7 {offsets = [8, 0], sizes = [8, 32], strides = [1, 1]} : vector<32x32xf32> to vector<8x32xf32>
    %cst_131 = arith.constant dense<0.000000e+00> : vector<8x32xf32>
    %328 = tpu.matmul %326, %327, %cst_131 {dimension_numbers = #tpu.dot_dimension_numbers<[1], [0], [0], [1], [0, 0, 1, 1], [], []>, precision = #tpu.contract_precision<fp32>} : vector<8x8xf32>, vector<8x32xf32>, vector<8x32xf32> -> vector<8x32xf32>
    %329 = arith.addf %323, %328 : vector<8x32xf32>
    %330 = vector.extract_strided_slice %286 {offsets = [48, 0], sizes = [8, 64], strides = [1, 1]} : vector<64x64xf32> to vector<8x64xf32>
    %331 = vector.extract_strided_slice %316 {offsets = [0, 16], sizes = [64, 8], strides = [1, 1]} : vector<64x32xf32> to vector<64x8xf32>
    %cst_132 = arith.constant dense<0.000000e+00> : vector<8x8xf32>
    %332 = tpu.matmul %330, %331, %cst_132 {dimension_numbers = #tpu.dot_dimension_numbers<[1], [0], [0], [1], [0, 0, 1, 1], [], []>, precision = #tpu.contract_precision<fp32>} : vector<8x64xf32>, vector<64x8xf32>, vector<8x8xf32> -> vector<8x8xf32>
    %333 = vector.extract_strided_slice %7 {offsets = [16, 0], sizes = [8, 32], strides = [1, 1]} : vector<32x32xf32> to vector<8x32xf32>
    %cst_133 = arith.constant dense<0.000000e+00> : vector<8x32xf32>
    %334 = tpu.matmul %332, %333, %cst_133 {dimension_numbers = #tpu.dot_dimension_numbers<[1], [0], [0], [1], [0, 0, 1, 1], [], []>, precision = #tpu.contract_precision<fp32>} : vector<8x8xf32>, vector<8x32xf32>, vector<8x32xf32> -> vector<8x32xf32>
    %335 = arith.addf %329, %334 : vector<8x32xf32>
    %336 = vector.extract_strided_slice %286 {offsets = [56, 0], sizes = [8, 64], strides = [1, 1]} : vector<64x64xf32> to vector<8x64xf32>
    %337 = vector.extract_strided_slice %316 {offsets = [0, 24], sizes = [64, 8], strides = [1, 1]} : vector<64x32xf32> to vector<64x8xf32>
    %cst_134 = arith.constant dense<0.000000e+00> : vector<8x8xf32>
    %338 = tpu.matmul %336, %337, %cst_134 {dimension_numbers = #tpu.dot_dimension_numbers<[1], [0], [0], [1], [0, 0, 1, 1], [], []>, precision = #tpu.contract_precision<fp32>} : vector<8x64xf32>, vector<64x8xf32>, vector<8x8xf32> -> vector<8x8xf32>
    %339 = vector.extract_strided_slice %7 {offsets = [24, 0], sizes = [8, 32], strides = [1, 1]} : vector<32x32xf32> to vector<8x32xf32>
    %cst_135 = arith.constant dense<0.000000e+00> : vector<8x32xf32>
    %340 = tpu.matmul %338, %339, %cst_135 {dimension_numbers = #tpu.dot_dimension_numbers<[1], [0], [0], [1], [0, 0, 1, 1], [], []>, precision = #tpu.contract_precision<fp32>} : vector<8x8xf32>, vector<8x32xf32>, vector<8x32xf32> -> vector<8x32xf32>
    %341 = arith.addf %335, %340 : vector<8x32xf32>
    %342 = vector.broadcast %15 : vector<1x32xf32> to vector<8x32xf32>
    %343 = arith.addf %341, %342 : vector<8x32xf32>
    %c8 = arith.constant 8 : index
    %c0_136 = arith.constant 0 : index
    %344 = vector.load %arg6[%c8, %c0_136] : memref<16x32xf32, #tpu.memory_space<vmem>>, vector<8x32xf32>
    tpu.vector_store %arg6[%c8, %c0_136], %343 {strides = array<i32>} : memref<16x32xf32, #tpu.memory_space<vmem>>, vector<8x32xf32>,
    return
  }
}

</mosaic_0001>

<bundles_post_ra>
// kernel: tpu_custom_call.1
= control target key start
LH: loop header
LB: loop body
LE: loop exit
PB: predicated region body
PF: predicated region fallthrough
CT: control target
= control target key end

     0   :  { %vm55_vm0 = vcmask 261120   ;;  %s13041_s0 = inlined_call_operand.vmem [shape: f32[16,32], index: 0, kind: input, shape index: {}]   ;;  %s13042_s1 = inlined_call_operand.vmem [shape: f32[128,32], index: 1, kind: input, shape index: {}]   ;;  %s13043_s2 = inlined_call_operand.vmem [shape: f32[128,32], index: 2, kind: input, shape index: {}]   ;;  %s13044_s3 = inlined_call_operand.vmem [shape: f32[2,8,64], index: 3, kind: input, shape index: {}]   ;;  %s13045_s4 = inlined_call_operand.vmem [shape: f32[4,32,32], index: 4, kind: input, shape index: {}]   ;;  %s13046_s5 = inlined_call_operand.vmem [shape: f32[4,1,32], index: 5, kind: input, shape index: {}]   ;;  %s13047_s6 = inlined_call_operand.hbm [shape: f32[16,32], index: 6, kind: output, shape index: {}]  }
   0x1   :  { %v27_v0 = vld [vmem:[%s13045_s4 + $0x18] sm:$0xff]  ;;  %v26_v1 = vld [vmem:[%s13045_s4 + $0x10] sm:$0xff]  ;;  %v25_v2 = vld [vmem:[%s13045_s4 + $0x8] sm:$0xff] }
   0x2   :  { %v8785_v3 = vand.u32 4294901760, %v27_v0  ;;  %v8787_v4 = vand.u32 4294901760, %v26_v1  ;;  %v8789_v5 = vand.u32 4294901760, %v25_v2  ;;  %v24_v6 = vld [vmem:[%s13045_s4] sm:$0xff]  ;;  %v51_v8 = vld [vmem:[%s13041_s0 + $0x8] sm:$0xff]  ;;  %v8651_v12 = vld [vmem:[%s13045_s4 + $0x38] sm:$0xff] }
   0x3   :  { %v50_v7 = vld [vmem:[%s13041_s0] sm:$0xff]  ;;  %v8800_v9 = vand.u32 4294901760, %v24_v6  ;;  %v60_v11 = vsel %vm55_vm0, %v51_v8, 0  ;;  %v8650_v13 = vld [vmem:[%s13045_s4 + $0x30] sm:$0xff]  ;;  %v8826_v20 = vand.u32 4294901760, %v8651_v12 }
   0x4   :  { %v57_v10 = vsel %vm55_vm0, %v50_v7, 0  ;;  %192 = vmatpush.msra.mxu3 %v8785_v3  ;;  %75 = vmatpush.msra.mxu0 %v8785_v3  ;;  %v112_v14 = vsub.f32 %v27_v0, %v8785_v3  ;;  %v8814_v15 = vsub.f32 %v26_v1, %v8787_v4  ;;  %v8817_v16 = vsub.f32 %v25_v2, %v8789_v5 }
   0x5   :  { %v8819_v17 = vand.u32 4294901760, %v57_v10  ;;  %v8822_v18 = vsub.f32 %v24_v6, %v8800_v9  ;;  %v8824_v19 = vand.u32 4294901760, %v60_v11  ;;  %v8828_v21 = vand.u32 4294901760, %v8650_v13 }
   0x6   :  { %158 = vmatpush.msra.mxu2 %v112_v14  ;;  %194 = vmatpush.msra.mxu3 %v8787_v4  ;;  %v113_v23 = vand.u32 4294901760, %v112_v14  ;;  %v119_v24 = vand.u32 4294901760, %v8814_v15  ;;  %v125_v25 = vand.u32 4294901760, %v8817_v16  ;;  %v8840_v28 = vsub.f32 %v8651_v12, %v8826_v20 }
   0x7   :  { %v83_v22 = vsub.f32 %v57_v10, %v8819_v17  ;;  %77 = vmatpush.msra.mxu0 %v8787_v4  ;;  %v131_v26 = vand.u32 4294901760, %v8822_v18  ;;  %v8837_v27 = vsub.f32 %v60_v11, %v8824_v19  ;;  %v8843_v29 = vsub.f32 %v8650_v13, %v8828_v21 }
   0x8   :  { %161 = vmatpush.msra.mxu2 %v8814_v15  ;;  %196 = vmatpush.msra.mxu3 %v8789_v5  ;;  %v114_v31 = vsub.f32 %v112_v14, %v113_v23  ;;  %v120_v32 = vsub.f32 %v8814_v15, %v119_v24  ;;  %v126_v33 = vsub.f32 %v8817_v16, %v125_v25 }
   0x9   :  { %v84_v30 = vand.u32 4294901760, %v83_v22 }
   0xa   :  { %11 = vsyncpa [#allocation3], 0  ;;  %79 = vmatpush.msra.mxu0 %v8789_v5  ;;  %v132_v34 = vsub.f32 %v8822_v18, %v131_v26  ;;  %v508_v35 = vand.u32 4294901760, %v8840_v28  ;;  %v514_v36 = vand.u32 4294901760, %v8843_v29  ;;  %v8649_v37 = vld [vmem:[%s13045_s4 + $0x28] sm:$0xff]  ;;  %v8648_v38 = vld [vmem:[%s13045_s4 + $0x20] sm:$0xff]  ;;  %164 = vmatpush.msra.mxu2 %v8817_v16 }
   0xb   :  { %v278_v39 = vld [vmem:[%s13042_s1] sm:$0xff]  ;;  %198 = vmatpush.msra.mxu3 %v8800_v9  ;;  %v115_v40 = vand.u32 4294901760, %v114_v31  ;;  %v85_v41 = vsub.f32 %v83_v22, %v84_v30  ;;  %v121_v42 = vand.u32 4294901760, %v120_v32  ;;  %v92_v43 = vand.u32 4294901760, %v8837_v27  ;;  %v279_v47 = vld [vmem:[%s13042_s1 + $0x8] sm:$0xff]  ;;  %v280_v7 = vld [vmem:[%s13042_s1 + $0x10] sm:$0xff] }
   0xc   :  { %202 = vmatmul.f32.vlgmr.msra.gmra.mxu3 %v84_v30  ;;  %81 = vmatpush.msra.mxu0 %v8800_v9  ;;  %v127_v44 = vand.u32 4294901760, %v126_v33  ;;  %v509_v45 = vsub.f32 %v8840_v28, %v508_v35  ;;  %v515_v46 = vsub.f32 %v8843_v29, %v514_v36  ;;  %v8880_v49 = vand.u32 4294901760, %v8649_v37  ;;  %s8736_s15 = smov 112   ;;  %s8737_s18 = smov 104  }
   0xd   :  { %116 = vmatpush.msra.mxu1 %v115_v40  ;;  %167 = vmatpush.msra.mxu2 %v8822_v18  ;;  %v86_v48 = vand.u32 4294901760, %v85_v41  ;;  %v8882_v50 = vand.u32 4294901760, %v8648_v38  ;;  %v298_v51 = vsel %vm55_vm0, %v278_v39, 0  ;;  %v133_v52 = vand.u32 4294901760, %v132_v34  ;;  %v285_v41 = vld [vmem:[%s13042_s1 + $0x38] sm:$0xff]  ;;  %s8738_s10 = smov [#allocation2]  }
   0xe   :  { %170 = vmatmul.f32.vlgmr.msra.gmra.mxu2 %v83_v22  ;;  %v510_v53 = vand.u32 4294901760, %v509_v45  ;;  %227 = vmatpush.msrb.mxu0 %v113_v23  ;;  %v516_v54 = vand.u32 4294901760, %v515_v46  ;;  %v8885_v55 = vand.u32 4294901760, %v298_v51  ;;  %v93_v56 = vsub.f32 %v8837_v27, %v92_v43  ;;  %v282_v23 = vld [vmem:[%s13042_s1 + $0x20] sm:$0xff]  ;;  %s8634_s11 = sshll.u32 %s8738_s10, 4  ;;  %s8636_s13 = sshll.u32 %s13047_s6, 4  ;;  %s8635_s11 = int_to_ptr.vmem [resolvable:$true] %s8634_s11  ;;  %s8637_s13 = int_to_ptr.hbm [resolvable:$true] %s8636_s13 }
   0xf   :  { %87 = vmatmul.f32.vlgmr.msra.gmra.mxu0 %v86_v48  ;;  %122 = vmatpush.msra.mxu1 %v121_v42  ;;  %v519_v57 = vsub.f32 %v8649_v37, %v8880_v49  ;;  %v8890_v58 = vsub.f32 %v8648_v38, %v8882_v50  ;;  %v301_v59 = vsel %vm55_vm0, %v279_v47, 0  ;;  %v304_v13 = vsel %vm55_vm0, %v280_v7, 0  ;;  %v286_v48 = vld [vmem:[%s13042_s1 + $0x40] sm:$0xff]  ;;  %s8740_s16 = smov 8  }
  0x10   :  { %511 = vmatpush.msrb.mxu3 %v510_v53  ;;  %358 = vmatpush.msrb.mxu2 %v8826_v20  ;;  %v8895_v60 = vsub.f32 %v298_v51, %v8885_v55  ;;  %v8900_v0 = vand.u32 4294901760, %v301_v59  ;;  %v94_v1 = vand.u32 4294901760, %v93_v56  ;;  %v8926_v15 = vand.u32 4294901760, %v304_v13  ;;  %v287_v56 = vld [vmem:[%s13042_s1 + $0x48] sm:$0xff] }
  0x11   :  { %128 = vmatpush.msra.mxu1 %v127_v44  ;;  %231 = vmatpush.msrb.mxu0 %v119_v24  ;;  %v520_v61 = vand.u32 4294901760, %v519_v57  ;;  %v526_v62 = vand.u32 4294901760, %v8890_v58  ;;  %v319_v44 = vsel %vm55_vm0, %v285_v41, 0  ;;  %v322_v51 = vsel %vm55_vm0, %v286_v48, 0 }
  0x12   :  { %517 = vmatpush.msrb.mxu3 %v516_v54  ;;  %360 = vmatpush.msrb.mxu2 %v8828_v21  ;;  %v367_v63 = vand.u32 4294901760, %v8895_v60  ;;  %v8918_v12 = vsub.f32 %v301_v59, %v8900_v0  ;;  %v382_v16 = vsub.f32 %v304_v13, %v8926_v15  ;;  %v8991_v47 = vand.u32 4294901760, %v319_v44 }
  0x13   :  { %134 = vmatpush.msra.mxu1 %v133_v52  ;;  %v521_v2 = vsub.f32 %v519_v57, %v520_v61  ;;  %235 = vmatpush.msrb.mxu0 %v125_v25  ;;  %v527_v6 = vsub.f32 %v8890_v58, %v526_v62  ;;  %v310_v25 = vsel %vm55_vm0, %v282_v23, 0  ;;  %v8999_v54 = vand.u32 4294901760, %v322_v51 }
  0x14   :  { %136 = vmatmul.f32.vlgmr.msra.gmra.mxu1 %v8819_v17  ;;  %208 = vmatmul.f32.gmra.mxu3 %v92_v43  ;;  %v368_v11 = vsub.f32 %v8895_v60, %v367_v63  ;;  %v383_v22 = vand.u32 4294901760, %v382_v16  ;;  %v325_v59 = vsel %vm55_vm0, %v287_v56, 0  ;;  %vm1713_vm1 = vcmask 64512  }
  0x15   :  { %v522_v8 = vand.u32 4294901760, %v521_v2  ;;  %362 = vmatpush.msrb.mxu2 %v8880_v49  ;;  %v528_v10 = vand.u32 4294901760, %v527_v6  ;;  %239 = vmatpush.msrb.mxu0 %v131_v26  ;;  %v288_v6 = vld [vmem:[%s13042_s1 + $0x50] sm:$0xff]  ;;  %vm3898_vm2 = vcmask 523264  }
  0x16   :  { %175 = vmatmul.f32.gmra.mxu2 %v8837_v27  ;;  %262 = vmatpush.msrb.mxu1 %v8785_v3  ;;  %v369_v14 = vand.u32 4294901760, %v368_v11  ;;  %v375_v3 = vand.u32 4294901760, %v8918_v12  ;;  %v8962_v27 = vand.u32 4294901760, %v310_v25 }
  0x17   :  { %95 = vmatmul.f32.gmra.mxu0 %v94_v1  ;;  %523 = vmatpush.msrb.mxu3 %v522_v8  ;;  %v9012_v1 = vand.u32 4294901760, %v325_v59 }
  0x18   :  { %364 = vmatpush.msrb.mxu2 %v8882_v50  ;;  %264 = vmatpush.msrb.mxu1 %v8787_v4  ;;  %v281_v4 = vld [vmem:[%s13042_s1 + $0x18] sm:$0xff]  ;;  %v398_v30 = vsub.f32 %v310_v25, %v8962_v27 }
  0x19   :  { %529 = vmatpush.msrb.mxu3 %v528_v10  ;;  %609 = vmatpush.msra.mxu0 %v8840_v28  ;;  %v307_v18 = vsel %vm55_vm0, %v281_v4, 0  ;;  %v283_v28 = vld [vmem:[%s13042_s1 + $0x28] sm:$0xff]  ;;  %v438_v10 = vsub.f32 %v325_v59, %v9012_v1 }
  0x1a   :  { %266 = vmatpush.msrb.mxu1 %v8789_v5  ;;  %832 = vmatpush.msra.mxu2 %v508_v35  ;;  %v376_v5 = vsub.f32 %v8918_v12, %v375_v3  ;;  %v313_v31 = vsel %vm55_vm0, %v283_v28, 0  ;;  %v399_v33 = vand.u32 4294901760, %v398_v30 }
  0x1b   :  { %612 = vmatpush.msra.mxu0 %v8843_v29  ;;  %923 = vmatpush.msra.mxu3 %v8826_v20  ;;  %v8972_v34 = vand.u32 4294901760, %v313_v31 }
  0x1c   :  { %140 = vmatmul.f32.gmra.mxu1 %v8824_v19  ;;  %531 = vmatmul.f32.vlgmr.msrb.gmra.mxu3 %v8885_v55  ;;  %v400_v35 = vsub.f32 %v398_v30, %v399_v33 }
  0x1d   :  { %268 = vmatpush.msrb.mxu1 %v8800_v9  ;;  %615 = vmatpush.msra.mxu0 %v519_v57  ;;  %v377_v9 = vand.u32 4294901760, %v376_v5  ;;  %v289_v5 = vld [vmem:[%s13042_s1 + $0x58] sm:$0xff] }
  0x1e   :  { %370 = vmatmul.f32.vlgmr.msrb.gmra.mxu2 %v369_v14  ;;  %925 = vmatpush.msra.mxu3 %v8828_v21  ;;  %v401_v38 = vand.u32 4294901760, %v400_v35 }
  0x1f   :  { %713 = vmatpush.msra.mxu1 %v8826_v20  ;;  %241 = vmatmul.f32.vlgmr.msrb.gmra.mxu0 %v8819_v17  ;;  %v8949_v20 = vand.u32 4294901760, %v307_v18 }
  0x20   :  { %836 = vmatpush.msra.mxu2 %v514_v36  ;;  %618 = vmatpush.msra.mxu0 %v8890_v58  ;;  %v406_v36 = vsub.f32 %v313_v31, %v8972_v34  ;;  %v430_v58 = vsub.f32 %v322_v51, %v8999_v54  ;;  %v291_v31 = vld [vmem:[%s13042_s1 + $0x68] sm:$0xff] }
  0x21   :  { %715 = vmatpush.msra.mxu1 %v8828_v21  ;;  %927 = vmatpush.msra.mxu3 %v8880_v49  ;;  %v384_v21 = vsub.f32 %v382_v16, %v383_v22  ;;  %v390_v24 = vsub.f32 %v307_v18, %v8949_v20 }
  0x22   :  { %840 = vmatpush.msra.mxu2 %v520_v61  ;;  %v407_v39 = vand.u32 4294901760, %v406_v36 }
  0x23   :  { %717 = vmatpush.msra.mxu1 %v8880_v49  ;;  %929 = vmatpush.msra.mxu3 %v8882_v50  ;;  %v385_v26 = vand.u32 4294901760, %v384_v21 }
  0x24   :  { %844 = vmatpush.msra.mxu2 %v526_v62  ;;  %270 = vmatmul.f32.vlgmr.msrb.gmra.mxu1 %v8819_v17  ;;  %v391_v17 = vand.u32 4294901760, %v390_v24  ;;  %v408_v42 = vsub.f32 %v406_v36, %v407_v39 }
  0x25   :  { %535 = vmatmul.f32.gmra.mxu3 %v8900_v0  ;;  %719 = vmatpush.msra.mxu1 %v8882_v50  ;;  %v422_v50 = vsub.f32 %v319_v44, %v8991_v47 }
  0x26   :  { %378 = vmatmul.f32.gmra.mxu2 %v377_v9  ;;  %v392_v29 = vsub.f32 %v390_v24, %v391_v17  ;;  %v409_v45 = vand.u32 4294901760, %v408_v42  ;;  %v331_v9 = vsel %vm55_vm0, %v289_v5, 0 }
  0x27   :  { %245 = vmatmul.f32.gmra.mxu0 %v8824_v19  ;;  %v423_v53 = vand.u32 4294901760, %v422_v50  ;;  %v9038_v21 = vand.u32 4294901760, %v331_v9 }
  0x28   :  { %v393_v32 = vand.u32 4294901760, %v392_v29 }
  0x29   :  { %v424_v57 = vsub.f32 %v422_v50, %v423_v53 }
  0x2b   :  { %v425_v62 = vand.u32 4294901760, %v424_v57 }
  0x2c   :  { %274 = vmatmul.f32.gmra.mxu1 %v8824_v19  ;;  %v284_v19 = vld [vmem:[%s13042_s1 + $0x30] sm:$0xff] }
  0x2d   :  { %539 = vmatmul.f32.gmra.mxu3 %v8926_v15  ;;  %v316_v37 = vsel %vm55_vm0, %v284_v19, 0  ;;  %v337_v19 = vsel %vm55_vm0, %v291_v31, 0 }
  0x2e   :  { %386 = vmatmul.f32.gmra.mxu2 %v385_v26  ;;  %v8983_v40 = vand.u32 4294901760, %v316_v37  ;;  %v9045_v26 = vsub.f32 %v331_v9, %v9038_v21 }
  0x2f   :  { %621 = vmatmul.f32.vlgmr.msra.gmra.mxu0 %v8895_v60  ;;  %v8655_v60 = vld [vmem:[%s13045_s4 + $0x58] sm:$0xff] }
  0x30   :  { %v414_v43 = vsub.f32 %v316_v37, %v8983_v40  ;;  %v9010_v61 = vand.u32 4294901760, %v8655_v60  ;;  %v455_v29 = vand.u32 4294901760, %v9045_v26  ;;  %v9061_v37 = vand.u32 4294901760, %v337_v19 }
  0x32   :  { %v415_v46 = vand.u32 4294901760, %v414_v43  ;;  %1075 = vmatpush.msrb.mxu0 %v9010_v61  ;;  %v9016_v2 = vsub.f32 %v8655_v60, %v9010_v61  ;;  %1430 = vmatpush.msrb.mxu3 %v9010_v61 }
  0x34   :  { %723 = vmatmul.f32.vlgmr.msra.gmra.mxu1 %v367_v63  ;;  %v416_v49 = vsub.f32 %v414_v43, %v415_v46  ;;  %v431_v63 = vand.u32 4294901760, %v430_v58  ;;  %v1225_v7 = vand.u32 4294901760, %v9016_v2  ;;  %1326 = vmatpush.msrb.mxu2 %v9016_v2 }
  0x35   :  { %543 = vmatmul.f32.gmra.mxu3 %v8949_v20 }
  0x36   :  { %394 = vmatmul.f32.gmra.mxu2 %v393_v32  ;;  %v417_v52 = vand.u32 4294901760, %v416_v49  ;;  %v432_v8 = vsub.f32 %v430_v58, %v431_v63  ;;  %v1226_v11 = vsub.f32 %v9016_v2, %v1225_v7  ;;  %v456_v32 = vsub.f32 %v9045_v26, %v455_v29  ;;  %v995_v2 = vld [vmem:[%s13043_s2] sm:$0xff] }
  0x37   :  { %626 = vmatmul.f32.gmra.mxu0 %v8918_v12  ;;  %v328_v12 = vsel %vm55_vm0, %v288_v6, 0 }
  0x38   :  { %v1227_v13 = vand.u32 4294901760, %v1226_v11  ;;  %v433_v14 = vand.u32 4294901760, %v432_v8  ;;  %v9030_v4 = vand.u32 4294901760, %v328_v12  ;;  %v457_v35 = vand.u32 4294901760, %v456_v32  ;;  %v8653_v8 = vld [vmem:[%s13045_s4 + $0x48] sm:$0xff]  ;;  %v8652_v11 = vld [vmem:[%s13045_s4 + $0x40] sm:$0xff] }
  0x3a   :  { %1228 = vmatpush.msrb.mxu1 %v1227_v13  ;;  %v446_v18 = vsub.f32 %v328_v12, %v9030_v4  ;;  %v8670_v12 = vld [vmem:[%s13046_s5] ss:$0 sm:$0xff] }
  0x3c   :  { %729 = vmatmul.f32.gmra.mxu1 %v375_v3  ;;  %v439_v3 = vand.u32 4294901760, %v438_v10  ;;  %v447_v23 = vand.u32 4294901760, %v446_v18 }
  0x3d   :  { %547 = vmatmul.f32.gmra.mxu3 %v8962_v27 }
  0x3e   :  { %402 = vmatmul.f32.gmra.mxu2 %v401_v38  ;;  %v448_v25 = vsub.f32 %v446_v18, %v447_v23  ;;  %v292_v38 = vld [vmem:[%s13042_s1 + $0x70] sm:$0xff] }
  0x3f   :  { %631 = vmatmul.f32.gmra.mxu0 %v382_v16  ;;  %v440_v16 = vsub.f32 %v438_v10, %v439_v3  ;;  %v340_v44 = vsel %vm55_vm0, %v292_v38, 0 }
  0x40   :  { %v449_v28 = vand.u32 4294901760, %v448_v25 }
  0x44   :  { %735 = vmatmul.f32.gmra.mxu1 %v383_v22  ;;  %v441_v22 = vand.u32 4294901760, %v440_v16 }
  0x45   :  { %551 = vmatmul.f32.gmra.mxu3 %v8972_v34 }
  0x46   :  { %410 = vmatmul.f32.gmra.mxu2 %v409_v45 }
  0x47   :  { %636 = vmatmul.f32.gmra.mxu0 %v390_v24  ;;  %v290_v24 = vld [vmem:[%s13042_s1 + $0x60] sm:$0xff] }
  0x4c   :  { %741 = vmatmul.f32.gmra.mxu1 %v391_v17  ;;  %v334_v17 = vsel %vm55_vm0, %v290_v24, 0 }
  0x4d   :  { %555 = vmatmul.f32.gmra.mxu3 %v8983_v40 }
  0x4e   :  { %418 = vmatmul.f32.gmra.mxu2 %v417_v52  ;;  %v293_v52 = vld [vmem:[%s13042_s1 + $0x78] sm:$0xff] }
  0x4f   :  { %641 = vmatmul.f32.gmra.mxu0 %v398_v30  ;;  %v9049_v30 = vand.u32 4294901760, %v334_v17 }
  0x54   :  { %747 = vmatmul.f32.gmra.mxu1 %v399_v33  ;;  %v9057_v33 = vsub.f32 %v334_v17, %v9049_v30 }
  0x55   :  { %559 = vmatmul.f32.gmra.mxu3 %v8991_v47 }
  0x56   :  { %426 = vmatmul.f32.gmra.mxu2 %v425_v62 }
  0x57   :  { %646 = vmatmul.f32.gmra.mxu0 %v406_v36  ;;  %v463_v36 = vand.u32 4294901760, %v9057_v33 }
  0x59   :  { %v464_v42 = vsub.f32 %v9057_v33, %v463_v36 }
  0x5b   :  { %v465_v48 = vand.u32 4294901760, %v464_v42 }
  0x5c   :  { %753 = vmatmul.f32.gmra.mxu1 %v407_v39  ;;  %v8654_v39 = vld [vmem:[%s13045_s4 + $0x50] sm:$0xff] }
  0x5d   :  { %563 = vmatmul.f32.gmra.mxu3 %v8999_v54  ;;  %v9070_v41 = vand.u32 4294901760, %v8654_v39 }
  0x5e   :  { %434 = vmatmul.f32.gmra.mxu2 %v433_v14 }
  0x5f   :  { %651 = vmatmul.f32.gmra.mxu0 %v414_v43  ;;  %v9076_v43 = vsub.f32 %v337_v19, %v9061_v37  ;;  %v1230_v45 = vsub.f32 %v8654_v39, %v9070_v41  ;;  %1432 = vmatpush.msrb.mxu3 %v9070_v41 }
  0x60   :  { %1077 = vmatpush.msrb.mxu0 %v9070_v41 }
  0x61   :  { %1329 = vmatpush.msrb.mxu2 %v1230_v45  ;;  %v471_v49 = vand.u32 4294901760, %v9076_v43 }
  0x63   :  { %v472_v56 = vsub.f32 %v9076_v43, %v471_v49 }
  0x64   :  { %759 = vmatmul.f32.gmra.mxu1 %v415_v46  ;;  %v1231_v46 = vand.u32 4294901760, %v1230_v45 }
  0x65   :  { %567 = vmatmul.f32.gmra.mxu3 %v9012_v1  ;;  %v473_v59 = vand.u32 4294901760, %v472_v56 }
  0x66   :  { %442 = vmatmul.f32.gmra.mxu2 %v441_v22  ;;  %v1232_v51 = vsub.f32 %v1230_v45, %v1231_v46  ;;  %v1015_v45 = vsel %vm55_vm0, %v995_v2, 0 }
  0x67   :  { %656 = vmatmul.f32.gmra.mxu0 %v422_v50  ;;  %v9083_v50 = vand.u32 4294901760, %v340_v44 }
  0x69   :  { %v9093_v57 = vsub.f32 %v340_v44, %v9083_v50 }
  0x6b   :  { %v479_v60 = vand.u32 4294901760, %v9093_v57 }
  0x6c   :  { %765 = vmatmul.f32.gmra.mxu1 %v423_v53  ;;  %v1233_v53 = vand.u32 4294901760, %v1232_v51 }
  0x6d   :  { %571 = vmatmul.f32.gmra.mxu3 %v9030_v4 }
  0x6e   :  { %450 = vmatmul.f32.gmra.mxu2 %v449_v28  ;;  %1234 = vmatpush.msrb.mxu1 %v1233_v53 }
  0x6f   :  { %661 = vmatmul.f32.gmra.mxu0 %v430_v58  ;;  %v343_v58 = vsel %vm55_vm0, %v293_v52, 0 }
  0x70   :  { %v9097_v62 = vand.u32 4294901760, %v343_v58 }
  0x72   :  { %v9104_v6 = vsub.f32 %v343_v58, %v9097_v62 }
  0x74   :  { %771 = vmatmul.f32.gmra.mxu1 %v431_v63  ;;  %v480_v63 = vsub.f32 %v9093_v57, %v479_v60  ;;  %v487_v14 = vand.u32 4294901760, %v9104_v6 }
  0x75   :  { %575 = vmatmul.f32.gmra.mxu3 %v9038_v21 }
  0x76   :  { %458 = vmatmul.f32.gmra.mxu2 %v457_v35  ;;  %v481_v13 = vand.u32 4294901760, %v480_v63 }
  0x77   :  { %666 = vmatmul.f32.gmra.mxu0 %v438_v10  ;;  %v1078_v10 = vand.u32 4294901760, %v8653_v8 }
  0x79   :  { %1079 = vmatpush.msrb.mxu0 %v1078_v10  ;;  %v1236_v5 = vsub.f32 %v8653_v8, %v1078_v10  ;;  %1434 = vmatpush.msrb.mxu3 %v1078_v10 }
  0x7b   :  { %1332 = vmatpush.msrb.mxu2 %v1236_v5 }
  0x7c   :  { %777 = vmatmul.f32.gmra.mxu1 %v439_v3  ;;  %v1080_v3 = vand.u32 4294901760, %v8652_v11 }
  0x7d   :  { %579 = vmatmul.f32.gmra.mxu3 %v9049_v30 }
  0x7e   :  { %466 = vmatmul.f32.gmra.mxu2 %v465_v48  ;;  %v1242_v9 = vsub.f32 %v8652_v11, %v1080_v3  ;;  %1081 = vmatpush.msrb.mxu0 %v1080_v3  ;;  %v9136_v48 = vand.u32 4294901760, %v1015_v45 }
  0x7f   :  { %671 = vmatmul.f32.gmra.mxu0 %v446_v18  ;;  %v1237_v18 = vand.u32 4294901760, %v1236_v5  ;;  %1436 = vmatpush.msrb.mxu3 %v1080_v3 }
  0x80   :  { %v1243_v25 = vand.u32 4294901760, %v1242_v9  ;;  %1549 = vmatpush.msra.mxu0 %v1225_v7  ;;  %1335 = vmatpush.msrb.mxu2 %v1242_v9 }
  0x81   :  { %v1238_v24 = vsub.f32 %v1236_v5, %v1237_v18 }
  0x82   :  { %v1244_v28 = vsub.f32 %v1242_v9, %v1243_v25  ;;  %1553 = vmatpush.msra.mxu0 %v1231_v46 }
  0x83   :  { %v1239_v17 = vand.u32 4294901760, %v1238_v24 }
  0x84   :  { %783 = vmatmul.f32.gmra.mxu1 %v447_v23  ;;  %v488_v23 = vsub.f32 %v9104_v6, %v487_v14  ;;  %v1245_v35 = vand.u32 4294901760, %v1244_v28  ;;  %1557 = vmatpush.msra.mxu0 %v1237_v18 }
  0x85   :  { %583 = vmatmul.f32.gmra.mxu3 %v9061_v37  ;;  %1240 = vmatpush.msrb.mxu1 %v1239_v17 }
  0x86   :  { %474 = vmatmul.f32.gmra.mxu2 %v473_v59  ;;  %v489_v19 = vand.u32 4294901760, %v488_v23  ;;  %1561 = vmatpush.msra.mxu0 %v1243_v25  ;;  %v998_v25 = vld [vmem:[%s13043_s2 + $0x18] sm:$0xff] }
  0x87   :  { %676 = vmatmul.f32.gmra.mxu0 %v9045_v26  ;;  %1246 = vmatpush.msrb.mxu1 %v1245_v35 }
  0x89   :  { %1640 = vmatpush.msra.mxu1 %v9010_v61  ;;  %v996_v61 = vld [vmem:[%s13043_s2 + $0x8] sm:$0xff] }
  0x8a   :  { %v1018_v56 = vsel %vm55_vm0, %v996_v61, 0 }
  0x8b   :  { %1642 = vmatpush.msra.mxu1 %v9070_v41  ;;  %v9150_v41 = vld [vmem:[%s13046_s5 + $0x1] ss:$0 sm:$0xff]  ;;  %v9163_v8 = vand.u32 4294901760, %v1018_v56 }
  0x8c   :  { %v88_v16 = vpop.f32.mrf.mxu0  ;;  %789 = vmatmul.f32.gmra.mxu1 %v455_v29 }
  0x8d   :  { %587 = vmatmul.f32.gmra.mxu3 %v9083_v50  ;;  %v89_v22 = vadd.f32 %v8670_v12, %v88_v16  ;;  %1644 = vmatpush.msra.mxu1 %v1078_v10 }
  0x8e   :  { %482 = vmatmul.f32.gmra.mxu2 %v481_v13 }
  0x8f   :  { %681 = vmatmul.f32.gmra.mxu0 %v9057_v33  ;;  %v203_v26 = vpop.f32.mrf.mxu3  ;;  %1646 = vmatpush.msra.mxu1 %v1080_v3 }
  0x91   :  { %v137_v29 = vpop.f32.mrf.mxu1  ;;  %v171_v31 = vpop.f32.mrf.mxu2 }
  0x92   :  { %v138_v32 = vadd.f32 %v137_v29, %v89_v22 }
  0x94   :  { %v172_v38 = vadd.f32 %v171_v31, %v138_v32  ;;  %v96_v39 = vpop.f32.mrf.mxu0  ;;  %795 = vmatmul.f32.gmra.mxu1 %v463_v36 }
  0x95   :  { %591 = vmatmul.f32.gmra.mxu3 %v9097_v62  ;;  %v97_v7 = vadd.f32 %v8670_v12, %v96_v39  ;;  %v997_v12 = vld [vmem:[%s13043_s2 + $0x10] sm:$0xff]  ;;  %v999_v39 = vld [vmem:[%s13043_s2 + $0x20] sm:$0xff] }
  0x96   :  { %490 = vmatmul.f32.gmra.mxu2 %v489_v19  ;;  %v9130_v42 = vadd.f32 %v203_v26, %v172_v38 }
  0x97   :  { %686 = vmatmul.f32.gmra.mxu0 %v9076_v43  ;;  %v209_v44 = vpop.f32.mrf.mxu3 }
  0x99   :  { %v141_v33 = vpop.f32.mrf.mxu1  ;;  %v176_v36 = vpop.f32.mrf.mxu2 }
  0x9a   :  { %v142_v46 = vadd.f32 %v141_v33, %v97_v7 }
  0x9c   :  { %v177_v51 = vadd.f32 %v176_v36, %v142_v46  ;;  %v9138_v52 = vpop.f32.mrf.mxu0  ;;  %801 = vmatmul.f32.gmra.mxu1 %v471_v49  ;;  %v9156_v49 = vsub.f32 %v1015_v45, %v9136_v48  ;;  %v1027_v45 = vsel %vm55_vm0, %v999_v39, 0 }
  0x9d   :  { %931 = vmatmul.f32.vlgmr.msra.gmra.mxu3 %v8885_v55 }
  0x9e   :  { %846 = vmatmul.f32.vlgmr.msra.gmra.mxu2 %v8885_v55  ;;  %v9152_v53 = vadd.f32 %v209_v44, %v177_v51  ;;  %v13054_v63 = vand.u32 4294901760, %v9156_v49 }
  0x9f   :  { %691 = vmatmul.f32.gmra.mxu0 %v9093_v57  ;;  %v532_v43 = vpop.f32.mrf.mxu3  ;;  %v9181_v57 = vsub.f32 %v1018_v56, %v9163_v8 }
  0xa0   :  { %13153 = vst [vmem:[#allocation5_spill] sm:$0xff] %v9152_v53  ;;  %v1085_v3 = vsub.f32 %v9156_v49, %v13054_v63 }
  0xa1   :  { %v9159_v58 = vpop.f32.mrf.mxu1  ;;  %v371_v59 = vpop.f32.mrf.mxu2 }
  0xa2   :  { %v372_v55 = vadd.f32 %v9150_v41, %v371_v59  ;;  %v1086_v9 = vand.u32 4294901760, %v1085_v3  ;;  %v1000_v59 = vld [vmem:[%s13043_s2 + $0x28] sm:$0xff] }
  0xa3   :  { %v1030_v3 = vsel %vm55_vm0, %v1000_v59, 0 }
  0xa4   :  { %v9165_v10 = vpop.f32.mrf.mxu0  ;;  %807 = vmatmul.f32.gmra.mxu1 %v479_v60  ;;  %v9170_v11 = vadd.f32 %v532_v43, %v372_v55  ;;  %v1021_v60 = vsel %vm55_vm0, %v997_v12, 0 }
  0xa5   :  { %13154 = vst [vmem:[#allocation6_spill] sm:$0xff] %v9165_v10  ;;  %935 = vmatmul.f32.gmra.mxu3 %v8900_v0  ;;  %v9188_v22 = vand.u32 4294901760, %v1021_v60 }
  0xa6   :  { %850 = vmatmul.f32.gmra.mxu2 %v8900_v0  ;;  %v13053_v0 = vand.u32 4294901760, %v9181_v57 }
  0xa7   :  { %696 = vmatmul.f32.gmra.mxu0 %v9104_v6  ;;  %v9205_v28 = vsub.f32 %v1021_v60, %v9188_v22  ;;  %v1024_v6 = vsel %vm55_vm0, %v998_v25, 0 }
  0xa8   :  { %v536_v13 = vpop.f32.mrf.mxu3  ;;  %v1093_v17 = vsub.f32 %v9181_v57, %v13053_v0 }
  0xa9   :  { %v9184_v5 = vpop.f32.mrf.mxu1  ;;  %v379_v16 = vpop.f32.mrf.mxu2  ;;  %v13051_v19 = vand.u32 4294901760, %v9205_v28 }
  0xaa   :  { %13155 = vst [vmem:[#allocation7_spill] sm:$0xff] %v9184_v5  ;;  %v380_v18 = vadd.f32 %v9150_v41, %v379_v16  ;;  %v1094_v32 = vand.u32 4294901760, %v1093_v17 }
  0xab   :  { %v1101_v7 = vsub.f32 %v9205_v28, %v13051_v19 }
  0xac   :  { %v9190_v23 = vpop.f32.mrf.mxu0  ;;  %813 = vmatmul.f32.gmra.mxu1 %v487_v14  ;;  %v9195_v24 = vadd.f32 %v536_v13, %v380_v18 }
  0xad   :  { %939 = vmatmul.f32.gmra.mxu3 %v8926_v15  ;;  %v1102_v51 = vand.u32 4294901760, %v1101_v7 }
  0xae   :  { %854 = vmatmul.f32.gmra.mxu2 %v8926_v15  ;;  %v9212_v15 = vand.u32 4294901760, %v1024_v6 }
  0xaf   :  { %1087 = vmatmul.f32.vlgmr.msrb.gmra.mxu0 %v1086_v9 }
  0xb0   :  { %v540_v26 = vpop.f32.mrf.mxu3  ;;  %v9228_v44 = vsub.f32 %v1024_v6, %v9212_v15  ;;  %v1001_v6 = vld [vmem:[%s13043_s2 + $0x30] sm:$0xff] }
  0xb1   :  { %v387_v14 = vpop.f32.mrf.mxu2  ;;  %v9208_v29 = vpop.f32.mrf.mxu1  ;;  %v1033_v39 = vsel %vm55_vm0, %v1001_v6, 0 }
  0xb2   :  { %v388_v31 = vadd.f32 %v9150_v41, %v387_v14  ;;  %v13050_v61 = vand.u32 4294901760, %v9228_v44 }
  0xb4   :  { %v9214_v35 = vpop.f32.mrf.mxu0  ;;  %1248 = vmatmul.f32.vlgmr.msrb.gmra.mxu1 %v9136_v48  ;;  %v9218_v38 = vadd.f32 %v540_v26, %v388_v31  ;;  %v1109_v12 = vsub.f32 %v9228_v44, %v13050_v61 }
  0xb5   :  { %943 = vmatmul.f32.gmra.mxu3 %v8949_v20 }
  0xb6   :  { %858 = vmatmul.f32.gmra.mxu2 %v8949_v20  ;;  %v9235_v20 = vand.u32 4294901760, %v1027_v45  ;;  %v1110_v9 = vand.u32 4294901760, %v1109_v12 }
  0xb7   :  { %1095 = vmatmul.f32.gmra.mxu0 %v1094_v32 }
  0xb8   :  { %v544_v2 = vpop.f32.mrf.mxu3  ;;  %v9251_v13 = vsub.f32 %v1027_v45, %v9235_v20 }
  0xb9   :  { %v395_v33 = vpop.f32.mrf.mxu2  ;;  %v9231_v36 = vpop.f32.mrf.mxu1 }
  0xba   :  { %v396_v46 = vadd.f32 %v9150_v41, %v395_v33  ;;  %v13049_v25 = vand.u32 4294901760, %v9251_v13 }
  0xbc   :  { %v9237_v43 = vpop.f32.mrf.mxu0  ;;  %1252 = vmatmul.f32.gmra.mxu1 %v9163_v8  ;;  %v9241_v56 = vadd.f32 %v544_v2, %v396_v46  ;;  %v1117_v31 = vsub.f32 %v9251_v13, %v13049_v25 }
  0xbd   :  { %947 = vmatmul.f32.gmra.mxu3 %v8962_v27 }
  0xbe   :  { %862 = vmatmul.f32.gmra.mxu2 %v8962_v27  ;;  %v9258_v27 = vand.u32 4294901760, %v1030_v3  ;;  %v1118_v33 = vand.u32 4294901760, %v1117_v31 }
  0xbf   :  { %1103 = vmatmul.f32.gmra.mxu0 %v1102_v51 }
  0xc0   :  { %v548_v55 = vpop.f32.mrf.mxu3  ;;  %13156 = vst [vmem:[#allocation8_spill] sm:$0xff] %v9258_v27  ;;  %v9274_v32 = vsub.f32 %v1030_v3, %v9258_v27 }
  0xc1   :  { %v403_v60 = vpop.f32.mrf.mxu2  ;;  %v9254_v16 = vpop.f32.mrf.mxu1 }
  0xc2   :  { %v404_v18 = vadd.f32 %v9150_v41, %v403_v60  ;;  %v13048_v46 = vand.u32 4294901760, %v9274_v32 }
  0xc4   :  { %v9260_v26 = vpop.f32.mrf.mxu0  ;;  %1256 = vmatmul.f32.gmra.mxu1 %v9188_v22  ;;  %v9264_v17 = vadd.f32 %v548_v55, %v404_v18  ;;  %v1002_v55 = vld [vmem:[%s13043_s2 + $0x38] sm:$0xff]  ;;  %v1125_v3 = vsub.f32 %v9274_v32, %v13048_v46 }
  0xc5   :  { %951 = vmatmul.f32.gmra.mxu3 %v8972_v34  ;;  %v1036_v18 = vsel %vm55_vm0, %v1002_v55, 0 }
  0xc6   :  { %866 = vmatmul.f32.gmra.mxu2 %v8972_v34  ;;  %v9281_v34 = vand.u32 4294901760, %v1033_v39  ;;  %v1126_v31 = vand.u32 4294901760, %v1125_v3 }
  0xc7   :  { %1111 = vmatmul.f32.gmra.mxu0 %v1110_v9 }
  0xc8   :  { %v552_v14 = vpop.f32.mrf.mxu3  ;;  %13157 = vst [vmem:[#allocation9_spill] sm:$0xff] %v9281_v34  ;;  %v9297_v60 = vsub.f32 %v1033_v39, %v9281_v34 }
  0xc9   :  { %v411_v2 = vpop.f32.mrf.mxu2  ;;  %v9277_v7 = vpop.f32.mrf.mxu1 }
  0xca   :  { %v412_v45 = vadd.f32 %v9150_v41, %v411_v2  ;;  %v13052_v2 = vand.u32 4294901760, %v9297_v60 }
  0xcc   :  { %v9283_v51 = vpop.f32.mrf.mxu0  ;;  %1260 = vmatmul.f32.gmra.mxu1 %v9212_v15  ;;  %v9287_v59 = vadd.f32 %v552_v14, %v412_v45  ;;  %v1133_v3 = vsub.f32 %v9297_v60, %v13052_v2 }
  0xcd   :  { %955 = vmatmul.f32.gmra.mxu3 %v8983_v40 }
  0xce   :  { %870 = vmatmul.f32.gmra.mxu2 %v8983_v40  ;;  %v9304_v40 = vand.u32 4294901760, %v1036_v18  ;;  %v1134_v61 = vand.u32 4294901760, %v1133_v3 }
  0xcf   :  { %1119 = vmatmul.f32.gmra.mxu0 %v1118_v33  ;;  %v1003_v33 = vld [vmem:[%s13043_s2 + $0x40] sm:$0xff] }
  0xd0   :  { %v556_v12 = vpop.f32.mrf.mxu3  ;;  %13158 = vst [vmem:[#allocation10_spill] sm:$0xff] %v9304_v40  ;;  %v1039_v46 = vsel %vm55_vm0, %v1003_v33, 0  ;;  %v1004_v33 = vld [vmem:[%s13043_s2 + $0x48] sm:$0xff] }
  0xd1   :  { %v419_v9 = vpop.f32.mrf.mxu2  ;;  %v9300_v6 = vpop.f32.mrf.mxu1  ;;  %v1042_v0 = vsel %vm55_vm0, %v1004_v33, 0  ;;  %v1005_v33 = vld [vmem:[%s13043_s2 + $0x50] sm:$0xff] }
  0xd2   :  { %v420_v14 = vadd.f32 %v9150_v41, %v419_v9  ;;  %v9320_v9 = vsub.f32 %v1036_v18, %v9304_v40  ;;  %v1045_v53 = vsel %vm55_vm0, %v1005_v33, 0  ;;  %v1006_v33 = vld [vmem:[%s13043_s2 + $0x58] sm:$0xff] }
  0xd4   :  { %v9306_v45 = vpop.f32.mrf.mxu0  ;;  %1264 = vmatmul.f32.gmra.mxu1 %v9235_v20  ;;  %v9310_v39 = vadd.f32 %v556_v12, %v420_v14  ;;  %v13055_v19 = vand.u32 4294901760, %v9320_v9 }
  0xd5   :  { %959 = vmatmul.f32.gmra.mxu3 %v8991_v47 }
  0xd6   :  { %874 = vmatmul.f32.gmra.mxu2 %v8991_v47  ;;  %v9327_v47 = vand.u32 4294901760, %v1039_v46  ;;  %v1141_v3 = vsub.f32 %v9320_v9, %v13055_v19 }
  0xd7   :  { %1127 = vmatmul.f32.gmra.mxu0 %v1126_v31 }
  0xd8   :  { %v560_v55 = vpop.f32.mrf.mxu3  ;;  %13159 = vst [vmem:[#allocation11_spill] sm:$0xff] %v9327_v47  ;;  %v9343_v2 = vsub.f32 %v1039_v46, %v9327_v47  ;;  %v1142_v5 = vand.u32 4294901760, %v1141_v3 }
  0xd9   :  { %v427_v25 = vpop.f32.mrf.mxu2  ;;  %v9323_v12 = vpop.f32.mrf.mxu1 }
  0xda   :  { %v428_v14 = vadd.f32 %v9150_v41, %v427_v25  ;;  %13160 = vst [vmem:[#allocation12_spill] sm:$0xff] %v9343_v2  ;;  %v13060_v10 = vand.u32 4294901760, %v9343_v2 }
  0xdc   :  { %v9329_v31 = vpop.f32.mrf.mxu0  ;;  %1268 = vmatmul.f32.gmra.mxu1 %v9258_v27  ;;  %v9333_v18 = vadd.f32 %v560_v55, %v428_v14  ;;  %v1149_v3 = vsub.f32 %v9343_v2, %v13060_v10 }
  0xdd   :  { %963 = vmatmul.f32.gmra.mxu3 %v8999_v54 }
  0xde   :  { %878 = vmatmul.f32.gmra.mxu2 %v8999_v54  ;;  %v9350_v54 = vand.u32 4294901760, %v1042_v0 }
  0xdf   :  { %1135 = vmatmul.f32.gmra.mxu0 %v1134_v61 }
  0xe0   :  { %v564_v25 = vpop.f32.mrf.mxu3  ;;  %13161 = vst [vmem:[#allocation13_spill] sm:$0xff] %v9350_v54  ;;  %v9366_v19 = vsub.f32 %v1042_v0, %v9350_v54 }
  0xe1   :  { %v435_v63 = vpop.f32.mrf.mxu2  ;;  %v9346_v55 = vpop.f32.mrf.mxu1 }
  0xe2   :  { %v436_v14 = vadd.f32 %v9150_v41, %v435_v63  ;;  %13163 = vst [vmem:[#allocation15_spill] sm:$0xff] %v9366_v19  ;;  %v13065_v27 = vand.u32 4294901760, %v9366_v19 }
  0xe4   :  { %v9352_v61 = vpop.f32.mrf.mxu0  ;;  %1272 = vmatmul.f32.gmra.mxu1 %v9281_v34  ;;  %v9356_v46 = vadd.f32 %v564_v25, %v436_v14 }
  0xe5   :  { %967 = vmatmul.f32.gmra.mxu3 %v9012_v1 }
  0xe6   :  { %13162 = vst [vmem:[#allocation14_spill] sm:$0xff] %v9356_v46  ;;  %882 = vmatmul.f32.gmra.mxu2 %v9012_v1  ;;  %v1150_v46 = vand.u32 4294901760, %v1149_v3  ;;  %v9373_v1 = vand.u32 4294901760, %v1045_v53  ;;  %v1157_v3 = vsub.f32 %v9366_v19, %v13065_v27 }
  0xe7   :  { %1143 = vmatmul.f32.gmra.mxu0 %v1142_v5 }
  0xe8   :  { %v568_v63 = vpop.f32.mrf.mxu3  ;;  %13164 = vst [vmem:[#allocation16_spill] sm:$0xff] %v9373_v1  ;;  %v9389_v10 = vsub.f32 %v1045_v53, %v9373_v1 }
  0xe9   :  { %v443_v34 = vpop.f32.mrf.mxu2  ;;  %v9369_v25 = vpop.f32.mrf.mxu1 }
  0xea   :  { %v444_v14 = vadd.f32 %v9150_v41, %v443_v34  ;;  %13167 = vst [vmem:[#allocation19_spill] sm:$0xff] %v9389_v10  ;;  %v13070_v2 = vand.u32 4294901760, %v9389_v10 }
  0xec   :  { %v9375_v5 = vpop.f32.mrf.mxu0  ;;  %1276 = vmatmul.f32.gmra.mxu1 %v9304_v40  ;;  %v9379_v0 = vadd.f32 %v568_v63, %v444_v14 }
  0xed   :  { %13165 = vst [vmem:[#allocation17_spill] sm:$0xff] %v9375_v5  ;;  %971 = vmatmul.f32.gmra.mxu3 %v9030_v4  ;;  %v1048_v5 = vsel %vm55_vm0, %v1006_v33, 0  ;;  %v1007_v33 = vld [vmem:[%s13043_s2 + $0x60] sm:$0xff] }
  0xee   :  { %13166 = vst [vmem:[#allocation18_spill] sm:$0xff] %v9379_v0  ;;  %886 = vmatmul.f32.gmra.mxu2 %v9030_v4  ;;  %v1158_v0 = vand.u32 4294901760, %v1157_v3  ;;  %v9396_v4 = vand.u32 4294901760, %v1048_v5  ;;  %v1165_v3 = vsub.f32 %v9389_v10, %v13070_v2 }
  0xef   :  { %1151 = vmatmul.f32.gmra.mxu0 %v1150_v46 }
  0xf0   :  { %v572_v34 = vpop.f32.mrf.mxu3  ;;  %13168 = vst [vmem:[#allocation20_spill] sm:$0xff] %v9396_v4  ;;  %v9412_v27 = vsub.f32 %v1048_v5, %v9396_v4 }
  0xf1   :  { %v451_v40 = vpop.f32.mrf.mxu2  ;;  %v9392_v63 = vpop.f32.mrf.mxu1 }
  0xf2   :  { %v452_v14 = vadd.f32 %v9150_v41, %v451_v40  ;;  %v13075_v19 = vand.u32 4294901760, %v9412_v27 }
  0xf4   :  { %v9398_v46 = vpop.f32.mrf.mxu0  ;;  %1280 = vmatmul.f32.gmra.mxu1 %v9327_v47  ;;  %v9402_v53 = vadd.f32 %v572_v34, %v452_v14 }
  0xf5   :  { %13169 = vst [vmem:[#allocation21_spill] sm:$0xff] %v9398_v46  ;;  %975 = vmatmul.f32.gmra.mxu3 %v9038_v21  ;;  %v1051_v46 = vsel %vm55_vm0, %v1007_v33, 0  ;;  %v1008_v33 = vld [vmem:[%s13043_s2 + $0x68] sm:$0xff] }
  0xf6   :  { %13170 = vst [vmem:[#allocation22_spill] sm:$0xff] %v9402_v53  ;;  %890 = vmatmul.f32.gmra.mxu2 %v9038_v21  ;;  %v1166_v53 = vand.u32 4294901760, %v1165_v3  ;;  %v9419_v21 = vand.u32 4294901760, %v1051_v46  ;;  %v1173_v3 = vsub.f32 %v9412_v27, %v13075_v19 }
  0xf7   :  { %1159 = vmatmul.f32.gmra.mxu0 %v1158_v0 }
  0xf8   :  { %v576_v40 = vpop.f32.mrf.mxu3  ;;  %v9435_v2 = vsub.f32 %v1051_v46, %v9419_v21 }
  0xf9   :  { %v459_v47 = vpop.f32.mrf.mxu2  ;;  %v9415_v34 = vpop.f32.mrf.mxu1 }
  0xfa   :  { %v460_v14 = vadd.f32 %v9150_v41, %v459_v47  ;;  %v13078_v10 = vand.u32 4294901760, %v9435_v2 }
  0xfc   :  { %v9421_v0 = vpop.f32.mrf.mxu0  ;;  %1284 = vmatmul.f32.gmra.mxu1 %v9350_v54  ;;  %v9425_v5 = vadd.f32 %v576_v40, %v460_v14 }
  0xfd   :  { %13171 = vst [vmem:[#allocation23_spill] sm:$0xff] %v9421_v0  ;;  %979 = vmatmul.f32.gmra.mxu3 %v9049_v30  ;;  %v1054_v0 = vsel %vm55_vm0, %v1008_v33, 0  ;;  %v1009_v33 = vld [vmem:[%s13043_s2 + $0x70] sm:$0xff] }
  0xfe   :  { %13172 = vst [vmem:[#allocation24_spill] sm:$0xff] %v9425_v5  ;;  %894 = vmatmul.f32.gmra.mxu2 %v9049_v30  ;;  %v1174_v5 = vand.u32 4294901760, %v1173_v3  ;;  %v9442_v30 = vand.u32 4294901760, %v1054_v0  ;;  %v1181_v3 = vsub.f32 %v9435_v2, %v13078_v10 }
  0xff   :  { %1167 = vmatmul.f32.gmra.mxu0 %v1166_v53 }
 0x100   :  { %v580_v47 = vpop.f32.mrf.mxu3  ;;  %v9458_v19 = vsub.f32 %v1054_v0, %v9442_v30 }
 0x101   :  { %v467_v54 = vpop.f32.mrf.mxu2  ;;  %v9438_v40 = vpop.f32.mrf.mxu1 }
 0x102   :  { %13173 = vst [vmem:[#allocation25_spill] sm:$0xff] %v9438_v40  ;;  %v468_v14 = vadd.f32 %v9150_v41, %v467_v54  ;;  %v1057_v40 = vsel %vm55_vm0, %v1009_v33, 0  ;;  %v1010_v33 = vld [vmem:[%s13043_s2 + $0x78] sm:$0xff]  ;;  %s8735_s2 = smov 120  }
 0x103   :  { %13176 = vst [vmem:[#allocation28_spill] sm:$0xff] %v9458_v19 }
 0x104   :  { %v9444_v53 = vpop.f32.mrf.mxu0  ;;  %1288 = vmatmul.f32.gmra.mxu1 %v9373_v1  ;;  %v9448_v46 = vadd.f32 %v580_v47, %v468_v14  ;;  %v13081_v1 = vand.u32 4294901760, %v9458_v19 }
 0x105   :  { %13174 = vst [vmem:[#allocation26_spill] sm:$0xff] %v9444_v53  ;;  %983 = vmatmul.f32.gmra.mxu3 %v9061_v37 }
 0x106   :  { %13175 = vst [vmem:[#allocation27_spill] sm:$0xff] %v9448_v46  ;;  %898 = vmatmul.f32.gmra.mxu2 %v9061_v37  ;;  %v1182_v46 = vand.u32 4294901760, %v1181_v3  ;;  %v9465_v37 = vand.u32 4294901760, %v1057_v40  ;;  %v1189_v3 = vsub.f32 %v9458_v19, %v13081_v1 }
 0x107   :  { %1175 = vmatmul.f32.gmra.mxu0 %v1174_v5 }
 0x108   :  { %v584_v54 = vpop.f32.mrf.mxu3  ;;  %v9481_v10 = vsub.f32 %v1057_v40, %v9465_v37 }
 0x109   :  { %v475_v53 = vpop.f32.mrf.mxu2  ;;  %v9461_v47 = vpop.f32.mrf.mxu1 }
 0x10a   :  { %13177 = vst [vmem:[#allocation29_spill] sm:$0xff] %v9461_v47  ;;  %v476_v14 = vadd.f32 %v9150_v41, %v475_v53  ;;  %v1060_v47 = vsel %vm55_vm0, %v1010_v33, 0 }
 0x10c   :  { %v9467_v5 = vpop.f32.mrf.mxu0  ;;  %1292 = vmatmul.f32.gmra.mxu1 %v9396_v4  ;;  %v9471_v0 = vadd.f32 %v584_v54, %v476_v14  ;;  %v13084_v4 = vand.u32 4294901760, %v9481_v10 }
 0x10d   :  { %13178 = vst [vmem:[#allocation30_spill] sm:$0xff] %v9467_v5  ;;  %987 = vmatmul.f32.gmra.mxu3 %v9083_v50 }
 0x10e   :  { %13179 = vst [vmem:[#allocation31_spill] sm:$0xff] %v9471_v0  ;;  %902 = vmatmul.f32.gmra.mxu2 %v9083_v50  ;;  %v1190_v0 = vand.u32 4294901760, %v1189_v3  ;;  %v9488_v50 = vand.u32 4294901760, %v1060_v47 }
 0x10f   :  { %1183 = vmatmul.f32.gmra.mxu0 %v1182_v46 }
 0x110   :  { %v588_v53 = vpop.f32.mrf.mxu3  ;;  %v9501_v3 = vsub.f32 %v1060_v47, %v9488_v50 }
 0x111   :  { %v483_v5 = vpop.f32.mrf.mxu2  ;;  %v9484_v54 = vpop.f32.mrf.mxu1 }
 0x112   :  { %13180 = vst [vmem:[#allocation32_spill] sm:$0xff] %v9484_v54  ;;  %v484_v14 = vadd.f32 %v9150_v41, %v483_v5  ;;  %v1197_v5 = vsub.f32 %v9481_v10, %v13084_v4 }
 0x114   :  { %v9490_v46 = vpop.f32.mrf.mxu0  ;;  %1296 = vmatmul.f32.gmra.mxu1 %v9419_v21  ;;  %v9494_v40 = vadd.f32 %v588_v53, %v484_v14  ;;  %v1198_v19 = vand.u32 4294901760, %v1197_v5  ;;  %v13085_v53 = vand.u32 4294901760, %v9501_v3 }
 0x115   :  { %13181 = vst [vmem:[#allocation33_spill] sm:$0xff] %v9490_v46  ;;  %991 = vmatmul.f32.gmra.mxu3 %v9097_v62 }
 0x116   :  { %906 = vmatmul.f32.gmra.mxu2 %v9097_v62  ;;  %v13184_v62 = vand.u32 4294901760, %v9156_v49 }
 0x117   :  { %1191 = vmatmul.f32.gmra.mxu0 %v1190_v0 }
 0x118   :  { %v592_v33 = vpop.f32.mrf.mxu3 }
 0x119   :  { %v491_v1 = vpop.f32.mrf.mxu2  ;;  %v9503_v54 = vpop.f32.mrf.mxu1 }
 0x11a   :  { %13182 = vst [vmem:[#allocation34_spill] sm:$0xff] %v9503_v54  ;;  %v492_v46 = vadd.f32 %v9150_v41, %v491_v1  ;;  %v1205_v41 = vsub.f32 %v9501_v3, %v13085_v53 }
 0x11c   :  { %v9507_v14 = vpop.f32.mrf.mxu0  ;;  %1300 = vmatmul.f32.gmra.mxu1 %v9442_v30  ;;  %v9512_v0 = vadd.f32 %v592_v33, %v492_v46  ;;  %v1206_v4 = vand.u32 4294901760, %v1205_v41  ;;  %v13186_v46 = vand.u32 4294901760, %v9181_v57 }
 0x11d   :  { %13183 = vst [vmem:[#allocation35_spill] sm:$0xff] %v9507_v14  ;;  %1440 = vmatmul.f32.vlgmr.msrb.gmra.mxu3 %v13184_v62 }
 0x11e   :  { %1338 = vmatmul.f32.vlgmr.msrb.gmra.mxu2 %v9156_v49  ;;  %v628_v49 = vadd.f32 %v9214_v35, %v9195_v24 }
 0x11f   :  { %1199 = vmatmul.f32.gmra.mxu0 %v1198_v19 }
 0x120   :  { %v9515_v47 = vpop.f32.mrf.mxu3  ;;  %v731_v33 = vadd.f32 %v9231_v36, %v628_v49 }
 0x121   :  { %v9520_v1 = vpop.f32.mrf.mxu1  ;;  %v9522_v5 = vpop.f32.mrf.mxu2 }
 0x122   :  { %13185 = vst [vmem:[#allocation36_spill] sm:$0xff] %v9520_v1 }
 0x124   :  { %v9524_v54 = vpop.f32.mrf.mxu0  ;;  %1304 = vmatmul.f32.gmra.mxu1 %v9465_v37 }
 0x125   :  { %1446 = vmatmul.f32.gmra.mxu3 %v13186_v46  ;;  %v13188_v46 = vand.u32 4294901760, %v9205_v28 }
 0x126   :  { %1343 = vmatmul.f32.gmra.mxu2 %v9181_v57 }
 0x127   :  { %1207 = vmatmul.f32.gmra.mxu0 %v1206_v4  ;;  %v13191_v4 = vand.u32 4294901760, %v9228_v44 }
 0x128   :  { %v936_v19 = vpop.f32.mrf.mxu3 }
 0x129   :  { %v9533_v62 = vpop.f32.mrf.mxu1  ;;  %v851_v53 = vpop.f32.mrf.mxu2 }
 0x12a   :  { %v852_v41 = vadd.f32 %v851_v53, %v731_v33  ;;  %v638_v53 = vadd.f32 %v9260_v26, %v9241_v56  ;;  %v13194_v56 = vand.u32 4294901760, %v9251_v13 }
 0x12c   :  { %v9535_v1 = vadd.f32 %v936_v19, %v852_v41  ;;  %v9537_v14 = vpop.f32.mrf.mxu0  ;;  %1308 = vmatmul.f32.gmra.mxu1 %v9488_v50  ;;  %v743_v49 = vadd.f32 %v9277_v7, %v638_v53 }
 0x12d   :  { %13187 = vst [vmem:[#allocation37_spill] sm:$0xff] %v9537_v14  ;;  %1452 = vmatmul.f32.gmra.mxu3 %v13188_v46  ;;  %v633_v46 = vadd.f32 %v9237_v43, %v9218_v38 }
 0x12e   :  { %1348 = vmatmul.f32.gmra.mxu2 %v9205_v28 }
 0x12f   :  { %1563 = vmatmul.f32.vlgmr.msra.gmra.mxu0 %v9136_v48 }
 0x130   :  { %v940_v57 = vpop.f32.mrf.mxu3 }
 0x131   :  { %v855_v24 = vpop.f32.mrf.mxu2  ;;  %v9544_v35 = vpop.f32.mrf.mxu1 }
 0x132   :  { %13189 = vst [vmem:[#allocation38_spill] sm:$0xff] %v9544_v35 }
 0x134   :  { %v9546_v36 = vpop.f32.mrf.mxu0  ;;  %1648 = vmatmul.f32.vlgmr.msra.gmra.mxu1 %v9136_v48 }
 0x135   :  { %13190 = vst [vmem:[#allocation39_spill] sm:$0xff] %v9546_v36  ;;  %1458 = vmatmul.f32.gmra.mxu3 %v13191_v4 }
 0x136   :  { %1353 = vmatmul.f32.gmra.mxu2 %v9228_v44  ;;  %v737_v44 = vadd.f32 %v9254_v16, %v633_v46 }
 0x137   :  { %1567 = vmatmul.f32.gmra.mxu0 %v9163_v8 }
 0x138   :  { %v944_v28 = vpop.f32.mrf.mxu3  ;;  %v856_v43 = vadd.f32 %v855_v24, %v737_v44 }
 0x139   :  { %v859_v19 = vpop.f32.mrf.mxu2  ;;  %v9556_v33 = vpop.f32.mrf.mxu1 }
 0x13a   :  { %13192 = vst [vmem:[#allocation40_spill] sm:$0xff] %v9556_v33  ;;  %v860_v41 = vadd.f32 %v859_v19, %v743_v49  ;;  %v9574_v53 = vadd.f32 %v940_v57, %v856_v43  ;;  %v13204_v43 = vld [vmem:[#allocation8_spill] sm:$0xff] }
 0x13c   :  { %v9560_v4 = vadd.f32 %v944_v28, %v860_v41  ;;  %v9562_v48 = vpop.f32.mrf.mxu0  ;;  %1652 = vmatmul.f32.gmra.mxu1 %v9163_v8  ;;  %v13197_v8 = vand.u32 4294901760, %v9274_v32  ;;  %v13200_v41 = vand.u32 4294901760, %v9297_v60 }
 0x13d   :  { %13193 = vst [vmem:[#allocation41_spill] sm:$0xff] %v9562_v48  ;;  %1464 = vmatmul.f32.gmra.mxu3 %v13194_v56 }
 0x13e   :  { %1358 = vmatmul.f32.gmra.mxu2 %v9251_v13  ;;  %1988 = vrot.lane.b32.xlu2 %v9560_v4, %s8735_s2  ;;  %v648_v13 = vadd.f32 %v9306_v45, %v9287_v59  ;;  %v643_v59 = vadd.f32 %v9283_v51, %v9264_v17 }
 0x13f   :  { %1571 = vmatmul.f32.gmra.mxu0 %v9188_v22 }
 0x140   :  { %v948_v38 = vpop.f32.mrf.mxu3  ;;  %v755_v57 = vadd.f32 %v9323_v12, %v648_v13  ;;  %v749_v46 = vadd.f32 %v9300_v6, %v643_v59  ;;  %v13207_v13 = vld [vmem:[#allocation12_spill] sm:$0xff] }
 0x141   :  { %v863_v26 = vpop.f32.mrf.mxu2  ;;  %v9572_v7 = vpop.f32.mrf.mxu1 }
 0x142   :  { %13195 = vst [vmem:[#allocation42_spill] sm:$0xff] %v9572_v7 }
 0x144   :  { %v9576_v28 = vpop.f32.mrf.mxu0  ;;  %1656 = vmatmul.f32.gmra.mxu1 %v9188_v22  ;;  %v243_v22 = vadd.f32 %v9138_v52, %v9130_v42  ;;  %v653_v42 = vadd.f32 %v9329_v31, %v9310_v39  ;;  %v623_v31 = vadd.f32 %v9190_v23, %v9170_v11 }
 0x145   :  { %13196 = vst [vmem:[#allocation43_spill] sm:$0xff] %v9576_v28  ;;  %1470 = vmatmul.f32.gmra.mxu3 %v13197_v8 }
 0x146   :  { %1363 = vmatmul.f32.gmra.mxu2 %v9274_v32  ;;  %1986 = vrot.lane.b32.xlu2 %v9574_v53, %s8735_s2  ;;  %v9602_v12 = vadd.f32 %v9159_v58, %v243_v22  ;;  %v864_v58 = vadd.f32 %v863_v26, %v749_v46 }
 0x147   :  { %1575 = vmatmul.f32.gmra.mxu0 %v9212_v15 }
 0x148   :  { %v952_v16 = vpop.f32.mrf.mxu3  ;;  %v9616_v56 = vadd.f32 %v948_v38, %v864_v58  ;;  %v725_v38 = vadd.f32 %v9208_v29, %v623_v31 }
 0x149   :  { %v867_v24 = vpop.f32.mrf.mxu2  ;;  %v9588_v49 = vpop.f32.mrf.mxu1 }
 0x14a   :  { %13198 = vst [vmem:[#allocation44_spill] sm:$0xff] %v9588_v49  ;;  %v868_v19 = vadd.f32 %v867_v24, %v755_v57  ;;  %v848_v23 = vadd.f32 %v9522_v5, %v725_v38  ;;  %v13209_v24 = vld [vmem:[#allocation14_spill] sm:$0xff] }
 0x14c   :  { %v9594_v45 = vadd.f32 %v952_v16, %v868_v19  ;;  %v9596_v32 = vpop.f32.mrf.mxu0  ;;  %1660 = vmatmul.f32.gmra.mxu1 %v9212_v15  ;;  %v761_v15 = vadd.f32 %v9346_v55, %v653_v42  ;;  %v658_v55 = vadd.f32 %v9352_v61, %v9333_v18  ;;  %v13208_v16 = vand.u32 4294901760, %v13207_v13  ;;  %v13210_v19 = vld [vmem:[#allocation17_spill] sm:$0xff] }
 0x14d   :  { %13199 = vst [vmem:[#allocation45_spill] sm:$0xff] %v9596_v32  ;;  %1476 = vmatmul.f32.gmra.mxu3 %v13200_v41  ;;  %v663_v22 = vadd.f32 %v13210_v19, %v13209_v24  ;;  %v13211_v41 = vld [vmem:[#allocation9_spill] sm:$0xff]  ;;  %v13219_v19 = vld [vmem:[#allocation10_spill] sm:$0xff] }
 0x14e   :  { %1368 = vmatmul.f32.gmra.mxu2 %v9297_v60  ;;  %1992 = vrot.lane.b32.xlu1 %v9594_v45, %s8735_s2  ;;  %v13203_v60 = vand.u32 4294901760, %v9320_v9  ;;  %v767_v11 = vadd.f32 %v9369_v25, %v658_v55  ;;  %v9652_v25 = vadd.f32 %v9515_v47, %v848_v23  ;;  %v1733_v5 = vsel %vm1713_vm1, %v9594_v45, 0 }
 0x14f   :  { %1579 = vmatmul.f32.gmra.mxu0 %v9235_v20  ;;  %1980 = vrot.lane.b32.xlu2 %v9602_v12, %s8735_s2  ;;  %v773_v42 = vadd.f32 %v9392_v63, %v663_v22  ;;  %v1730_v63 = vsel %vm1713_vm1, %v9616_v56, 0  ;;  %v1727_v55 = vsel %vm1713_vm1, %v9560_v4, 0 }
 0x150   :  { %v956_v52 = vpop.f32.mrf.mxu3 }
 0x151   :  { %v871_v17 = vpop.f32.mrf.mxu2  ;;  %v9614_v51 = vpop.f32.mrf.mxu1 }
 0x152   :  { %13201 = vst [vmem:[#allocation46_spill] sm:$0xff] %v9614_v51  ;;  %v872_v6 = vadd.f32 %v871_v17, %v761_v15  ;;  %v9674_v15 = vand.u32 4294901760, %v1733_v5 }
 0x154   :  { %v9618_v39 = vpop.f32.mrf.mxu0  ;;  %1664 = vmatmul.f32.gmra.mxu1 %v9235_v20  ;;  %v9625_v44 = vadd.f32 %v956_v52, %v872_v6  ;;  %v9697_v23 = vsub.f32 %v1733_v5, %v9674_v15 }
 0x155   :  { %13202 = vst [vmem:[#allocation47_spill] sm:$0xff] %v9618_v39  ;;  %1482 = vmatmul.f32.gmra.mxu3 %v13203_v60 }
 0x156   :  { %1373 = vmatmul.f32.gmra.mxu2 %v9320_v9  ;;  %1990 = vrot.lane.b32.xlu1 %v9616_v56, %s8735_s2  ;;  %v1736_v9 = vsel %vm1713_vm1, %v9625_v44, 0 }
 0x157   :  { %1583 = vmatmul.f32.gmra.mxu0 %v13204_v43  ;;  %2267 = vrot.lane.b32.xlu2 %v9594_v45, %s8736_s15  ;;  %v9649_v57 = vand.u32 4294901760, %v1736_v9 }
 0x158   :  { %v960_v20 = vpop.f32.mrf.mxu3 }
 0x159   :  { %v875_v18 = vpop.f32.mrf.mxu2  ;;  %v9638_v61 = vpop.f32.mrf.mxu1  ;;  %v9672_v52 = vsub.f32 %v1736_v9, %v9649_v57 }
 0x15a   :  { %13205 = vst [vmem:[#allocation8_spill] sm:$0xff] %v9638_v61  ;;  %v876_v26 = vadd.f32 %v875_v18, %v767_v11  ;;  %v9699_v18 = vand.u32 4294901760, %v1730_v63 }
 0x15b   :  { %v13086_v9 = vand.u32 4294901760, %v9672_v52  ;;  %v13242_v51 = vand.u32 4294901760, %v9672_v52 }
 0x15c   :  { %v9642_v29 = vadd.f32 %v960_v20, %v876_v26  ;;  %v9644_v8 = vpop.f32.mrf.mxu0  ;;  %1668 = vmatmul.f32.gmra.mxu1 %v13204_v43  ;;  %v13215_v20 = vld [vmem:[#allocation15_spill] sm:$0xff]  ;;  %v13217_v26 = vld [vmem:[#allocation18_spill] sm:$0xff] }
 0x15d   :  { %13206 = vst [vmem:[#allocation48_spill] sm:$0xff] %v9644_v8  ;;  %1488 = vmatmul.f32.gmra.mxu3 %v13208_v16  ;;  %v13216_v11 = vand.u32 4294901760, %v13215_v20 }
 0x15e   :  { %1378 = vmatmul.f32.gmra.mxu2 %v13207_v13  ;;  %1996 = vrot.lane.b32.xlu0 %v9642_v29, %s8735_s2  ;;  %v1739_v59 = vsel %vm1713_vm1, %v9642_v29, 0  ;;  %v13218_v13 = vld [vmem:[#allocation21_spill] sm:$0xff] }
 0x15f   :  { %1587 = vmatmul.f32.gmra.mxu0 %v13211_v41  ;;  %1982 = vrot.lane.b32.xlu1 %v9652_v25, %s8735_s2  ;;  %v9666_v46 = vand.u32 4294901760, %v1739_v59  ;;  %v668_v16 = vadd.f32 %v13218_v13, %v13217_v26 }
 0x160   :  { %v964_v47 = vpop.f32.mrf.mxu3  ;;  %2261 = vrot.lane.b32.xlu2 %v9574_v53, %s8736_s15 }
 0x161   :  { %v879_v58 = vpop.f32.mrf.mxu2  ;;  %v9676_v17 = vpop.f32.mrf.mxu1  ;;  %1750 = vmatpush.xpose.msra.mxu2 %v9666_v46  ;;  %1882 = vmatpush.xpose.msrb.mxu1 %v9666_v46  ;;  %v9681_v6 = vsub.f32 %v1739_v59, %v9666_v46  ;;  %v779_v5 = vadd.f32 %v9415_v34, %v668_v16  ;;  %v9725_v34 = vsub.f32 %v1730_v63, %v9699_v18  ;;  %v1721_v63 = vsel %vm1713_vm1, %v9535_v1, 0 }
 0x162   :  { %13212 = vst [vmem:[#allocation12_spill] sm:$0xff] %v9676_v17  ;;  %v880_v60 = vadd.f32 %v879_v58, %v773_v42  ;;  %v13088_v42 = vand.u32 4294901760, %v9697_v23  ;;  %v1724_v58 = vsel %vm1713_vm1, %v9574_v53, 0 }
 0x163   :  { %1845 = vmatpush.xpose.msrb.mxu0 %v9681_v6  ;;  %v13087_v31 = vand.u32 4294901760, %v9681_v6  ;;  %v9737_v13 = vand.u32 4294901760, %v1724_v58 }
 0x164   :  { %v9689_v38 = vadd.f32 %v964_v47, %v880_v60  ;;  %v9691_v43 = vpop.f32.mrf.mxu0  ;;  %1672 = vmatmul.f32.gmra.mxu1 %v13211_v41  ;;  %v9716_v41 = vand.u32 4294901760, %v1727_v55  ;;  %v1791_v47 = vsub.f32 %v9672_v52, %v13086_v9  ;;  %v13223_v9 = vld [vmem:[#allocation19_spill] sm:$0xff] }
 0x165   :  { %13214 = vst [vmem:[#allocation17_spill] sm:$0xff] %v9691_v43  ;;  %1494 = vmatmul.f32.gmra.mxu3 %v13216_v11  ;;  %1752 = vmatpush.xpose.msra.mxu2 %v9649_v57  ;;  %v1785_v24 = vsub.f32 %v9681_v6, %v13087_v31  ;;  %v13224_v31 = vand.u32 4294901760, %v13223_v9 }
 0x166   :  { %13213 = vst [vmem:[#allocation14_spill] sm:$0xff] %v9689_v38  ;;  %1884 = vmatpush.xpose.msrb.mxu1 %v9649_v57  ;;  %1383 = vmatmul.f32.gmra.mxu2 %v13215_v20  ;;  %v9735_v26 = vsub.f32 %v1727_v55, %v9716_v41  ;;  %v1797_v55 = vsub.f32 %v9697_v23, %v13088_v42 }
 0x167   :  { %1994 = vrot.lane.b32.xlu0 %v9625_v44, %s8735_s2  ;;  %1591 = vmatmul.f32.gmra.mxu0 %v13219_v19  ;;  %v1786_v59 = vand.u32 4294901760, %v1785_v24 }
 0x168   :  { %2269 = vrot.lane.b32.xlu1 %v9625_v44, %s8736_s15  ;;  %v968_v22 = vpop.f32.mrf.mxu3  ;;  %2257 = vrot.lane.b32.xlu2 %v9652_v25, %s8736_s15 }
 0x169   :  { %1848 = vmatpush.xpose.msrb.mxu0 %v9672_v52  ;;  %v883_v60 = vpop.f32.mrf.mxu2  ;;  %v9730_v20 = vpop.f32.mrf.mxu1  ;;  %1754 = vmatpush.xpose.msra.mxu2 %v9674_v15  ;;  %v1715_v52 = vsel %vm1713_vm1, %v9602_v12, 0 }
 0x16a   :  { %13220 = vst [vmem:[#allocation9_spill] sm:$0xff] %v9730_v20  ;;  %1787 = vmatpush.xpose.msra.mxu3 %v1786_v59  ;;  %v884_v11 = vadd.f32 %v883_v60, %v779_v5  ;;  %1886 = vmatpush.xpose.msrb.mxu1 %v9674_v15  ;;  %v1792_v5 = vand.u32 4294901760, %v1791_v47  ;;  %v13089_v59 = vand.u32 4294901760, %v9725_v34  ;;  %v1718_v47 = vsel %vm1713_vm1, %v9652_v25, 0 }
 0x16c   :  { %v9741_v16 = vadd.f32 %v968_v22, %v884_v11  ;;  %v9743_v24 = vpop.f32.mrf.mxu0  ;;  %1676 = vmatmul.f32.gmra.mxu1 %v13219_v19  ;;  %v13225_v22 = vld [vmem:[#allocation11_spill] sm:$0xff]  ;;  %v1798_v19 = vand.u32 4294901760, %v1797_v55  ;;  %v9771_v11 = vsub.f32 %v1724_v58, %v9737_v13  ;;  %v9781_v55 = vand.u32 4294901760, %v1718_v47 }
 0x16d   :  { %13222 = vst [vmem:[#allocation18_spill] sm:$0xff] %v9743_v24  ;;  %1851 = vmatpush.xpose.msrb.mxu0 %v9697_v23  ;;  %1500 = vmatmul.f32.gmra.mxu3 %v13224_v31  ;;  %v9759_v31 = vand.u32 4294901760, %v1721_v63  ;;  %v13230_v58 = vand.u32 4294901760, %v9412_v27 }
 0x16e   :  { %13221 = vst [vmem:[#allocation15_spill] sm:$0xff] %v9741_v16  ;;  %1756 = vmatpush.xpose.msra.mxu2 %v9699_v18  ;;  %1793 = vmatpush.xpose.msra.mxu3 %v1792_v5  ;;  %v13090_v5 = vand.u32 4294901760, %v9735_v26 }
 0x16f   :  { %1888 = vmatpush.xpose.msrb.mxu1 %v9699_v18  ;;  %1388 = vmatmul.f32.gmra.mxu2 %v13223_v9  ;;  %v1803_v9 = vsub.f32 %v9725_v34, %v13089_v59  ;;  %v9791_v49 = vsub.f32 %v1721_v63, %v9759_v31 }
 0x170   :  { %1595 = vmatmul.f32.gmra.mxu0 %v13225_v22  ;;  %v9757_v60 = vpop.f32.mrf.mxu3  ;;  %1984 = vrot.lane.b32.xlu0 %v9535_v1, %s8735_s2  ;;  %v1809_v7 = vsub.f32 %v9735_v26, %v13090_v5 }
 0x171   :  { %13226 = vst [vmem:[#allocation21_spill] sm:$0xff] %v9757_v60  ;;  %2263 = vrot.lane.b32.xlu1 %v9560_v4, %s8736_s15  ;;  %1854 = vmatpush.xpose.msrb.mxu0 %v9725_v34  ;;  %v9775_v42 = vpop.f32.mrf.mxu2  ;;  %v9777_v24 = vpop.f32.mrf.mxu1  ;;  %v1804_v59 = vand.u32 4294901760, %v1803_v9  ;;  %v13232_v9 = vld [vmem:[#allocation13_spill] sm:$0xff] }
 0x172   :  { %13227 = vst [vmem:[#allocation10_spill] sm:$0xff] %v9775_v42  ;;  %1758 = vmatpush.xpose.msra.mxu2 %v9716_v41  ;;  %1799 = vmatpush.xpose.msra.mxu3 %v1798_v19  ;;  %v1810_v63 = vand.u32 4294901760, %v1809_v7 }
 0x173   :  { %13228 = vst [vmem:[#allocation19_spill] sm:$0xff] %v9777_v24  ;;  %1890 = vmatpush.xpose.msrb.mxu1 %v9716_v41  ;;  %v13091_v24 = vand.u32 4294901760, %v9771_v11 }
 0x174   :  { %v9783_v33 = vpop.f32.mrf.mxu0  ;;  %1680 = vmatmul.f32.gmra.mxu1 %v13225_v22  ;;  %v9808_v22 = vsub.f32 %v1718_v47, %v9781_v55 }
 0x175   :  { %13229 = vst [vmem:[#allocation11_spill] sm:$0xff] %v9783_v33  ;;  %1506 = vmatmul.f32.gmra.mxu3 %v13230_v58  ;;  %1857 = vmatpush.xpose.msrb.mxu0 %v9735_v26  ;;  %v1815_v58 = vsub.f32 %v9771_v11, %v13091_v24  ;;  %v13235_v24 = vand.u32 4294901760, %v9435_v2 }
 0x176   :  { %1760 = vmatpush.xpose.msra.mxu2 %v9737_v13  ;;  %1805 = vmatpush.xpose.msra.mxu3 %v1804_v59  ;;  %v13092_v59 = vand.u32 4294901760, %v9791_v49  ;;  %v1826_v36 = vand.u32 4294901760, %v9808_v22 }
 0x177   :  { %1892 = vmatpush.xpose.msrb.mxu1 %v9737_v13  ;;  %1393 = vmatmul.f32.gmra.mxu2 %v9412_v27  ;;  %v1816_v47 = vand.u32 4294901760, %v1815_v58 }
 0x178   :  { %v9799_v19 = vpop.f32.mrf.mxu3  ;;  %1599 = vmatmul.f32.gmra.mxu0 %v13232_v9  ;;  %2271 = vrot.lane.b32.xlu0 %v9642_v29, %s8736_s15  ;;  %v1821_v33 = vsub.f32 %v9791_v49, %v13092_v59  ;;  %v1827_v59 = vsub.f32 %v9808_v22, %v1826_v36 }
 0x179   :  { %13231 = vst [vmem:[#allocation49_spill] sm:$0xff] %v9799_v19  ;;  %1860 = vmatpush.xpose.msrb.mxu0 %v9771_v11  ;;  %v9812_v27 = vpop.f32.mrf.mxu2  ;;  %v9814_v5 = vpop.f32.mrf.mxu1 }
 0x17a   :  { %13233 = vst [vmem:[#allocation13_spill] sm:$0xff] %v9814_v5  ;;  %1762 = vmatpush.xpose.msra.mxu2 %v9759_v31  ;;  %1811 = vmatpush.xpose.msra.mxu3 %v1810_v63  ;;  %v1822_v58 = vand.u32 4294901760, %v1821_v33  ;;  %v1828_v33 = vand.u32 4294901760, %v1827_v59 }
 0x17b   :  { %1894 = vmatpush.xpose.msrb.mxu1 %v9759_v31 }
 0x17c   :  { %v9818_v7 = vpop.f32.mrf.mxu0  ;;  %1684 = vmatmul.f32.gmra.mxu1 %v13232_v9  ;;  %v13237_v9 = vand.u32 4294901760, %v9681_v6 }
 0x17d   :  { %13234 = vst [vmem:[#allocation50_spill] sm:$0xff] %v9818_v7  ;;  %1512 = vmatmul.f32.gmra.mxu3 %v13235_v24  ;;  %1863 = vmatpush.xpose.msrb.mxu0 %v9791_v49  ;;  %v13236_v24 = vld [vmem:[#allocation16_spill] sm:$0xff] }
 0x17e   :  { %1764 = vmatpush.xpose.msra.mxu2 %v9781_v55  ;;  %1817 = vmatpush.xpose.msra.mxu3 %v1816_v47  ;;  %v13240_v7 = vld [vmem:[#allocation28_spill] sm:$0xff] }
 0x17f   :  { %1896 = vmatpush.xpose.msrb.mxu1 %v9781_v55  ;;  %1398 = vmatmul.f32.gmra.mxu2 %v9435_v2  ;;  %v13241_v35 = vand.u32 4294901760, %v13240_v7 }
 0x180   :  { %v9831_v63 = vpop.f32.mrf.mxu3  ;;  %1603 = vmatmul.f32.gmra.mxu0 %v13236_v24  ;;  %2265 = vrot.lane.b32.xlu0 %v9616_v56, %s8736_s15 }
 0x181   :  { %1866 = vmatpush.xpose.msrb.mxu0 %v9808_v22  ;;  %v9842_v47 = vpop.f32.mrf.mxu2  ;;  %v9844_v2 = vpop.f32.mrf.mxu1 }
 0x182   :  { %1915 = vmatpush.xpose.msrb.mxu2 %v13237_v9  ;;  %13238 = vst [vmem:[#allocation16_spill] sm:$0xff] %v9844_v2  ;;  %1823 = vmatpush.xpose.msra.mxu3 %v1822_v58  ;;  %v13243_v9 = vld [vmem:[#allocation20_spill] sm:$0xff]  ;;  %v13248_v58 = vand.u32 4294901760, %v9725_v34 }
 0x184   :  { %v9846_v5 = vpop.f32.mrf.mxu0  ;;  %1688 = vmatmul.f32.gmra.mxu1 %v13236_v24  ;;  %v1765_v24 = vand.u32 4294901760, %v1715_v52 }
 0x185   :  { %13239 = vst [vmem:[#allocation51_spill] sm:$0xff] %v9846_v5  ;;  %1518 = vmatmul.f32.gmra.mxu3 %v13241_v35  ;;  %v13244_v35 = vand.u32 4294901760, %v9697_v23 }
 0x186   :  { %1919 = vmatpush.xpose.msrb.mxu2 %v13242_v51  ;;  %1829 = vmatpush.xpose.msra.mxu3 %v1828_v33  ;;  %v13249_v33 = vand.u32 4294901760, %v9735_v26 }
 0x187   :  { %1403 = vmatmul.f32.gmra.mxu2 %v13240_v7  ;;  %v13247_v7 = vand.u32 4294901760, %v9481_v10 }
 0x188   :  { %v9855_v6 = vpop.f32.mrf.mxu3  ;;  %1607 = vmatmul.f32.gmra.mxu0 %v13243_v9  ;;  %2259 = vrot.lane.b32.xlu0 %v9535_v1, %s8736_s15 }
 0x189   :  { %v9862_v59 = vpop.f32.mrf.mxu2  ;;  %v9864_v51 = vpop.f32.mrf.mxu1 }
 0x18a   :  { %1958 = vmatpush.xpose.msrb.mxu3 %v9666_v46  ;;  %1923 = vmatpush.xpose.msrb.mxu2 %v13244_v35  ;;  %13245 = vst [vmem:[#allocation28_spill] sm:$0xff] %v9864_v51 }
 0x18c   :  { %v9869_v46 = vpop.f32.mrf.mxu0  ;;  %1692 = vmatmul.f32.gmra.mxu1 %v13243_v9  ;;  %v13253_v9 = vand.u32 4294901760, %v9771_v11 }
 0x18d   :  { %13246 = vst [vmem:[#allocation20_spill] sm:$0xff] %v9869_v46  ;;  %1524 = vmatmul.f32.gmra.mxu3 %v13247_v7 }
 0x18e   :  { %1960 = vmatpush.xpose.msrb.mxu3 %v9649_v57  ;;  %1927 = vmatpush.xpose.msrb.mxu2 %v13248_v58  ;;  %v1766_v57 = vsub.f32 %v1715_v52, %v1765_v24 }
 0x18f   :  { %1408 = vmatmul.f32.gmra.mxu2 %v9481_v10 }
 0x190   :  { %v9878_v23 = vpop.f32.mrf.mxu3  ;;  %1611 = vmatmul.f32.gmra.mxu0 %v9419_v21  ;;  %2255 = vrot.lane.b32.xlu0 %v9602_v12, %s8736_s15  ;;  %v1767_v52 = vand.u32 4294901760, %v1766_v57 }
 0x191   :  { %v9885_v35 = vpop.f32.mrf.mxu2  ;;  %v9887_v34 = vpop.f32.mrf.mxu1 }
 0x192   :  { %1962 = vmatpush.xpose.msrb.mxu3 %v9674_v15  ;;  %1931 = vmatpush.xpose.msrb.mxu2 %v13249_v33  ;;  %13250 = vst [vmem:[#allocation52_spill] sm:$0xff] %v9887_v34  ;;  %v13252_v15 = vand.u32 4294901760, %v9501_v3  ;;  %v1768_v11 = vsub.f32 %v1766_v57, %v1767_v52 }
 0x194   :  { %v9890_v10 = vpop.f32.mrf.mxu0  ;;  %1696 = vmatmul.f32.gmra.mxu1 %v9419_v21 }
 0x195   :  { %13251 = vst [vmem:[#allocation53_spill] sm:$0xff] %v9890_v10  ;;  %1530 = vmatmul.f32.gmra.mxu3 %v13252_v15 }
 0x196   :  { %1964 = vmatpush.xpose.msrb.mxu3 %v9699_v18  ;;  %1935 = vmatpush.xpose.msrb.mxu2 %v13253_v9  ;;  %v13254_v18 = vand.u32 4294901760, %v9791_v49 }
 0x197   :  { %1413 = vmatmul.f32.gmra.mxu2 %v9501_v3  ;;  %v1769_v3 = vand.u32 4294901760, %v1768_v11 }
 0x198   :  { %v9899_v26 = vpop.f32.mrf.mxu3  ;;  %1615 = vmatmul.f32.gmra.mxu0 %v9442_v30 }
 0x199   :  { %v9904_v7 = vpop.f32.mrf.mxu2  ;;  %v9906_v58 = vpop.f32.mrf.mxu1 }
 0x19a   :  { %1966 = vmatpush.xpose.msrb.mxu3 %v9716_v41  ;;  %1939 = vmatpush.xpose.msrb.mxu2 %v13254_v18  ;;  %13255 = vst [vmem:[#allocation54_spill] sm:$0xff] %v9906_v58  ;;  %v1989_v58 = vpop.permute.xlu2 %1988 }
 0x19c   :  { %v9909_v21 = vpop.f32.mrf.mxu0  ;;  %1700 = vmatmul.f32.gmra.mxu1 %v9442_v30 }
 0x19d   :  { %13256 = vst [vmem:[#allocation55_spill] sm:$0xff] %v9909_v21  ;;  %1831 = vmatmul.f32.vlgmr.msra.gmra.mxu3 %v1765_v24 }
 0x19e   :  { %1968 = vmatpush.xpose.msrb.mxu3 %v9737_v13  ;;  %1943 = vmatpush.xpose.msrb.mxu2 %v1826_v36 }
 0x19f   :  { %1770 = vmatmul.f32.vlgmr.msra.gmra.mxu2 %v1769_v3 }
 0x1a0   :  { %v9915_v49 = vpop.f32.mrf.mxu3  ;;  %1619 = vmatmul.f32.gmra.mxu0 %v9465_v37 }
 0x1a1   :  { %13257 = vst [vmem:[#allocation56_spill] sm:$0xff] %v9915_v49  ;;  %v9918_v41 = vpop.f32.mrf.mxu1  ;;  %v9920_v33 = vpop.f32.mrf.mxu2 }
 0x1a2   :  { %1970 = vmatpush.xpose.msrb.mxu3 %v9759_v31  ;;  %13258 = vst [vmem:[#allocation57_spill] sm:$0xff] %v9918_v41 }
 0x1a3   :  { %13259 = vst [vmem:[#allocation58_spill] sm:$0xff] %v9920_v33 }
 0x1a4   :  { %v9923_v13 = vpop.f32.mrf.mxu0  ;;  %1704 = vmatmul.f32.gmra.mxu1 %v9465_v37 }
 0x1a5   :  { %13260 = vst [vmem:[#allocation59_spill] sm:$0xff] %v9923_v13  ;;  %v1987_v13 = vpop.permute.xlu2 %1986 }
 0x1a6   :  { %1972 = vmatpush.xpose.msrb.mxu3 %v9781_v55 }
 0x1a7   :  { %1945 = vmatmul.f32.vlgmr.msrb.gmra.mxu2 %v1765_v24 }
 0x1a8   :  { %v9926_v30 = vpop.f32.mrf.mxu3  ;;  %1623 = vmatmul.f32.gmra.mxu0 %v9488_v50 }
 0x1a9   :  { %1974 = vmatmul.f32.vlgmr.msrb.gmra.mxu3 %v1765_v24  ;;  %13261 = vst [vmem:[#allocation60_spill] sm:$0xff] %v9926_v30  ;;  %v9929_v36 = vpop.f32.mrf.mxu1  ;;  %v9931_v31 = vpop.f32.mrf.mxu2 }
 0x1aa   :  { %13262 = vst [vmem:[#allocation61_spill] sm:$0xff] %v9929_v36 }
 0x1ab   :  { %13263 = vst [vmem:[#allocation62_spill] sm:$0xff] %v9931_v31 }
 0x1ac   :  { %v9933_v22 = vpop.f32.mrf.mxu0  ;;  %1708 = vmatmul.f32.gmra.mxu1 %v9488_v50 }
 0x1ad   :  { %13264 = vst [vmem:[#allocation63_spill] sm:$0xff] %v9933_v22 }
 0x1b0   :  { %v9936_v15 = vpop.f32.mrf.mxu3  ;;  %1869 = vmatmul.f32.vlgmr.msrb.gmra.mxu0 %v1766_v57 }
 0x1b1   :  { %13265 = vst [vmem:[#allocation64_spill] sm:$0xff] %v9936_v15  ;;  %v9938_v55 = vpop.f32.mrf.mxu1  ;;  %v9940_v37 = vpop.f32.mrf.mxu2 }
 0x1b2   :  { %13266 = vst [vmem:[#allocation65_spill] sm:$0xff] %v9938_v55 }
 0x1b3   :  { %13267 = vst [vmem:[#allocation66_spill] sm:$0xff] %v9940_v37 }
 0x1b4   :  { %v9942_v24 = vpop.f32.mrf.mxu0  ;;  %1900 = vmatmul.f32.vlgmr.msrb.gmra.mxu1 %v1767_v52 }
 0x1b5   :  { %13268 = vst [vmem:[#allocation67_spill] sm:$0xff] %v9942_v24 }
 0x1b8   :  { %v9944_v9 = vpop.f32.mrf.mxu3 }
 0x1b9   :  { %13269 = vst [vmem:[#allocation68_spill] sm:$0xff] %v9944_v9  ;;  %v9946_v18 = vpop.f32.mrf.mxu1  ;;  %v9948_v11 = vpop.f32.mrf.mxu2 }
 0x1ba   :  { %13270 = vst [vmem:[#allocation69_spill] sm:$0xff] %v9946_v18 }
 0x1bb   :  { %13271 = vst [vmem:[#allocation70_spill] sm:$0xff] %v9948_v11 }
 0x1bc   :  { %v9950_v3 = vpop.f32.mrf.mxu0 }
 0x1bd   :  { %13272 = vst [vmem:[#allocation71_spill] sm:$0xff] %v9950_v3 }
 0x1c0   :  { %v9952_v2 = vpop.f32.mrf.mxu3  ;;  %v1993_v51 = vpop.permute.xlu1 %1992 }
 0x1c1   :  { %13273 = vst [vmem:[#allocation72_spill] sm:$0xff] %v9952_v2  ;;  %v9954_v50 = vpop.f32.mrf.mxu1  ;;  %v9956_v57 = vpop.f32.mrf.mxu2  ;;  %v2010_v24 = vsel %vm1713_vm1, %v1993_v51, 0 }
 0x1c2   :  { %13274 = vst [vmem:[#allocation73_spill] sm:$0xff] %v9954_v50  ;;  %v9985_v30 = vand.u32 4294901760, %v2010_v24 }
 0x1c3   :  { %13275 = vst [vmem:[#allocation74_spill] sm:$0xff] %v9956_v57 }
 0x1c4   :  { %v9958_v34 = vpop.f32.mrf.mxu0  ;;  %v10000_v31 = vsub.f32 %v2010_v24, %v9985_v30 }
 0x1c5   :  { %13276 = vst [vmem:[#allocation75_spill] sm:$0xff] %v9958_v34 }
 0x1c6   :  { %v13291_v57 = vand.u32 4294901760, %v10000_v31 }
 0x1c8   :  { %v9960_v5 = vpop.f32.mrf.mxu3  ;;  %v1991_v36 = vpop.permute.xlu1 %1990 }
 0x1c9   :  { %13277 = vst [vmem:[#allocation76_spill] sm:$0xff] %v9960_v5  ;;  %v9962_v52 = vpop.f32.mrf.mxu1  ;;  %v9964_v41 = vpop.f32.mrf.mxu2 }
 0x1ca   :  { %13278 = vst [vmem:[#allocation77_spill] sm:$0xff] %v9962_v52  ;;  %v1981_v5 = vpop.permute.xlu2 %1980 }
 0x1cb   :  { %13279 = vst [vmem:[#allocation78_spill] sm:$0xff] %v9964_v41  ;;  %v1998_v33 = vsel %vm1713_vm1, %v1981_v5, 0 }
 0x1cc   :  { %v9966_v46 = vpop.f32.mrf.mxu0  ;;  %v10050_v5 = vand.u32 4294901760, %v1998_v33 }
 0x1cd   :  { %13280 = vst [vmem:[#allocation79_spill] sm:$0xff] %v9966_v46  ;;  %v2006_v46 = vsel %vm1713_vm1, %v1989_v58, 0 }
 0x1ce   :  { %v10014_v58 = vand.u32 4294901760, %v2006_v46 }
 0x1d0   :  { %v9968_v10 = vpop.f32.mrf.mxu3  ;;  %v1997_v21 = vpop.permute.xlu0 %1996 }
 0x1d1   :  { %13281 = vst [vmem:[#allocation80_spill] sm:$0xff] %v9968_v10  ;;  %v2014_v55 = vsel %vm1713_vm1, %v1997_v21, 0  ;;  %v9971_v18 = vpop.f32.mrf.mxu1  ;;  %v9975_v50 = vpop.f32.mrf.mxu2 }
 0x1d2   :  { %13282 = vst [vmem:[#allocation81_spill] sm:$0xff] %v9971_v18  ;;  %v9973_v22 = vand.u32 4294901760, %v2014_v55  ;;  %v2008_v18 = vsel %vm1713_vm1, %v1991_v36, 0 }
 0x1d3   :  { %13283 = vst [vmem:[#allocation82_spill] sm:$0xff] %v9975_v50 }
 0x1d4   :  { %v9979_v52 = vsub.f32 %v2014_v55, %v9973_v22  ;;  %v9981_v3 = vpop.f32.mrf.mxu0  ;;  %2025 = vmatpush.xpose.msra.mxu0 %v9973_v22  ;;  %2157 = vmatpush.xpose.msra.mxu3 %v9973_v22  ;;  %v1983_v55 = vpop.permute.xlu1 %1982 }
 0x1d5   :  { %13284 = vst [vmem:[#allocation83_spill] sm:$0xff] %v9981_v3  ;;  %v10002_v3 = vand.u32 4294901760, %v2008_v18  ;;  %v2000_v50 = vsel %vm1713_vm1, %v1983_v55, 0 }
 0x1d6   :  { %v13093_v21 = vand.u32 4294901760, %v9979_v52  ;;  %2120 = vmatpush.xpose.msra.mxu2 %v9979_v52 }
 0x1d7   :  { %v10019_v24 = vsub.f32 %v2008_v18, %v10002_v3 }
 0x1d8   :  { %v9990_v34 = vpop.f32.mrf.mxu3  ;;  %v2060_v51 = vsub.f32 %v9979_v52, %v13093_v21 }
 0x1d9   :  { %13285 = vst [vmem:[#allocation84_spill] sm:$0xff] %v9990_v34  ;;  %v1995_v15 = vpop.permute.xlu0 %1994  ;;  %v9997_v49 = vpop.f32.mrf.mxu1 }
 0x1da   :  { %v2012_v9 = vsel %vm1713_vm1, %v1995_v15, 0  ;;  %13286 = vst [vmem:[#allocation85_spill] sm:$0xff] %v9997_v49  ;;  %v10006_v2 = vpop.f32.mrf.mxu2  ;;  %v2061_v37 = vand.u32 4294901760, %v2060_v51  ;;  %v2004_v15 = vsel %vm1713_vm1, %v1987_v13, 0 }
 0x1db   :  { %v10004_v36 = vand.u32 4294901760, %v2012_v9  ;;  %13287 = vst [vmem:[#allocation86_spill] sm:$0xff] %v10006_v2  ;;  %v10033_v13 = vand.u32 4294901760, %v2004_v15 }
 0x1dc   :  { %v10011_v11 = vpop.f32.mrf.mxu0  ;;  %2062 = vmatpush.xpose.msra.mxu1 %v2061_v37 }
 0x1dd   :  { %v10009_v21 = vsub.f32 %v2012_v9, %v10004_v36  ;;  %13288 = vst [vmem:[#allocation87_spill] sm:$0xff] %v10011_v11  ;;  %2027 = vmatpush.xpose.msra.mxu0 %v10004_v36  ;;  %2159 = vmatpush.xpose.msra.mxu3 %v10004_v36  ;;  %v10031_v11 = vsub.f32 %v2006_v46, %v10014_v58  ;;  %v2270_v9 = vpop.permute.xlu1 %2269 }
 0x1de   :  { %v10056_v46 = vsub.f32 %v2004_v15, %v10033_v13  ;;  %v10072_v15 = vsub.f32 %v1998_v33, %v10050_v5 }
 0x1df   :  { %2123 = vmatpush.xpose.msra.mxu2 %v10009_v21  ;;  %v13094_v51 = vand.u32 4294901760, %v10009_v21 }
 0x1e0   :  { %v10024_v49 = vpop.f32.mrf.mxu3 }
 0x1e1   :  { %13289 = vst [vmem:[#allocation88_spill] sm:$0xff] %v10024_v49  ;;  %2029 = vmatpush.xpose.msra.mxu0 %v9985_v30  ;;  %v2066_v37 = vsub.f32 %v10009_v21, %v13094_v51  ;;  %2161 = vmatpush.xpose.msra.mxu3 %v9985_v30  ;;  %v10036_v18 = vpop.f32.mrf.mxu1  ;;  %v2072_v51 = vsub.f32 %v10000_v31, %v13291_v57  ;;  %v13095_v57 = vand.u32 4294901760, %v10031_v11 }
 0x1e2   :  { %13290 = vst [vmem:[#allocation89_spill] sm:$0xff] %v10036_v18  ;;  %v1985_v10 = vpop.permute.xlu0 %1984  ;;  %v10045_v34 = vpop.f32.mrf.mxu2 }
 0x1e3   :  { %2126 = vmatpush.xpose.msra.mxu2 %v10000_v31  ;;  %v2067_v49 = vand.u32 4294901760, %v2066_v37  ;;  %v2002_v41 = vsel %vm1713_vm1, %v1985_v10, 0  ;;  %13292 = vst [vmem:[#allocation90_spill] sm:$0xff] %v10045_v34  ;;  %v2268_v18 = vpop.permute.xlu2 %2267  ;;  %v2287_v37 = vsel %vm1713_vm1, %v2270_v9, 0  ;;  %v2073_v34 = vand.u32 4294901760, %v2072_v51 }
 0x1e4   :  { %v10047_v48 = vpop.f32.mrf.mxu0  ;;  %v10058_v10 = vand.u32 4294901760, %v2002_v41  ;;  %v2285_v9 = vsel %vm1713_vm1, %v2268_v18, 0  ;;  %v10068_v28 = vand.u32 4294901760, %v2287_v37  ;;  %v10078_v51 = vand.u32 4294901760, %v2000_v50 }
 0x1e5   :  { %13293 = vst [vmem:[#allocation91_spill] sm:$0xff] %v10047_v48  ;;  %2031 = vmatpush.xpose.msra.mxu0 %v10002_v3  ;;  %2068 = vmatpush.xpose.msra.mxu1 %v2067_v49  ;;  %v13294_v48 = vand.u32 4294901760, %v10019_v24  ;;  %v10087_v14 = vand.u32 4294901760, %v2285_v9 }
 0x1e6   :  { %2163 = vmatpush.xpose.msra.mxu3 %v10002_v3  ;;  %v10081_v55 = vsub.f32 %v2002_v41, %v10058_v10 }
 0x1e7   :  { %2129 = vmatpush.xpose.msra.mxu2 %v10019_v24  ;;  %v2078_v49 = vsub.f32 %v10019_v24, %v13294_v48  ;;  %v2084_v48 = vsub.f32 %v10031_v11, %v13095_v57  ;;  %v10093_v57 = vsub.f32 %v2287_v37, %v10068_v28  ;;  %v13299_v37 = vand.u32 4294901760, %v10056_v46 }
 0x1e8   :  { %v10065_v61 = vpop.f32.mrf.mxu3  ;;  %v10114_v39 = vsub.f32 %v2285_v9, %v10087_v14 }
 0x1e9   :  { %13295 = vst [vmem:[#allocation92_spill] sm:$0xff] %v10065_v61  ;;  %2033 = vmatpush.xpose.msra.mxu0 %v10014_v58  ;;  %2074 = vmatpush.xpose.msra.mxu1 %v2073_v34  ;;  %v10083_v61 = vpop.f32.mrf.mxu1  ;;  %v2079_v34 = vand.u32 4294901760, %v2078_v49  ;;  %v2042_v49 = vand.u32 4294901760, %v10072_v15  ;;  %v2085_v33 = vand.u32 4294901760, %v2084_v48 }
 0x1ea   :  { %2165 = vmatpush.xpose.msra.mxu3 %v10014_v58  ;;  %v2272_v18 = vpop.permute.xlu0 %2271  ;;  %13296 = vst [vmem:[#allocation93_spill] sm:$0xff] %v10083_v61  ;;  %v10090_v32 = vpop.f32.mrf.mxu2  ;;  %v10103_v61 = vsub.f32 %v2000_v50, %v10078_v51 }
 0x1eb   :  { %2132 = vmatpush.xpose.msra.mxu2 %v10031_v11  ;;  %v2289_v17 = vsel %vm1713_vm1, %v2272_v18, 0  ;;  %13297 = vst [vmem:[#allocation94_spill] sm:$0xff] %v10090_v32  ;;  %v2264_v18 = vpop.permute.xlu1 %2263  ;;  %v2262_v20 = vpop.permute.xlu2 %2261  ;;  %v2043_v8 = vsub.f32 %v10072_v15, %v2042_v49 }
 0x1ec   :  { %v10095_v2 = vand.u32 4294901760, %v2289_v17  ;;  %v2281_v43 = vsel %vm1713_vm1, %v2264_v18, 0  ;;  %v2279_v18 = vsel %vm1713_vm1, %v2262_v20, 0 }
 0x1ed   :  { %v10097_v41 = vpop.f32.mrf.mxu0  ;;  %2035 = vmatpush.xpose.msra.mxu0 %v10033_v13  ;;  %2080 = vmatpush.xpose.msra.mxu1 %v2079_v34  ;;  %v10139_v19 = vand.u32 4294901760, %v2281_v43  ;;  %v2044_v42 = vand.u32 4294901760, %v2043_v8 }
 0x1ee   :  { %13298 = vst [vmem:[#allocation95_spill] sm:$0xff] %v10097_v41  ;;  %2167 = vmatpush.xpose.msra.mxu3 %v10033_v13  ;;  %v10106_v32 = vsub.f32 %v2289_v17, %v10095_v2  ;;  %v2090_v41 = vsub.f32 %v10056_v46, %v13299_v37 }
 0x1ef   :  { %2135 = vmatpush.xpose.msra.mxu2 %v10056_v46  ;;  %v10163_v8 = vsub.f32 %v2281_v43, %v10139_v19 }
 0x1f0   :  { %v10116_v48 = vpop.f32.mrf.mxu3  ;;  %v13098_v50 = vand.u32 4294901760, %v10106_v32 }
 0x1f1   :  { %13300 = vst [vmem:[#allocation96_spill] sm:$0xff] %v10116_v48  ;;  %2037 = vmatpush.xpose.msra.mxu0 %v10058_v10  ;;  %2086 = vmatpush.xpose.msra.mxu1 %v2085_v33  ;;  %v10127_v34 = vpop.f32.mrf.mxu1  ;;  %v2091_v48 = vand.u32 4294901760, %v2090_v41  ;;  %v13302_v33 = vand.u32 4294901760, %v10081_v55 }
 0x1f2   :  { %2169 = vmatpush.xpose.msra.mxu3 %v10058_v10  ;;  %v2335_v9 = vsub.f32 %v10106_v32, %v13098_v50  ;;  %v2266_v37 = vpop.permute.xlu0 %2265  ;;  %13301 = vst [vmem:[#allocation97_spill] sm:$0xff] %v10127_v34  ;;  %v10136_v60 = vpop.f32.mrf.mxu2 }
 0x1f3   :  { %2138 = vmatpush.xpose.msra.mxu2 %v10081_v55  ;;  %v2096_v17 = vsub.f32 %v10081_v55, %v13302_v33  ;;  %v2283_v16 = vsel %vm1713_vm1, %v2266_v37, 0  ;;  %13303 = vst [vmem:[#allocation98_spill] sm:$0xff] %v10136_v60  ;;  %v13304_v33 = vand.u32 4294901760, %v10093_v57  ;;  %v13306_v37 = vand.u32 4294901760, %v9979_v52 }
 0x1f4   :  { %v10141_v34 = vand.u32 4294901760, %v2283_v16  ;;  %v2336_v41 = vand.u32 4294901760, %v2335_v9  ;;  %v13307_v9 = vand.u32 4294901760, %v10103_v61  ;;  %v13308_v52 = vand.u32 4294901760, %v10114_v39 }
 0x1f5   :  { %2039 = vmatpush.xpose.msra.mxu0 %v10078_v51  ;;  %2092 = vmatpush.xpose.msra.mxu1 %v2091_v48  ;;  %v2341_v38 = vsub.f32 %v10093_v57, %v13304_v33  ;;  %v10147_v20 = vpop.f32.mrf.mxu0  ;;  %v2097_v48 = vand.u32 4294901760, %v2096_v17  ;;  %v10159_v33 = vand.u32 4294901760, %v2279_v18 }
 0x1f6   :  { %13305 = vst [vmem:[#allocation99_spill] sm:$0xff] %v10147_v20  ;;  %2171 = vmatpush.xpose.msra.mxu3 %v10078_v51  ;;  %v10153_v50 = vsub.f32 %v2283_v16, %v10141_v34  ;;  %v2102_v60 = vsub.f32 %v10103_v61, %v13307_v9 }
 0x1f7   :  { %2141 = vmatpush.xpose.msra.mxu2 %v10103_v61  ;;  %v2342_v16 = vand.u32 4294901760, %v2341_v38  ;;  %v10177_v38 = vsub.f32 %v2279_v18, %v10159_v33 }
 0x1f8   :  { %2045 = vmatmul.f32.vlgmr.msra.gmra.mxu0 %v2044_v42  ;;  %v10169_v20 = vpop.f32.mrf.mxu3  ;;  %v13310_v42 = vand.u32 4294901760, %v10009_v21  ;;  %v13313_v21 = vand.u32 4294901760, %v10153_v50 }
 0x1f9   :  { %2190 = vmatpush.xpose.msrb.mxu0 %v13306_v37  ;;  %2175 = vmatmul.f32.vlgmr.msra.gmra.mxu3 %v2042_v49  ;;  %v2258_v37 = vpop.permute.xlu2 %2257  ;;  %13309 = vst [vmem:[#allocation100_spill] sm:$0xff] %v10169_v20  ;;  %v10174_v43 = vpop.f32.mrf.mxu1  ;;  %v2103_v49 = vand.u32 4294901760, %v2102_v60 }
 0x1fa   :  { %2337 = vmatpush.xpose.msrb.mxu3 %v2336_v41  ;;  %2098 = vmatpush.xpose.msra.mxu1 %v2097_v48  ;;  %v2347_v41 = vsub.f32 %v10114_v39, %v13308_v52  ;;  %v2260_v9 = vpop.permute.xlu0 %2259  ;;  %13311 = vst [vmem:[#allocation101_spill] sm:$0xff] %v10174_v43  ;;  %v10180_v52 = vpop.f32.mrf.mxu2  ;;  %v2275_v60 = vsel %vm1713_vm1, %v2258_v37, 0 }
 0x1fb   :  { %2300 = vmatpush.xpose.msrb.mxu2 %v10095_v2  ;;  %v2277_v48 = vsel %vm1713_vm1, %v2260_v9, 0  ;;  %13312 = vst [vmem:[#allocation102_spill] sm:$0xff] %v10180_v52  ;;  %v13315_v9 = vand.u32 4294901760, %v10000_v31 }
 0x1fc   :  { %2144 = vmatmul.f32.vlgmr.msra.gmra.mxu2 %v10072_v15  ;;  %v10183_v17 = vand.u32 4294901760, %v2277_v48  ;;  %v2348_v15 = vand.u32 4294901760, %v2347_v41 }
 0x1fd   :  { %2194 = vmatpush.xpose.msrb.mxu0 %v13310_v42  ;;  %v2353_v42 = vsub.f32 %v10153_v50, %v13313_v21  ;;  %v10190_v18 = vpop.f32.mrf.mxu0 }
 0x1fe   :  { %2343 = vmatpush.xpose.msrb.mxu3 %v2342_v16  ;;  %2104 = vmatpush.xpose.msra.mxu1 %v2103_v49  ;;  %v13099_v16 = vand.u32 4294901760, %v10163_v8  ;;  %13314 = vst [vmem:[#allocation103_spill] sm:$0xff] %v10190_v18  ;;  %v10198_v49 = vand.u32 4294901760, %v2275_v60  ;;  %v10201_v21 = vsub.f32 %v2277_v48, %v10183_v17  ;;  %v13319_v48 = vand.u32 4294901760, %v10177_v38 }
 0x1ff   :  { %2302 = vmatpush.xpose.msrb.mxu2 %v10068_v28  ;;  %v2354_v37 = vand.u32 4294901760, %v2353_v42 }
 0x200   :  { %v2359_v31 = vsub.f32 %v10163_v8, %v13099_v16  ;;  %v2365_v42 = vsub.f32 %v10177_v38, %v13319_v48  ;;  %v10219_v16 = vsub.f32 %v2275_v60, %v10198_v49 }
 0x201   :  { %2198 = vmatpush.xpose.msrb.mxu0 %v13315_v9  ;;  %2106 = vmatmul.f32.vlgmr.msra.gmra.mxu1 %v10050_v5  ;;  %v13316_v9 = vand.u32 4294901760, %v10019_v24  ;;  %v10221_v24 = vpop.f32.mrf.mxu3 }
 0x202   :  { %2233 = vmatpush.xpose.msrb.mxu1 %v9973_v22  ;;  %2349 = vmatpush.xpose.msrb.mxu3 %v2348_v15  ;;  %v2256_v22 = vpop.permute.xlu0 %2255  ;;  %v10209_v15 = vpop.f32.mrf.mxu1  ;;  %13320 = vst [vmem:[#allocation106_spill] sm:$0xff] %v10221_v24  ;;  %v2366_v48 = vand.u32 4294901760, %v2365_v42  ;;  %v13100_v18 = vand.u32 4294901760, %v10219_v16 }
 0x203   :  { %2304 = vmatpush.xpose.msrb.mxu2 %v10087_v14  ;;  %13317 = vst [vmem:[#allocation104_spill] sm:$0xff] %v10209_v15  ;;  %v2273_v41 = vsel %vm1713_vm1, %v2256_v22, 0  ;;  %v10212_v43 = vpop.f32.mrf.mxu2  ;;  %v13322_v22 = vand.u32 4294901760, %v10031_v11 }
 0x204   :  { %13318 = vst [vmem:[#allocation105_spill] sm:$0xff] %v10212_v43 }
 0x205   :  { %2202 = vmatpush.xpose.msrb.mxu0 %v13316_v9  ;;  %v2360_v9 = vand.u32 4294901760, %v2359_v31  ;;  %v10226_v15 = vpop.f32.mrf.mxu0 }
 0x206   :  { %2235 = vmatpush.xpose.msrb.mxu1 %v10004_v36  ;;  %2355 = vmatpush.xpose.msrb.mxu3 %v2354_v37  ;;  %v10223_v36 = vand.u32 4294901760, %v2273_v41  ;;  %v2370_v37 = vand.u32 4294901760, %v10201_v21  ;;  %13321 = vst [vmem:[#allocation107_spill] sm:$0xff] %v10226_v15  ;;  %v13323_v15 = vand.u32 4294901760, %v10056_v46  ;;  %v13327_v46 = vand.u32 4294901760, %v10081_v55 }
 0x207   :  { %2306 = vmatpush.xpose.msrb.mxu2 %v10141_v34  ;;  %v13331_v55 = vand.u32 4294901760, %v10106_v32 }
 0x208   :  { %v10233_v60 = vsub.f32 %v2273_v41, %v10223_v36  ;;  %v2371_v31 = vsub.f32 %v10201_v21, %v2370_v37 }
 0x209   :  { %2206 = vmatpush.xpose.msrb.mxu0 %v13322_v22 }
 0x20a   :  { %2237 = vmatpush.xpose.msrb.mxu1 %v9985_v30  ;;  %2361 = vmatpush.xpose.msrb.mxu3 %v2360_v9  ;;  %v10242_v11 = vpop.f32.mrf.mxu1  ;;  %v2317_v30 = vand.u32 4294901760, %v10233_v60  ;;  %v2372_v42 = vand.u32 4294901760, %v2371_v31  ;;  %v2377_v9 = vsub.f32 %v10219_v16, %v13100_v18  ;;  %v13329_v31 = vand.u32 4294901760, %v10103_v61 }
 0x20b   :  { %2308 = vmatpush.xpose.msrb.mxu2 %v10139_v19  ;;  %13324 = vst [vmem:[#allocation108_spill] sm:$0xff] %v10242_v11  ;;  %v10246_v41 = vpop.f32.mrf.mxu2 }
 0x20c   :  { %13325 = vst [vmem:[#allocation109_spill] sm:$0xff] %v10246_v41 }
 0x20d   :  { %2210 = vmatpush.xpose.msrb.mxu0 %v13323_v15  ;;  %v10251_v22 = vpop.f32.mrf.mxu0  ;;  %v2318_v15 = vsub.f32 %v10233_v60, %v2317_v30 }
 0x20e   :  { %2239 = vmatpush.xpose.msrb.mxu1 %v10002_v3  ;;  %2367 = vmatpush.xpose.msrb.mxu3 %v2366_v48  ;;  %13326 = vst [vmem:[#allocation110_spill] sm:$0xff] %v10251_v22  ;;  %v10256_v3 = vpop.f32.mrf.mxu3  ;;  %v2378_v48 = vand.u32 4294901760, %v2377_v9  ;;  %v13335_v9 = vand.u32 4294901760, %v10093_v57 }
 0x20f   :  { %2310 = vmatpush.xpose.msrb.mxu2 %v10159_v33  ;;  %13328 = vst [vmem:[#allocation111_spill] sm:$0xff] %v10256_v3 }
 0x211   :  { %2214 = vmatpush.xpose.msrb.mxu0 %v13327_v46 }
 0x212   :  { %2241 = vmatpush.xpose.msrb.mxu1 %v10014_v58  ;;  %2373 = vmatpush.xpose.msrb.mxu3 %v2372_v42  ;;  %v10265_v18 = vpop.f32.mrf.mxu1  ;;  %v2319_v58 = vand.u32 4294901760, %v2318_v15 }
 0x213   :  { %2312 = vmatpush.xpose.msrb.mxu2 %v10183_v17  ;;  %13330 = vst [vmem:[#allocation112_spill] sm:$0xff] %v10265_v18  ;;  %v10277_v61 = vpop.f32.mrf.mxu2 }
 0x214   :  { %13333 = vst [vmem:[#allocation114_spill] sm:$0xff] %v10277_v61 }
 0x215   :  { %2218 = vmatpush.xpose.msrb.mxu0 %v13329_v31  ;;  %v10273_v42 = vpop.f32.mrf.mxu0 }
 0x216   :  { %2243 = vmatpush.xpose.msrb.mxu1 %v10033_v13  ;;  %2379 = vmatpush.xpose.msrb.mxu3 %v2378_v48  ;;  %13332 = vst [vmem:[#allocation113_spill] sm:$0xff] %v10273_v42  ;;  %v10281_v13 = vpop.f32.mrf.mxu3 }
 0x217   :  { %2314 = vmatpush.xpose.msrb.mxu2 %v10198_v49  ;;  %13334 = vst [vmem:[#allocation115_spill] sm:$0xff] %v10281_v13 }
 0x218   :  { %2220 = vmatmul.f32.vlgmr.msrb.gmra.mxu0 %v10050_v5 }
 0x219   :  { %2395 = vmatpush.xpose.msra.mxu0 %v10106_v32  ;;  %2381 = vmatmul.f32.vlgmr.msrb.gmra.mxu3 %v10223_v36 }
 0x21a   :  { %2508 = vmatpush.xpose.msra.mxu3 %v10095_v2  ;;  %2245 = vmatpush.xpose.msrb.mxu1 %v10058_v10  ;;  %v10286_v32 = vpop.f32.mrf.mxu1  ;;  %v13337_v10 = vand.u32 4294901760, %v10114_v39 }
 0x21b   :  { %2465 = vmatpush.xpose.msra.mxu2 %v13331_v55  ;;  %13336 = vst [vmem:[#allocation116_spill] sm:$0xff] %v10286_v32 }
 0x21c   :  { %2320 = vmatmul.f32.vlgmr.msrb.gmra.mxu2 %v2319_v58 }
 0x21d   :  { %2398 = vmatpush.xpose.msra.mxu0 %v10093_v57  ;;  %v10294_v46 = vpop.f32.mrf.mxu0  ;;  %v10299_v57 = vpop.f32.mrf.mxu2 }
 0x21e   :  { %2510 = vmatpush.xpose.msra.mxu3 %v10068_v28  ;;  %2247 = vmatpush.xpose.msrb.mxu1 %v10078_v51  ;;  %13338 = vst [vmem:[#allocation117_spill] sm:$0xff] %v10294_v46  ;;  %v13340_v51 = vand.u32 4294901760, %v10153_v50 }
 0x21f   :  { %2469 = vmatpush.xpose.msra.mxu2 %v13335_v9  ;;  %13339 = vst [vmem:[#allocation118_spill] sm:$0xff] %v10299_v57 }
 0x221   :  { %2401 = vmatpush.xpose.msra.mxu0 %v10114_v39  ;;  %2249 = vmatmul.f32.vlgmr.msrb.gmra.mxu1 %v10050_v5  ;;  %v13343_v39 = vand.u32 4294901760, %v10163_v8  ;;  %v13345_v5 = vand.u32 4294901760, %v10177_v38 }
 0x222   :  { %2432 = vmatpush.xpose.msra.mxu1 %v10095_v2  ;;  %2512 = vmatpush.xpose.msra.mxu3 %v10087_v14  ;;  %v10303_v2 = vpop.f32.mrf.mxu3  ;;  %v10305_v15 = vpop.f32.mrf.mxu1 }
 0x223   :  { %2473 = vmatpush.xpose.msra.mxu2 %v13337_v10  ;;  %13341 = vst [vmem:[#allocation119_spill] sm:$0xff] %v10303_v2 }
 0x224   :  { %13342 = vst [vmem:[#allocation120_spill] sm:$0xff] %v10305_v15 }
 0x225   :  { %2404 = vmatpush.xpose.msra.mxu0 %v10153_v50  ;;  %v1771_v50 = vpop.f32.mrf.mxu2 }
 0x226   :  { %2434 = vmatpush.xpose.msra.mxu1 %v10068_v28  ;;  %2514 = vmatpush.xpose.msra.mxu3 %v10141_v34  ;;  %v10312_v28 = vpop.f32.mrf.mxu0 }
 0x227   :  { %2477 = vmatpush.xpose.msra.mxu2 %v13340_v51  ;;  %13344 = vst [vmem:[#allocation121_spill] sm:$0xff] %v10312_v28 }
 0x229   :  { %2407 = vmatpush.xpose.msra.mxu0 %v10163_v8 }
 0x22a   :  { %2436 = vmatpush.xpose.msra.mxu1 %v10087_v14  ;;  %2516 = vmatpush.xpose.msra.mxu3 %v10139_v19  ;;  %v10319_v48 = vpop.f32.mrf.mxu1  ;;  %v1832_v14 = vpop.f32.mrf.mxu3 }
 0x22b   :  { %2481 = vmatpush.xpose.msra.mxu2 %v13343_v39  ;;  %13346 = vst [vmem:[#allocation122_spill] sm:$0xff] %v10319_v48 }
 0x22d   :  { %2410 = vmatpush.xpose.msra.mxu0 %v10177_v38  ;;  %v13347_v38 = vand.u32 4294901760, %v10219_v16 }
 0x22e   :  { %2438 = vmatpush.xpose.msra.mxu1 %v10141_v34  ;;  %2518 = vmatpush.xpose.msra.mxu3 %v10159_v33  ;;  %v1870_v8 = vpop.f32.mrf.mxu0  ;;  %v1833_v34 = vadd.f32 %v1832_v14, %v1771_v50 }
 0x22f   :  { %2485 = vmatpush.xpose.msra.mxu2 %v13345_v5 }
 0x230   :  { %v1871_v31 = vadd.f32 %v1870_v8, %v1833_v34 }
 0x231   :  { %2413 = vmatpush.xpose.msra.mxu0 %v10201_v21 }
 0x232   :  { %2440 = vmatpush.xpose.msra.mxu1 %v10139_v19  ;;  %2520 = vmatpush.xpose.msra.mxu3 %v10183_v17  ;;  %v1901_v19 = vpop.f32.mrf.mxu1 }
 0x233   :  { %2489 = vmatpush.xpose.msra.mxu2 %v2370_v37  ;;  %v1902_v21 = vadd.f32 %v1901_v19, %v1871_v31  ;;  %v1946_v37 = vpop.f32.mrf.mxu2 }
 0x235   :  { %2416 = vmatpush.xpose.msra.mxu0 %v10219_v16  ;;  %v1947_v58 = vadd.f32 %v1946_v37, %v1902_v21  ;;  %v10339_v16 = vld [vmem:[%s13044_s3] sm:$0xff] }
 0x236   :  { %2442 = vmatpush.xpose.msra.mxu1 %v10159_v33  ;;  %2522 = vmatpush.xpose.msra.mxu3 %v10198_v49  ;;  %v1975_v33 = vpop.f32.mrf.mxu3 }
 0x237   :  { %2493 = vmatpush.xpose.msra.mxu2 %v13347_v38  ;;  %v1976_v55 = vadd.f32 %v1975_v33, %v1947_v58 }
 0x238   :  { %2419 = vmatmul.f32.vlgmr.msra.gmra.mxu0 %v10233_v60 }
 0x239   :  { %2524 = vmatmul.f32.vlgmr.msra.gmra.mxu3 %v10223_v36  ;;  %v1978_v9 = vmul.f32 0.35355338, %v1976_v55 }
 0x23a   :  { %2444 = vmatpush.xpose.msra.mxu1 %v10183_v17  ;;  %2495 = vmatmul.f32.vlgmr.msra.gmra.mxu2 %v10223_v36 }
 0x23b   :  { %v10344_v17 = vadd.f32 %v1978_v9, %v10339_v16 }
 0x23d   :  { %v3899_v36 = vsel %vm3898_vm2, %v10344_v17, -inf }
 0x23e   :  { %2446 = vmatpush.xpose.msra.mxu1 %v10198_v49  ;;  %3900 = vmax.xlane.f32.xlu1 %v3899_v36 }
 0x241   :  { %2450 = vmatmul.f32.vlgmr.msra.gmra.mxu1 %v2317_v30 }
 0x275   :  { %v2046_v49 = vpop.f32.mrf.mxu0 }
 0x27c   :  { %v2176_v50 = vpop.f32.mrf.mxu3 }
 0x27e   :  { %v2107_v10 = vpop.f32.mrf.mxu1 }
 0x27f   :  { %v2108_v51 = vadd.f32 %v2107_v10, %v2046_v49  ;;  %v2145_v39 = vpop.f32.mrf.mxu2 }
 0x281   :  { %v2146_v5 = vadd.f32 %v2145_v39, %v2108_v51 }
 0x283   :  { %v2177_v8 = vadd.f32 %v2176_v50, %v2146_v5 }
 0x295   :  { %v2221_v14 = vpop.f32.mrf.mxu0 }
 0x296   :  { %v2222_v34 = vadd.f32 %v2221_v14, %v2177_v8 }
 0x29e   :  { %v2250_v38 = vpop.f32.mrf.mxu1 }
 0x29f   :  { %v2251_v60 = vadd.f32 %v2250_v38, %v2222_v34  ;;  %v2321_v15 = vpop.f32.mrf.mxu2 }
 0x2a1   :  { %v2253_v30 = vmul.f32 0.35355338, %v2251_v60 }
 0x2a3   :  { %v10349_v31 = vadd.f32 %v2253_v30, %v10339_v16 }
 0x2a5   :  { %13348 = vst [vmem:[#allocation123_spill] sm:$0xff] %v10349_v31  ;;  %v3902_v19 = vsel %vm3898_vm2, %v10349_v31, -inf }
 0x2a6   :  { %3903 = vmax.xlane.f32.xlu2 %v3902_v19 }
 0x2b1   :  { %v10353_v21 = vpop.xlane.xlu1 %3900 }
 0x2b2   :  { %vm3923_vm3 = vcmp.ge.f32.partialorder %v10344_v17, %v10353_v21 }
 0x2b3   :  { %v3931_v37 = vsel %vm3923_vm3, -1e+30, %v10344_v17 }
 0x2b4   :  { %v3939_v58 = vsel %vm3898_vm2, %v3931_v37, -inf }
 0x2b5   :  { %3940 = vmax.xlane.f32.xlu0 %v3939_v58  ;;  %v2420_v24 = vpop.f32.mrf.mxu0 }
 0x2be   :  { %v2451_v52 = vpop.f32.mrf.mxu1 }
 0x2c9   :  { %2546 = vrot.lane.b32.xlu0 %v9642_v29, %s8737_s18 }
 0x2d1   :  { %2540 = vrot.lane.b32.xlu0 %v9616_v56, %s8737_s18 }
 0x2d9   :  { %2538 = vrot.lane.b32.xlu0 %v9560_v4, %s8737_s18 }
 0x2e1   :  { %2532 = vrot.lane.b32.xlu0 %v9652_v25, %s8737_s18 }
 0x319   :  { %v10367_v33 = vpop.xlane.xlu2 %3903 }
 0x31a   :  { %vm3924_vm4 = vcmp.ge.f32.partialorder %v10349_v31, %v10367_v33 }
 0x31b   :  { %v3932_v55 = vsel %vm3924_vm4, -1e+30, %v10349_v31 }
 0x31c   :  { %v3942_v9 = vsel %vm3898_vm2, %v3932_v55, -inf }
 0x31d   :  { %3943 = vmax.xlane.f32.xlu1 %v3942_v9 }
 0x328   :  { %v3941_v29 = vpop.xlane.xlu0 %3940 }
 0x329   :  { %vm3963_vm5 = vcmp.ge.f32.partialorder %v3931_v37, %v3941_v29 }
 0x32a   :  { %v3971_v36 = vsel %vm3963_vm5, -1e+30, %v3931_v37 }
 0x32b   :  { %v3979_v56 = vsel %vm3898_vm2, %v3971_v36, -inf }
 0x32c   :  { %3980 = vmax.xlane.f32.xlu2 %v3979_v56 }
 0x336   :  { %2542 = vrot.lane.b32.xlu1 %v9594_v45, %s8737_s18 }
 0x33b   :  { %v2547_v4 = vpop.permute.xlu0 %2546 }
 0x33c   :  { %v2564_v25 = vsel %vm1713_vm1, %v2547_v4, 0 }
 0x33d   :  { %v10377_v10 = vand.u32 4294901760, %v2564_v25 }
 0x33f   :  { %v10380_v49 = vsub.f32 %v2564_v25, %v10377_v10  ;;  %2575 = vmatpush.xpose.msrb.mxu0 %v10377_v10  ;;  %2707 = vmatpush.xpose.msrb.mxu3 %v10377_v10 }
 0x341   :  { %v13105_v51 = vand.u32 4294901760, %v10380_v49  ;;  %2670 = vmatpush.xpose.msrb.mxu2 %v10380_v49 }
 0x343   :  { %v2610_v45 = vsub.f32 %v10380_v49, %v13105_v51  ;;  %v2541_v8 = vpop.permute.xlu0 %2540  ;;  %v13354_v51 = vld [vmem:[#allocation30_spill] sm:$0xff] }
 0x344   :  { %2544 = vrot.lane.b32.xlu2 %v9625_v44, %s8737_s18  ;;  %v2558_v37 = vsel %vm1713_vm1, %v2541_v8, 0 }
 0x345   :  { %v2611_v39 = vand.u32 4294901760, %v2610_v45  ;;  %v10403_v29 = vand.u32 4294901760, %v2558_v37 }
 0x347   :  { %2612 = vmatpush.xpose.msrb.mxu1 %v2611_v39  ;;  %v10417_v45 = vsub.f32 %v2558_v37, %v10403_v29 }
 0x34b   :  { %v2539_v58 = vpop.permute.xlu0 %2538 }
 0x34c   :  { %v2556_v4 = vsel %vm1713_vm1, %v2539_v58, 0 }
 0x390   :  { %v3944_v5 = vpop.xlane.xlu1 %3943 }
 0x391   :  { %vm3964_vm6 = vcmp.ge.f32.partialorder %v3932_v55, %v3944_v5 }
 0x392   :  { %v3972_v50 = vsel %vm3964_vm6, -1e+30, %v3932_v55 }
 0x393   :  { %v3982_v14 = vsel %vm3898_vm2, %v3972_v50, -inf }
 0x394   :  { %3983 = vmax.xlane.f32.xlu1 %v3982_v14 }
 0x39f   :  { %v3981_v34 = vpop.xlane.xlu2 %3980 }
 0x3a0   :  { %vm4003_vm7 = vcmp.ge.f32.partialorder %v3971_v36, %v3981_v34 }
 0x3a1   :  { %v10392_v38 = vsel %vm4003_vm7, -1e+30, %v3971_v36 }
 0x3a2   :  { %v4019_v60 = vsel %vm3898_vm2, %v10392_v38, -inf }
 0x3a3   :  { %4020 = vmax.xlane.f32.xlu2 %v4019_v60 }
 0x3a7   :  { %v2545_v55 = vpop.permute.xlu2 %2544 }
 0x3a8   :  { %v2543_v30 = vpop.permute.xlu1 %2542  ;;  %v2562_v9 = vsel %vm1713_vm1, %v2545_v55, 0 }
 0x3a9   :  { %v2560_v44 = vsel %vm1713_vm1, %v2543_v30, 0  ;;  %v10408_v56 = vand.u32 4294901760, %v2562_v9  ;;  %v13102_v30 = vand.u32 4294901760, %v10417_v45 }
 0x3aa   :  { %v10397_v19 = vand.u32 4294901760, %v2560_v44 }
 0x3ab   :  { %v10412_v25 = vsub.f32 %v2562_v9, %v10408_v56  ;;  %2577 = vmatpush.xpose.msrb.mxu0 %v10408_v56  ;;  %2709 = vmatpush.xpose.msrb.mxu3 %v10408_v56  ;;  %v2628_v37 = vsub.f32 %v10417_v45, %v13102_v30 }
 0x3ac   :  { %v10406_v36 = vsub.f32 %v2560_v44, %v10397_v19 }
 0x3ad   :  { %2534 = vrot.lane.b32.xlu1 %v9535_v1, %s8737_s18  ;;  %v10419_v1 = vand.u32 4294901760, %v2556_v4  ;;  %2673 = vmatpush.xpose.msrb.mxu2 %v10412_v25  ;;  %v13104_v39 = vand.u32 4294901760, %v10412_v25  ;;  %v2629_v55 = vand.u32 4294901760, %v2628_v37  ;;  %v13370_v48 = vand.u32 4294901760, %v10412_v25 }
 0x3ae   :  { %v13103_v5 = vand.u32 4294901760, %v10406_v36 }
 0x3af   :  { %2579 = vmatpush.xpose.msrb.mxu0 %v10397_v19  ;;  %2711 = vmatpush.xpose.msrb.mxu3 %v10397_v19  ;;  %v2616_v14 = vsub.f32 %v10412_v25, %v13104_v39  ;;  %v10430_v8 = vsub.f32 %v2556_v4, %v10419_v1 }
 0x3b0   :  { %v2622_v60 = vsub.f32 %v10406_v36, %v13103_v5 }
 0x3b1   :  { %2676 = vmatpush.xpose.msrb.mxu2 %v10406_v36  ;;  %v2617_v34 = vand.u32 4294901760, %v2616_v14  ;;  %v13101_v58 = vand.u32 4294901760, %v10430_v8 }
 0x3b2   :  { %v2623_v44 = vand.u32 4294901760, %v2622_v60 }
 0x3b3   :  { %2581 = vmatpush.xpose.msrb.mxu0 %v10403_v29  ;;  %2618 = vmatpush.xpose.msrb.mxu1 %v2617_v34  ;;  %v2634_v9 = vsub.f32 %v10430_v8, %v13101_v58  ;;  %v13349_v58 = vld [vmem:[#allocation35_spill] sm:$0xff] }
 0x3b4   :  { %2713 = vmatpush.xpose.msrb.mxu3 %v10403_v29  ;;  %v693_v30 = vadd.f32 %v13349_v58, %v9494_v40 }
 0x3b5   :  { %2679 = vmatpush.xpose.msrb.mxu2 %v10417_v45  ;;  %v2635_v4 = vand.u32 4294901760, %v2634_v9 }
 0x3b7   :  { %2583 = vmatpush.xpose.msrb.mxu0 %v10419_v1  ;;  %2624 = vmatpush.xpose.msrb.mxu1 %v2623_v44  ;;  %v698_v44 = vadd.f32 %v9524_v54, %v9512_v0  ;;  %v13355_v0 = vld [vmem:[#allocation34_spill] sm:$0xff] }
 0x3b8   :  { %2715 = vmatpush.xpose.msrb.mxu3 %v10419_v1 }
 0x3b9   :  { %2682 = vmatpush.xpose.msrb.mxu2 %v10430_v8  ;;  %v815_v37 = vadd.f32 %v9533_v62, %v698_v44  ;;  %v13356_v44 = vld [vmem:[#allocation32_spill] sm:$0xff] }
 0x3bb   :  { %2536 = vrot.lane.b32.xlu2 %v9574_v53, %s8737_s18  ;;  %2630 = vmatpush.xpose.msrb.mxu1 %v2629_v55  ;;  %v908_v53 = vadd.f32 %v9904_v7, %v815_v37  ;;  %v13350_v55 = vld [vmem:[#allocation36_spill] sm:$0xff] }
 0x3bc   :  { %v809_v9 = vadd.f32 %v13350_v55, %v693_v30 }
 0x3bd   :  { %v10467_v39 = vadd.f32 %v9899_v26, %v908_v53  ;;  %v13357_v26 = vld [vmem:[#allocation24_spill] sm:$0xff] }
 0x3be   :  { %v904_v5 = vadd.f32 %v9885_v35, %v809_v9  ;;  %v13359_v9 = vld [vmem:[#allocation29_spill] sm:$0xff] }
 0x3bf   :  { %2636 = vmatpush.xpose.msrb.mxu1 %v2635_v4  ;;  %v13351_v4 = vld [vmem:[#allocation31_spill] sm:$0xff]  ;;  %v2832_v58 = vsel %vm1713_vm1, %v10467_v39, 0 }
 0x3c0   :  { %v10475_v30 = vadd.f32 %v9878_v23, %v904_v5  ;;  %v2533_v23 = vpop.permute.xlu0 %2532 }
 0x407   :  { %v3984_v14 = vpop.xlane.xlu1 %3983 }
 0x408   :  { %vm4004_vm8 = vcmp.ge.f32.partialorder %v3972_v50, %v3984_v14  ;;  %v13352_v14 = vld [vmem:[#allocation33_spill] sm:$0xff] }
 0x409   :  { %v10452_v34 = vsel %vm4004_vm8, -1e+30, %v3972_v50  ;;  %v688_v50 = vadd.f32 %v13352_v14, %v13351_v4 }
 0x40a   :  { %v4022_v60 = vsel %vm3898_vm2, %v10452_v34, -inf }
 0x40b   :  { %4023 = vmax.xlane.f32.xlu1 %v4022_v60  ;;  %v13353_v60 = vld [vmem:[#allocation27_spill] sm:$0xff]  ;;  %v803_v62 = vadd.f32 %v13355_v0, %v688_v50  ;;  %v2829_v50 = vsel %vm1713_vm1, %v10475_v30, 0 }
 0x40c   :  { %v683_v54 = vadd.f32 %v13354_v51, %v13353_v60  ;;  %v13358_v51 = vld [vmem:[#allocation26_spill] sm:$0xff] }
 0x40d   :  { %v900_v7 = vadd.f32 %v9862_v59, %v803_v62  ;;  %v678_v37 = vadd.f32 %v13358_v51, %v13357_v26  ;;  %v10488_v59 = vand.u32 4294901760, %v2832_v58  ;;  %v13362_v26 = vld [vmem:[#allocation25_spill] sm:$0xff] }
 0x40e   :  { %v797_v11 = vadd.f32 %v13356_v44, %v683_v54  ;;  %v2550_v44 = vsel %vm1713_vm1, %v2533_v23, 0 }
 0x40f   :  { %v791_v4 = vadd.f32 %v13359_v9, %v678_v37  ;;  %v10492_v14 = vadd.f32 %v9855_v6, %v900_v7  ;;  %v10507_v6 = vsub.f32 %v2832_v58, %v10488_v59  ;;  %v10509_v7 = vand.u32 4294901760, %v2829_v50  ;;  %v13363_v58 = vld [vmem:[#allocation10_spill] sm:$0xff] }
 0x410   :  { %v896_v53 = vadd.f32 %v9842_v47, %v797_v11  ;;  %v13360_v47 = vld [vmem:[#allocation22_spill] sm:$0xff]  ;;  %v13361_v11 = vld [vmem:[#allocation23_spill] sm:$0xff] }
 0x411   :  { %v673_v54 = vadd.f32 %v13361_v11, %v13360_v47  ;;  %v892_v0 = vadd.f32 %v9812_v27, %v791_v4  ;;  %v2826_v27 = vsel %vm1713_vm1, %v10492_v14, 0  ;;  %v10537_v47 = vsub.f32 %v2829_v50, %v10509_v7 }
 0x412   :  { %v10503_v62 = vadd.f32 %v9831_v63, %v896_v53  ;;  %v10517_v63 = vand.u32 4294901760, %v2550_v44  ;;  %v10539_v11 = vand.u32 4294901760, %v2826_v27 }
 0x413   :  { %v785_v51 = vadd.f32 %v13362_v26, %v673_v54  ;;  %v13365_v26 = vld [vmem:[#allocation21_spill] sm:$0xff] }
 0x414   :  { %v2823_v4 = vsel %vm1713_vm1, %v10503_v62, 0  ;;  %v10542_v54 = vsub.f32 %v2550_v44, %v10517_v63 }
 0x415   :  { %v888_v23 = vadd.f32 %v13363_v58, %v785_v51 }
 0x416   :  { %v4021_v40 = vpop.xlane.xlu2 %4020 }
 0x417   :  { %vm4043_vm9 = vcmp.ge.f32.partialorder %v10392_v38, %v4021_v40  ;;  %v10548_v51 = vadd.f32 %v13365_v26, %v888_v23  ;;  %v13109_v23 = vand.u32 4294901760, %v10537_v47 }
 0x418   :  { %v10481_v35 = vsel %vm4043_vm9, -1e+30, %v10392_v38 }
 0x419   :  { %v4059_v55 = vsel %vm3898_vm2, %v10481_v35, -inf }
 0x41a   :  { %4060 = vmax.xlane.f32.xlu2 %v4059_v55 }
 0x41e   :  { %v2537_v40 = vpop.permute.xlu2 %2536 }
 0x41f   :  { %v2535_v5 = vpop.permute.xlu1 %2534  ;;  %v2554_v37 = vsel %vm1713_vm1, %v2537_v40, 0 }
 0x420   :  { %v2552_v38 = vsel %vm1713_vm1, %v2535_v5, 0  ;;  %v10522_v55 = vand.u32 4294901760, %v2554_v37  ;;  %v13364_v5 = vld [vmem:[#allocation49_spill] sm:$0xff] }
 0x421   :  { %v10497_v60 = vand.u32 4294901760, %v2552_v38  ;;  %v10526_v9 = vadd.f32 %v13364_v5, %v892_v0  ;;  %v10564_v5 = vsub.f32 %v2826_v27, %v10539_v11  ;;  %v2884_v27 = vsub.f32 %v10537_v47, %v13109_v23 }
 0x422   :  { %2585 = vmatpush.xpose.msrb.mxu0 %v10522_v55  ;;  %2717 = vmatpush.xpose.msrb.mxu3 %v10522_v55 }
 0x423   :  { %v10520_v53 = vsub.f32 %v2552_v38, %v10497_v60  ;;  %v13107_v38 = vand.u32 4294901760, %v10507_v6  ;;  %v2820_v50 = vsel %vm1713_vm1, %v10526_v9, 0  ;;  %v2885_v42 = vand.u32 4294901760, %v2884_v27 }
 0x424   :  { %2530 = vrot.lane.b32.xlu1 %v9602_v12, %s8737_s18  ;;  %v10531_v12 = vsub.f32 %v2554_v37, %v10522_v55  ;;  %v10550_v37 = vand.u32 4294901760, %v2823_v4  ;;  %v10571_v22 = vand.u32 4294901760, %v2820_v50 }
 0x425   :  { %v13108_v40 = vand.u32 4294901760, %v10520_v53  ;;  %v2878_v58 = vsub.f32 %v10507_v6, %v13107_v38 }
 0x426   :  { %2685 = vmatpush.xpose.msrb.mxu2 %v10531_v12  ;;  %v13106_v0 = vand.u32 4294901760, %v10531_v12  ;;  %2587 = vmatpush.xpose.msrb.mxu0 %v10497_v60  ;;  %v10581_v20 = vsub.f32 %v2823_v4, %v10550_v37  ;;  %v13368_v4 = vld [vmem:[#allocation15_spill] sm:$0xff] }
 0x427   :  { %2719 = vmatpush.xpose.msrb.mxu3 %v10497_v60  ;;  %v2646_v18 = vsub.f32 %v10520_v53, %v13108_v40  ;;  %v2879_v38 = vand.u32 4294901760, %v2878_v58  ;;  %v13366_v40 = vand.u32 4294901760, %v10380_v49  ;;  %v13367_v58 = vand.u32 4294901760, %v10542_v54 }
 0x428   :  { %v2640_v44 = vsub.f32 %v10531_v12, %v13106_v0  ;;  %v2817_v0 = vsel %vm1713_vm1, %v10548_v51, 0  ;;  %v13369_v49 = vand.u32 4294901760, %v10564_v5  ;;  %v13372_v25 = vand.u32 4294901760, %v10581_v20 }
 0x429   :  { %v2647_v32 = vand.u32 4294901760, %v2646_v18  ;;  %v10591_v23 = vand.u32 4294901760, %v2817_v0 }
 0x42a   :  { %2688 = vmatpush.xpose.msrb.mxu2 %v10520_v53  ;;  %v2641_v26 = vand.u32 4294901760, %v2640_v44  ;;  %2589 = vmatpush.xpose.msrb.mxu0 %v10517_v63  ;;  %v2814_v44 = vsel %vm1713_vm1, %v13368_v4, 0 }
 0x42b   :  { %2721 = vmatpush.xpose.msrb.mxu3 %v10517_v63  ;;  %v10608_v27 = vand.u32 4294901760, %v2814_v44 }
 0x42c   :  { %2642 = vmatpush.xpose.msrb.mxu1 %v2641_v26  ;;  %v2652_v26 = vsub.f32 %v10542_v54, %v13367_v58  ;;  %v2382_v58 = vpop.f32.mrf.mxu3 }
 0x42d   :  { %v2383_v46 = vadd.f32 %v2382_v58, %v2321_v15  ;;  %v2896_v15 = vsub.f32 %v10581_v20, %v13372_v25  ;;  %v13374_v58 = vand.u32 4294901760, %v10417_v45  ;;  %v13375_v45 = vand.u32 4294901760, %v10430_v8 }
 0x42e   :  { %2740 = vmatpush.xpose.msra.mxu0 %v13366_v40  ;;  %2691 = vmatpush.xpose.msrb.mxu2 %v10542_v54  ;;  %v10600_v40 = vsub.f32 %v2820_v50, %v10571_v22  ;;  %v2653_v3 = vand.u32 4294901760, %v2652_v26 }
 0x42f   :  { %2880 = vmatpush.xpose.msra.mxu3 %v2879_v38  ;;  %v2890_v38 = vsub.f32 %v10564_v5, %v13369_v49  ;;  %v13371_v49 = vld [vmem:[#allocation14_spill] sm:$0xff]  ;;  %v2421_v18 = vadd.f32 %v2420_v24, %v2383_v46  ;;  %v2897_v24 = vand.u32 4294901760, %v2896_v15 }
 0x430   :  { %2648 = vmatpush.xpose.msrb.mxu1 %v2647_v32  ;;  %v10606_v32 = vsub.f32 %v2817_v0, %v10591_v23  ;;  %v2811_v50 = vsel %vm1713_vm1, %v13371_v49, 0 }
 0x431   :  { %v2891_v28 = vand.u32 4294901760, %v2890_v38  ;;  %v2452_v0 = vadd.f32 %v2451_v52, %v2421_v18  ;;  %v10620_v26 = vand.u32 4294901760, %v2811_v50  ;;  %v10627_v38 = vsub.f32 %v2814_v44, %v10608_v27 }
 0x432   :  { %2843 = vmatpush.xpose.msra.mxu2 %v10488_v59  ;;  %2744 = vmatpush.xpose.msra.mxu0 %v13370_v48  ;;  %v13373_v48 = vand.u32 4294901760, %v10406_v36  ;;  %v2907_v46 = vand.u32 4294901760, %v10606_v32  ;;  %v2496_v36 = vpop.f32.mrf.mxu2 }
 0x433   :  { %2886 = vmatpush.xpose.msra.mxu3 %v2885_v42  ;;  %v2901_v42 = vand.u32 4294901760, %v10600_v40  ;;  %v2497_v52 = vadd.f32 %v2496_v36, %v2452_v0  ;;  %v2913_v18 = vand.u32 4294901760, %v10627_v38  ;;  %v10638_v44 = vsub.f32 %v2811_v50, %v10620_v26 }
 0x434   :  { %2654 = vmatpush.xpose.msrb.mxu1 %v2653_v3  ;;  %v2525_v25 = vpop.f32.mrf.mxu3  ;;  %v13376_v50 = vand.u32 4294901760, %v10531_v12  ;;  %v13379_v12 = vand.u32 4294901760, %v10542_v54  ;;  %v13380_v54 = vld [vmem:[#allocation5_spill] sm:$0xff] }
 0x435   :  { %v2902_v3 = vsub.f32 %v10600_v40, %v2901_v42  ;;  %v2919_v0 = vand.u32 4294901760, %v10638_v44 }
 0x436   :  { %2845 = vmatpush.xpose.msra.mxu2 %v10509_v7  ;;  %2748 = vmatpush.xpose.msra.mxu0 %v13373_v48  ;;  %v2914_v48 = vsub.f32 %v10627_v38, %v2913_v18 }
 0x437   :  { %2892 = vmatpush.xpose.msra.mxu3 %v2891_v28  ;;  %v2903_v28 = vand.u32 4294901760, %v2902_v3  ;;  %v13377_v3 = vand.u32 4294901760, %v10520_v53 }
 0x438   :  { %2783 = vmatpush.xpose.msra.mxu1 %v10377_v10  ;;  %v2908_v10 = vsub.f32 %v10606_v32, %v2907_v46 }
 0x43a   :  { %2847 = vmatpush.xpose.msra.mxu2 %v10539_v11  ;;  %2752 = vmatpush.xpose.msra.mxu0 %v13374_v58  ;;  %v2909_v15 = vand.u32 4294901760, %v2908_v10  ;;  %v13382_v10 = vld [vmem:[#allocation7_spill] sm:$0xff] }
 0x43b   :  { %2898 = vmatpush.xpose.msra.mxu3 %v2897_v24  ;;  %v2920_v24 = vsub.f32 %v10638_v44, %v2919_v0 }
 0x43c   :  { %2785 = vmatpush.xpose.msra.mxu1 %v10408_v56  ;;  %v2526_v56 = vadd.f32 %v2525_v25, %v2497_v52  ;;  %v13381_v52 = vld [vmem:[#allocation6_spill] sm:$0xff] }
 0x43e   :  { %2849 = vmatpush.xpose.msra.mxu2 %v10550_v37  ;;  %2756 = vmatpush.xpose.msra.mxu0 %v13375_v45  ;;  %v2528_v8 = vmul.f32 0.35355338, %v2526_v56 }
 0x43f   :  { %2904 = vmatpush.xpose.msra.mxu3 %v2903_v28  ;;  %v247_v28 = vadd.f32 %v13381_v52, %v13380_v54  ;;  %v13385_v54 = vand.u32 4294901760, %v10564_v5 }
 0x440   :  { %2787 = vmatpush.xpose.msra.mxu1 %v10397_v19  ;;  %v2915_v19 = vand.u32 4294901760, %v2914_v48  ;;  %v10659_v36 = vadd.f32 %v2528_v8, %v10339_v16 }
 0x442   :  { %2851 = vmatpush.xpose.msra.mxu2 %v10571_v22  ;;  %2760 = vmatpush.xpose.msra.mxu0 %v13376_v50  ;;  %13378 = vst [vmem:[#allocation35_spill] sm:$0xff] %v10659_v36  ;;  %v3905_v58 = vsel %vm3898_vm2, %v10659_v36, -inf }
 0x443   :  { %2910 = vmatpush.xpose.msra.mxu3 %v2909_v15 }
 0x444   :  { %2789 = vmatpush.xpose.msra.mxu1 %v10403_v29  ;;  %v2921_v29 = vand.u32 4294901760, %v2920_v24 }
 0x446   :  { %2853 = vmatpush.xpose.msra.mxu2 %v10591_v23  ;;  %2764 = vmatpush.xpose.msra.mxu0 %v13377_v3 }
 0x447   :  { %2916 = vmatpush.xpose.msra.mxu3 %v2915_v19 }
 0x448   :  { %2791 = vmatpush.xpose.msra.mxu1 %v10419_v1 }
 0x44a   :  { %2855 = vmatpush.xpose.msra.mxu2 %v10608_v27  ;;  %2768 = vmatpush.xpose.msra.mxu0 %v13379_v12 }
 0x44b   :  { %2922 = vmatpush.xpose.msra.mxu3 %v2921_v29 }
 0x44c   :  { %2793 = vmatpush.xpose.msra.mxu1 %v10522_v55 }
 0x44e   :  { %2857 = vmatpush.xpose.msra.mxu2 %v10620_v26  ;;  %3906 = vmax.xlane.f32.xlu1 %v3905_v58 }
 0x450   :  { %2795 = vmatpush.xpose.msra.mxu1 %v10497_v60  ;;  %v10681_v60 = vadd.f32 %v13382_v10, %v247_v28 }
 0x454   :  { %2797 = vmatpush.xpose.msra.mxu1 %v10517_v63  ;;  %v2808_v63 = vsel %vm1713_vm1, %v10681_v60, 0 }
 0x455   :  { %v2858_v25 = vand.u32 4294901760, %v2808_v63 }
 0x457   :  { %v2859_v15 = vsub.f32 %v2808_v63, %v2858_v25 }
 0x459   :  { %v2860_v24 = vand.u32 4294901760, %v2859_v15 }
 0x45b   :  { %v2861_v12 = vsub.f32 %v2859_v15, %v2860_v24 }
 0x467   :  { %3087 = vrot.lane.b32.xlu1 %v10475_v30, %s8735_s2 }
 0x47e   :  { %v4024_v1 = vpop.xlane.xlu1 %4023 }
 0x47f   :  { %vm4044_vm10 = vcmp.ge.f32.partialorder %v10452_v34, %v4024_v1  ;;  %v13384_v1 = vand.u32 4294901760, %v10537_v47 }
 0x480   :  { %v10674_v53 = vsel %vm4044_vm10, -1e+30, %v10452_v34 }
 0x481   :  { %v4062_v55 = vsel %vm3898_vm2, %v10674_v53, -inf }
 0x482   :  { %4063 = vmax.xlane.f32.xlu0 %v4062_v55  ;;  %v2862_v55 = vand.u32 4294901760, %v2861_v12 }
 0x48d   :  { %v4061_v45 = vpop.xlane.xlu2 %4060 }
 0x48e   :  { %vm4083_vm11 = vcmp.ge.f32.partialorder %v10481_v35, %v4061_v45 }
 0x48f   :  { %v10687_v34 = vsel %vm4083_vm11, -1e+30, %v10481_v35  ;;  %v13383_v35 = vand.u32 4294901760, %v10507_v6 }
 0x490   :  { %v4099_v56 = vsel %vm3898_vm2, %v10687_v34, -inf }
 0x491   :  { %4100 = vmax.xlane.f32.xlu2 %v4099_v56 }
 0x496   :  { %3085 = vrot.lane.b32.xlu0 %v10492_v14, %s8735_s2  ;;  %v2531_v48 = vpop.permute.xlu1 %2530 }
 0x497   :  { %v2548_v50 = vsel %vm1713_vm1, %v2531_v48, 0 }
 0x498   :  { %v2590_v8 = vand.u32 4294901760, %v2548_v50 }
 0x49a   :  { %v2591_v19 = vsub.f32 %v2548_v50, %v2590_v8  ;;  %2656 = vmatmul.f32.vlgmr.msrb.gmra.mxu1 %v2590_v8 }
 0x49b   :  { %2975 = vmatpush.xpose.msrb.mxu1 %v10488_v59 }
 0x49c   :  { %v2592_v3 = vand.u32 4294901760, %v2591_v19  ;;  %2694 = vmatmul.f32.vlgmr.msrb.gmra.mxu2 %v2591_v19 }
 0x49d   :  { %3008 = vmatpush.xpose.msrb.mxu2 %v13383_v35 }
 0x49e   :  { %v2593_v29 = vsub.f32 %v2591_v19, %v2592_v3  ;;  %3083 = vrot.lane.b32.xlu0 %v10503_v62, %s8735_s2  ;;  %2725 = vmatmul.f32.vlgmr.msrb.gmra.mxu3 %v2592_v3 }
 0x49f   :  { %2977 = vmatpush.xpose.msrb.mxu1 %v10509_v7  ;;  %3051 = vmatpush.xpose.msrb.mxu3 %v10488_v59  ;;  %v13386_v59 = vand.u32 4294901760, %v10581_v20 }
 0x4a0   :  { %v2594_v58 = vand.u32 4294901760, %v2593_v29 }
 0x4a1   :  { %3012 = vmatpush.xpose.msrb.mxu2 %v13384_v1 }
 0x4a2   :  { %2595 = vmatmul.f32.vlgmr.msrb.gmra.mxu0 %v2594_v58  ;;  %2799 = vmatmul.f32.vlgmr.msra.gmra.mxu1 %v2590_v8 }
 0x4a3   :  { %2938 = vmatpush.xpose.msrb.mxu0 %v10507_v6  ;;  %2979 = vmatpush.xpose.msrb.mxu1 %v10539_v11 }
 0x4a4   :  { %3053 = vmatpush.xpose.msrb.mxu3 %v10509_v7  ;;  %2863 = vmatmul.f32.vlgmr.msra.gmra.mxu2 %v2862_v55 }
 0x4a5   :  { %3016 = vmatpush.xpose.msrb.mxu2 %v13385_v54 }
 0x4a6   :  { %2924 = vmatmul.f32.vlgmr.msra.gmra.mxu3 %v2858_v25 }
 0x4a7   :  { %2941 = vmatpush.xpose.msrb.mxu0 %v10537_v47  ;;  %2981 = vmatpush.xpose.msrb.mxu1 %v10550_v37 }
 0x4a8   :  { %3055 = vmatpush.xpose.msrb.mxu3 %v10539_v11 }
 0x4a9   :  { %3020 = vmatpush.xpose.msrb.mxu2 %v13386_v59 }
 0x4aa   :  { %2770 = vmatmul.f32.vlgmr.msra.gmra.mxu0 %v2590_v8 }
 0x4ab   :  { %2944 = vmatpush.xpose.msrb.mxu0 %v10564_v5  ;;  %2983 = vmatpush.xpose.msrb.mxu1 %v10571_v22 }
 0x4ac   :  { %3057 = vmatpush.xpose.msrb.mxu3 %v10550_v37 }
 0x4ad   :  { %3024 = vmatpush.xpose.msrb.mxu2 %v2901_v42 }
 0x4af   :  { %2947 = vmatpush.xpose.msrb.mxu0 %v10581_v20  ;;  %2985 = vmatpush.xpose.msrb.mxu1 %v10591_v23 }
 0x4b0   :  { %3059 = vmatpush.xpose.msrb.mxu3 %v10571_v22 }
 0x4b1   :  { %3028 = vmatpush.xpose.msrb.mxu2 %v2907_v46 }
 0x4b3   :  { %2950 = vmatpush.xpose.msrb.mxu0 %v10600_v40  ;;  %2987 = vmatpush.xpose.msrb.mxu1 %v10608_v27 }
 0x4b4   :  { %3061 = vmatpush.xpose.msrb.mxu3 %v10591_v23 }
 0x4b5   :  { %3032 = vmatpush.xpose.msrb.mxu2 %v2913_v18 }
 0x4b7   :  { %2953 = vmatpush.xpose.msrb.mxu0 %v10606_v32  ;;  %2989 = vmatpush.xpose.msrb.mxu1 %v10620_v26 }
 0x4b8   :  { %3063 = vmatpush.xpose.msrb.mxu3 %v10608_v27 }
 0x4b9   :  { %3036 = vmatpush.xpose.msrb.mxu2 %v2919_v0 }
 0x4ba   :  { %2993 = vmatmul.f32.vlgmr.msrb.gmra.mxu1 %v2860_v24 }
 0x4bb   :  { %2956 = vmatpush.xpose.msrb.mxu0 %v10627_v38 }
 0x4bc   :  { %3065 = vmatpush.xpose.msrb.mxu3 %v10620_v26  ;;  %3038 = vmatmul.f32.vlgmr.msrb.gmra.mxu2 %v2858_v25 }
 0x4bf   :  { %3067 = vmatmul.f32.vlgmr.msrb.gmra.mxu3 %v2858_v25  ;;  %2959 = vmatpush.xpose.msrb.mxu0 %v10638_v44 }
 0x4c1   :  { %v10736_v20 = vpop.xlane.xlu1 %3906 }
 0x4c2   :  { %13387 = vst [vmem:[#allocation36_spill] sm:$0xff] %v10736_v20  ;;  %2962 = vmatmul.f32.vlgmr.msrb.gmra.mxu0 %v2859_v15  ;;  %vm3925_vm12 = vcmp.ge.f32.partialorder %v10659_v36, %v10736_v20 }
 0x4c3   :  { %v3933_v22 = vsel %vm3925_vm12, -1e+30, %v10659_v36 }
 0x4c4   :  { %v3945_v6 = vsel %vm3898_vm2, %v3933_v22, -inf }
 0x4c5   :  { %3946 = vmax.xlane.f32.xlu2 %v3945_v6 }
 0x4d9   :  { %v3088_v44 = vpop.permute.xlu1 %3087 }
 0x4da   :  { %v3105_v63 = vsel %vm1713_vm1, %v3088_v44, 0 }
 0x4db   :  { %v10766_v45 = vand.u32 4294901760, %v3105_v63 }
 0x4dd   :  { %v10771_v48 = vsub.f32 %v3105_v63, %v10766_v45 }
 0x4df   :  { %v3158_v12 = vand.u32 4294901760, %v10771_v48 }
 0x4e1   :  { %v3159_v54 = vsub.f32 %v10771_v48, %v3158_v12 }
 0x4f5   :  { %v4064_v7 = vpop.xlane.xlu0 %4063 }
 0x4f6   :  { %vm4084_vm13 = vcmp.ge.f32.partialorder %v10674_v53, %v4064_v7 }
 0x4f7   :  { %v4092_v47 = vsel %vm4084_vm13, -1e+30, %v10674_v53 }
 0x4f8   :  { %v4102_v11 = vsel %vm3898_vm2, %v4092_v47, -inf }
 0x4f9   :  { %4103 = vmax.xlane.f32.xlu0 %v4102_v11 }
 0x504   :  { %v4101_v37 = vpop.xlane.xlu2 %4100 }
 0x505   :  { %vm4123_vm14 = vcmp.ge.f32.partialorder %v10687_v34, %v4101_v37 }
 0x506   :  { %v4131_v23 = vsel %vm4123_vm14, -1e+30, %v10687_v34 }
 0x507   :  { %v4139_v5 = vsel %vm3898_vm2, %v4131_v23, -inf }
 0x508   :  { %4140 = vmax.xlane.f32.xlu1 %v4139_v5  ;;  %v3086_v42 = vpop.permute.xlu0 %3085 }
 0x509   :  { %v3103_v34 = vsel %vm1713_vm1, %v3086_v42, 0 }
 0x50a   :  { %v10773_v50 = vand.u32 4294901760, %v3103_v34 }
 0x50c   :  { %v10784_v3 = vsub.f32 %v3103_v34, %v10773_v50 }
 0x50e   :  { %v3164_v59 = vand.u32 4294901760, %v10784_v3 }
 0x510   :  { %v3084_v26 = vpop.permute.xlu0 %3083  ;;  %v3165_v6 = vsub.f32 %v10784_v3, %v3164_v59 }
 0x511   :  { %v3101_v19 = vsel %vm1713_vm1, %v3084_v26, 0 }
 0x512   :  { %v10786_v35 = vand.u32 4294901760, %v3101_v19 }
 0x514   :  { %v10797_v1 = vsub.f32 %v3101_v19, %v10786_v35 }
 0x516   :  { %v3170_v7 = vand.u32 4294901760, %v10797_v1 }
 0x518   :  { %v3171_v11 = vsub.f32 %v10797_v1, %v3170_v7 }
 0x51a   :  { %v3172_v37 = vand.u32 4294901760, %v3171_v11 }
 0x538   :  { %v3947_v40 = vpop.xlane.xlu2 %3946 }
 0x539   :  { %vm3965_vm15 = vcmp.ge.f32.partialorder %v3933_v22, %v3947_v40 }
 0x53a   :  { %v3973_v32 = vsel %vm3965_vm15, -1e+30, %v3933_v22  ;;  %v3160_v22 = vand.u32 4294901760, %v3159_v54 }
 0x53b   :  { %v3985_v27 = vsel %vm3898_vm2, %v3973_v32, -inf }
 0x53c   :  { %3986 = vmax.xlane.f32.xlu2 %v3985_v27 }
 0x554   :  { %3089 = vrot.lane.b32.xlu2 %v10467_v39, %s8735_s2 }
 0x56c   :  { %v4104_v46 = vpop.xlane.xlu0 %4103 }
 0x56d   :  { %vm4124_vm3 = vcmp.ge.f32.partialorder %v4092_v47, %v4104_v46 }
 0x56e   :  { %v4132_v38 = vsel %vm4124_vm3, -1e+30, %v4092_v47  ;;  %v3166_v47 = vand.u32 4294901760, %v3165_v6 }
 0x56f   :  { %v4142_v18 = vsel %vm3898_vm2, %v4132_v38, -inf }
 0x570   :  { %4143 = vmax.xlane.f32.xlu0 %v4142_v18  ;;  %v2596_v18 = vpop.f32.mrf.mxu0 }
 0x578   :  { %v2771_v19 = vpop.f32.mrf.mxu0 }
 0x57b   :  { %v4141_v0 = vpop.xlane.xlu1 %4140 }
 0x57c   :  { %vm4163_vm4 = vcmp.ge.f32.partialorder %v4131_v23, %v4141_v0 }
 0x57d   :  { %v4171_v53 = vsel %vm4163_vm4, -1e+30, %v4131_v23 }
 0x57e   :  { %v4179_v52 = vsel %vm3898_vm2, %v4171_v53, -inf }
 0x57f   :  { %4180 = vmax.xlane.f32.xlu1 %v4179_v52  ;;  %v2695_v52 = vpop.f32.mrf.mxu2 }
 0x584   :  { %3079 = vrot.lane.b32.xlu0 %v10548_v51, %s8735_s2 }
 0x58c   :  { %3077 = vrot.lane.b32.xlu0 %v13368_v4, %s8735_s2 }
 0x594   :  { %3075 = vrot.lane.b32.xlu0 %v13371_v49, %s8735_s2 }
 0x598   :  { %3081 = vrot.lane.b32.xlu1 %v10526_v9, %s8735_s2 }
 0x5af   :  { %v3987_v28 = vpop.xlane.xlu2 %3986 }
 0x5b0   :  { %vm4005_vm5 = vcmp.ge.f32.partialorder %v3973_v32, %v3987_v28 }
 0x5b1   :  { %v10761_v10 = vsel %vm4005_vm5, -1e+30, %v3973_v32 }
 0x5b2   :  { %v4025_v25 = vsel %vm3898_vm2, %v10761_v10, -inf }
 0x5b3   :  { %4026 = vmax.xlane.f32.xlu2 %v4025_v25 }
 0x5b7   :  { %v3090_v56 = vpop.permute.xlu2 %3089 }
 0x5b8   :  { %v3107_v15 = vsel %vm1713_vm1, %v3090_v56, 0 }
 0x5b9   :  { %v10775_v8 = vand.u32 4294901760, %v3107_v15 }
 0x5bb   :  { %v10779_v24 = vsub.f32 %v3107_v15, %v10775_v8  ;;  %3118 = vmatpush.xpose.msra.mxu0 %v10775_v8  ;;  %3250 = vmatpush.xpose.msra.mxu3 %v10775_v8  ;;  %v2726_v15 = vpop.f32.mrf.mxu3 }
 0x5bd   :  { %v3152_v29 = vand.u32 4294901760, %v10779_v24  ;;  %3213 = vmatpush.xpose.msra.mxu2 %v10779_v24 }
 0x5bf   :  { %v3153_v58 = vsub.f32 %v10779_v24, %v3152_v29  ;;  %3120 = vmatpush.xpose.msra.mxu0 %v10766_v45  ;;  %3252 = vmatpush.xpose.msra.mxu3 %v10766_v45 }
 0x5c1   :  { %3216 = vmatpush.xpose.msra.mxu2 %v10771_v48  ;;  %v3154_v55 = vand.u32 4294901760, %v3153_v58 }
 0x5c3   :  { %3122 = vmatpush.xpose.msra.mxu0 %v10773_v50  ;;  %3155 = vmatpush.xpose.msra.mxu1 %v3154_v55 }
 0x5c4   :  { %3254 = vmatpush.xpose.msra.mxu3 %v10773_v50 }
 0x5c5   :  { %3219 = vmatpush.xpose.msra.mxu2 %v10784_v3 }
 0x5c7   :  { %3124 = vmatpush.xpose.msra.mxu0 %v10786_v35  ;;  %3161 = vmatpush.xpose.msra.mxu1 %v3160_v22 }
 0x5c8   :  { %3256 = vmatpush.xpose.msra.mxu3 %v10786_v35 }
 0x5c9   :  { %3222 = vmatpush.xpose.msra.mxu2 %v10797_v1 }
 0x5cb   :  { %3167 = vmatpush.xpose.msra.mxu1 %v3166_v47 }
 0x5cf   :  { %3173 = vmatpush.xpose.msra.mxu1 %v3172_v37 }
 0x5e3   :  { %v4144_v23 = vpop.xlane.xlu0 %4143 }
 0x5e4   :  { %vm4164_vm6 = vcmp.ge.f32.partialorder %v4132_v38, %v4144_v23 }
 0x5e5   :  { %v10817_v5 = vsel %vm4164_vm6, -1e+30, %v4132_v38  ;;  %v2657_v38 = vpop.f32.mrf.mxu1 }
 0x5e6   :  { %v4182_v40 = vsel %vm3898_vm2, %v10817_v5, -inf  ;;  %v2658_v44 = vadd.f32 %v2657_v38, %v2596_v18 }
 0x5e7   :  { %4183 = vmax.xlane.f32.xlu0 %v4182_v40 }
 0x5e8   :  { %v2696_v63 = vadd.f32 %v2695_v52, %v2658_v44 }
 0x5ea   :  { %v2727_v22 = vadd.f32 %v2726_v15, %v2696_v63 }
 0x5ec   :  { %v2772_v11 = vadd.f32 %v2771_v19, %v2727_v22 }
 0x5f2   :  { %v4181_v32 = vpop.xlane.xlu1 %4180 }
 0x5f3   :  { %vm4203_vm7 = vcmp.ge.f32.partialorder %v4171_v53, %v4181_v32 }
 0x5f4   :  { %v10821_v27 = vsel %vm4203_vm7, -1e+30, %v4171_v53 }
 0x5f5   :  { %v4219_v42 = vsel %vm3898_vm2, %v10821_v27, -inf }
 0x5f6   :  { %v3080_v26 = vpop.permute.xlu0 %3079  ;;  %4220 = vmax.xlane.f32.xlu1 %v4219_v42  ;;  %v2800_v42 = vpop.f32.mrf.mxu1 }
 0x5f7   :  { %v3097_v0 = vsel %vm1713_vm1, %v3080_v26, 0 }
 0x5f8   :  { %v10828_v28 = vand.u32 4294901760, %v3097_v0 }
 0x5fa   :  { %v3181_v58 = vsub.f32 %v3097_v0, %v10828_v28 }
 0x5fb   :  { %3073 = vrot.lane.b32.xlu0 %v10681_v60, %s8735_s2 }
 0x5fc   :  { %v3182_v32 = vand.u32 4294901760, %v3181_v58 }
 0x5fe   :  { %v3078_v46 = vpop.permute.xlu0 %3077  ;;  %v3183_v44 = vsub.f32 %v3181_v58, %v3182_v32 }
 0x5ff   :  { %v3095_v53 = vsel %vm1713_vm1, %v3078_v46, 0  ;;  %v2801_v46 = vadd.f32 %v2800_v42, %v2772_v11 }
 0x600   :  { %v3129_v55 = vand.u32 4294901760, %v3095_v53  ;;  %v3184_v63 = vand.u32 4294901760, %v3183_v44 }
 0x601   :  { %v2803_v52 = vmul.f32 0.35355338, %v2801_v46 }
 0x602   :  { %v3187_v37 = vsub.f32 %v3095_v53, %v3129_v55 }
 0x604   :  { %v3188_v0 = vand.u32 4294901760, %v3187_v37 }
 0x606   :  { %v3076_v25 = vpop.permute.xlu0 %3075  ;;  %v3189_v53 = vsub.f32 %v3187_v37, %v3188_v0 }
 0x607   :  { %v3093_v6 = vsel %vm1713_vm1, %v3076_v25, 0 }
 0x608   :  { %v3131_v23 = vand.u32 4294901760, %v3093_v6 }
 0x60a   :  { %v3082_v34 = vpop.permute.xlu1 %3081  ;;  %v3193_v18 = vsub.f32 %v3093_v6, %v3131_v23 }
 0x60b   :  { %v3099_v56 = vsel %vm1713_vm1, %v3082_v34, 0  ;;  %v10837_v34 = vadd.f32 %v2803_v52, %v10339_v16 }
 0x60c   :  { %v3125_v54 = vand.u32 4294901760, %v3099_v56  ;;  %v3194_v25 = vand.u32 4294901760, %v3193_v18 }
 0x60d   :  { %13388 = vst [vmem:[#allocation31_spill] sm:$0xff] %v10837_v34  ;;  %v3908_v19 = vsel %vm3898_vm2, %v10837_v34, -inf }
 0x60e   :  { %v3175_v47 = vsub.f32 %v3099_v56, %v3125_v54  ;;  %3126 = vmatpush.xpose.msra.mxu0 %v3125_v54  ;;  %3258 = vmatpush.xpose.msra.mxu3 %v3125_v54  ;;  %v3190_v56 = vand.u32 4294901760, %v3189_v53  ;;  %v3195_v15 = vsub.f32 %v3193_v18, %v3194_v25 }
 0x610   :  { %3225 = vmatpush.xpose.msra.mxu2 %v3175_v47  ;;  %v3176_v40 = vand.u32 4294901760, %v3175_v47 }
 0x612   :  { %3128 = vmatpush.xpose.msra.mxu0 %v10828_v28  ;;  %3260 = vmatpush.xpose.msra.mxu3 %v10828_v28  ;;  %v3177_v26 = vsub.f32 %v3175_v47, %v3176_v40 }
 0x614   :  { %3228 = vmatpush.xpose.msra.mxu2 %v3181_v58  ;;  %v3178_v38 = vand.u32 4294901760, %v3177_v26  ;;  %v3196_v58 = vand.u32 4294901760, %v3195_v15  ;;  %v2963_v15 = vpop.f32.mrf.mxu0 }
 0x616   :  { %3130 = vmatpush.xpose.msra.mxu0 %v3129_v55  ;;  %3179 = vmatpush.xpose.msra.mxu1 %v3178_v38 }
 0x617   :  { %3262 = vmatpush.xpose.msra.mxu3 %v3129_v55 }
 0x618   :  { %3231 = vmatpush.xpose.msra.mxu2 %v3187_v37 }
 0x61a   :  { %3132 = vmatpush.xpose.msra.mxu0 %v3131_v23  ;;  %3185 = vmatpush.xpose.msra.mxu1 %v3184_v63 }
 0x61b   :  { %3264 = vmatpush.xpose.msra.mxu3 %v3131_v23 }
 0x61c   :  { %3234 = vmatpush.xpose.msra.mxu2 %v3193_v18 }
 0x61e   :  { %3283 = vmatpush.xpose.msrb.mxu0 %v3152_v29  ;;  %3191 = vmatpush.xpose.msra.mxu1 %v3190_v56  ;;  %v2864_v56 = vpop.f32.mrf.mxu2 }
 0x622   :  { %3287 = vmatpush.xpose.msrb.mxu0 %v3158_v12  ;;  %3197 = vmatpush.xpose.msra.mxu1 %v3196_v58 }
 0x625   :  { %3909 = vmax.xlane.f32.xlu0 %v3908_v19 }
 0x626   :  { %3291 = vmatpush.xpose.msrb.mxu0 %v3164_v59  ;;  %3326 = vmatpush.xpose.msrb.mxu1 %v10775_v8  ;;  %v4027_v48 = vpop.xlane.xlu2 %4026 }
 0x627   :  { %vm4045_vm9 = vcmp.ge.f32.partialorder %v10761_v10, %v4027_v48 }
 0x62a   :  { %3295 = vmatpush.xpose.msrb.mxu0 %v3170_v7  ;;  %3328 = vmatpush.xpose.msrb.mxu1 %v10766_v45 }
 0x62e   :  { %3299 = vmatpush.xpose.msrb.mxu0 %v3176_v40  ;;  %3330 = vmatpush.xpose.msrb.mxu1 %v10773_v50  ;;  %v4053_v50 = vsel %vm4045_vm9, -1e+30, %v10761_v10 }
 0x62f   :  { %v4065_v24 = vsel %vm3898_vm2, %v4053_v50, -inf }
 0x632   :  { %3303 = vmatpush.xpose.msrb.mxu0 %v3182_v32  ;;  %3332 = vmatpush.xpose.msrb.mxu1 %v10786_v35 }
 0x636   :  { %3307 = vmatpush.xpose.msrb.mxu0 %v3188_v0  ;;  %3334 = vmatpush.xpose.msrb.mxu1 %v3125_v54 }
 0x63a   :  { %3311 = vmatpush.xpose.msrb.mxu0 %v3194_v25  ;;  %3336 = vmatpush.xpose.msrb.mxu1 %v10828_v28  ;;  %v2925_v25 = vpop.f32.mrf.mxu3 }
 0x63b   :  { %v2926_v19 = vadd.f32 %v2925_v25, %v2864_v56 }
 0x63d   :  { %v2964_v58 = vadd.f32 %v2963_v15, %v2926_v19 }
 0x63e   :  { %3338 = vmatpush.xpose.msrb.mxu1 %v3129_v55 }
 0x642   :  { %3340 = vmatpush.xpose.msrb.mxu1 %v3131_v23 }
 0x65a   :  { %v4184_v16 = vpop.xlane.xlu0 %4183 }
 0x65b   :  { %vm4204_vm8 = vcmp.ge.f32.partialorder %v10817_v5, %v4184_v16  ;;  %v2994_v16 = vpop.f32.mrf.mxu1 }
 0x65c   :  { %v4212_v8 = vsel %vm4204_vm8, -1e+30, %v10817_v5  ;;  %v2995_v48 = vadd.f32 %v2994_v16, %v2964_v58 }
 0x65d   :  { %v4222_v45 = vsel %vm3898_vm2, %v4212_v8, -inf }
 0x65e   :  { %4223 = vmax.xlane.f32.xlu2 %v4222_v45 }
 0x666   :  { %4066 = vmax.xlane.f32.xlu2 %v4065_v24 }
 0x669   :  { %v4221_v29 = vpop.xlane.xlu1 %4220 }
 0x66a   :  { %vm4243_vm10 = vcmp.ge.f32.partialorder %v10821_v27, %v4221_v29 }
 0x66b   :  { %v4251_v1 = vsel %vm4243_vm10, -1e+30, %v10821_v27 }
 0x66c   :  { %v4259_v7 = vsel %vm3898_vm2, %v4251_v1, -inf }
 0x66d   :  { %v3074_v3 = vpop.permute.xlu0 %3073  ;;  %4260 = vmax.xlane.f32.xlu1 %v4259_v7 }
 0x66e   :  { %v3091_v35 = vsel %vm1713_vm1, %v3074_v3, 0 }
 0x66f   :  { %v3133_v12 = vand.u32 4294901760, %v3091_v35 }
 0x671   :  { %v3134_v59 = vsub.f32 %v3091_v35, %v3133_v12  ;;  %3199 = vmatmul.f32.vlgmr.msra.gmra.mxu1 %v3133_v12  ;;  %v10893_v35 = vld [vmem:[%s13044_s3 + $0x8] sm:$0xff] }
 0x673   :  { %v3135_v5 = vand.u32 4294901760, %v3134_v59  ;;  %3237 = vmatmul.f32.vlgmr.msra.gmra.mxu2 %v3134_v59 }
 0x675   :  { %v3136_v10 = vsub.f32 %v3134_v59, %v3135_v5  ;;  %3268 = vmatmul.f32.vlgmr.msra.gmra.mxu3 %v3135_v5 }
 0x677   :  { %v3137_v28 = vand.u32 4294901760, %v3136_v10 }
 0x679   :  { %3138 = vmatmul.f32.vlgmr.msra.gmra.mxu0 %v3137_v28  ;;  %3342 = vmatmul.f32.vlgmr.msrb.gmra.mxu1 %v3133_v12 }
 0x681   :  { %3313 = vmatmul.f32.vlgmr.msrb.gmra.mxu0 %v3133_v12 }
 0x698   :  { %v10864_v55 = vpop.xlane.xlu0 %3909 }
 0x699   :  { %13389 = vst [vmem:[#allocation33_spill] sm:$0xff] %v10864_v55  ;;  %vm3926_vm11 = vcmp.ge.f32.partialorder %v10837_v34, %v10864_v55 }
 0x69a   :  { %v3934_v27 = vsel %vm3926_vm11, -1e+30, %v10837_v34 }
 0x69b   :  { %v3948_v54 = vsel %vm3898_vm2, %v3934_v27, -inf }
 0x69c   :  { %3949 = vmax.xlane.f32.xlu1 %v3948_v54 }
 0x6d1   :  { %v4224_v22 = vpop.xlane.xlu2 %4223 }
 0x6d2   :  { %vm4244_vm12 = vcmp.ge.f32.partialorder %v4212_v8, %v4224_v22 }
 0x6d3   :  { %v4252_v6 = vsel %vm4244_vm12, -1e+30, %v4212_v8  ;;  %v3039_v8 = vpop.f32.mrf.mxu2 }
 0x6d4   :  { %v4262_v47 = vsel %vm3898_vm2, %v4252_v6, -inf  ;;  %v3040_v45 = vadd.f32 %v3039_v8, %v2995_v48 }
 0x6d5   :  { %4263 = vmax.xlane.f32.xlu2 %v4262_v47 }
 0x6d9   :  { %v4067_v11 = vpop.xlane.xlu2 %4066 }
 0x6da   :  { %vm4085_vm13 = vcmp.ge.f32.partialorder %v4053_v50, %v4067_v11 }
 0x6db   :  { %v4093_v37 = vsel %vm4085_vm13, -1e+30, %v4053_v50  ;;  %v3068_v50 = vpop.f32.mrf.mxu3 }
 0x6dc   :  { %v4105_v23 = vsel %vm3898_vm2, %v4093_v37, -inf  ;;  %v3069_v24 = vadd.f32 %v3068_v50, %v3040_v45 }
 0x6dd   :  { %4106 = vmax.xlane.f32.xlu2 %v4105_v23 }
 0x6de   :  { %v3071_v3 = vmul.f32 0.35355338, %v3069_v24 }
 0x6e0   :  { %v4261_v40 = vpop.xlane.xlu1 %4260  ;;  %v10896_v29 = vadd.f32 %v10893_v35, %v3071_v3 }
 0x6e1   :  { %vm4283_vm15 = vcmp.ge.f32.partialorder %v4251_v1, %v4261_v40 }
 0x6e2   :  { %v4291_v46 = vsel %vm4283_vm15, -1e+30, %v4251_v1  ;;  %13390 = vst [vmem:[#allocation27_spill] sm:$0xff] %v10896_v29  ;;  %v3911_v12 = vsel %vm3898_vm2, %v10896_v29, -inf }
 0x6e3   :  { %v4299_v18 = vsel %vm3898_vm2, %v4291_v46, -inf }
 0x6ee   :  { %v3200_v56 = vpop.f32.mrf.mxu1 }
 0x6f6   :  { %v3139_v25 = vpop.f32.mrf.mxu0  ;;  %v3238_v19 = vpop.f32.mrf.mxu2 }
 0x6f7   :  { %v3201_v15 = vadd.f32 %v3200_v56, %v3139_v25  ;;  %v3343_v50 = vpop.f32.mrf.mxu1 }
 0x6f8   :  { %v3269_v16 = vpop.f32.mrf.mxu3 }
 0x6f9   :  { %v3239_v58 = vadd.f32 %v3238_v19, %v3201_v15 }
 0x6fb   :  { %v3270_v8 = vadd.f32 %v3269_v16, %v3239_v58 }
 0x6fe   :  { %v3314_v48 = vpop.f32.mrf.mxu0 }
 0x6ff   :  { %v3315_v45 = vadd.f32 %v3314_v48, %v3270_v8 }
 0x701   :  { %v3344_v24 = vadd.f32 %v3343_v50, %v3315_v45 }
 0x703   :  { %v3346_v3 = vmul.f32 0.35355338, %v3344_v24 }
 0x70f   :  { %v3950_v32 = vpop.xlane.xlu1 %3949 }
 0x710   :  { %vm3966_vm14 = vcmp.ge.f32.partialorder %v3934_v27, %v3950_v32 }
 0x711   :  { %v3974_v42 = vsel %vm3966_vm14, -1e+30, %v3934_v27 }
 0x712   :  { %v3988_v26 = vsel %vm3898_vm2, %v3974_v42, -inf }
 0x713   :  { %3989 = vmax.xlane.f32.xlu1 %v3988_v26 }
 0x71b   :  { %4300 = vmax.xlane.f32.xlu1 %v4299_v18 }
 0x734   :  { %3362 = vrot.lane.b32.xlu1 %v10475_v30, %s8736_s15 }
 0x73c   :  { %3358 = vrot.lane.b32.xlu1 %v10503_v62, %s8736_s15 }
 0x744   :  { %3354 = vrot.lane.b32.xlu1 %v10548_v51, %s8736_s15 }
 0x748   :  { %v4264_v38 = vpop.xlane.xlu2 %4263 }
 0x749   :  { %vm4284_vm4 = vcmp.ge.f32.partialorder %v4252_v6, %v4264_v38 }
 0x74a   :  { %v4292_v63 = vsel %vm4284_vm4, -1e+30, %v4252_v6 }
 0x74b   :  { %v4302_v53 = vsel %vm3898_vm2, %v4292_v63, -inf }
 0x74c   :  { %3352 = vrot.lane.b32.xlu1 %v13368_v4, %s8736_s15 }
 0x750   :  { %v4107_v44 = vpop.xlane.xlu2 %4106 }
 0x751   :  { %vm4125_vm3 = vcmp.ge.f32.partialorder %v4093_v37, %v4107_v44 }
 0x752   :  { %v4133_v0 = vsel %vm4125_vm3, -1e+30, %v4093_v37 }
 0x753   :  { %v4145_v52 = vsel %vm3898_vm2, %v4133_v0, -inf }
 0x754   :  { %4146 = vmax.xlane.f32.xlu2 %v4145_v52  ;;  %3350 = vrot.lane.b32.xlu1 %v13371_v49, %s8736_s15 }
 0x75c   :  { %4303 = vmax.xlane.f32.xlu2 %v4302_v53  ;;  %3348 = vrot.lane.b32.xlu1 %v10681_v60, %s8736_s15 }
 0x774   :  { %3364 = vrot.lane.b32.xlu2 %v10467_v39, %s8736_s15 }
 0x786   :  { %3912 = vmax.xlane.f32.xlu1 %v3911_v12  ;;  %v3990_v1 = vpop.xlane.xlu1 %3989 }
 0x787   :  { %vm4006_vm5 = vcmp.ge.f32.partialorder %v3974_v42, %v3990_v1 }
 0x788   :  { %v4014_v59 = vsel %vm4006_vm5, -1e+30, %v3974_v42 }
 0x789   :  { %v4028_v7 = vsel %vm3898_vm2, %v4014_v59, -inf }
 0x78a   :  { %4029 = vmax.xlane.f32.xlu0 %v4028_v7 }
 0x78e   :  { %v4301_v5 = vpop.xlane.xlu1 %4300 }
 0x78f   :  { %vm4323_vm6 = vcmp.ge.f32.partialorder %v4291_v46, %v4301_v5  ;;  %v10948_v5 = vadd.f32 %v10893_v35, %v3346_v3 }
 0x790   :  { %v10903_v10 = vsel %vm4323_vm6, -1e+30, %v4291_v46 }
 0x791   :  { %v4339_v27 = vsel %vm3898_vm2, %v10903_v10, -inf  ;;  %13391 = vst [vmem:[#allocation30_spill] sm:$0xff] %v10948_v5 }
 0x79e   :  { %3360 = vrot.lane.b32.xlu0 %v10492_v14, %s8736_s15 }
 0x7a6   :  { %v3363_v6 = vpop.permute.xlu1 %3362 }
 0x7a7   :  { %v3380_v37 = vsel %vm1713_vm1, %v3363_v6, 0 }
 0x7a8   :  { %v10916_v40 = vand.u32 4294901760, %v3380_v37 }
 0x7aa   :  { %v10920_v26 = vsub.f32 %v3380_v37, %v10916_v40 }
 0x7ac   :  { %v13112_v44 = vand.u32 4294901760, %v10920_v26 }
 0x7c7   :  { %v4147_v28 = vpop.xlane.xlu2 %4146 }
 0x7c8   :  { %vm4165_vm7 = vcmp.ge.f32.partialorder %v4133_v0, %v4147_v28  ;;  %4340 = vmax.xlane.f32.xlu0 %v4339_v27  ;;  %v3914_v28 = vsel %vm3898_vm2, %v10948_v5, -inf  ;;  %v3359_v27 = vpop.permute.xlu1 %3358 }
 0x7c9   :  { %v10907_v54 = vsel %vm4165_vm7, -1e+30, %v4133_v0 }
 0x7ca   :  { %v4185_v22 = vsel %vm3898_vm2, %v10907_v54, -inf }
 0x7cb   :  { %4186 = vmax.xlane.f32.xlu2 %v4185_v22  ;;  %v3376_v22 = vsel %vm1713_vm1, %v3359_v27, 0 }
 0x7cc   :  { %v10953_v6 = vand.u32 4294901760, %v3376_v22 }
 0x7ce   :  { %v10957_v37 = vsub.f32 %v3376_v22, %v10953_v6 }
 0x7cf   :  { %v4304_v47 = vpop.xlane.xlu2 %4303 }
 0x7d0   :  { %vm4324_vm8 = vcmp.ge.f32.partialorder %v4292_v63, %v4304_v47 }
 0x7d1   :  { %v10911_v11 = vsel %vm4324_vm8, -1e+30, %v4292_v63  ;;  %v3434_v63 = vsub.f32 %v10920_v26, %v13112_v44 }
 0x7d2   :  { %v4342_v23 = vsel %vm3898_vm2, %v10911_v11, -inf }
 0x7d3   :  { %4343 = vmax.xlane.f32.xlu1 %v4342_v23  ;;  %v3435_v53 = vand.u32 4294901760, %v3434_v63 }
 0x7d7   :  { %v3365_v32 = vpop.permute.xlu2 %3364 }
 0x7d8   :  { %v3382_v42 = vsel %vm1713_vm1, %v3365_v32, 0 }
 0x7d9   :  { %v10922_v46 = vand.u32 4294901760, %v3382_v42 }
 0x7db   :  { %v10925_v18 = vsub.f32 %v3382_v42, %v10922_v46  ;;  %3393 = vmatpush.xpose.msrb.mxu2 %v10922_v46  ;;  %3525 = vmatpush.xpose.msra.mxu1 %v10922_v46 }
 0x7dc   :  { %3356 = vrot.lane.b32.xlu0 %v10526_v9, %s8736_s15 }
 0x7dd   :  { %v3427_v38 = vand.u32 4294901760, %v10925_v18  ;;  %3488 = vmatpush.xpose.msra.mxu0 %v10925_v18 }
 0x7df   :  { %v3428_v0 = vsub.f32 %v10925_v18, %v3427_v38  ;;  %3395 = vmatpush.xpose.msrb.mxu2 %v10916_v40  ;;  %3527 = vmatpush.xpose.msra.mxu1 %v10916_v40  ;;  %v13395_v18 = vand.u32 4294901760, %v10957_v37 }
 0x7e1   :  { %3491 = vmatpush.xpose.msra.mxu0 %v10920_v26  ;;  %v3429_v52 = vand.u32 4294901760, %v3428_v0  ;;  %v13110_v0 = vand.u32 4294901760, %v10957_v37 }
 0x7e3   :  { %3430 = vmatpush.xpose.msrb.mxu3 %v3429_v52  ;;  %v3355_v52 = vpop.permute.xlu1 %3354  ;;  %v3446_v25 = vsub.f32 %v10957_v37, %v13110_v0 }
 0x7e5   :  { %v3447_v56 = vand.u32 4294901760, %v3446_v25 }
 0x7e7   :  { %3436 = vmatpush.xpose.msrb.mxu3 %v3435_v53 }
 0x7eb   :  { %v3353_v15 = vpop.permute.xlu1 %3352 }
 0x7f3   :  { %v3351_v19 = vpop.permute.xlu1 %3350 }
 0x7fb   :  { %v3349_v58 = vpop.permute.xlu1 %3348 }
 0x7fc   :  { %v3366_v22 = vsel %vm1713_vm1, %v3349_v58, 0 }
 0x7fd   :  { %v4030_v12 = vpop.xlane.xlu0 %4029 }
 0x7fe   :  { %vm4046_vm9 = vcmp.ge.f32.partialorder %v4014_v59, %v4030_v12  ;;  %v3372_v12 = vsel %vm1713_vm1, %v3355_v52, 0 }
 0x7ff   :  { %v10943_v1 = vsel %vm4046_vm9, -1e+30, %v4014_v59  ;;  %v11000_v27 = vand.u32 4294901760, %v3372_v12 }
 0x800   :  { %v4068_v7 = vsel %vm3898_vm2, %v10943_v1, -inf }
 0x801   :  { %4069 = vmax.xlane.f32.xlu2 %v4068_v7 }
 0x803   :  { %v10979_v48 = vpop.xlane.xlu1 %3912 }
 0x804   :  { %13392 = vst [vmem:[#allocation34_spill] sm:$0xff] %v10979_v48  ;;  %vm3927_vm11 = vcmp.ge.f32.partialorder %v10896_v29, %v10979_v48 }
 0x805   :  { %v10989_v50 = vsel %vm3927_vm11, -1e+30, %v10896_v29 }
 0x806   :  { %3915 = vmax.xlane.f32.xlu0 %v3914_v28  ;;  %v3951_v3 = vsel %vm3898_vm2, %v10989_v50, -inf }
 0x810   :  { %v3361_v47 = vpop.permute.xlu0 %3360 }
 0x811   :  { %v3378_v59 = vsel %vm1713_vm1, %v3361_v47, 0  ;;  %v3370_v47 = vsel %vm1713_vm1, %v3353_v15, 0 }
 0x812   :  { %v10959_v23 = vand.u32 4294901760, %v3378_v59  ;;  %v11012_v25 = vand.u32 4294901760, %v3370_v47 }
 0x814   :  { %v10962_v32 = vsub.f32 %v3378_v59, %v10959_v23  ;;  %3397 = vmatpush.xpose.msrb.mxu2 %v10959_v23  ;;  %3529 = vmatpush.xpose.msra.mxu1 %v10959_v23 }
 0x816   :  { %3494 = vmatpush.xpose.msra.mxu0 %v10962_v32  ;;  %v13111_v42 = vand.u32 4294901760, %v10962_v32 }
 0x818   :  { %3399 = vmatpush.xpose.msrb.mxu2 %v10953_v6  ;;  %3531 = vmatpush.xpose.msra.mxu1 %v10953_v6  ;;  %v3440_v63 = vsub.f32 %v10962_v32, %v13111_v42 }
 0x81a   :  { %3497 = vmatpush.xpose.msra.mxu0 %v10957_v37  ;;  %v3441_v53 = vand.u32 4294901760, %v3440_v63  ;;  %v11005_v63 = vand.u32 4294901760, %v3366_v22 }
 0x81c   :  { %3442 = vmatpush.xpose.msrb.mxu3 %v3441_v53  ;;  %v3456_v53 = vsub.f32 %v3372_v12, %v11000_v27 }
 0x81e   :  { %v3457_v12 = vand.u32 4294901760, %v3456_v53 }
 0x820   :  { %3448 = vmatpush.xpose.msrb.mxu3 %v3447_v56 }
 0x83b   :  { %v4341_v16 = vpop.xlane.xlu0 %4340 }
 0x83c   :  { %vm4363_vm10 = vcmp.ge.f32.partialorder %v10903_v10, %v4341_v16  ;;  %v3368_v16 = vsel %vm1713_vm1, %v3351_v19, 0 }
 0x83d   :  { %v10982_v8 = vsel %vm4363_vm10, -1e+30, %v10903_v10 }
 0x83e   :  { %v4379_v45 = vsel %vm3898_vm2, %v10982_v8, -inf  ;;  %v4187_v7 = vpop.xlane.xlu2 %4186 }
 0x83f   :  { %4380 = vmax.xlane.f32.xlu0 %v4379_v45  ;;  %vm4205_vm13 = vcmp.ge.f32.partialorder %v10907_v54, %v4187_v7  ;;  %v3409_v45 = vsub.f32 %v3366_v22, %v11005_v63 }
 0x840   :  { %v11009_v52 = vsel %vm4205_vm13, -1e+30, %v10907_v54  ;;  %v3406_v54 = vand.u32 4294901760, %v3368_v16 }
 0x841   :  { %v4225_v15 = vsel %vm3898_vm2, %v11009_v52, -inf  ;;  %v3410_v7 = vand.u32 4294901760, %v3409_v45 }
 0x843   :  { %v3411_v22 = vsub.f32 %v3409_v45, %v3410_v7 }
 0x845   :  { %v3412_v44 = vand.u32 4294901760, %v3411_v22 }
 0x846   :  { %v4344_v24 = vpop.xlane.xlu1 %4343 }
 0x847   :  { %vm4364_vm12 = vcmp.ge.f32.partialorder %v10911_v11, %v4344_v24  ;;  %3952 = vmax.xlane.f32.xlu0 %v3951_v3  ;;  %v3462_v24 = vsub.f32 %v3370_v47, %v11012_v25 }
 0x848   :  { %v10995_v10 = vsel %vm4364_vm12, -1e+30, %v10911_v11 }
 0x849   :  { %v4382_v28 = vsel %vm3898_vm2, %v10995_v10, -inf  ;;  %v3463_v0 = vand.u32 4294901760, %v3462_v24 }
 0x84a   :  { %4383 = vmax.xlane.f32.xlu2 %v4382_v28  ;;  %v3468_v28 = vsub.f32 %v3368_v16, %v3406_v54 }
 0x84c   :  { %v3469_v42 = vand.u32 4294901760, %v3468_v28 }
 0x84e   :  { %v3357_v59 = vpop.permute.xlu0 %3356  ;;  %v3470_v16 = vsub.f32 %v3468_v28, %v3469_v42 }
 0x84f   :  { %v3374_v11 = vsel %vm1713_vm1, %v3357_v59, 0 }
 0x850   :  { %v3400_v56 = vand.u32 4294901760, %v3374_v11 }
 0x852   :  { %v3450_v58 = vsub.f32 %v3374_v11, %v3400_v56  ;;  %3401 = vmatpush.xpose.msrb.mxu2 %v3400_v56  ;;  %3533 = vmatpush.xpose.msra.mxu1 %v3400_v56  ;;  %v3458_v11 = vsub.f32 %v3456_v53, %v3457_v12 }
 0x853   :  { %4226 = vmax.xlane.f32.xlu2 %v4225_v15  ;;  %v3464_v15 = vsub.f32 %v3462_v24, %v3463_v0 }
 0x854   :  { %3500 = vmatpush.xpose.msra.mxu0 %v3450_v58  ;;  %v3451_v3 = vand.u32 4294901760, %v3450_v58  ;;  %v3459_v47 = vand.u32 4294901760, %v3458_v11 }
 0x856   :  { %3403 = vmatpush.xpose.msrb.mxu2 %v11000_v27  ;;  %3535 = vmatpush.xpose.msra.mxu1 %v11000_v27  ;;  %v3452_v19 = vsub.f32 %v3450_v58, %v3451_v3  ;;  %v13393_v58 = vand.u32 4294901760, %v10920_v26 }
 0x858   :  { %3503 = vmatpush.xpose.msra.mxu0 %v3456_v53  ;;  %v3453_v59 = vand.u32 4294901760, %v3452_v19  ;;  %v3465_v53 = vand.u32 4294901760, %v3464_v15  ;;  %v3471_v19 = vand.u32 4294901760, %v3470_v16 }
 0x85a   :  { %3405 = vmatpush.xpose.msrb.mxu2 %v11012_v25  ;;  %3454 = vmatpush.xpose.msrb.mxu3 %v3453_v59 }
 0x85b   :  { %3537 = vmatpush.xpose.msra.mxu1 %v11012_v25 }
 0x85c   :  { %3506 = vmatpush.xpose.msra.mxu0 %v3462_v24  ;;  %v13394_v24 = vand.u32 4294901760, %v10962_v32 }
 0x85e   :  { %3407 = vmatpush.xpose.msrb.mxu2 %v3406_v54  ;;  %3460 = vmatpush.xpose.msrb.mxu3 %v3459_v47 }
 0x85f   :  { %3539 = vmatpush.xpose.msra.mxu1 %v3406_v54 }
 0x860   :  { %3509 = vmatpush.xpose.msra.mxu0 %v3468_v28 }
 0x861   :  { %3413 = vmatmul.f32.vlgmr.msrb.gmra.mxu2 %v3412_v44 }
 0x862   :  { %3558 = vmatpush.xpose.msra.mxu2 %v3427_v38  ;;  %3543 = vmatmul.f32.vlgmr.msra.gmra.mxu1 %v3410_v7 }
 0x863   :  { %3466 = vmatpush.xpose.msrb.mxu3 %v3465_v53  ;;  %3512 = vmatmul.f32.vlgmr.msra.gmra.mxu0 %v3409_v45 }
 0x866   :  { %3562 = vmatpush.xpose.msra.mxu2 %v13393_v58 }
 0x867   :  { %3472 = vmatpush.xpose.msrb.mxu3 %v3471_v19 }
 0x86a   :  { %3566 = vmatpush.xpose.msra.mxu2 %v13394_v24  ;;  %3474 = vmatmul.f32.vlgmr.msrb.gmra.mxu3 %v11005_v63 }
 0x86b   :  { %3601 = vmatpush.xpose.msra.mxu3 %v10922_v46 }
 0x86e   :  { %3570 = vmatpush.xpose.msra.mxu2 %v13395_v18 }
 0x86f   :  { %3603 = vmatpush.xpose.msra.mxu3 %v10916_v40 }
 0x872   :  { %3574 = vmatpush.xpose.msra.mxu2 %v3451_v3 }
 0x873   :  { %3605 = vmatpush.xpose.msra.mxu3 %v10959_v23 }
 0x874   :  { %v4070_v26 = vpop.xlane.xlu2 %4069 }
 0x875   :  { %vm4086_vm14 = vcmp.ge.f32.partialorder %v10943_v1, %v4070_v26 }
 0x876   :  { %3578 = vmatpush.xpose.msra.mxu2 %v3457_v12  ;;  %v4094_v38 = vsel %vm4086_vm14, -1e+30, %v10943_v1 }
 0x877   :  { %3607 = vmatpush.xpose.msra.mxu3 %v10953_v6  ;;  %v4108_v46 = vsel %vm3898_vm2, %v4094_v38, -inf }
 0x878   :  { %4109 = vmax.xlane.f32.xlu2 %v4108_v46 }
 0x879   :  { %v11039_v44 = vpop.xlane.xlu0 %3915 }
 0x87a   :  { %3582 = vmatpush.xpose.msra.mxu2 %v3463_v0  ;;  %13396 = vst [vmem:[#allocation32_spill] sm:$0xff] %v11039_v44  ;;  %vm3928_vm15 = vcmp.ge.f32.partialorder %v10948_v5, %v11039_v44 }
 0x87b   :  { %3609 = vmatpush.xpose.msra.mxu3 %v3400_v56  ;;  %v3936_v40 = vsel %vm3928_vm15, -1e+30, %v10948_v5  ;;  %v13446_v5 = vld [vmem:[#allocation65_spill] sm:$0xff] }
 0x87c   :  { %v3954_v6 = vsel %vm3898_vm2, %v3936_v40, -inf }
 0x87d   :  { %3955 = vmax.xlane.f32.xlu0 %v3954_v6 }
 0x87e   :  { %3586 = vmatpush.xpose.msra.mxu2 %v3469_v42 }
 0x87f   :  { %3611 = vmatpush.xpose.msra.mxu3 %v11000_v27 }
 0x881   :  { %3588 = vmatmul.f32.vlgmr.msra.gmra.mxu2 %v11005_v63 }
 0x883   :  { %3613 = vmatpush.xpose.msra.mxu3 %v11012_v25 }
 0x887   :  { %3615 = vmatpush.xpose.msra.mxu3 %v3406_v54 }
 0x88a   :  { %3617 = vmatmul.f32.vlgmr.msra.gmra.mxu3 %v11005_v63 }
 0x8b2   :  { %v4381_v37 = vpop.xlane.xlu0 %4380 }
 0x8b3   :  { %vm4403_vm8 = vcmp.ge.f32.partialorder %v10982_v8, %v4381_v37 }
 0x8b4   :  { %v4411_v7 = vsel %vm4403_vm8, -1e+30, %v10982_v8 }
 0x8ba   :  { %v3953_v32 = vpop.xlane.xlu0 %3952 }
 0x8bb   :  { %vm3967_vm4 = vcmp.ge.f32.partialorder %v10989_v50, %v3953_v32 }
 0x8bc   :  { %v3975_v27 = vsel %vm3967_vm4, -1e+30, %v10989_v50 }
 0x8bd   :  { %v4384_v1 = vpop.xlane.xlu2 %4383  ;;  %v3991_v25 = vsel %vm3898_vm2, %v3975_v27, -inf }
 0x8be   :  { %vm4404_vm5 = vcmp.ge.f32.partialorder %v10995_v10, %v4384_v1 }
 0x8bf   :  { %v4412_v63 = vsel %vm4404_vm5, -1e+30, %v10995_v10  ;;  %v4419_v10 = vsel %vm3898_vm2, %v4411_v7, -inf }
 0x8c0   :  { %v4422_v56 = vsel %vm3898_vm2, %v4412_v63, -inf }
 0x8c6   :  { %v4227_v23 = vpop.xlane.xlu2 %4226 }
 0x8c7   :  { %vm4245_vm3 = vcmp.ge.f32.partialorder %v11009_v52, %v4227_v23 }
 0x8c8   :  { %v4253_v42 = vsel %vm4245_vm3, -1e+30, %v11009_v52 }
 0x8c9   :  { %v4265_v0 = vsel %vm3898_vm2, %v4253_v42, -inf }
 0x8ca   :  { %4266 = vmax.xlane.f32.xlu2 %v4265_v0 }
 0x8d2   :  { %3992 = vmax.xlane.f32.xlu2 %v3991_v25 }
 0x8da   :  { %4423 = vmax.xlane.f32.xlu2 %v4422_v56 }
 0x8eb   :  { %v4110_v45 = vpop.xlane.xlu2 %4109 }
 0x8ec   :  { %vm4126_vm6 = vcmp.ge.f32.partialorder %v4094_v38, %v4110_v45 }
 0x8ed   :  { %v4134_v52 = vsel %vm4126_vm6, -1e+30, %v4094_v38 }
 0x8ee   :  { %v4148_v54 = vsel %vm3898_vm2, %v4134_v52, -inf }
 0x8ef   :  { %4149 = vmax.xlane.f32.xlu1 %v4148_v54 }
 0x8f0   :  { %v3956_v3 = vpop.xlane.xlu0 %3955 }
 0x8f1   :  { %vm3968_vm7 = vcmp.ge.f32.partialorder %v3936_v40, %v3956_v3 }
 0x8f2   :  { %v3976_v12 = vsel %vm3968_vm7, -1e+30, %v3936_v40 }
 0x8f3   :  { %v3994_v50 = vsel %vm3898_vm2, %v3976_v12, -inf }
 0x8f4   :  { %3995 = vmax.xlane.f32.xlu0 %v3994_v50 }
 0x8fc   :  { %4420 = vmax.xlane.f32.xlu0 %v4419_v10 }
 0x93d   :  { %v4267_v28 = vpop.xlane.xlu2 %4266 }
 0x93e   :  { %vm4285_vm9 = vcmp.ge.f32.partialorder %v4253_v42, %v4267_v28 }
 0x93f   :  { %v4293_v59 = vsel %vm4285_vm9, -1e+30, %v4253_v42 }
 0x940   :  { %v4305_v11 = vsel %vm3898_vm2, %v4293_v59, -inf }
 0x941   :  { %4306 = vmax.xlane.f32.xlu2 %v4305_v11 }
 0x945   :  { %v3993_v22 = vpop.xlane.xlu2 %3992 }
 0x946   :  { %vm4007_vm10 = vcmp.ge.f32.partialorder %v3975_v27, %v3993_v22 }
 0x947   :  { %v4015_v47 = vsel %vm4007_vm10, -1e+30, %v3975_v27 }
 0x948   :  { %v4031_v15 = vsel %vm3898_vm2, %v4015_v47, -inf }
 0x949   :  { %4032 = vmax.xlane.f32.xlu1 %v4031_v15 }
 0x94d   :  { %v4424_v26 = vpop.xlane.xlu2 %4423 }
 0x94e   :  { %vm4444_vm14 = vcmp.ge.f32.partialorder %v4412_v63, %v4424_v26 }
 0x94f   :  { %v11082_v38 = vsel %vm4444_vm14, -1e+30, %v4412_v63 }
 0x950   :  { %v4462_v46 = vsel %vm3898_vm2, %v11082_v38, -inf }
 0x959   :  { %3639 = vrot.lane.b32.xlu2 %v10467_v39, %s8737_s18 }
 0x962   :  { %3637 = vrot.lane.b32.xlu1 %v10475_v30, %s8737_s18  ;;  %v4150_v8 = vpop.xlane.xlu1 %4149 }
 0x963   :  { %vm4166_vm11 = vcmp.ge.f32.partialorder %v4134_v52, %v4150_v8 }
 0x964   :  { %v11069_v53 = vsel %vm4166_vm11, -1e+30, %v4134_v52 }
 0x965   :  { %v4188_v16 = vsel %vm3898_vm2, %v11069_v53, -inf }
 0x966   :  { %4189 = vmax.xlane.f32.xlu0 %v4188_v16 }
 0x967   :  { %v3996_v58 = vpop.xlane.xlu0 %3995 }
 0x968   :  { %vm4008_vm12 = vcmp.ge.f32.partialorder %v3976_v12, %v3996_v58 }
 0x969   :  { %v11073_v19 = vsel %vm4008_vm12, -1e+30, %v3976_v12 }
 0x96a   :  { %v4034_v24 = vsel %vm3898_vm2, %v11073_v19, -inf }
 0x96e   :  { %4035 = vmax.xlane.f32.xlu0 %v4034_v24 }
 0x96f   :  { %v4421_v39 = vpop.xlane.xlu0 %4420 }
 0x970   :  { %vm4443_vm13 = vcmp.ge.f32.partialorder %v4411_v7, %v4421_v39 }
 0x971   :  { %v4451_v30 = vsel %vm4443_vm13, -1e+30, %v4411_v7 }
 0x972   :  { %v4459_v18 = vsel %vm3898_vm2, %v4451_v30, -inf }
 0x982   :  { %3635 = vrot.lane.b32.xlu0 %v10492_v14, %s8737_s18 }
 0x98c   :  { %4460 = vmax.xlane.f32.xlu1 %v4459_v18 }
 0x9a5   :  { %3633 = vrot.lane.b32.xlu1 %v10503_v62, %s8737_s18 }
 0x9ac   :  { %4463 = vmax.xlane.f32.xlu0 %v4462_v46 }
 0x9b4   :  { %v4307_v40 = vpop.xlane.xlu2 %4306 }
 0x9b5   :  { %vm4325_vm15 = vcmp.ge.f32.partialorder %v4293_v59, %v4307_v40 }
 0x9b6   :  { %v11086_v6 = vsel %vm4325_vm15, -1e+30, %v4293_v59 }
 0x9b7   :  { %v4345_v14 = vsel %vm3898_vm2, %v11086_v6, -inf }
 0x9b8   :  { %4346 = vmax.xlane.f32.xlu2 %v4345_v14 }
 0x9bc   :  { %v3640_v1 = vpop.permute.xlu2 %3639  ;;  %v4033_v27 = vpop.xlane.xlu1 %4032 }
 0x9bd   :  { %v3657_v37 = vsel %vm1713_vm1, %v3640_v1, 0  ;;  %vm4047_vm3 = vcmp.ge.f32.partialorder %v4015_v47, %v4033_v27  ;;  %v3414_v27 = vpop.f32.mrf.mxu2 }
 0x9be   :  { %v11091_v23 = vand.u32 4294901760, %v3657_v37  ;;  %v11119_v10 = vsel %vm4047_vm3, -1e+30, %v4015_v47 }
 0x9bf   :  { %v4071_v11 = vsel %vm3898_vm2, %v11119_v10, -inf }
 0x9c0   :  { %v11094_v62 = vsub.f32 %v3657_v37, %v11091_v23  ;;  %3668 = vmatpush.xpose.msrb.mxu0 %v11091_v23  ;;  %3800 = vmatpush.xpose.msrb.mxu3 %v11091_v23 }
 0x9c2   :  { %v13116_v32 = vand.u32 4294901760, %v11094_v62  ;;  %3763 = vmatpush.xpose.msrb.mxu2 %v11094_v62  ;;  %v13450_v41 = vand.u32 4294901760, %v11094_v62 }
 0x9c4   :  { %v3703_v42 = vsub.f32 %v11094_v62, %v13116_v32 }
 0x9c6   :  { %v3704_v0 = vand.u32 4294901760, %v3703_v42 }
 0x9c8   :  { %3705 = vmatpush.xpose.msrb.mxu1 %v3704_v0 }
 0x9d0   :  { %3623 = vrot.lane.b32.xlu2 %v10681_v60, %s8737_s18 }
 0x9d4   :  { %v3638_v25 = vpop.permute.xlu1 %3637 }
 0x9d5   :  { %v3655_v63 = vsel %vm1713_vm1, %v3638_v25, 0 }
 0x9d6   :  { %v11106_v56 = vand.u32 4294901760, %v3655_v63 }
 0x9d8   :  { %v11109_v45 = vsub.f32 %v3655_v63, %v11106_v56  ;;  %3670 = vmatpush.xpose.msrb.mxu0 %v11106_v56  ;;  %3802 = vmatpush.xpose.msrb.mxu3 %v11106_v56 }
 0x9d9   :  { %v4190_v3 = vpop.xlane.xlu0 %4189 }
 0x9da   :  { %3766 = vmatpush.xpose.msrb.mxu2 %v11109_v45  ;;  %v13115_v52 = vand.u32 4294901760, %v11109_v45  ;;  %vm4206_vm7 = vcmp.ge.f32.partialorder %v11069_v53, %v4190_v3 }
 0x9db   :  { %v11166_v0 = vsel %vm4206_vm7, -1e+30, %v11069_v53  ;;  %v3513_v53 = vpop.f32.mrf.mxu0 }
 0x9dc   :  { %v3709_v60 = vsub.f32 %v11109_v45, %v13115_v52  ;;  %v13418_v52 = vld [vmem:[#allocation42_spill] sm:$0xff] }
 0x9de   :  { %v3710_v54 = vand.u32 4294901760, %v3709_v60 }
 0x9e0   :  { %3711 = vmatpush.xpose.msrb.mxu1 %v3710_v54 }
 0x9e1   :  { %v4036_v12 = vpop.xlane.xlu0 %4035 }
 0x9e2   :  { %vm4048_vm8 = vcmp.ge.f32.partialorder %v11073_v19, %v4036_v12  ;;  %v3589_v12 = vpop.f32.mrf.mxu2 }
 0x9f4   :  { %v3636_v50 = vpop.permute.xlu0 %3635 }
 0x9f5   :  { %v3653_v7 = vsel %vm1713_vm1, %v3636_v50, 0  ;;  %v3544_v50 = vpop.f32.mrf.mxu1 }
 0x9f6   :  { %v11121_v28 = vand.u32 4294901760, %v3653_v7 }
 0x9f8   :  { %v11124_v59 = vsub.f32 %v3653_v7, %v11121_v28  ;;  %3672 = vmatpush.xpose.msrb.mxu0 %v11121_v28  ;;  %3804 = vmatpush.xpose.msrb.mxu3 %v11121_v28 }
 0x9f9   :  { %4072 = vmax.xlane.f32.xlu2 %v4071_v11 }
 0x9fa   :  { %3769 = vmatpush.xpose.msrb.mxu2 %v11124_v59  ;;  %v13114_v22 = vand.u32 4294901760, %v11124_v59 }
 0x9fc   :  { %v3715_v47 = vsub.f32 %v11124_v59, %v13114_v22 }
 0x9fe   :  { %v3716_v15 = vand.u32 4294901760, %v3715_v47 }
 0x9ff   :  { %v4461_v8 = vpop.xlane.xlu1 %4460 }
 0xa00   :  { %vm4483_vm4 = vcmp.ge.f32.partialorder %v4451_v30, %v4461_v8  ;;  %3717 = vmatpush.xpose.msrb.mxu1 %v3716_v15  ;;  %v8672_v15 = vld [vmem:[%s13046_s5 + $0x2] ss:$0 sm:$0xff] }
 0xa01   :  { %v4491_v16 = vsel %vm4483_vm4, -1e+30, %v4451_v30 }
 0xa02   :  { %v4499_v58 = vsel %vm3898_vm2, %v4491_v16, -inf }
 0xa03   :  { %4500 = vmax.xlane.f32.xlu1 %v4499_v58 }
 0xa17   :  { %v3634_v24 = vpop.permute.xlu1 %3633 }
 0xa18   :  { %v3651_v39 = vsel %vm1713_vm1, %v3634_v24, 0  ;;  %v13397_v24 = vld [vmem:[#allocation17_spill] sm:$0xff] }
 0xa19   :  { %v11137_v18 = vand.u32 4294901760, %v3651_v39 }
 0xa1b   :  { %v11140_v26 = vsub.f32 %v3651_v39, %v11137_v18  ;;  %3674 = vmatpush.xpose.msrb.mxu0 %v11137_v18  ;;  %3806 = vmatpush.xpose.msrb.mxu3 %v11137_v18  ;;  %v1145_v39 = vadd.f32 %v8672_v15, %v13397_v24 }
 0xa1c   :  { %3629 = vrot.lane.b32.xlu1 %v10548_v51, %s8737_s18 }
 0xa1d   :  { %3772 = vmatpush.xpose.msrb.mxu2 %v11140_v26  ;;  %v13113_v30 = vand.u32 4294901760, %v11140_v26 }
 0xa1f   :  { %v4464_v46 = vpop.xlane.xlu0 %4463  ;;  %v3721_v40 = vsub.f32 %v11140_v26, %v13113_v30  ;;  %v13417_v30 = vld [vmem:[#allocation80_spill] sm:$0xff] }
 0xa20   :  { %vm4484_vm5 = vcmp.ge.f32.partialorder %v11082_v38, %v4464_v46 }
 0xa21   :  { %v3722_v14 = vand.u32 4294901760, %v3721_v40  ;;  %v4492_v1 = vsel %vm4484_vm5, -1e+30, %v11082_v38 }
 0xa22   :  { %v4502_v37 = vsel %vm3898_vm2, %v4492_v1, -inf }
 0xa23   :  { %3723 = vmatpush.xpose.msrb.mxu1 %v3722_v14  ;;  %4503 = vmax.xlane.f32.xlu0 %v4502_v37  ;;  %v13398_v14 = vld [vmem:[#allocation48_spill] sm:$0xff] }
 0xa24   :  { %3627 = vrot.lane.b32.xlu1 %v13368_v4, %s8737_s18  ;;  %v4228_v4 = vsel %vm3898_vm2, %v11166_v0, -inf  ;;  %v1137_v37 = vadd.f32 %v8672_v15, %v13398_v14  ;;  %v13409_v14 = vld [vmem:[#allocation84_spill] sm:$0xff] }
 0xa2b   :  { %v4347_v25 = vpop.xlane.xlu2 %4346 }
 0xa2c   :  { %3625 = vrot.lane.b32.xlu1 %v13371_v49, %s8737_s18  ;;  %v11172_v49 = vsel %vm4048_vm8, -1e+30, %v11073_v19  ;;  %vm4365_vm9 = vcmp.ge.f32.partialorder %v11086_v6, %v4347_v25 }
 0xa2d   :  { %v4074_v60 = vsel %vm3898_vm2, %v11172_v49, -inf  ;;  %v11178_v3 = vsel %vm4365_vm9, -1e+30, %v11086_v6 }
 0xa2e   :  { %v4385_v19 = vsel %vm3898_vm2, %v11178_v3, -inf }
 0xa37   :  { %3631 = vrot.lane.b32.xlu0 %v10526_v9, %s8737_s18  ;;  %v3475_v9 = vpop.f32.mrf.mxu3 }
 0xa38   :  { %v3476_v63 = vadd.f32 %v3475_v9, %v3414_v27  ;;  %v13401_v27 = vld [vmem:[#allocation86_spill] sm:$0xff] }
 0xa3a   :  { %v3514_v54 = vadd.f32 %v3513_v53, %v3476_v63 }
 0xa3c   :  { %v3545_v7 = vadd.f32 %v3544_v50, %v3514_v54  ;;  %v13404_v50 = vld [vmem:[#allocation37_spill] sm:$0xff] }
 0xa3e   :  { %v3590_v47 = vadd.f32 %v3589_v12, %v3545_v7  ;;  %v1089_v12 = vadd.f32 %v8672_v15, %v13404_v50  ;;  %v13405_v7 = vld [vmem:[#allocation43_spill] sm:$0xff] }
 0xa3f   :  { %v3618_v11 = vpop.f32.mrf.mxu3 }
 0xa40   :  { %v3619_v8 = vadd.f32 %v3618_v11, %v3590_v47  ;;  %v13406_v47 = vld [vmem:[#allocation8_spill] sm:$0xff] }
 0xa42   :  { %v3621_v46 = vmul.f32 0.35355338, %v3619_v8 }
 0xa44   :  { %v11195_v63 = vadd.f32 %v10893_v35, %v3621_v46  ;;  %v13410_v46 = vld [vmem:[#allocation46_spill] sm:$0xff] }
 0xa46   :  { %v3917_v35 = vsel %vm3898_vm2, %v11195_v63, -inf }
 0xa76   :  { %v4501_v51 = vpop.xlane.xlu1 %4500 }
 0xa77   :  { %vm4523_vm6 = vcmp.ge.f32.partialorder %v4491_v16, %v4501_v51  ;;  %v13399_v51 = vld [vmem:[#allocation9_spill] sm:$0xff] }
 0xa78   :  { %v11160_v42 = vsel %vm4523_vm6, -1e+30, %v4491_v16 }
 0xa79   :  { %v4539_v38 = vsel %vm3898_vm2, %v11160_v42, -inf }
 0xa7a   :  { %4540 = vmax.xlane.f32.xlu0 %v4539_v38  ;;  %v1278_v38 = vadd.f32 %v13399_v51, %v1145_v39  ;;  %v13408_v39 = vld [vmem:[#allocation41_spill] sm:$0xff] }
 0xa7c   :  { %v1375_v25 = vadd.f32 %v13401_v27, %v1278_v38  ;;  %v13412_v27 = vld [vmem:[#allocation38_spill] sm:$0xff] }
 0xa7e   :  { %v1484_v51 = vadd.f32 %v13409_v14, %v1375_v25  ;;  %v3624_v14 = vpop.permute.xlu2 %3623 }
 0xa82   :  { %4229 = vmax.xlane.f32.xlu0 %v4228_v4  ;;  %v13400_v4 = vld [vmem:[#allocation47_spill] sm:$0xff] }
 0xa83   :  { %v1129_v9 = vadd.f32 %v8672_v15, %v13400_v4  ;;  %v13411_v4 = vld [vmem:[#allocation78_spill] sm:$0xff] }
 0xa85   :  { %v1270_v8 = vadd.f32 %v13406_v47, %v1129_v9  ;;  %v13415_v47 = vld [vmem:[#allocation91_spill] sm:$0xff] }
 0xa8a   :  { %4075 = vmax.xlane.f32.xlu0 %v4074_v60  ;;  %v13402_v60 = vld [vmem:[#allocation45_spill] sm:$0xff] }
 0xa8b   :  { %v1121_v53 = vadd.f32 %v8672_v15, %v13402_v60  ;;  %v1250_v60 = vadd.f32 %v13412_v27, %v1089_v12  ;;  %v13421_v12 = vld [vmem:[#allocation93_spill] sm:$0xff] }
 0xa8d   :  { %v1266_v38 = vadd.f32 %v13410_v46, %v1121_v53  ;;  %v13419_v46 = vld [vmem:[#allocation58_spill] sm:$0xff] }
 0xa8e   :  { %v3630_v16 = vpop.permute.xlu1 %3629 }
 0xa8f   :  { %v3647_v22 = vsel %vm1713_vm1, %v3630_v16, 0 }
 0xa90   :  { %v11227_v16 = vand.u32 4294901760, %v3647_v22 }
 0xa92   :  { %4386 = vmax.xlane.f32.xlu0 %v4385_v19  ;;  %v1113_v19 = vadd.f32 %v8672_v15, %v13405_v7  ;;  %v13414_v7 = vld [vmem:[#allocation44_spill] sm:$0xff] }
 0xa94   :  { %v1262_v9 = vadd.f32 %v13414_v7, %v1113_v19  ;;  %v13424_v7 = vld [vmem:[#allocation40_spill] sm:$0xff] }
 0xa96   :  { %v4504_v58 = vpop.xlane.xlu0 %4503  ;;  %v3628_v11 = vpop.permute.xlu1 %3627 }
 0xa97   :  { %vm4524_vm10 = vcmp.ge.f32.partialorder %v4492_v1, %v4504_v58  ;;  %v13407_v58 = vld [vmem:[#allocation82_spill] sm:$0xff] }
 0xa98   :  { %v11186_v6 = vsel %vm4524_vm10, -1e+30, %v4492_v1  ;;  %v13403_v1 = vld [vmem:[#allocation12_spill] sm:$0xff] }
 0xa99   :  { %v4542_v40 = vsel %vm3898_vm2, %v11186_v6, -inf  ;;  %v1274_v54 = vadd.f32 %v13403_v1, %v1137_v37  ;;  %v1365_v37 = vadd.f32 %v13411_v4, %v1270_v8  ;;  %v13413_v1 = vld [vmem:[#allocation39_spill] sm:$0xff]  ;;  %v1340_v8 = vadd.f32 %v13419_v46, %v1250_v60 }
 0xa9a   :  { %4543 = vmax.xlane.f32.xlu1 %v4542_v40  ;;  %v1105_v40 = vadd.f32 %v8672_v15, %v13408_v39  ;;  %v1097_v50 = vadd.f32 %v8672_v15, %v13413_v1  ;;  %v13422_v15 = vld [vmem:[#allocation76_spill] sm:$0xff]  ;;  %v13423_v1 = vld [vmem:[#allocation87_spill] sm:$0xff] }
 0xa9b   :  { %v1370_v24 = vadd.f32 %v13407_v58, %v1274_v54  ;;  %v1593_v54 = vadd.f32 %v13415_v47, %v1484_v51  ;;  %v13416_v58 = vld [vmem:[#allocation74_spill] sm:$0xff]  ;;  %v1472_v19 = vadd.f32 %v13422_v15, %v1365_v37  ;;  %v13427_v60 = vld [vmem:[#allocation83_spill] sm:$0xff] }
 0xa9c   :  { %v1360_v39 = vadd.f32 %v13416_v58, %v1266_v38  ;;  %v1258_v53 = vadd.f32 %v13418_v52, %v1105_v40  ;;  %v1254_v38 = vadd.f32 %v13424_v7, %v1097_v50  ;;  %v13425_v47 = vld [vmem:[#allocation66_spill] sm:$0xff]  ;;  %v13426_v52 = vld [vmem:[#allocation72_spill] sm:$0xff]  ;;  %v13432_v7 = vld [vmem:[#allocation79_spill] sm:$0xff] }
 0xa9d   :  { %v1478_v25 = vadd.f32 %v13417_v30, %v1370_v24  ;;  %v11220_v27 = vadd.f32 %v13421_v12, %v1593_v54  ;;  %v3641_v24 = vsel %vm1713_vm1, %v3624_v14, 0  ;;  %v1585_v58 = vadd.f32 %v13427_v60, %v1472_v19  ;;  %v13429_v37 = vld [vmem:[#allocation62_spill] sm:$0xff]  ;;  %v13431_v50 = vld [vmem:[#allocation68_spill] sm:$0xff] }
 0xa9e   :  { %v1350_v30 = vadd.f32 %v13425_v47, %v1258_v53  ;;  %v1466_v40 = vadd.f32 %v13426_v52, %v1360_v39  ;;  %v3645_v54 = vsel %vm1713_vm1, %v3628_v11, 0  ;;  %v3626_v14 = vpop.permute.xlu1 %3625  ;;  %v13433_v47 = vld [vmem:[#allocation85_spill] sm:$0xff]  ;;  %v13434_v52 = vld [vmem:[#allocation64_spill] sm:$0xff] }
 0xa9f   :  { %v1589_v51 = vadd.f32 %v13423_v1, %v1478_v25  ;;  %v13430_v25 = vld [vmem:[#allocation56_spill] sm:$0xff]  ;;  %v11239_v53 = vand.u32 4294901760, %v11220_v27  ;;  %v11243_v19 = vadd.f32 %v13433_v47, %v1585_v58  ;;  %v13439_v47 = vld [vmem:[#allocation77_spill] sm:$0xff] }
 0xaa0   :  { %v1442_v12 = vadd.f32 %v13430_v25, %v1340_v8  ;;  %v1581_v39 = vadd.f32 %v13432_v7, %v1466_v40  ;;  %v11250_v8 = vsub.f32 %v3647_v22, %v11227_v16  ;;  %v13436_v25 = vld [vmem:[#allocation81_spill] sm:$0xff] }
 0xaa1   :  { %v11272_v22 = vsub.f32 %v11220_v27, %v11239_v53 }
 0xaa2   :  { %3918 = vmax.xlane.f32.xlu1 %v3917_v35  ;;  %v13420_v35 = vld [vmem:[#allocation70_spill] sm:$0xff]  ;;  %v11258_v40 = vadd.f32 %v13436_v25, %v1581_v39 }
 0xaa3   :  { %v1355_v4 = vadd.f32 %v13420_v35, %v1262_v9  ;;  %v13428_v9 = vld [vmem:[#allocation89_spill] sm:$0xff]  ;;  %v1345_v35 = vadd.f32 %v13429_v37, %v1254_v38  ;;  %v1454_v38 = vadd.f32 %v13434_v52, %v1350_v30 }
 0xaa4   :  { %v11232_v46 = vadd.f32 %v13428_v9, %v1589_v51  ;;  %v11245_v51 = vand.u32 4294901760, %v3641_v24  ;;  %v13435_v9 = vld [vmem:[#allocation75_spill] sm:$0xff]  ;;  %v11297_v32 = vand.u32 4294901760, %v11258_v40 }
 0xaa5   :  { %v1460_v15 = vadd.f32 %v13431_v50, %v1355_v4  ;;  %v11252_v4 = vand.u32 4294901760, %v3645_v54  ;;  %v3643_v50 = vsel %vm1713_vm1, %v3626_v14, 0  ;;  %v11279_v14 = vand.u32 4294901760, %v11243_v19 }
 0xaa6   :  { %v11261_v58 = vand.u32 4294901760, %v11232_v46 }
 0xaa7   :  { %v1577_v37 = vadd.f32 %v13435_v9, %v1460_v15  ;;  %v13438_v15 = vld [vmem:[#allocation71_spill] sm:$0xff]  ;;  %v11287_v9 = vand.u32 4294901760, %v3643_v50 }
 0xaa8   :  { %v1573_v39 = vadd.f32 %v13438_v15, %v1454_v38  ;;  %v13441_v15 = vld [vmem:[#allocation73_spill] sm:$0xff] }
 0xaa9   :  { %v3632_v1 = vpop.permute.xlu0 %3631  ;;  %v11276_v52 = vadd.f32 %v13439_v47, %v1577_v37 }
 0xaaa   :  { %v3649_v11 = vsel %vm1713_vm1, %v3632_v1, 0  ;;  %v13437_v1 = vld [vmem:[#allocation60_spill] sm:$0xff]  ;;  %v11294_v47 = vadd.f32 %v13441_v15, %v1573_v39  ;;  %v13445_v39 = vand.u32 4294901760, %v11250_v8 }
 0xaab   :  { %v11254_v60 = vand.u32 4294901760, %v3649_v11  ;;  %v1448_v7 = vadd.f32 %v13437_v1, %v1345_v35  ;;  %v11282_v35 = vsub.f32 %v3641_v24, %v11245_v51  ;;  %v13440_v1 = vld [vmem:[#allocation67_spill] sm:$0xff]  ;;  %v11301_v24 = vsub.f32 %v11232_v46, %v11261_v58 }
 0xaac   :  { %v11314_v38 = vand.u32 4294901760, %v11276_v52  ;;  %v11333_v13 = vand.u32 4294901760, %v11294_v47 }
 0xaad   :  { %v11266_v30 = vsub.f32 %v3649_v11, %v11254_v60  ;;  %3676 = vmatpush.xpose.msrb.mxu0 %v11254_v60  ;;  %3808 = vmatpush.xpose.msrb.mxu3 %v11254_v60  ;;  %v11285_v11 = vsub.f32 %v3645_v54, %v11252_v4  ;;  %v1569_v37 = vadd.f32 %v13440_v1, %v1448_v7  ;;  %v13442_v54 = vld [vmem:[#allocation63_spill] sm:$0xff]  ;;  %v13443_v1 = vld [vmem:[#allocation69_spill] sm:$0xff]  ;;  %v3685_v48 = vand.u32 4294901760, %v11282_v35 }
 0xaae   :  { %v1565_v29 = vadd.f32 %v13442_v54, %v1442_v12  ;;  %v11319_v12 = vsub.f32 %v11243_v19, %v11279_v14  ;;  %v11322_v54 = vsub.f32 %v3643_v50, %v11287_v9  ;;  %v11338_v50 = vsub.f32 %v11258_v40, %v11297_v32 }
 0xaaf   :  { %3775 = vmatpush.xpose.msrb.mxu2 %v11266_v30  ;;  %v13120_v25 = vand.u32 4294901760, %v11266_v30  ;;  %v11311_v15 = vadd.f32 %v13443_v1, %v1569_v37  ;;  %v3733_v37 = vsub.f32 %v11250_v8, %v13445_v39  ;;  %v11352_v43 = vsub.f32 %v11276_v52, %v11314_v38 }
 0xab0   :  { %v11330_v44 = vadd.f32 %v13446_v5, %v1565_v29  ;;  %v3686_v29 = vsub.f32 %v11282_v35, %v3685_v48  ;;  %v13448_v2 = vand.u32 4294901760, %v11285_v11  ;;  %v13449_v57 = vand.u32 4294901760, %v11301_v24 }
 0xab1   :  { %3678 = vmatpush.xpose.msrb.mxu0 %v11227_v16  ;;  %3810 = vmatpush.xpose.msrb.mxu3 %v11227_v16  ;;  %v3727_v7 = vsub.f32 %v11266_v30, %v13120_v25  ;;  %13444 = vst [vmem:[#allocation24_spill] sm:$0xff] %v11311_v15  ;;  %v11345_v1 = vand.u32 4294901760, %v11311_v15  ;;  %v11368_v55 = vsub.f32 %v11294_v47, %v11333_v13  ;;  %v13451_v36 = vand.u32 4294901760, %v11319_v12 }
 0xab2   :  { %v11360_v61 = vand.u32 4294901760, %v11330_v44  ;;  %v5400_v5 = vsub.f32 %v11301_v24, %v13449_v57 }
 0xab3   :  { %3778 = vmatpush.xpose.msrb.mxu2 %v11250_v8  ;;  %v3728_v25 = vand.u32 4294901760, %v3727_v7  ;;  %v13447_v7 = vand.u32 4294901760, %v11272_v22  ;;  %v5406_v57 = vsub.f32 %v11319_v12, %v13451_v36  ;;  %v11380_v20 = vsub.f32 %v11311_v15, %v11345_v1 }
 0xab4   :  { %v13453_v36 = vand.u32 4294901760, %v11338_v50  ;;  %v5423_v34 = vand.u32 4294901760, %v11368_v55 }
 0xab5   :  { %3680 = vmatpush.xpose.msrb.mxu0 %v11252_v4  ;;  %3729 = vmatpush.xpose.msrb.mxu1 %v3728_v25  ;;  %v5394_v39 = vsub.f32 %v11272_v22, %v13447_v7  ;;  %v3734_v25 = vand.u32 4294901760, %v3733_v37  ;;  %v3739_v7 = vsub.f32 %v11285_v11, %v13448_v2  ;;  %v3687_v2 = vand.u32 4294901760, %v3686_v29 }
 0xab6   :  { %3812 = vmatpush.xpose.msrb.mxu3 %v11252_v4  ;;  %v13452_v29 = vand.u32 4294901760, %v11322_v54  ;;  %v5412_v62 = vsub.f32 %v11338_v50, %v13453_v36  ;;  %v13455_v36 = vand.u32 4294901760, %v11109_v45  ;;  %v13456_v45 = vand.u32 4294901760, %v11124_v59 }
 0xab7   :  { %3781 = vmatpush.xpose.msrb.mxu2 %v11285_v11  ;;  %v5395_v37 = vand.u32 4294901760, %v5394_v39  ;;  %v3740_v39 = vand.u32 4294901760, %v3739_v7  ;;  %v5407_v7 = vand.u32 4294901760, %v5406_v57 }
 0xab8   :  { %v5413_v31 = vand.u32 4294901760, %v5412_v62  ;;  %v13463_v62 = vand.u32 4294901760, %v11338_v50 }
 0xab9   :  { %3682 = vmatpush.xpose.msrb.mxu0 %v11287_v9  ;;  %3735 = vmatpush.xpose.msrb.mxu1 %v3734_v25  ;;  %v3745_v25 = vsub.f32 %v11322_v54, %v13452_v29  ;;  %v5429_v29 = vand.u32 4294901760, %v11380_v20 }
 0xaba   :  { %3814 = vmatpush.xpose.msrb.mxu3 %v11287_v9 }
 0xabb   :  { %3784 = vmatpush.xpose.msrb.mxu2 %v11322_v54  ;;  %v3746_v15 = vand.u32 4294901760, %v3745_v25  ;;  %v5430_v57 = vsub.f32 %v11380_v20, %v5429_v29 }
 0xabc   :  { %3688 = vmatmul.f32.vlgmr.msrb.gmra.mxu0 %v3687_v2  ;;  %v13454_v2 = vand.u32 4294901760, %v11352_v43 }
 0xabd   :  { %3833 = vmatpush.xpose.msra.mxu0 %v13450_v41  ;;  %v5401_v41 = vand.u32 4294901760, %v5400_v5  ;;  %3818 = vmatmul.f32.vlgmr.msrb.gmra.mxu3 %v3685_v48  ;;  %v5424_v48 = vsub.f32 %v11368_v55, %v5423_v34 }
 0xabe   :  { %5396 = vmatpush.msra.mxu3 %v5395_v37  ;;  %v11393_v37 = vsub.f32 %v11330_v44, %v11360_v61  ;;  %3741 = vmatpush.xpose.msrb.mxu1 %v3740_v39  ;;  %v5418_v5 = vsub.f32 %v11352_v43, %v13454_v2 }
 0xabf   :  { %5359 = vmatpush.msra.mxu2 %v11239_v53  ;;  %v5425_v25 = vand.u32 4294901760, %v5424_v48 }
 0xac0   :  { %5402 = vmatpush.msra.mxu3 %v5401_v41  ;;  %3787 = vmatmul.f32.vlgmr.msrb.gmra.mxu2 %v11282_v35  ;;  %v5435_v39 = vand.u32 4294901760, %v11393_v37  ;;  %v5419_v35 = vand.u32 4294901760, %v5418_v5 }
 0xac1   :  { %3837 = vmatpush.xpose.msra.mxu0 %v13455_v36  ;;  %5361 = vmatpush.msra.mxu2 %v11261_v58 }
 0xac2   :  { %5408 = vmatpush.msra.mxu3 %v5407_v7  ;;  %3747 = vmatpush.xpose.msrb.mxu1 %v3746_v15  ;;  %v5436_v41 = vsub.f32 %v11393_v37, %v5435_v39  ;;  %v13458_v15 = vand.u32 4294901760, %v11266_v30  ;;  %v13462_v30 = vand.u32 4294901760, %v11319_v12  ;;  %v13465_v7 = vmov %v13454_v2 }
 0xac3   :  { %5363 = vmatpush.msra.mxu2 %v11279_v14 }
 0xac4   :  { %5414 = vmatpush.msra.mxu3 %v5413_v31  ;;  %v5431_v31 = vand.u32 4294901760, %v5430_v57  ;;  %v5437_v59 = vand.u32 4294901760, %v5436_v41 }
 0xac5   :  { %3841 = vmatpush.xpose.msra.mxu0 %v13456_v45  ;;  %5365 = vmatpush.msra.mxu2 %v11297_v32 }
 0xac6   :  { %3876 = vmatpush.xpose.msra.mxu1 %v11091_v23  ;;  %5420 = vmatpush.msra.mxu3 %v5419_v35  ;;  %v13457_v23 = vand.u32 4294901760, %v11140_v26  ;;  %v13460_v26 = vand.u32 4294901760, %v11301_v24 }
 0xac7   :  { %3749 = vmatmul.f32.vlgmr.msrb.gmra.mxu1 %v11245_v51  ;;  %5367 = vmatpush.msra.mxu2 %v11314_v38 }
 0xac8   :  { %5426 = vmatpush.msra.mxu3 %v5425_v25 }
 0xac9   :  { %3845 = vmatpush.xpose.msra.mxu0 %v13457_v23  ;;  %5369 = vmatpush.msra.mxu2 %v11333_v13 }
 0xaca   :  { %3878 = vmatpush.xpose.msra.mxu1 %v11106_v56  ;;  %5432 = vmatpush.msra.mxu3 %v5431_v31  ;;  %v13459_v56 = vand.u32 4294901760, %v11272_v22 }
 0xacb   :  { %5371 = vmatpush.msra.mxu2 %v11345_v1 }
 0xacc   :  { %5438 = vmatpush.msra.mxu3 %v5437_v59 }
 0xacd   :  { %3849 = vmatpush.xpose.msra.mxu0 %v13458_v15  ;;  %5373 = vmatpush.msra.mxu2 %v11360_v61 }
 0xace   :  { %3880 = vmatpush.xpose.msra.mxu1 %v11121_v28  ;;  %5567 = vmatpush.msrb.mxu3 %v11239_v53  ;;  %v13461_v28 = vand.u32 4294901760, %v11250_v8  ;;  %v13466_v8 = vand.u32 4294901760, %v11322_v54 }
 0xacf   :  { %5524 = vmatpush.msrb.mxu2 %v13459_v56 }
 0xad0   :  { %5569 = vmatpush.msrb.mxu3 %v11261_v58 }
 0xad1   :  { %5528 = vmatpush.msrb.mxu2 %v13460_v26  ;;  %3853 = vmatpush.xpose.msra.mxu0 %v13461_v28 }
 0xad2   :  { %3882 = vmatpush.xpose.msra.mxu1 %v11137_v18  ;;  %5571 = vmatpush.msrb.mxu3 %v11279_v14  ;;  %v13464_v18 = vand.u32 4294901760, %v11285_v11 }
 0xad3   :  { %5532 = vmatpush.msrb.mxu2 %v13462_v30 }
 0xad4   :  { %5573 = vmatpush.msrb.mxu3 %v11297_v32 }
 0xad5   :  { %5536 = vmatpush.msrb.mxu2 %v13463_v62  ;;  %3857 = vmatpush.xpose.msra.mxu0 %v13464_v18 }
 0xad6   :  { %3884 = vmatpush.xpose.msra.mxu1 %v11254_v60  ;;  %5575 = vmatpush.msrb.mxu3 %v11314_v38 }
 0xad7   :  { %5540 = vmatpush.msrb.mxu2 %v13465_v7 }
 0xad8   :  { %5577 = vmatpush.msrb.mxu3 %v11333_v13 }
 0xad9   :  { %5544 = vmatpush.msrb.mxu2 %v5423_v34  ;;  %3861 = vmatpush.xpose.msra.mxu0 %v13466_v8 }
 0xada   :  { %3886 = vmatpush.xpose.msra.mxu1 %v11227_v16  ;;  %5579 = vmatpush.msrb.mxu3 %v11345_v1 }
 0xadb   :  { %5548 = vmatpush.msrb.mxu2 %v5429_v29 }
 0xadc   :  { %5581 = vmatpush.msrb.mxu3 %v11360_v61  ;;  %3863 = vmatmul.f32.vlgmr.msra.gmra.mxu0 %v11245_v51 }
 0xadd   :  { %5454 = vmatpush.msrb.mxu0 %v11272_v22  ;;  %5552 = vmatpush.msrb.mxu2 %v5435_v39 }
 0xade   :  { %3888 = vmatpush.xpose.msra.mxu1 %v11252_v4 }
 0xadf   :  { %5457 = vmatpush.msrb.mxu0 %v11301_v24 }
 0xae1   :  { %5460 = vmatpush.msrb.mxu0 %v11319_v12 }
 0xae2   :  { %3890 = vmatpush.xpose.msra.mxu1 %v11287_v9 }
 0xae3   :  { %5463 = vmatpush.msrb.mxu0 %v11338_v50 }
 0xae5   :  { %3892 = vmatmul.f32.vlgmr.msra.gmra.mxu1 %v11245_v51  ;;  %5466 = vmatpush.msrb.mxu0 %v11352_v43  ;;  %v4073_v43 = vpop.xlane.xlu2 %4072 }
 0xae6   :  { %5491 = vmatpush.msrb.mxu1 %v11239_v53  ;;  %vm4087_vm12 = vcmp.ge.f32.partialorder %v11119_v10, %v4073_v43 }
 0xae7   :  { %5469 = vmatpush.msrb.mxu0 %v11368_v55  ;;  %v4095_v16 = vsel %vm4087_vm12, -1e+30, %v11119_v10 }
 0xae8   :  { %5493 = vmatpush.msrb.mxu1 %v11261_v58 }
 0xae9   :  { %5472 = vmatpush.msrb.mxu0 %v11380_v20 }
 0xaea   :  { %5495 = vmatpush.msrb.mxu1 %v11279_v14 }
 0xaeb   :  { %5475 = vmatpush.msrb.mxu0 %v11393_v37 }
 0xaec   :  { %5497 = vmatpush.msrb.mxu1 %v11297_v32 }
 0xaed   :  { %v4541_v34 = vpop.xlane.xlu0 %4540 }
 0xaee   :  { %5499 = vmatpush.msrb.mxu1 %v11314_v38  ;;  %vm4563_vm11 = vcmp.ge.f32.partialorder %v11160_v42, %v4541_v34 }
 0xaef   :  { %v4571_v55 = vsel %vm4563_vm11, -1e+30, %v11160_v42 }
 0xaf0   :  { %5501 = vmatpush.msrb.mxu1 %v11333_v13  ;;  %v4579_v20 = vsel %vm3898_vm2, %v4571_v55, -inf  ;;  %v4111_v13 = vsel %vm3898_vm2, %v4095_v16, -inf }
 0xaf1   :  { %4580 = vmax.xlane.f32.xlu0 %v4579_v20 }
 0xaf2   :  { %5503 = vmatpush.msrb.mxu1 %v11345_v1 }
 0xaf4   :  { %5505 = vmatpush.msrb.mxu1 %v11360_v61 }
 0xaf5   :  { %v4230_v32 = vpop.xlane.xlu0 %4229 }
 0xaf6   :  { %vm4246_vm3 = vcmp.ge.f32.partialorder %v11166_v0, %v4230_v32 }
 0xaf9   :  { %4112 = vmax.xlane.f32.xlu0 %v4111_v13 }
 0xafd   :  { %v4076_v53 = vpop.xlane.xlu0 %4075 }
 0xafe   :  { %vm4088_vm13 = vcmp.ge.f32.partialorder %v11172_v49, %v4076_v53 }
 0xaff   :  { %v4096_v51 = vsel %vm4088_vm13, -1e+30, %v11172_v49  ;;  %v4254_v49 = vsel %vm4246_vm3, -1e+30, %v11166_v0 }
 0xb00   :  { %v4114_v61 = vsel %vm3898_vm2, %v4096_v51, -inf  ;;  %v4268_v11 = vsel %vm3898_vm2, %v4254_v49, -inf }
 0xb01   :  { %4115 = vmax.xlane.f32.xlu2 %v4114_v61 }
 0xb05   :  { %v4387_v42 = vpop.xlane.xlu0 %4386 }
 0xb06   :  { %vm4405_vm14 = vcmp.ge.f32.partialorder %v11178_v3, %v4387_v42 }
 0xb07   :  { %v4413_v4 = vsel %vm4405_vm14, -1e+30, %v11178_v3 }
 0xb08   :  { %v4425_v60 = vsel %vm3898_vm2, %v4413_v4, -inf }
 0xb09   :  { %4426 = vmax.xlane.f32.xlu0 %v4425_v60 }
 0xb0d   :  { %v4544_v10 = vpop.xlane.xlu1 %4543 }
 0xb0e   :  { %vm4564_vm15 = vcmp.ge.f32.partialorder %v11186_v6, %v4544_v10 }
 0xb0f   :  { %v4572_v58 = vsel %vm4564_vm15, -1e+30, %v11186_v6 }
 0xb10   :  { %v4582_v22 = vsel %vm3898_vm2, %v4572_v58, -inf }
 0xb11   :  { %4583 = vmax.xlane.f32.xlu1 %v4582_v22 }
 0xb15   :  { %v11487_v14 = vpop.xlane.xlu1 %3918 }
 0xb16   :  { %vm3929_vm4 = vcmp.ge.f32.partialorder %v11195_v63, %v11487_v14 }
 0xb17   :  { %v3937_v3 = vsel %vm3929_vm4, -1e+30, %v11195_v63 }
 0xb18   :  { %v3957_v9 = vsel %vm3898_vm2, %v3937_v3, -inf }
 0xb19   :  { %4269 = vmax.xlane.f32.xlu1 %v4268_v11 }
 0xb21   :  { %3958 = vmax.xlane.f32.xlu1 %v3957_v9 }
 0xb39   :  { %v3689_v11 = vpop.f32.mrf.mxu0 }
 0xb43   :  { %v3788_v9 = vpop.f32.mrf.mxu2 }
 0xb64   :  { %v4581_v6 = vpop.xlane.xlu0 %4580 }
 0xb65   :  { %vm4603_vm5 = vcmp.ge.f32.partialorder %v4571_v55, %v4581_v6 }
 0xb66   :  { %v4611_v38 = vsel %vm4603_vm5, -1e+30, %v4571_v55 }
 0xb67   :  { %v4619_v24 = vsel %vm3898_vm2, %v4611_v38, -inf }
 0xb68   :  { %4620 = vmax.xlane.f32.xlu2 %v4619_v24  ;;  %v3864_v24 = vpop.f32.mrf.mxu0 }
 0xb6c   :  { %v4113_v0 = vpop.xlane.xlu0 %4112 }
 0xb6d   :  { %vm4127_vm6 = vcmp.ge.f32.partialorder %v4095_v16, %v4113_v0 }
 0xb6e   :  { %v4135_v12 = vsel %vm4127_vm6, -1e+30, %v4095_v16 }
 0xb6f   :  { %v4151_v54 = vsel %vm3898_vm2, %v4135_v12, -inf }
 0xb70   :  { %4152 = vmax.xlane.f32.xlu1 %v4151_v54 }
 0xb74   :  { %v4116_v5 = vpop.xlane.xlu2 %4115 }
 0xb75   :  { %vm4128_vm9 = vcmp.ge.f32.partialorder %v4096_v51, %v4116_v5 }
 0xb76   :  { %v4136_v39 = vsel %vm4128_vm9, -1e+30, %v4096_v51 }
 0xb77   :  { %v4154_v45 = vsel %vm3898_vm2, %v4136_v39, -inf }
 0xb7c   :  { %v4427_v1 = vpop.xlane.xlu0 %4426 }
 0xb7d   :  { %vm4445_vm7 = vcmp.ge.f32.partialorder %v4413_v4, %v4427_v1 }
 0xb7e   :  { %v4453_v50 = vsel %vm4445_vm7, -1e+30, %v4413_v4 }
 0xb7f   :  { %v4465_v37 = vsel %vm3898_vm2, %v4453_v50, -inf }
 0xb80   :  { %4466 = vmax.xlane.f32.xlu1 %v4465_v37 }
 0xb84   :  { %v4584_v2 = vpop.xlane.xlu1 %4583 }
 0xb85   :  { %vm4604_vm8 = vcmp.ge.f32.partialorder %v4572_v58, %v4584_v2 }
 0xb86   :  { %v4612_v29 = vsel %vm4604_vm8, -1e+30, %v4572_v58 }
 0xb87   :  { %v4622_v36 = vsel %vm3898_vm2, %v4612_v29, -inf }
 0xb88   :  { %4623 = vmax.xlane.f32.xlu0 %v4622_v36 }
 0xb8c   :  { %v4270_v48 = vpop.xlane.xlu1 %4269 }
 0xb8d   :  { %vm4286_vm10 = vcmp.ge.f32.partialorder %v4254_v49, %v4270_v48 }
 0xb8e   :  { %v4294_v35 = vsel %vm4286_vm10, -1e+30, %v4254_v49  ;;  %v3750_v49 = vpop.f32.mrf.mxu1 }
 0xb8f   :  { %v4308_v57 = vsel %vm3898_vm2, %v4294_v35, -inf }
 0xb90   :  { %4309 = vmax.xlane.f32.xlu2 %v4308_v57  ;;  %4155 = vmax.xlane.f32.xlu0 %v4154_v45 }
 0xb94   :  { %v3959_v25 = vpop.xlane.xlu1 %3958 }
 0xb95   :  { %vm3969_vm11 = vcmp.ge.f32.partialorder %v3937_v3, %v3959_v25 }
 0xb96   :  { %v3977_v41 = vsel %vm3969_vm11, -1e+30, %v3937_v3  ;;  %v3751_v3 = vadd.f32 %v3750_v49, %v3689_v11 }
 0xb97   :  { %v3997_v31 = vsel %vm3898_vm2, %v3977_v41, -inf }
 0xb98   :  { %3998 = vmax.xlane.f32.xlu2 %v3997_v31  ;;  %v3789_v6 = vadd.f32 %v3788_v9, %v3751_v3 }
 0xbdb   :  { %v4621_v23 = vpop.xlane.xlu2 %4620 }
 0xbdc   :  { %vm4643_vm12 = vcmp.ge.f32.partialorder %v4611_v38, %v4621_v23 }
 0xbdd   :  { %v4651_v59 = vsel %vm4643_vm12, -1e+30, %v4611_v38  ;;  %v3819_v38 = vpop.f32.mrf.mxu3 }
 0xbde   :  { %v4659_v15 = vsel %vm3898_vm2, %v4651_v59, -inf  ;;  %v3820_v0 = vadd.f32 %v3819_v38, %v3789_v6 }
 0xbdf   :  { %4660 = vmax.xlane.f32.xlu0 %v4659_v15 }
 0xbe0   :  { %v3865_v54 = vadd.f32 %v3864_v24, %v3820_v0 }
 0xbe3   :  { %v4153_v56 = vpop.xlane.xlu1 %4152 }
 0xbe4   :  { %vm4167_vm13 = vcmp.ge.f32.partialorder %v4135_v12, %v4153_v56 }
 0xbe5   :  { %v4175_v26 = vsel %vm4167_vm13, -1e+30, %v4135_v12  ;;  %v3893_v12 = vpop.f32.mrf.mxu1 }
 0xbe6   :  { %v4191_v28 = vsel %vm3898_vm2, %v4175_v26, -inf  ;;  %v3894_v1 = vadd.f32 %v3893_v12, %v3865_v54 }
 0xbe7   :  { %4192 = vmax.xlane.f32.xlu2 %v4191_v28 }
 0xbe8   :  { %v3896_v2 = vmul.f32 0.35355338, %v3894_v1 }
 0xbf3   :  { %v4467_v30 = vpop.xlane.xlu1 %4466 }
 0xbf4   :  { %vm4485_vm14 = vcmp.ge.f32.partialorder %v4453_v50, %v4467_v30 }
 0xbf5   :  { %v11503_v62 = vsel %vm4485_vm14, -1e+30, %v4453_v50 }
 0xbf6   :  { %v4505_v18 = vsel %vm3898_vm2, %v11503_v62, -inf }
 0xbf7   :  { %4506 = vmax.xlane.f32.xlu2 %v4505_v18 }
 0xbfb   :  { %v4624_v7 = vpop.xlane.xlu0 %4623 }
 0xbfc   :  { %vm4644_vm15 = vcmp.ge.f32.partialorder %v4612_v29, %v4624_v7 }
 0xbfd   :  { %v4652_v8 = vsel %vm4644_vm15, -1e+30, %v4612_v29  ;;  %v8706_v29 = vld [vmem:[%s13044_s3 + $0x8] sm:$0xff] }
 0xbfe   :  { %v4662_v34 = vsel %vm3898_vm2, %v4652_v8, -inf  ;;  %v11517_v36 = vadd.f32 %v8706_v29, %v3896_v2 }
 0xbff   :  { %4663 = vmax.xlane.f32.xlu1 %v4662_v34 }
 0xc00   :  { %v3920_v25 = vsel %vm3898_vm2, %v11517_v36, -inf }
 0xc03   :  { %v4156_v43 = vpop.xlane.xlu0 %4155  ;;  %v4310_v55 = vpop.xlane.xlu2 %4309 }
 0xc04   :  { %vm4168_vm3 = vcmp.ge.f32.partialorder %v4136_v39, %v4156_v43  ;;  %vm4326_vm4 = vcmp.ge.f32.partialorder %v4294_v35, %v4310_v55 }
 0xc05   :  { %v4334_v20 = vsel %vm4326_vm4, -1e+30, %v4294_v35  ;;  %v4176_v32 = vsel %vm4168_vm3, -1e+30, %v4136_v39 }
 0xc06   :  { %v4194_v16 = vsel %vm3898_vm2, %v4176_v32, -inf  ;;  %v4348_v13 = vsel %vm3898_vm2, %v4334_v20, -inf }
 0xc07   :  { %4195 = vmax.xlane.f32.xlu1 %v4194_v16  ;;  %4349 = vmax.xlane.f32.xlu0 %v4348_v13 }
 0xc0b   :  { %v3999_v53 = vpop.xlane.xlu2 %3998 }
 0xc0c   :  { %vm4009_vm5 = vcmp.ge.f32.partialorder %v3977_v41, %v3999_v53 }
 0xc0d   :  { %v4017_v51 = vsel %vm4009_vm5, -1e+30, %v3977_v41 }
 0xc0e   :  { %v4037_v61 = vsel %vm3898_vm2, %v4017_v51, -inf }
 0xc0f   :  { %4038 = vmax.xlane.f32.xlu0 %v4037_v61 }
 0xc52   :  { %v4661_v42 = vpop.xlane.xlu0 %4660 }
 0xc53   :  { %vm4683_vm6 = vcmp.ge.f32.partialorder %v4651_v59, %v4661_v42 }
 0xc54   :  { %v4691_v4 = vsel %vm4683_vm6, -1e+30, %v4651_v59 }
 0xc55   :  { %v4699_v60 = vsel %vm3898_vm2, %v4691_v4, -inf }
 0xc56   :  { %4700 = vmax.xlane.f32.xlu1 %v4699_v60 }
 0xc5a   :  { %v4193_v10 = vpop.xlane.xlu2 %4192 }
 0xc5b   :  { %vm4207_vm7 = vcmp.ge.f32.partialorder %v4175_v26, %v4193_v10 }
 0xc5c   :  { %v4215_v58 = vsel %vm4207_vm7, -1e+30, %v4175_v26 }
 0xc5d   :  { %v4231_v22 = vsel %vm3898_vm2, %v4215_v58, -inf }
 0xc5e   :  { %4232 = vmax.xlane.f32.xlu0 %v4231_v22 }
 0xc6a   :  { %v4507_v35 = vpop.xlane.xlu2 %4506 }
 0xc6b   :  { %vm4525_vm11 = vcmp.ge.f32.partialorder %v11503_v62, %v4507_v35 }
 0xc6c   :  { %v4533_v23 = vsel %vm4525_vm11, -1e+30, %v11503_v62 }
 0xc6d   :  { %v4545_v26 = vsel %vm3898_vm2, %v4533_v23, -inf }
 0xc72   :  { %v4664_v50 = vpop.xlane.xlu1 %4663 }
 0xc73   :  { %vm4684_vm8 = vcmp.ge.f32.partialorder %v4652_v8, %v4664_v50 }
 0xc74   :  { %v4692_v37 = vsel %vm4684_vm8, -1e+30, %v4652_v8 }
 0xc75   :  { %v4702_v5 = vsel %vm3898_vm2, %v4692_v37, -inf }
 0xc76   :  { %4703 = vmax.xlane.f32.xlu2 %v4702_v5 }
 0xc7a   :  { %v4196_v48 = vpop.xlane.xlu1 %4195  ;;  %v4350_v39 = vpop.xlane.xlu0 %4349 }
 0xc7b   :  { %vm4208_vm9 = vcmp.ge.f32.partialorder %v4176_v32, %v4196_v48  ;;  %vm4366_vm10 = vcmp.ge.f32.partialorder %v4334_v20, %v4350_v39 }
 0xc7c   :  { %v4216_v57 = vsel %vm4208_vm9, -1e+30, %v4176_v32  ;;  %v4374_v45 = vsel %vm4366_vm10, -1e+30, %v4334_v20 }
 0xc7d   :  { %v4388_v41 = vsel %vm3898_vm2, %v4374_v45, -inf  ;;  %v4234_v31 = vsel %vm3898_vm2, %v4216_v57, -inf }
 0xc7e   :  { %3921 = vmax.xlane.f32.xlu2 %v3920_v25  ;;  %4389 = vmax.xlane.f32.xlu1 %v4388_v41 }
 0xc7f   :  { %4235 = vmax.xlane.f32.xlu0 %v4234_v31 }
 0xc82   :  { %v4039_v59 = vpop.xlane.xlu0 %4038 }
 0xc83   :  { %vm4049_vm12 = vcmp.ge.f32.partialorder %v4017_v51, %v4039_v59 }
 0xc84   :  { %v4057_v15 = vsel %vm4049_vm12, -1e+30, %v4017_v51 }
 0xc85   :  { %v4077_v56 = vsel %vm3898_vm2, %v4057_v15, -inf }
 0xc86   :  { %4078 = vmax.xlane.f32.xlu2 %v4077_v56  ;;  %4546 = vmax.xlane.f32.xlu1 %v4545_v26 }
 0xcc9   :  { %v4701_v28 = vpop.xlane.xlu1 %4700 }
 0xcca   :  { %vm4723_vm13 = vcmp.ge.f32.partialorder %v4691_v4, %v4701_v28 }
 0xccb   :  { %v4731_v30 = vsel %vm4723_vm13, -1e+30, %v4691_v4 }
 0xccc   :  { %v4739_v18 = vsel %vm3898_vm2, %v4731_v30, -inf }
 0xccd   :  { %4740 = vmax.xlane.f32.xlu0 %v4739_v18 }
 0xcd1   :  { %v4233_v7 = vpop.xlane.xlu0 %4232 }
 0xcd2   :  { %vm4247_vm14 = vcmp.ge.f32.partialorder %v4215_v58, %v4233_v7 }
 0xcd3   :  { %v4255_v8 = vsel %vm4247_vm14, -1e+30, %v4215_v58 }
 0xcd4   :  { %v4271_v62 = vsel %vm3898_vm2, %v4255_v8, -inf }
 0xcd5   :  { %4272 = vmax.xlane.f32.xlu2 %v4271_v62 }
 0xce9   :  { %v4704_v34 = vpop.xlane.xlu2 %4703 }
 0xcea   :  { %vm4724_vm15 = vcmp.ge.f32.partialorder %v4692_v37, %v4704_v34 }
 0xceb   :  { %v4732_v43 = vsel %vm4724_vm15, -1e+30, %v4692_v37 }
 0xcec   :  { %v4742_v55 = vsel %vm3898_vm2, %v4732_v43, -inf }
 0xced   :  { %4743 = vmax.xlane.f32.xlu1 %v4742_v55 }
 0xcf1   :  { %v4390_v20 = vpop.xlane.xlu1 %4389  ;;  %v11530_v32 = vpop.xlane.xlu2 %3921 }
 0xcf2   :  { %vm4406_vm3 = vcmp.ge.f32.partialorder %v4374_v45, %v4390_v20  ;;  %v4236_v16 = vpop.xlane.xlu0 %4235  ;;  %vm3930_vm4 = vcmp.ge.f32.partialorder %v11517_v36, %v11530_v32 }
 0xcf3   :  { %v4414_v13 = vsel %vm4406_vm3, -1e+30, %v4374_v45  ;;  %vm4248_vm5 = vcmp.ge.f32.partialorder %v4216_v57, %v4236_v16  ;;  %v3938_v53 = vsel %vm3930_vm4, -1e+30, %v11517_v36 }
 0xcf4   :  { %v4428_v51 = vsel %vm3898_vm2, %v4414_v13, -inf  ;;  %v4256_v61 = vsel %vm4248_vm5, -1e+30, %v4216_v57  ;;  %v3960_v42 = vsel %vm3898_vm2, %v3938_v53, -inf }
 0xcf5   :  { %4429 = vmax.xlane.f32.xlu0 %v4428_v51  ;;  %v4274_v4 = vsel %vm3898_vm2, %v4256_v61, -inf  ;;  %3961 = vmax.xlane.f32.xlu1 %v3960_v42 }
 0xcf6   :  { %4275 = vmax.xlane.f32.xlu2 %v4274_v4 }
 0xcf9   :  { %v4547_v60 = vpop.xlane.xlu1 %4546  ;;  %v4079_v10 = vpop.xlane.xlu2 %4078 }
 0xcfa   :  { %vm4565_vm6 = vcmp.ge.f32.partialorder %v4533_v23, %v4547_v60  ;;  %vm4089_vm7 = vcmp.ge.f32.partialorder %v4057_v15, %v4079_v10 }
 0xcfb   :  { %v4573_v58 = vsel %vm4565_vm6, -1e+30, %v4533_v23  ;;  %v4097_v22 = vsel %vm4089_vm7, -1e+30, %v4057_v15 }
 0xcfc   :  { %v4585_v49 = vsel %vm3898_vm2, %v4573_v58, -inf  ;;  %v4117_v11 = vsel %vm3898_vm2, %v4097_v22, -inf }
 0xcfd   :  { %4586 = vmax.xlane.f32.xlu0 %v4585_v49  ;;  %4118 = vmax.xlane.f32.xlu1 %v4117_v11 }
 0xd40   :  { %v4741_v3 = vpop.xlane.xlu0 %4740 }
 0xd41   :  { %vm4763_vm8 = vcmp.ge.f32.partialorder %v4731_v30, %v4741_v3 }
 0xd42   :  { %v4771_v9 = vsel %vm4763_vm8, -1e+30, %v4731_v30 }
 0xd43   :  { %v4779_v6 = vsel %vm3898_vm2, %v4771_v9, -inf }
 0xd44   :  { %4780 = vmax.xlane.f32.xlu2 %v4779_v6 }
 0xd48   :  { %v4273_v38 = vpop.xlane.xlu2 %4272 }
 0xd49   :  { %vm4287_vm9 = vcmp.ge.f32.partialorder %v4255_v8, %v4273_v38 }
 0xd4a   :  { %v4295_v24 = vsel %vm4287_vm9, -1e+30, %v4255_v8 }
 0xd4b   :  { %v4311_v0 = vsel %vm3898_vm2, %v4295_v24, -inf }
 0xd4c   :  { %4312 = vmax.xlane.f32.xlu1 %v4311_v0 }
 0xd60   :  { %v4744_v12 = vpop.xlane.xlu1 %4743 }
 0xd61   :  { %vm4764_vm10 = vcmp.ge.f32.partialorder %v4732_v43, %v4744_v12 }
 0xd62   :  { %v4772_v54 = vsel %vm4764_vm10, -1e+30, %v4732_v43 }
 0xd63   :  { %v4782_v1 = vsel %vm3898_vm2, %v4772_v54, -inf }
 0xd64   :  { %4783 = vmax.xlane.f32.xlu0 %v4782_v1 }
 0xd68   :  { %v4430_v50 = vpop.xlane.xlu0 %4429  ;;  %v3962_v37 = vpop.xlane.xlu1 %3961 }
 0xd69   :  { %vm4446_vm11 = vcmp.ge.f32.partialorder %v4414_v13, %v4430_v50  ;;  %vm3970_vm12 = vcmp.ge.f32.partialorder %v3938_v53, %v3962_v37  ;;  %v4276_v2 = vpop.xlane.xlu2 %4275 }
 0xd6a   :  { %v4454_v5 = vsel %vm4446_vm11, -1e+30, %v4414_v13  ;;  %v3978_v29 = vsel %vm3970_vm12, -1e+30, %v3938_v53  ;;  %vm4288_vm13 = vcmp.ge.f32.partialorder %v4256_v61, %v4276_v2 }
 0xd6b   :  { %v4296_v48 = vsel %vm4288_vm13, -1e+30, %v4256_v61  ;;  %v4468_v39 = vsel %vm3898_vm2, %v4454_v5, -inf  ;;  %v4000_v35 = vsel %vm3898_vm2, %v3978_v29, -inf }
 0xd6c   :  { %4469 = vmax.xlane.f32.xlu2 %v4468_v39  ;;  %4001 = vmax.xlane.f32.xlu0 %v4000_v35  ;;  %v4314_v57 = vsel %vm3898_vm2, %v4296_v48, -inf }
 0xd6d   :  { %4315 = vmax.xlane.f32.xlu1 %v4314_v57 }
 0xd70   :  { %v4587_v45 = vpop.xlane.xlu0 %4586  ;;  %v4119_v25 = vpop.xlane.xlu1 %4118 }
 0xd71   :  { %vm4605_vm14 = vcmp.ge.f32.partialorder %v4573_v58, %v4587_v45  ;;  %vm4129_vm15 = vcmp.ge.f32.partialorder %v4097_v22, %v4119_v25 }
 0xd72   :  { %v4613_v41 = vsel %vm4605_vm14, -1e+30, %v4573_v58  ;;  %v4137_v31 = vsel %vm4129_vm15, -1e+30, %v4097_v22 }
 0xd73   :  { %v4625_v23 = vsel %vm3898_vm2, %v4613_v41, -inf  ;;  %v4157_v59 = vsel %vm3898_vm2, %v4137_v31, -inf }
 0xd74   :  { %4626 = vmax.xlane.f32.xlu2 %v4625_v23  ;;  %4158 = vmax.xlane.f32.xlu0 %v4157_v59 }
 0xdb7   :  { %v4781_v15 = vpop.xlane.xlu2 %4780 }
 0xdb8   :  { %vm4803_vm3 = vcmp.ge.f32.partialorder %v4771_v9, %v4781_v15 }
 0xdb9   :  { %v4811_v56 = vsel %vm4803_vm3, -1e+30, %v4771_v9 }
 0xdba   :  { %v4819_v26 = vsel %vm3898_vm2, %v4811_v56, -inf }
 0xdbb   :  { %4820 = vmax.xlane.f32.xlu1 %v4819_v26 }
 0xdbf   :  { %v4313_v28 = vpop.xlane.xlu1 %4312 }
 0xdc0   :  { %vm4327_vm4 = vcmp.ge.f32.partialorder %v4295_v24, %v4313_v28 }
 0xdc1   :  { %v4335_v30 = vsel %vm4327_vm4, -1e+30, %v4295_v24 }
 0xdc2   :  { %v4351_v18 = vsel %vm3898_vm2, %v4335_v30, -inf }
 0xdc3   :  { %4352 = vmax.xlane.f32.xlu0 %v4351_v18 }
 0xdd7   :  { %v4784_v7 = vpop.xlane.xlu0 %4783 }
 0xdd8   :  { %vm4804_vm5 = vcmp.ge.f32.partialorder %v4772_v54, %v4784_v7 }
 0xdd9   :  { %v4812_v8 = vsel %vm4804_vm5, -1e+30, %v4772_v54 }
 0xdda   :  { %v4822_v62 = vsel %vm3898_vm2, %v4812_v8, -inf }
 0xddb   :  { %4823 = vmax.xlane.f32.xlu2 %v4822_v62 }
 0xddf   :  { %v4002_v34 = vpop.xlane.xlu0 %4001  ;;  %v4470_v43 = vpop.xlane.xlu2 %4469 }
 0xde0   :  { %vm4010_vm6 = vcmp.ge.f32.partialorder %v3978_v29, %v4002_v34  ;;  %v4316_v55 = vpop.xlane.xlu1 %4315  ;;  %vm4486_vm7 = vcmp.ge.f32.partialorder %v4454_v5, %v4470_v43 }
 0xde1   :  { %v4018_v20 = vsel %vm4010_vm6, -1e+30, %v3978_v29  ;;  %vm4328_vm8 = vcmp.ge.f32.partialorder %v4296_v48, %v4316_v55  ;;  %v4494_v16 = vsel %vm4486_vm7, -1e+30, %v4454_v5 }
 0xde2   :  { %v4336_v13 = vsel %vm4328_vm8, -1e+30, %v4296_v48  ;;  %v4040_v53 = vsel %vm3898_vm2, %v4018_v20, -inf  ;;  %v4508_v51 = vsel %vm3898_vm2, %v4494_v16, -inf }
 0xde3   :  { %4041 = vmax.xlane.f32.xlu2 %v4040_v53  ;;  %v4354_v61 = vsel %vm3898_vm2, %v4336_v13, -inf  ;;  %4509 = vmax.xlane.f32.xlu1 %v4508_v51 }
 0xde4   :  { %4355 = vmax.xlane.f32.xlu0 %v4354_v61 }
 0xde7   :  { %v4159_v42 = vpop.xlane.xlu0 %4158  ;;  %v4627_v4 = vpop.xlane.xlu2 %4626 }
 0xde8   :  { %vm4169_vm9 = vcmp.ge.f32.partialorder %v4137_v31, %v4159_v42  ;;  %vm4645_vm10 = vcmp.ge.f32.partialorder %v4613_v41, %v4627_v4 }
 0xde9   :  { %v4177_v60 = vsel %vm4169_vm9, -1e+30, %v4137_v31  ;;  %v4653_v10 = vsel %vm4645_vm10, -1e+30, %v4613_v41 }
 0xdea   :  { %v4197_v58 = vsel %vm3898_vm2, %v4177_v60, -inf  ;;  %v4665_v22 = vsel %vm3898_vm2, %v4653_v10, -inf }
 0xdeb   :  { %4198 = vmax.xlane.f32.xlu2 %v4197_v58  ;;  %4666 = vmax.xlane.f32.xlu1 %v4665_v22 }
 0xe2e   :  { %v4821_v49 = vpop.xlane.xlu1 %4820 }
 0xe2f   :  { %vm4843_vm11 = vcmp.ge.f32.partialorder %v4811_v56, %v4821_v49 }
 0xe30   :  { %v4851_v11 = vsel %vm4843_vm11, -1e+30, %v4811_v56 }
 0xe31   :  { %v4859_v3 = vsel %vm3898_vm2, %v4851_v11, -inf }
 0xe32   :  { %4860 = vmax.xlane.f32.xlu0 %v4859_v3 }
 0xe36   :  { %v4353_v9 = vpop.xlane.xlu0 %4352 }
 0xe37   :  { %vm4367_vm12 = vcmp.ge.f32.partialorder %v4335_v30, %v4353_v9 }
 0xe38   :  { %v4375_v6 = vsel %vm4367_vm12, -1e+30, %v4335_v30 }
 0xe39   :  { %v4391_v38 = vsel %vm3898_vm2, %v4375_v6, -inf }
 0xe3a   :  { %4392 = vmax.xlane.f32.xlu2 %v4391_v38 }
 0xe4e   :  { %v4824_v24 = vpop.xlane.xlu2 %4823 }
 0xe4f   :  { %vm4844_vm13 = vcmp.ge.f32.partialorder %v4812_v8, %v4824_v24 }
 0xe50   :  { %v4852_v0 = vsel %vm4844_vm13, -1e+30, %v4812_v8 }
 0xe51   :  { %v4862_v12 = vsel %vm3898_vm2, %v4852_v0, -inf }
 0xe52   :  { %4863 = vmax.xlane.f32.xlu1 %v4862_v12 }
 0xe56   :  { %v4510_v54 = vpop.xlane.xlu1 %4509  ;;  %v4042_v1 = vpop.xlane.xlu2 %4041 }
 0xe57   :  { %v4356_v50 = vpop.xlane.xlu0 %4355  ;;  %vm4526_vm14 = vcmp.ge.f32.partialorder %v4494_v16, %v4510_v54  ;;  %vm4050_vm15 = vcmp.ge.f32.partialorder %v4018_v20, %v4042_v1 }
 0xe58   :  { %vm4368_vm3 = vcmp.ge.f32.partialorder %v4336_v13, %v4356_v50  ;;  %v4534_v37 = vsel %vm4526_vm14, -1e+30, %v4494_v16  ;;  %v4058_v2 = vsel %vm4050_vm15, -1e+30, %v4018_v20 }
 0xe59   :  { %v4376_v5 = vsel %vm4368_vm3, -1e+30, %v4336_v13  ;;  %v4548_v29 = vsel %vm3898_vm2, %v4534_v37, -inf  ;;  %v4080_v48 = vsel %vm3898_vm2, %v4058_v2, -inf }
 0xe5a   :  { %v4394_v39 = vsel %vm3898_vm2, %v4376_v5, -inf  ;;  %4549 = vmax.xlane.f32.xlu0 %v4548_v29  ;;  %4081 = vmax.xlane.f32.xlu1 %v4080_v48 }
 0xe5b   :  { %4395 = vmax.xlane.f32.xlu2 %v4394_v39 }
 0xe5e   :  { %v4667_v35 = vpop.xlane.xlu1 %4666  ;;  %v4199_v57 = vpop.xlane.xlu2 %4198 }
 0xe5f   :  { %vm4685_vm4 = vcmp.ge.f32.partialorder %v4653_v10, %v4667_v35  ;;  %vm4209_vm5 = vcmp.ge.f32.partialorder %v4177_v60, %v4199_v57 }
 0xe60   :  { %v4693_v45 = vsel %vm4685_vm4, -1e+30, %v4653_v10  ;;  %v4217_v25 = vsel %vm4209_vm5, -1e+30, %v4177_v60 }
 0xe61   :  { %v4705_v41 = vsel %vm3898_vm2, %v4693_v45, -inf  ;;  %v4237_v31 = vsel %vm3898_vm2, %v4217_v25, -inf }
 0xe62   :  { %4706 = vmax.xlane.f32.xlu0 %v4705_v41  ;;  %4238 = vmax.xlane.f32.xlu1 %v4237_v31 }
 0xea5   :  { %v4861_v23 = vpop.xlane.xlu0 %4860 }
 0xea6   :  { %vm4883_vm6 = vcmp.ge.f32.partialorder %v4851_v11, %v4861_v23 }
 0xea7   :  { %v4891_v59 = vsel %vm4883_vm6, -1e+30, %v4851_v11 }
 0xea8   :  { %v4899_v15 = vsel %vm3898_vm2, %v4891_v59, -inf }
 0xea9   :  { %4900 = vmax.xlane.f32.xlu2 %v4899_v15 }
 0xead   :  { %v4393_v56 = vpop.xlane.xlu2 %4392 }
 0xeae   :  { %vm4407_vm7 = vcmp.ge.f32.partialorder %v4375_v6, %v4393_v56 }
 0xeaf   :  { %v4415_v26 = vsel %vm4407_vm7, -1e+30, %v4375_v6 }
 0xeb0   :  { %v4431_v28 = vsel %vm3898_vm2, %v4415_v26, -inf }
 0xeb1   :  { %4432 = vmax.xlane.f32.xlu1 %v4431_v28 }
 0xec5   :  { %v4864_v30 = vpop.xlane.xlu1 %4863 }
 0xec6   :  { %vm4884_vm8 = vcmp.ge.f32.partialorder %v4852_v0, %v4864_v30 }
 0xec7   :  { %v11566_v18 = vsel %vm4884_vm8, -1e+30, %v4852_v0 }
 0xec8   :  { %v4902_v7 = vsel %vm3898_vm2, %v11566_v18, -inf }
 0xec9   :  { %4903 = vmax.xlane.f32.xlu0 %v4902_v7 }
 0xecd   :  { %v4550_v8 = vpop.xlane.xlu0 %4549  ;;  %v4082_v62 = vpop.xlane.xlu1 %4081 }
 0xece   :  { %vm4566_vm9 = vcmp.ge.f32.partialorder %v4534_v37, %v4550_v8  ;;  %vm4090_vm10 = vcmp.ge.f32.partialorder %v4058_v2, %v4082_v62  ;;  %v4396_v34 = vpop.xlane.xlu2 %4395 }
 0xecf   :  { %v4574_v43 = vsel %vm4566_vm9, -1e+30, %v4534_v37  ;;  %v4098_v55 = vsel %vm4090_vm10, -1e+30, %v4058_v2  ;;  %vm4408_vm11 = vcmp.ge.f32.partialorder %v4376_v5, %v4396_v34 }
 0xed0   :  { %v4416_v20 = vsel %vm4408_vm11, -1e+30, %v4376_v5  ;;  %v4588_v16 = vsel %vm3898_vm2, %v4574_v43, -inf  ;;  %v4120_v13 = vsel %vm3898_vm2, %v4098_v55, -inf }
 0xed1   :  { %4589 = vmax.xlane.f32.xlu2 %v4588_v16  ;;  %4121 = vmax.xlane.f32.xlu0 %v4120_v13  ;;  %v4434_v53 = vsel %vm3898_vm2, %v4416_v20, -inf }
 0xed2   :  { %4435 = vmax.xlane.f32.xlu1 %v4434_v53 }
 0xed5   :  { %v4707_v51 = vpop.xlane.xlu0 %4706  ;;  %v4239_v61 = vpop.xlane.xlu1 %4238 }
 0xed6   :  { %vm4725_vm12 = vcmp.ge.f32.partialorder %v4693_v45, %v4707_v51  ;;  %vm4249_vm13 = vcmp.ge.f32.partialorder %v4217_v25, %v4239_v61 }
 0xed7   :  { %v4733_v42 = vsel %vm4725_vm12, -1e+30, %v4693_v45  ;;  %v4257_v4 = vsel %vm4249_vm13, -1e+30, %v4217_v25 }
 0xed8   :  { %v4745_v60 = vsel %vm3898_vm2, %v4733_v42, -inf  ;;  %v4277_v10 = vsel %vm3898_vm2, %v4257_v4, -inf }
 0xed9   :  { %4746 = vmax.xlane.f32.xlu2 %v4745_v60  ;;  %4278 = vmax.xlane.f32.xlu0 %v4277_v10 }
 0xf1c   :  { %v4901_v58 = vpop.xlane.xlu2 %4900 }
 0xf1d   :  { %vm4923_vm14 = vcmp.ge.f32.partialorder %v4891_v59, %v4901_v58 }
 0xf1e   :  { %v4931_v22 = vsel %vm4923_vm14, -1e+30, %v4891_v59 }
 0xf1f   :  { %v4939_v49 = vsel %vm3898_vm2, %v4931_v22, -inf }
 0xf20   :  { %4940 = vmax.xlane.f32.xlu1 %v4939_v49 }
 0xf24   :  { %v4433_v11 = vpop.xlane.xlu1 %4432 }
 0xf25   :  { %vm4447_vm15 = vcmp.ge.f32.partialorder %v4415_v26, %v4433_v11 }
 0xf26   :  { %v4455_v3 = vsel %vm4447_vm15, -1e+30, %v4415_v26 }
 0xf27   :  { %v4471_v9 = vsel %vm3898_vm2, %v4455_v3, -inf }
 0xf28   :  { %4472 = vmax.xlane.f32.xlu0 %v4471_v9 }
 0xf3c   :  { %v4904_v6 = vpop.xlane.xlu0 %4903 }
 0xf3d   :  { %vm4924_vm8 = vcmp.ge.f32.partialorder %v11566_v18, %v4904_v6 }
 0xf3e   :  { %v4932_v45 = vsel %vm4924_vm8, -1e+30, %v11566_v18 }
 0xf3f   :  { %v4942_v25 = vsel %vm3898_vm2, %v4932_v45, -inf }
 0xf44   :  { %v4122_v38 = vpop.xlane.xlu0 %4121  ;;  %v4590_v24 = vpop.xlane.xlu2 %4589 }
 0xf45   :  { %vm4130_vm3 = vcmp.ge.f32.partialorder %v4098_v55, %v4122_v38  ;;  %v4436_v0 = vpop.xlane.xlu1 %4435  ;;  %vm4606_vm4 = vcmp.ge.f32.partialorder %v4574_v43, %v4590_v24 }
 0xf46   :  { %v4138_v12 = vsel %vm4130_vm3, -1e+30, %v4098_v55  ;;  %vm4448_vm5 = vcmp.ge.f32.partialorder %v4416_v20, %v4436_v0  ;;  %v4614_v54 = vsel %vm4606_vm4, -1e+30, %v4574_v43 }
 0xf47   :  { %v4456_v1 = vsel %vm4448_vm5, -1e+30, %v4416_v20  ;;  %v4160_v50 = vsel %vm3898_vm2, %v4138_v12, -inf  ;;  %v4628_v37 = vsel %vm3898_vm2, %v4614_v54, -inf }
 0xf48   :  { %4161 = vmax.xlane.f32.xlu2 %v4160_v50  ;;  %v4474_v2 = vsel %vm3898_vm2, %v4456_v1, -inf  ;;  %4629 = vmax.xlane.f32.xlu1 %v4628_v37 }
 0xf49   :  { %4475 = vmax.xlane.f32.xlu0 %v4474_v2 }
 0xf4c   :  { %v4279_v5 = vpop.xlane.xlu0 %4278  ;;  %v4747_v29 = vpop.xlane.xlu2 %4746 }
 0xf4d   :  { %vm4289_vm6 = vcmp.ge.f32.partialorder %v4257_v4, %v4279_v5  ;;  %vm4765_vm7 = vcmp.ge.f32.partialorder %v4733_v42, %v4747_v29 }
 0xf4e   :  { %v4297_v48 = vsel %vm4289_vm6, -1e+30, %v4257_v4  ;;  %v4773_v39 = vsel %vm4765_vm7, -1e+30, %v4733_v42 }
 0xf4f   :  { %v4317_v35 = vsel %vm3898_vm2, %v4297_v48, -inf  ;;  %v4785_v57 = vsel %vm3898_vm2, %v4773_v39, -inf }
 0xf50   :  { %4318 = vmax.xlane.f32.xlu2 %v4317_v35  ;;  %4786 = vmax.xlane.f32.xlu1 %v4785_v57 }
 0xf58   :  { %4943 = vmax.xlane.f32.xlu2 %v4942_v25 }
 0xf93   :  { %v4941_v41 = vpop.xlane.xlu1 %4940 }
 0xf94   :  { %vm4963_vm9 = vcmp.ge.f32.partialorder %v4931_v22, %v4941_v41 }
 0xf95   :  { %v4971_v31 = vsel %vm4963_vm9, -1e+30, %v4931_v22 }
 0xf96   :  { %v4979_v23 = vsel %vm3898_vm2, %v4971_v31, -inf }
 0xf97   :  { %4980 = vmax.xlane.f32.xlu0 %v4979_v23 }
 0xf9b   :  { %v4473_v59 = vpop.xlane.xlu0 %4472 }
 0xf9c   :  { %vm4487_vm10 = vcmp.ge.f32.partialorder %v4455_v3, %v4473_v59 }
 0xf9d   :  { %v4495_v15 = vsel %vm4487_vm10, -1e+30, %v4455_v3 }
 0xf9e   :  { %v4511_v56 = vsel %vm3898_vm2, %v4495_v15, -inf }
 0xf9f   :  { %4512 = vmax.xlane.f32.xlu2 %v4511_v56 }
 0xfbb   :  { %v4630_v26 = vpop.xlane.xlu1 %4629  ;;  %v4162_v28 = vpop.xlane.xlu2 %4161 }
 0xfbc   :  { %v4476_v30 = vpop.xlane.xlu0 %4475  ;;  %vm4646_vm11 = vcmp.ge.f32.partialorder %v4614_v54, %v4630_v26  ;;  %vm4170_vm15 = vcmp.ge.f32.partialorder %v4138_v12, %v4162_v28 }
 0xfbd   :  { %vm4488_vm12 = vcmp.ge.f32.partialorder %v4456_v1, %v4476_v30  ;;  %v4654_v18 = vsel %vm4646_vm11, -1e+30, %v4614_v54  ;;  %v4178_v51 = vsel %vm4170_vm15, -1e+30, %v4138_v12 }
 0xfbe   :  { %v4496_v7 = vsel %vm4488_vm12, -1e+30, %v4456_v1  ;;  %v4668_v8 = vsel %vm3898_vm2, %v4654_v18, -inf  ;;  %v4200_v61 = vsel %vm3898_vm2, %v4178_v51, -inf }
 0xfbf   :  { %v4514_v62 = vsel %vm3898_vm2, %v4496_v7, -inf  ;;  %4669 = vmax.xlane.f32.xlu0 %v4668_v8 }
 0xfc0   :  { %4515 = vmax.xlane.f32.xlu2 %v4514_v62 }
 0xfc3   :  { %v4787_v34 = vpop.xlane.xlu1 %4786  ;;  %v4319_v43 = vpop.xlane.xlu2 %4318 }
 0xfc4   :  { %vm4805_vm13 = vcmp.ge.f32.partialorder %v4773_v39, %v4787_v34  ;;  %vm4329_vm3 = vcmp.ge.f32.partialorder %v4297_v48, %v4319_v43 }
 0xfc5   :  { %v4813_v55 = vsel %vm4805_vm13, -1e+30, %v4773_v39  ;;  %v4337_v42 = vsel %vm4329_vm3, -1e+30, %v4297_v48 }
 0xfc6   :  { %v4825_v20 = vsel %vm3898_vm2, %v4813_v55, -inf  ;;  %v4357_v4 = vsel %vm3898_vm2, %v4337_v42, -inf }
 0xfc7   :  { %4826 = vmax.xlane.f32.xlu0 %v4825_v20 }
 0xfcb   :  { %v4944_v16 = vpop.xlane.xlu2 %4943 }
 0xfcc   :  { %vm4964_vm14 = vcmp.ge.f32.partialorder %v4932_v45, %v4944_v16 }
 0xfcd   :  { %v4972_v13 = vsel %vm4964_vm14, -1e+30, %v4932_v45 }
 0xfce   :  { %v4982_v53 = vsel %vm3898_vm2, %v4972_v13, -inf }
 0xfcf   :  { %4983 = vmax.xlane.f32.xlu1 %v4982_v53 }
 0xfd7   :  { %4201 = vmax.xlane.f32.xlu1 %v4200_v61 }
 0xfdf   :  { %4358 = vmax.xlane.f32.xlu1 %v4357_v4 }
0x100a   :  { %v4981_v22 = vpop.xlane.xlu0 %4980 }
0x100b   :  { %vm5003_vm7 = vcmp.ge.f32.partialorder %v4971_v31, %v4981_v22 }
0x100c   :  { %v5011_v24 = vsel %vm5003_vm7, -1e+30, %v4971_v31 }
0x100d   :  { %v5019_v12 = vsel %vm3898_vm2, %v5011_v24, -inf }
0x1012   :  { %v4513_v60 = vpop.xlane.xlu2 %4512 }
0x1013   :  { %vm4527_vm4 = vcmp.ge.f32.partialorder %v4495_v15, %v4513_v60 }
0x1014   :  { %v4535_v10 = vsel %vm4527_vm4, -1e+30, %v4495_v15 }
0x1015   :  { %v4551_v58 = vsel %vm3898_vm2, %v4535_v10, -inf }
0x1016   :  { %4552 = vmax.xlane.f32.xlu1 %v4551_v58 }
0x1032   :  { %v4670_v49 = vpop.xlane.xlu0 %4669 }
0x1033   :  { %vm4686_vm5 = vcmp.ge.f32.partialorder %v4654_v18, %v4670_v49  ;;  %v4516_v11 = vpop.xlane.xlu2 %4515 }
0x1034   :  { %v4694_v3 = vsel %vm4686_vm5, -1e+30, %v4654_v18  ;;  %vm4528_vm6 = vcmp.ge.f32.partialorder %v4496_v7, %v4516_v11 }
0x1035   :  { %v4536_v9 = vsel %vm4528_vm6, -1e+30, %v4496_v7  ;;  %v4708_v6 = vsel %vm3898_vm2, %v4694_v3, -inf }
0x1036   :  { %4709 = vmax.xlane.f32.xlu2 %v4708_v6  ;;  %v4554_v38 = vsel %vm3898_vm2, %v4536_v9, -inf }
0x1037   :  { %4555 = vmax.xlane.f32.xlu1 %v4554_v38 }
0x103a   :  { %v4827_v0 = vpop.xlane.xlu0 %4826 }
0x103b   :  { %vm4845_vm8 = vcmp.ge.f32.partialorder %v4813_v55, %v4827_v0 }
0x103c   :  { %v4853_v54 = vsel %vm4845_vm8, -1e+30, %v4813_v55 }
0x103d   :  { %v4865_v37 = vsel %vm3898_vm2, %v4853_v54, -inf }
0x103e   :  { %5020 = vmax.xlane.f32.xlu2 %v5019_v12 }
0x1042   :  { %v4984_v1 = vpop.xlane.xlu1 %4983 }
0x1043   :  { %vm5004_vm9 = vcmp.ge.f32.partialorder %v4972_v13, %v4984_v1 }
0x1044   :  { %v5012_v50 = vsel %vm5004_vm9, -1e+30, %v4972_v13 }
0x1045   :  { %v5022_v2 = vsel %vm3898_vm2, %v5012_v50, -inf }
0x1046   :  { %4866 = vmax.xlane.f32.xlu2 %v4865_v37  ;;  %5023 = vmax.xlane.f32.xlu0 %v5022_v2 }
0x104a   :  { %v4202_v5 = vpop.xlane.xlu1 %4201 }
0x104b   :  { %vm4210_vm10 = vcmp.ge.f32.partialorder %v4178_v51, %v4202_v5 }
0x104c   :  { %v4218_v29 = vsel %vm4210_vm10, -1e+30, %v4178_v51 }
0x104d   :  { %v4240_v48 = vsel %vm3898_vm2, %v4218_v29, -inf }
0x104e   :  { %4241 = vmax.xlane.f32.xlu0 %v4240_v48 }
0x1052   :  { %v4359_v39 = vpop.xlane.xlu1 %4358 }
0x1053   :  { %vm4369_vm11 = vcmp.ge.f32.partialorder %v4337_v42, %v4359_v39 }
0x1054   :  { %v4377_v35 = vsel %vm4369_vm11, -1e+30, %v4337_v42 }
0x1055   :  { %v4397_v57 = vsel %vm3898_vm2, %v4377_v35, -inf }
0x1056   :  { %4398 = vmax.xlane.f32.xlu0 %v4397_v57 }
0x1089   :  { %v4553_v45 = vpop.xlane.xlu1 %4552 }
0x108a   :  { %vm4567_vm12 = vcmp.ge.f32.partialorder %v4535_v10, %v4553_v45 }
0x108b   :  { %v4575_v25 = vsel %vm4567_vm12, -1e+30, %v4535_v10 }
0x108c   :  { %v4591_v41 = vsel %vm3898_vm2, %v4575_v25, -inf }
0x108d   :  { %4592 = vmax.xlane.f32.xlu0 %v4591_v41 }
0x10a9   :  { %v4710_v31 = vpop.xlane.xlu2 %4709 }
0x10aa   :  { %v4556_v23 = vpop.xlane.xlu1 %4555  ;;  %vm4726_vm13 = vcmp.ge.f32.partialorder %v4694_v3, %v4710_v31 }
0x10ab   :  { %vm4568_vm14 = vcmp.ge.f32.partialorder %v4536_v9, %v4556_v23  ;;  %v4734_v59 = vsel %vm4726_vm13, -1e+30, %v4694_v3 }
0x10ac   :  { %v4576_v15 = vsel %vm4568_vm14, -1e+30, %v4536_v9  ;;  %v4748_v56 = vsel %vm3898_vm2, %v4734_v59, -inf }
0x10ad   :  { %v4594_v26 = vsel %vm3898_vm2, %v4576_v15, -inf  ;;  %4749 = vmax.xlane.f32.xlu1 %v4748_v56 }
0x10ae   :  { %4595 = vmax.xlane.f32.xlu0 %v4594_v26 }
0x10b1   :  { %v5021_v28 = vpop.xlane.xlu2 %5020 }
0x10b2   :  { %vm5043_vm3 = vcmp.ge.f32.partialorder %v5011_v24, %v5021_v28 }
0x10b3   :  { %v5051_v62 = vsel %vm5043_vm3, -1e+30, %v5011_v24 }
0x10b4   :  { %v5059_v20 = vsel %vm3898_vm2, %v5051_v62, -inf }
0x10b9   :  { %v5024_v30 = vpop.xlane.xlu0 %5023  ;;  %v4867_v18 = vpop.xlane.xlu2 %4866 }
0x10ba   :  { %vm4885_vm15 = vcmp.ge.f32.partialorder %v4853_v54, %v4867_v18  ;;  %vm5044_vm6 = vcmp.ge.f32.partialorder %v5012_v50, %v5024_v30 }
0x10bb   :  { %v4893_v7 = vsel %vm4885_vm15, -1e+30, %v4853_v54  ;;  %v11608_v51 = vsel %vm5044_vm6, -1e+30, %v5012_v50 }
0x10bc   :  { %v4905_v8 = vsel %vm3898_vm2, %v4893_v7, -inf  ;;  %v5062_v61 = vsel %vm3898_vm2, %v11608_v51, -inf }
0x10bd   :  { %4906 = vmax.xlane.f32.xlu1 %v4905_v8 }
0x10c1   :  { %v4242_v34 = vpop.xlane.xlu0 %4241 }
0x10c2   :  { %vm4250_vm4 = vcmp.ge.f32.partialorder %v4218_v29, %v4242_v34 }
0x10c3   :  { %v4258_v43 = vsel %vm4250_vm4, -1e+30, %v4218_v29 }
0x10c4   :  { %v4280_v55 = vsel %vm3898_vm2, %v4258_v43, -inf }
0x10c5   :  { %4281 = vmax.xlane.f32.xlu2 %v4280_v55  ;;  %5060 = vmax.xlane.f32.xlu1 %v5059_v20 }
0x10c9   :  { %v4399_v16 = vpop.xlane.xlu0 %4398 }
0x10ca   :  { %vm4409_vm5 = vcmp.ge.f32.partialorder %v4377_v35, %v4399_v16 }
0x10cb   :  { %v4417_v13 = vsel %vm4409_vm5, -1e+30, %v4377_v35 }
0x10cc   :  { %v4437_v53 = vsel %vm3898_vm2, %v4417_v13, -inf }
0x10cd   :  { %4438 = vmax.xlane.f32.xlu2 %v4437_v53 }
0x10d5   :  { %5063 = vmax.xlane.f32.xlu2 %v5062_v61 }
0x1100   :  { %v4593_v42 = vpop.xlane.xlu0 %4592 }
0x1101   :  { %vm4607_vm7 = vcmp.ge.f32.partialorder %v4575_v25, %v4593_v42 }
0x1102   :  { %v4615_v4 = vsel %vm4607_vm7, -1e+30, %v4575_v25 }
0x1103   :  { %v4631_v60 = vsel %vm3898_vm2, %v4615_v4, -inf }
0x1104   :  { %4632 = vmax.xlane.f32.xlu2 %v4631_v60 }
0x1120   :  { %v4750_v49 = vpop.xlane.xlu1 %4749 }
0x1121   :  { %v4596_v10 = vpop.xlane.xlu0 %4595  ;;  %vm4766_vm11 = vcmp.ge.f32.partialorder %v4734_v59, %v4750_v49 }
0x1122   :  { %vm4608_vm8 = vcmp.ge.f32.partialorder %v4576_v15, %v4596_v10  ;;  %v4774_v12 = vsel %vm4766_vm11, -1e+30, %v4734_v59 }
0x1123   :  { %v4616_v58 = vsel %vm4608_vm8, -1e+30, %v4576_v15  ;;  %v4788_v50 = vsel %vm3898_vm2, %v4774_v12, -inf }
0x1124   :  { %v4634_v22 = vsel %vm3898_vm2, %v4616_v58, -inf }
0x1125   :  { %4635 = vmax.xlane.f32.xlu2 %v4634_v22 }
0x1130   :  { %v4907_v11 = vpop.xlane.xlu1 %4906 }
0x1131   :  { %vm4925_vm13 = vcmp.ge.f32.partialorder %v4893_v7, %v4907_v11 }
0x1132   :  { %v4933_v2 = vsel %vm4925_vm13, -1e+30, %v4893_v7 }
0x1133   :  { %v4945_v5 = vsel %vm3898_vm2, %v4933_v2, -inf }
0x1138   :  { %v5061_v3 = vpop.xlane.xlu1 %5060  ;;  %v4282_v9 = vpop.xlane.xlu2 %4281 }
0x1139   :  { %vm5083_vm9 = vcmp.ge.f32.partialorder %v5051_v62, %v5061_v3  ;;  %vm4290_vm10 = vcmp.ge.f32.partialorder %v4258_v43, %v4282_v9 }
0x113a   :  { %v5091_v6 = vsel %vm5083_vm9, -1e+30, %v5051_v62  ;;  %v4298_v38 = vsel %vm4290_vm10, -1e+30, %v4258_v43 }
0x113b   :  { %v5099_v24 = vsel %vm3898_vm2, %v5091_v6, -inf  ;;  %v4320_v0 = vsel %vm3898_vm2, %v4298_v38, -inf }
0x113c   :  { %5100 = vmax.xlane.f32.xlu0 %v5099_v24  ;;  %4321 = vmax.xlane.f32.xlu1 %v4320_v0 }
0x1140   :  { %v4439_v54 = vpop.xlane.xlu2 %4438 }
0x1141   :  { %vm4449_vm12 = vcmp.ge.f32.partialorder %v4417_v13, %v4439_v54 }
0x1142   :  { %v4457_v1 = vsel %vm4449_vm12, -1e+30, %v4417_v13 }
0x1143   :  { %v4477_v37 = vsel %vm3898_vm2, %v4457_v1, -inf }
0x1144   :  { %4789 = vmax.xlane.f32.xlu0 %v4788_v50  ;;  %4478 = vmax.xlane.f32.xlu1 %v4477_v37 }
0x1148   :  { %v11619_v29 = vpop.xlane.xlu2 %5063 }
0x1149   :  { %vm5084_vm12 = vcmp.ge.f32.partialorder %v11608_v51, %v11619_v29 }
0x114a   :  { %v5092_v11 = vsel %vm5084_vm12, -1e+30, %v11608_v51 }
0x114c   :  { %4946 = vmax.xlane.f32.xlu0 %v4945_v5 }
0x1177   :  { %v4633_v48 = vpop.xlane.xlu2 %4632 }
0x1178   :  { %vm4647_vm14 = vcmp.ge.f32.partialorder %v4615_v4, %v4633_v48 }
0x1179   :  { %v4655_v39 = vsel %vm4647_vm14, -1e+30, %v4615_v4 }
0x117a   :  { %v4671_v35 = vsel %vm3898_vm2, %v4655_v39, -inf }
0x117b   :  { %4672 = vmax.xlane.f32.xlu1 %v4671_v35 }
0x1198   :  { %v4636_v57 = vpop.xlane.xlu2 %4635 }
0x1199   :  { %vm4648_vm15 = vcmp.ge.f32.partialorder %v4616_v58, %v4636_v57 }
0x119a   :  { %v4656_v45 = vsel %vm4648_vm15, -1e+30, %v4616_v58 }
0x119b   :  { %v4674_v25 = vsel %vm3898_vm2, %v4656_v45, -inf }
0x119c   :  { %4675 = vmax.xlane.f32.xlu1 %v4674_v25 }
0x11af   :  { %v5101_v41 = vpop.xlane.xlu0 %5100  ;;  %v4322_v31 = vpop.xlane.xlu1 %4321 }
0x11b0   :  { %vm4330_vm3 = vcmp.ge.f32.partialorder %v4298_v38, %v4322_v31  ;;  %vm5123_vm8 = vcmp.ge.f32.partialorder %v5091_v6, %v5101_v41 }
0x11b1   :  { %v4338_v23 = vsel %vm4330_vm3, -1e+30, %v4298_v38  ;;  %v5131_v20 = vsel %vm5123_vm8, -1e+30, %v5091_v6  ;;  %v5102_v38 = vsel %vm3898_vm2, %v5092_v11, -inf }
0x11b2   :  { %v4360_v59 = vsel %vm3898_vm2, %v4338_v23, -inf  ;;  %v5139_v16 = vsel %vm3898_vm2, %v5131_v20, -inf }
0x11b3   :  { %4361 = vmax.xlane.f32.xlu0 %v4360_v59 }
0x11b7   :  { %v4790_v15 = vpop.xlane.xlu0 %4789  ;;  %v4479_v56 = vpop.xlane.xlu1 %4478 }
0x11b8   :  { %vm4806_vm4 = vcmp.ge.f32.partialorder %v4774_v12, %v4790_v15  ;;  %vm4489_vm5 = vcmp.ge.f32.partialorder %v4457_v1, %v4479_v56 }
0x11b9   :  { %v4814_v26 = vsel %vm4806_vm4, -1e+30, %v4774_v12  ;;  %v11624_v28 = vsel %vm4489_vm5, -1e+30, %v4457_v1  ;;  %v5171_v1 = vsub.f32 %v10344_v17, %v10353_v21 }
0x11ba   :  { %v4828_v30 = vsel %vm3898_vm2, %v4814_v26, -inf  ;;  %v4517_v18 = vsel %vm3898_vm2, %v11624_v28, -inf }
0x11bb   :  { %4829 = vmax.xlane.f32.xlu2 %v4828_v30  ;;  %4518 = vmax.xlane.f32.xlu0 %v4517_v18  ;;  %v5179_v50 = vmul.f32 1.442695, %v5171_v1 }
0x11bd   :  { %8674 = vpow2.f32 %v5179_v50 }
0x11bf   :  { %v4947_v7 = vpop.xlane.xlu0 %4946 }
0x11c0   :  { %vm4965_vm6 = vcmp.ge.f32.partialorder %v4933_v2, %v4947_v7 }
0x11c1   :  { %v4973_v8 = vsel %vm4965_vm6, -1e+30, %v4933_v2 }
0x11c2   :  { %v4985_v62 = vsel %vm3898_vm2, %v4973_v8, -inf }
0x11c3   :  { %4986 = vmax.xlane.f32.xlu2 %v4985_v62  ;;  %v8675_v2 = vpop.eup %8674 }
0x11db   :  { %5609 = vrot.lane.b32.xlu2 %v11220_v27, %s8735_s2 }
0x11ee   :  { %v4673_v34 = vpop.xlane.xlu1 %4672 }
0x11ef   :  { %vm4687_vm7 = vcmp.ge.f32.partialorder %v4655_v39, %v4673_v34 }
0x11f0   :  { %v11632_v43 = vsel %vm4687_vm7, -1e+30, %v4655_v39 }
0x11f1   :  { %v4711_v55 = vsel %vm3898_vm2, %v11632_v43, -inf }
0x11f2   :  { %4712 = vmax.xlane.f32.xlu0 %v4711_v55 }
0x1204   :  { %5140 = vmax.xlane.f32.xlu2 %v5139_v16 }
0x120f   :  { %v4676_v4 = vpop.xlane.xlu1 %4675 }
0x1210   :  { %vm4688_vm11 = vcmp.ge.f32.partialorder %v4656_v45, %v4676_v4 }
0x1211   :  { %v4696_v58 = vsel %vm4688_vm11, -1e+30, %v4656_v45 }
0x1212   :  { %v4714_v49 = vsel %vm3898_vm2, %v4696_v58, -inf }
0x121c   :  { %5603 = vrot.lane.b32.xlu2 %v11258_v40, %s8735_s2 }
0x1224   :  { %5601 = vrot.lane.b32.xlu2 %v11276_v52, %s8735_s2 }
0x1226   :  { %v4362_v13 = vpop.xlane.xlu0 %4361 }
0x1227   :  { %vm4370_vm9 = vcmp.ge.f32.partialorder %v4338_v23, %v4362_v13 }
0x1228   :  { %v11641_v53 = vsel %vm4370_vm9, -1e+30, %v4338_v23 }
0x1229   :  { %v4400_v61 = vsel %vm3898_vm2, %v11641_v53, -inf }
0x122a   :  { %4401 = vmax.xlane.f32.xlu0 %v4400_v61 }
0x122c   :  { %5599 = vrot.lane.b32.xlu2 %v11294_v47, %s8735_s2 }
0x122e   :  { %v4830_v42 = vpop.xlane.xlu2 %4829  ;;  %v4519_v25 = vpop.xlane.xlu0 %4518 }
0x122f   :  { %vm4846_vm10 = vcmp.ge.f32.partialorder %v4814_v26, %v4830_v42  ;;  %vm4529_vm4 = vcmp.ge.f32.partialorder %v11624_v28, %v4519_v25 }
0x1230   :  { %v4854_v60 = vsel %vm4846_vm10, -1e+30, %v4814_v26  ;;  %v11683_v23 = vsel %vm4529_vm4, -1e+30, %v11624_v28 }
0x1231   :  { %v4868_v10 = vsel %vm3898_vm2, %v4854_v60, -inf  ;;  %v4557_v15 = vsel %vm3898_vm2, %v11683_v23, -inf }
0x1232   :  { %4869 = vmax.xlane.f32.xlu1 %v4868_v10 }
0x1236   :  { %v4987_v22 = vpop.xlane.xlu2 %4986 }
0x1237   :  { %vm5005_vm13 = vcmp.ge.f32.partialorder %v4973_v8, %v4987_v22 }
0x1238   :  { %v5013_v12 = vsel %vm5005_vm13, -1e+30, %v4973_v8 }
0x1239   :  { %v5025_v54 = vsel %vm3898_vm2, %v5013_v12, -inf }
0x123a   :  { %4715 = vmax.xlane.f32.xlu1 %v4714_v49 }
0x123e   :  { %v5610_v3 = vpop.permute.xlu2 %5609 }
0x123f   :  { %v11652_v9 = vand.u32 4294901760, %v5610_v3 }
0x1241   :  { %v11655_v6 = vsub.f32 %v5610_v3, %v11652_v9  ;;  %5631 = vmatpush.msra.mxu0 %v11652_v9 }
0x1242   :  { %5103 = vmax.xlane.f32.xlu1 %v5102_v38 }
0x1243   :  { %v5665_v24 = vand.u32 4294901760, %v11655_v6 }
0x1245   :  { %v5666_v0 = vsub.f32 %v11655_v6, %v5665_v24 }
0x1247   :  { %v5667_v51 = vand.u32 4294901760, %v5666_v0  ;;  %v13467_v0 = vld [vmem:[#allocation123_spill] sm:$0xff] }
0x1249   :  { %5668 = vmatpush.msra.mxu1 %v5667_v51 }
0x124a   :  { %5026 = vmax.xlane.f32.xlu1 %v5025_v54 }
0x1263   :  { %5605 = vrot.lane.b32.xlu1 %v11243_v19, %s8735_s2 }
0x1265   :  { %v11679_v41 = vpop.xlane.xlu0 %4712 }
0x1277   :  { %v5141_v37 = vpop.xlane.xlu2 %5140 }
0x1278   :  { %vm5163_vm14 = vcmp.ge.f32.partialorder %v10344_v17, %v5141_v37 }
0x1279   :  { %v5195_v5 = vsel %vm5163_vm14, %v8675_v2, 0.0  ;;  %vm4727_vm14 = vcmp.ge.f32.partialorder %v11632_v43, %v11679_v41 }
0x127a   :  { %v5203_v29 = vsel %vm3898_vm2, %v5195_v5, 0.0 }
0x127f   :  { %v5604_v54 = vpop.permute.xlu2 %5603 }
0x128d   :  { %5204 = vadd.xlane.f32.xlu1 %v5203_v29 }
0x129d   :  { %v4402_v59 = vpop.xlane.xlu0 %4401 }
0x129e   :  { %vm4410_vm5 = vcmp.ge.f32.partialorder %v11641_v53, %v4402_v59 }
0x129f   :  { %v11689_v26 = vsel %vm4410_vm5, -1e+30, %v11641_v53 }
0x12a0   :  { %v4440_v30 = vsel %vm3898_vm2, %v11689_v26, -inf }
0x12a5   :  { %v4870_v48 = vpop.xlane.xlu1 %4869 }
0x12a6   :  { %5595 = vrot.lane.b32.xlu1 %v11330_v44, %s8735_s2  ;;  %vm4886_vm3 = vcmp.ge.f32.partialorder %v4854_v60, %v4870_v48  ;;  %v11715_v48 = vand.u32 4294901760, %v5604_v54 }
0x12a7   :  { %v11673_v45 = vsel %vm4886_vm3, -1e+30, %v4854_v60 }
0x12a8   :  { %v4908_v17 = vsel %vm3898_vm2, %v11673_v45, -inf }
0x12ad   :  { %v4716_v39 = vpop.xlane.xlu1 %4715 }
0x12ae   :  { %vm4728_vm6 = vcmp.ge.f32.partialorder %v4696_v58, %v4716_v39 }
0x12af   :  { %v11693_v28 = vsel %vm4728_vm6, -1e+30, %v4696_v58 }
0x12b0   :  { %v4754_v7 = vsel %vm3898_vm2, %v11693_v28, -inf }
0x12b5   :  { %v5104_v35 = vpop.xlane.xlu1 %5103 }
0x12b6   :  { %vm5124_vm15 = vcmp.ge.f32.partialorder %v5092_v11, %v5104_v35 }
0x12b7   :  { %v5132_v57 = vsel %vm5124_vm15, -1e+30, %v5092_v11 }
0x12b8   :  { %v5142_v21 = vsel %vm3898_vm2, %v5132_v57, -inf }
0x12b9   :  { %5143 = vmax.xlane.f32.xlu0 %v5142_v21 }
0x12bd   :  { %v5027_v31 = vpop.xlane.xlu1 %5026 }
0x12be   :  { %vm5045_vm7 = vcmp.ge.f32.partialorder %v5013_v12, %v5027_v31 }
0x12bf   :  { %v11697_v55 = vsel %vm5045_vm7, -1e+30, %v5013_v12  ;;  %v5172_v12 = vsub.f32 %v13467_v0, %v10367_v33 }
0x12c0   :  { %v5065_v61 = vsel %vm3898_vm2, %v11697_v55, -inf }
0x12c1   :  { %v5181_v51 = vmul.f32 1.442695, %v5172_v12 }
0x12cd   :  { %5607 = vrot.lane.b32.xlu0 %v11232_v46, %s8735_s2 }
0x12d0   :  { %4909 = vmax.xlane.f32.xlu1 %v4908_v17  ;;  %v11723_v17 = vsub.f32 %v5604_v54, %v11715_v48 }
0x12d5   :  { %v5606_v56 = vpop.permute.xlu1 %5605 }
0x12d6   :  { %v11711_v33 = vand.u32 4294901760, %v5606_v56 }
0x12d8   :  { %v11720_v57 = vsub.f32 %v5606_v56, %v11711_v33 }
0x12f7   :  { %4558 = vmax.xlane.f32.xlu0 %v4557_v15  ;;  %v5677_v15 = vand.u32 4294901760, %v11720_v57 }
0x12ff   :  { %4441 = vmax.xlane.f32.xlu0 %v4440_v30 }
0x1300   :  { %v5205_v18 = vpop.xlane.xlu1 %5204 }
0x1301   :  { %8676 = vrcp.f32 %v5205_v18  ;;  %v5238_v20 = vand.u32 2147483648, %v5205_v18  ;;  %v5236_v13 = vand.u32 2147483647, %v5205_v18  ;;  %vm5232_vm9 = vweird.f32 %v5205_v18 }
0x1302   :  { %8678 = vpow2.f32 %v5181_v51 }
0x1303   :  { %v5239_v42 = vor.u32 1.1754944e-38, %v5238_v20  ;;  %vm5237_vm11 = vcmp.eq.f32.partialorder %v5236_v13, 8.507059e+37 }
0x1307   :  { %v8677_v8 = vpop.eup %8676  ;;  %4755 = vmax.xlane.f32.xlu0 %v4754_v7 }
0x1308   :  { %v5228_v62 = vmul.f32 %v8677_v8, %v5205_v18  ;;  %vm5233_vm8 = vweird.f32 %v8677_v8  ;;  %v8679_v50 = vpop.eup %8678  ;;  %v5683_v18 = vand.u32 4294901760, %v11723_v17 }
0x1309   :  { %vm5234_vm10 = vmor %vm5232_vm9, %vm5233_vm8 }
0x130a   :  { %v5229_v34 = vsub.f32 1.0, %v5228_v62 }
0x130c   :  { %v5230_v16 = vmul.f32 %v8677_v8, %v5229_v34 }
0x130e   :  { %v5231_v53 = vadd.f32 %v8677_v8, %v5230_v16 }
0x130f   :  { %5066 = vmax.xlane.f32.xlu0 %v5065_v61 }
0x1310   :  { %v5235_v4 = vsel %vm5234_vm10, %v8677_v8, %v5231_v53  ;;  %v13468_v53 = vld [vmem:[#allocation24_spill] sm:$0xff] }
0x1311   :  { %v5240_v60 = vsel %vm5237_vm11, %v5239_v42, %v5235_v4  ;;  %v5684_v42 = vsub.f32 %v11723_v17, %v5683_v18 }
0x1312   :  { %v5339_v10 = vmul.f32 %v5240_v60, %v5195_v5  ;;  %v5602_v5 = vpop.permute.xlu2 %5601 }
0x1313   :  { %v11717_v35 = vand.u32 4294901760, %v5602_v5 }
0x1314   :  { %v5348_v58 = vsel %vm3898_vm2, %v5339_v10, 0  ;;  %v5685_v10 = vand.u32 4294901760, %v5684_v42 }
0x1315   :  { %v5374_v22 = vand.u32 4294901760, %v5348_v58  ;;  %v11730_v59 = vsub.f32 %v5602_v5, %v11717_v35 }
0x1317   :  { %5440 = vmatmul.f32.vlgmr.msra.gmra.mxu3 %v5374_v22  ;;  %v5375_v49 = vsub.f32 %v5348_v58, %v5374_v22  ;;  %v5689_v34 = vand.u32 4294901760, %v11730_v59 }
0x1318   :  { %5763 = vmatpush.msra.mxu3 %v11652_v9  ;;  %v11713_v29 = vpop.permute.xlu1 %5595 }
0x1319   :  { %5478 = vmatmul.f32.vlgmr.msrb.gmra.mxu0 %v5375_v49  ;;  %v5376_v11 = vand.u32 4294901760, %v5375_v49  ;;  %v5690_v60 = vsub.f32 %v11730_v59, %v5689_v34  ;;  %v11809_v5 = vand.u32 4294901760, %v11713_v29 }
0x131a   :  { %v5600_v39 = vpop.permute.xlu2 %5599 }
0x131b   :  { %5509 = vmatmul.f32.vlgmr.msrb.gmra.mxu1 %v5376_v11  ;;  %v5377_v3 = vsub.f32 %v5375_v49, %v5376_v11  ;;  %v11725_v25 = vand.u32 4294901760, %v5600_v39 }
0x131d   :  { %v5378_v38 = vand.u32 4294901760, %v5377_v3  ;;  %v11740_v7 = vsub.f32 %v5600_v39, %v11725_v25  ;;  %v11784_v3 = vsel %vm4727_vm14, -1e+30, %v11632_v43  ;;  %v5706_v39 = vsub.f32 %v11713_v29, %v11809_v5 }
0x131f   :  { %5379 = vmatmul.f32.vlgmr.msra.gmra.mxu2 %v5378_v38  ;;  %5583 = vmatmul.f32.vlgmr.msrb.gmra.mxu3 %v5374_v22  ;;  %v5695_v13 = vand.u32 4294901760, %v11740_v7  ;;  %v4751_v38 = vsel %vm3898_vm2, %v11784_v3, -inf }
0x1320   :  { %5726 = vmatpush.msra.mxu2 %v11655_v6 }
0x1321   :  { %v5696_v58 = vsub.f32 %v11740_v7, %v5695_v13 }
0x1323   :  { %v5697_v49 = vand.u32 4294901760, %v5696_v58 }
0x1327   :  { %5554 = vmatmul.f32.vlgmr.msrb.gmra.mxu2 %v5374_v22  ;;  %v5691_v22 = vand.u32 4294901760, %v5690_v60 }
0x132c   :  { %v5144_v1 = vpop.xlane.xlu0 %5143 }
0x132d   :  { %vm5164_vm12 = vcmp.ge.f32.partialorder %v13467_v0, %v5144_v1 }
0x132e   :  { %v11707_v37 = vsel %vm5164_vm12, %v8679_v50, 0.0 }
0x132f   :  { %v5206_v2 = vsel %vm3898_vm2, %v11707_v37, 0.0 }
0x1330   :  { %5207 = vadd.xlane.f32.xlu2 %v5206_v2 }
0x133f   :  { %v5608_v21 = vpop.permute.xlu0 %5607 }
0x1340   :  { %v11727_v31 = vand.u32 4294901760, %v5608_v21 }
0x1342   :  { %v11734_v30 = vsub.f32 %v5608_v21, %v11727_v31  ;;  %5633 = vmatpush.msra.mxu0 %v11727_v31  ;;  %5765 = vmatpush.msra.mxu3 %v11727_v31 }
0x1343   :  { %v4910_v56 = vpop.xlane.xlu1 %4909 }
0x1344   :  { %v5671_v8 = vand.u32 4294901760, %v11734_v30  ;;  %vm4926_vm13 = vcmp.ge.f32.partialorder %v11673_v45, %v4910_v56  ;;  %5635 = vmatpush.msra.mxu0 %v11711_v33  ;;  %5729 = vmatpush.msra.mxu2 %v11734_v30 }
0x1345   :  { %v11747_v62 = vsel %vm4926_vm13, -1e+30, %v11673_v45  ;;  %5767 = vmatpush.msra.mxu3 %v11711_v33  ;;  %v5678_v45 = vsub.f32 %v11720_v57, %v5677_v15 }
0x1346   :  { %5637 = vmatpush.msra.mxu0 %v11715_v48  ;;  %5732 = vmatpush.msra.mxu2 %v11720_v57  ;;  %v4948_v20 = vsel %vm3898_vm2, %v11747_v62, -inf  ;;  %v5672_v16 = vsub.f32 %v11734_v30, %v5671_v8 }
0x1347   :  { %5769 = vmatpush.msra.mxu3 %v11715_v48  ;;  %4949 = vmax.xlane.f32.xlu1 %v4948_v20  ;;  %v5679_v4 = vand.u32 4294901760, %v5678_v45  ;;  %v5707_v45 = vand.u32 4294901760, %v5706_v39 }
0x1348   :  { %5597 = vrot.lane.b32.xlu2 %v13468_v53, %s8735_s2  ;;  %5639 = vmatpush.msra.mxu0 %v11717_v35  ;;  %v5673_v61 = vand.u32 4294901760, %v5672_v16 }
0x1349   :  { %5735 = vmatpush.msra.mxu2 %v11723_v17  ;;  %5771 = vmatpush.msra.mxu3 %v11717_v35 }
0x134a   :  { %5641 = vmatpush.msra.mxu0 %v11725_v25  ;;  %5674 = vmatpush.msra.mxu1 %v5673_v61 }
0x134b   :  { %5738 = vmatpush.msra.mxu2 %v11730_v59  ;;  %5773 = vmatpush.msra.mxu3 %v11725_v25 }
0x134c   :  { %5680 = vmatpush.msra.mxu1 %v5679_v4 }
0x134d   :  { %5741 = vmatpush.msra.mxu2 %v11740_v7 }
0x134e   :  { %5686 = vmatpush.msra.mxu1 %v5685_v10 }
0x1350   :  { %5692 = vmatpush.msra.mxu1 %v5691_v22  ;;  %v5708_v22 = vsub.f32 %v5706_v39, %v5707_v45 }
0x1352   :  { %5698 = vmatpush.msra.mxu1 %v5697_v49  ;;  %v5709_v6 = vand.u32 4294901760, %v5708_v22 }
0x136a   :  { %v4559_v11 = vpop.xlane.xlu0 %4558 }
0x136b   :  { %vm4569_vm15 = vcmp.ge.f32.partialorder %v11683_v23, %v4559_v11 }
0x136c   :  { %v11790_v12 = vsel %vm4569_vm15, -1e+30, %v11683_v23 }
0x136d   :  { %v4597_v51 = vsel %vm3898_vm2, %v11790_v12, -inf }
0x1371   :  { %4752 = vmax.xlane.f32.xlu2 %v4751_v38 }
0x1372   :  { %v4442_v0 = vpop.xlane.xlu0 %4441 }
0x1373   :  { %vm4450_vm3 = vcmp.ge.f32.partialorder %v11689_v26, %v4442_v0 }
0x1374   :  { %v11798_v43 = vsel %vm4450_vm3, -1e+30, %v11689_v26 }
0x1375   :  { %v4480_v54 = vsel %vm3898_vm2, %v11798_v43, -inf }
0x1379   :  { %4598 = vmax.xlane.f32.xlu2 %v4597_v51 }
0x137a   :  { %v11795_v41 = vpop.xlane.xlu0 %4755 }
0x137b   :  { %vm4768_vm11 = vcmp.ge.f32.partialorder %v11693_v28, %v11795_v41  ;;  %v8657_v41 = vld [vmem:[%s13045_s4 + $0x68] sm:$0xff] }
0x1381   :  { %4481 = vmax.xlane.f32.xlu2 %v4480_v54  ;;  %v11870_v54 = vand.u32 4294901760, %v8657_v41 }
0x1382   :  { %v5067_v1 = vpop.xlane.xlu0 %5066 }
0x1383   :  { %vm5085_vm4 = vcmp.ge.f32.partialorder %v11697_v55, %v5067_v1 }
0x1384   :  { %v11804_v23 = vsel %vm5085_vm4, -1e+30, %v11697_v55 }
0x1385   :  { %v5105_v50 = vsel %vm3898_vm2, %v11804_v23, -inf }
0x1386   :  { %5106 = vmax.xlane.f32.xlu1 %v5105_v50 }
0x13a2   :  { %v5380_v50 = vpop.f32.mrf.mxu2 }
0x13a3   :  { %v5208_v2 = vpop.xlane.xlu2 %5207 }
0x13a4   :  { %8680 = vrcp.f32 %v5208_v2  ;;  %v5252_v55 = vand.u32 2147483648, %v5208_v2  ;;  %v5250_v4 = vand.u32 2147483647, %v5208_v2  ;;  %vm5246_vm6 = vweird.f32 %v5208_v2 }
0x13a6   :  { %v5253_v29 = vor.u32 1.1754944e-38, %v5252_v55  ;;  %vm5251_vm8 = vcmp.eq.f32.partialorder %v5250_v4, 8.507059e+37 }
0x13aa   :  { %v8681_v26 = vpop.eup %8680 }
0x13ab   :  { %v5242_v21 = vmul.f32 %v8681_v26, %v5208_v2  ;;  %v5598_v56 = vpop.permute.xlu2 %5597  ;;  %vm5247_vm5 = vweird.f32 %v8681_v26 }
0x13ac   :  { %v5642_v20 = vand.u32 4294901760, %v5598_v56  ;;  %vm5248_vm7 = vmor %vm5246_vm6, %vm5247_vm5 }
0x13ad   :  { %v5243_v16 = vsub.f32 1.0, %v5242_v21 }
0x13ae   :  { %v5700_v61 = vsub.f32 %v5598_v56, %v5642_v20  ;;  %5643 = vmatpush.msra.mxu0 %v5642_v20  ;;  %5775 = vmatpush.msra.mxu3 %v5642_v20  ;;  %v8656_v56 = vld [vmem:[%s13045_s4 + $0x60] sm:$0xff] }
0x13af   :  { %v5244_v42 = vmul.f32 %v8681_v26, %v5243_v16  ;;  %v5479_v16 = vpop.f32.mrf.mxu0 }
0x13b0   :  { %v5701_v60 = vand.u32 4294901760, %v5700_v61  ;;  %5645 = vmatpush.msra.mxu0 %v11809_v5  ;;  %5744 = vmatpush.msra.mxu2 %v5700_v61 }
0x13b1   :  { %v5245_v10 = vadd.f32 %v8681_v26, %v5244_v42  ;;  %5777 = vmatpush.msra.mxu3 %v11809_v5  ;;  %v5555_v42 = vpop.f32.mrf.mxu2 }
0x13b2   :  { %5796 = vmatpush.msrb.mxu0 %v5665_v24  ;;  %5747 = vmatpush.msra.mxu2 %v5706_v39  ;;  %v5702_v58 = vsub.f32 %v5700_v61, %v5701_v60 }
0x13b3   :  { %v5249_v49 = vsel %vm5248_vm7, %v8681_v26, %v5245_v10  ;;  %v5441_v26 = vpop.f32.mrf.mxu3 }
0x13b4   :  { %5800 = vmatpush.msrb.mxu0 %v5671_v8  ;;  %v5254_v11 = vsel %vm5251_vm8, %v5253_v29, %v5249_v49  ;;  %v5703_v38 = vand.u32 4294901760, %v5702_v58  ;;  %5878 = vmatpush.msrb.mxu2 %v11870_v54  ;;  %v5442_v61 = vadd.f32 %v5441_v26, %v5380_v50 }
0x13b5   :  { %v5340_v0 = vmul.f32 %v5254_v11, %v11707_v37 }
0x13b6   :  { %5804 = vmatpush.msrb.mxu0 %v5677_v15  ;;  %5704 = vmatpush.msra.mxu1 %v5703_v38  ;;  %v5480_v4 = vadd.f32 %v5479_v16, %v5442_v61 }
0x13b7   :  { %v5620_v24 = vsel %vm3898_vm2, %v5340_v0, 0 }
0x13b8   :  { %5808 = vmatpush.msrb.mxu0 %v5683_v18  ;;  %5710 = vmatpush.msra.mxu1 %v5709_v6  ;;  %v5646_v51 = vand.u32 4294901760, %v5620_v24 }
0x13ba   :  { %5812 = vmatpush.msrb.mxu0 %v5689_v34  ;;  %5839 = vmatpush.msrb.mxu1 %v11652_v9  ;;  %v4950_v30 = vpop.xlane.xlu1 %4949  ;;  %v5647_v37 = vsub.f32 %v5620_v24, %v5646_v51 }
0x13bb   :  { %5712 = vmatmul.f32.vlgmr.msra.gmra.mxu1 %v5646_v51  ;;  %vm4966_vm9 = vcmp.ge.f32.partialorder %v11747_v62, %v4950_v30 }
0x13bc   :  { %5816 = vmatpush.msrb.mxu0 %v5695_v13  ;;  %5841 = vmatpush.msrb.mxu1 %v11727_v31  ;;  %v4974_v57 = vsel %vm4966_vm9, -1e+30, %v11747_v62  ;;  %v5648_v17 = vand.u32 4294901760, %v5647_v37 }
0x13bd   :  { %5750 = vmatmul.f32.vlgmr.msra.gmra.mxu2 %v5647_v37  ;;  %v4988_v59 = vsel %vm3898_vm2, %v4974_v57, -inf }
0x13be   :  { %5820 = vmatpush.msrb.mxu0 %v5701_v60  ;;  %5843 = vmatpush.msrb.mxu1 %v11711_v33  ;;  %v5649_v9 = vsub.f32 %v5647_v37, %v5648_v17  ;;  %v5584_v60 = vpop.f32.mrf.mxu3 }
0x13bf   :  { %4989 = vmax.xlane.f32.xlu1 %v4988_v59  ;;  %5781 = vmatmul.f32.vlgmr.msra.gmra.mxu3 %v5648_v17 }
0x13c0   :  { %5824 = vmatpush.msrb.mxu0 %v5707_v45  ;;  %5845 = vmatpush.msrb.mxu1 %v11715_v48  ;;  %v5650_v15 = vand.u32 4294901760, %v5649_v9  ;;  %v5510_v45 = vpop.f32.mrf.mxu1 }
0x13c1   :  { %v5511_v22 = vadd.f32 %v5510_v45, %v5480_v4  ;;  %v13470_v4 = vld [vmem:[#allocation35_spill] sm:$0xff] }
0x13c2   :  { %5847 = vmatpush.msrb.mxu1 %v11717_v35  ;;  %5651 = vmatmul.f32.vlgmr.msra.gmra.mxu0 %v5650_v15  ;;  %v11848_v35 = vsel %vm4768_vm11, -1e+30, %v11693_v28 }
0x13c3   :  { %v4794_v7 = vsel %vm3898_vm2, %v11848_v35, -inf  ;;  %v5556_v38 = vadd.f32 %v5555_v42, %v5511_v22  ;;  %v13469_v42 = vld [vmem:[#allocation36_spill] sm:$0xff] }
0x13c4   :  { %5849 = vmatpush.msrb.mxu1 %v11725_v25 }
0x13c6   :  { %5851 = vmatpush.msrb.mxu1 %v5642_v20  ;;  %v11895_v20 = vand.u32 4294901760, %v8656_v56 }
0x13c8   :  { %5853 = vmatpush.msrb.mxu1 %v11809_v5  ;;  %v11898_v55 = vsub.f32 %v8656_v56, %v11895_v20 }
0x13c9   :  { %5855 = vmatmul.f32.vlgmr.msrb.gmra.mxu1 %v5646_v51 }
0x13ca   :  { %5826 = vmatmul.f32.vlgmr.msrb.gmra.mxu0 %v5646_v51  ;;  %6002 = vmatpush.msra.mxu1 %v11870_v54  ;;  %v11903_v0 = vand.u32 4294901760, %v11898_v55  ;;  %v5585_v51 = vadd.f32 %v5584_v60, %v5556_v38  ;;  %v5173_v60 = vsub.f32 %v13470_v4, %v13469_v42 }
0x13cc   :  { %6103 = vmatpush.msrb.mxu1 %v11895_v20  ;;  %v6009_v9 = vsel %vm1713_vm1, %v5585_v51, 0 }
0x13e4   :  { %v4753_v33 = vpop.xlane.xlu2 %4752 }
0x13e5   :  { %vm4767_vm10 = vcmp.ge.f32.partialorder %v11784_v3, %v4753_v33 }
0x13e6   :  { %v11841_v31 = vsel %vm4767_vm10, -1e+30, %v11784_v3 }
0x13e7   :  { %v4791_v48 = vsel %vm3898_vm2, %v11841_v31, -inf }
0x13e8   :  { %4792 = vmax.xlane.f32.xlu0 %v4791_v48 }
0x13ec   :  { %v4599_v25 = vpop.xlane.xlu2 %4598 }
0x13ed   :  { %vm4609_vm12 = vcmp.ge.f32.partialorder %v11790_v12, %v4599_v25  ;;  %v6028_v25 = vand.u32 4294901760, %v6009_v9 }
0x13ee   :  { %v11852_v18 = vsel %vm4609_vm12, -1e+30, %v11790_v12 }
0x13ef   :  { %v4637_v8 = vsel %vm3898_vm2, %v11852_v18, -inf }
0x13f0   :  { %4795 = vmax.xlane.f32.xlu0 %v4794_v7  ;;  %4638 = vmax.xlane.f32.xlu2 %v4637_v8 }
0x13f4   :  { %v4482_v62 = vpop.xlane.xlu2 %4481 }
0x13f5   :  { %vm4490_vm13 = vcmp.ge.f32.partialorder %v11798_v43, %v4482_v62  ;;  %v6029_v62 = vsub.f32 %v6009_v9, %v6028_v25 }
0x13f6   :  { %v11860_v28 = vsel %vm4490_vm13, -1e+30, %v11798_v43  ;;  %v11873_v43 = vsub.f32 %v8657_v41, %v11870_v54 }
0x13f7   :  { %v4520_v34 = vsel %vm3898_vm2, %v11860_v28, -inf }
0x13f8   :  { %4521 = vmax.xlane.f32.xlu2 %v4520_v34  ;;  %v11878_v1 = vand.u32 4294901760, %v11873_v43  ;;  %5931 = vmatpush.msra.mxu2 %v11873_v43 }
0x13f9   :  { %v5107_v13 = vpop.xlane.xlu1 %5106 }
0x13fa   :  { %vm5125_vm14 = vcmp.ge.f32.partialorder %v11804_v23, %v5107_v13  ;;  %5980 = vmatpush.msra.mxu0 %v11878_v1 }
0x13fb   :  { %v5133_v3 = vsel %vm5125_vm14, -1e+30, %v11804_v23  ;;  %v5906_v23 = vsub.f32 %v11873_v43, %v11878_v1 }
0x13fc   :  { %v5145_v12 = vsel %vm3898_vm2, %v5133_v3, -inf  ;;  %6080 = vmatpush.msrb.mxu0 %v11898_v55  ;;  %v6030_v3 = vand.u32 4294901760, %v6029_v62 }
0x13fd   :  { %5146 = vmax.xlane.f32.xlu1 %v5145_v12  ;;  %v11884_v2 = vand.u32 4294901760, %v5906_v23 }
0x13fe   :  { %v6031_v50 = vsub.f32 %v6029_v62, %v6030_v3 }
0x13ff   :  { %5908 = vmatpush.msrb.mxu3 %v11884_v2 }
0x1401   :  { %5954 = vmatpush.msra.mxu3 %v11870_v54 }
0x1432   :  { %v4990_v5 = vpop.xlane.xlu1 %4989 }
0x1433   :  { %vm5006_vm15 = vcmp.ge.f32.partialorder %v4974_v57, %v4990_v5 }
0x1434   :  { %v11888_v39 = vsel %vm5006_vm15, -1e+30, %v4974_v57  ;;  %v6055_v57 = vsub.f32 %v11898_v55, %v11903_v0 }
0x1435   :  { %v5028_v21 = vsel %vm3898_vm2, %v11888_v39, -inf }
0x1436   :  { %5029 = vmax.xlane.f32.xlu1 %v5028_v21  ;;  %v11909_v33 = vand.u32 4294901760, %v6055_v57  ;;  %v6032_v21 = vand.u32 4294901760, %v6031_v50 }
0x1438   :  { %v5713_v10 = vpop.f32.mrf.mxu1 }
0x143f   :  { %v5652_v29 = vpop.f32.mrf.mxu0 }
0x1440   :  { %v5714_v58 = vadd.f32 %v5713_v10, %v5652_v29  ;;  %v5751_v49 = vpop.f32.mrf.mxu2 }
0x1442   :  { %v5752_v11 = vadd.f32 %v5751_v49, %v5714_v58  ;;  %v5782_v6 = vpop.f32.mrf.mxu3 }
0x1444   :  { %v5783_v24 = vadd.f32 %v5782_v6, %v5752_v11 }
0x1446   :  { %v5856_v17 = vpop.f32.mrf.mxu1 }
0x1447   :  { %v5827_v30 = vpop.f32.mrf.mxu0 }
0x1448   :  { %v5828_v37 = vadd.f32 %v5827_v30, %v5783_v24 }
0x144a   :  { %v5857_v59 = vadd.f32 %v5856_v17, %v5828_v37 }
0x144c   :  { %v5860_v15 = vsel %vm1713_vm1, %v5857_v59, 0 }
0x144d   :  { %v5879_v48 = vand.u32 4294901760, %v5860_v15 }
0x144f   :  { %6169 = vrot.lane.b32.xlu1 %v11232_v46, %s8736_s15  ;;  %v5880_v7 = vsub.f32 %v5860_v15, %v5879_v48  ;;  %5910 = vmatmul.f32.vlgmr.msrb.gmra.mxu3 %v5879_v48 }
0x1450   :  { %5982 = vmatmul.f32.vlgmr.msra.gmra.mxu0 %v5879_v48  ;;  %6004 = vmatmul.f32.vlgmr.msra.gmra.mxu1 %v5879_v48 }
0x1451   :  { %6057 = vmatpush.msrb.mxu3 %v11909_v33  ;;  %v5881_v8 = vand.u32 4294901760, %v5880_v7 }
0x1453   :  { %v5882_v34 = vsub.f32 %v5880_v7, %v5881_v8 }
0x1455   :  { %v5883_v13 = vand.u32 4294901760, %v5882_v34 }
0x1457   :  { %6163 = vrot.lane.b32.xlu1 %v11276_v52, %s8736_s15  ;;  %5884 = vmatmul.f32.vlgmr.msrb.gmra.mxu2 %v5883_v13 }
0x1458   :  { %5958 = vmatmul.f32.vlgmr.msra.gmra.mxu3 %v5881_v8  ;;  %6083 = vmatmul.f32.vlgmr.msrb.gmra.mxu0 %v6029_v62 }
0x1459   :  { %6107 = vmatmul.f32.vlgmr.msrb.gmra.mxu1 %v6030_v3  ;;  %6027 = vmatpush.msrb.mxu2 %v11895_v20 }
0x145a   :  { %6151 = vmatpush.msra.mxu3 %v11895_v20 }
0x145b   :  { %v4793_v12 = vpop.xlane.xlu0 %4792 }
0x145c   :  { %vm4807_vm3 = vcmp.ge.f32.partialorder %v11841_v31, %v4793_v12 }
0x145d   :  { %v4815_v41 = vsel %vm4807_vm3, -1e+30, %v11841_v31 }
0x145e   :  { %v4831_v23 = vsel %vm3898_vm2, %v4815_v41, -inf }
0x145f   :  { %5934 = vmatmul.f32.vlgmr.msra.gmra.mxu2 %v5880_v7  ;;  %4832 = vmax.xlane.f32.xlu0 %v4831_v23 }
0x1460   :  { %6059 = vmatmul.f32.vlgmr.msrb.gmra.mxu3 %v6028_v25  ;;  %6129 = vmatpush.msra.mxu2 %v11903_v0 }
0x1463   :  { %v4796_v5 = vpop.xlane.xlu0 %4795  ;;  %v4639_v26 = vpop.xlane.xlu2 %4638 }
0x1464   :  { %vm4808_vm4 = vcmp.ge.f32.partialorder %v11848_v35, %v4796_v5  ;;  %vm4649_vm5 = vcmp.ge.f32.partialorder %v11852_v18, %v4639_v26 }
0x1465   :  { %v4816_v56 = vsel %vm4808_vm4, -1e+30, %v11848_v35  ;;  %v4657_v16 = vsel %vm4649_vm5, -1e+30, %v11852_v18  ;;  %v5183_v18 = vmul.f32 1.442695, %v5173_v60 }
0x1466   :  { %v4834_v31 = vsel %vm3898_vm2, %v4816_v56, -inf  ;;  %v4677_v45 = vsel %vm3898_vm2, %v4657_v16, -inf }
0x1467   :  { %6033 = vmatmul.f32.vlgmr.msrb.gmra.mxu2 %v6032_v21  ;;  %4835 = vmax.xlane.f32.xlu0 %v4834_v31  ;;  %8682 = vpow2.f32 %v5183_v18 }
0x1468   :  { %6153 = vmatmul.f32.vlgmr.msra.gmra.mxu3 %v6028_v25  ;;  %4678 = vmax.xlane.f32.xlu2 %v4677_v45 }
0x146b   :  { %v4522_v61 = vpop.xlane.xlu2 %4521 }
0x146c   :  { %vm4530_vm6 = vcmp.ge.f32.partialorder %v11860_v28, %v4522_v61 }
0x146d   :  { %v4538_v10 = vsel %vm4530_vm6, -1e+30, %v11860_v28  ;;  %v8683_v58 = vpop.eup %8682 }
0x146e   :  { %v4560_v35 = vsel %vm3898_vm2, %v4538_v10, -inf }
0x146f   :  { %6131 = vmatmul.f32.vlgmr.msra.gmra.mxu2 %v6028_v25 }
0x1470   :  { %4561 = vmax.xlane.f32.xlu2 %v4560_v35  ;;  %v5147_v29 = vpop.xlane.xlu1 %5146 }
0x1471   :  { %vm5165_vm7 = vcmp.ge.f32.partialorder %v13470_v4, %v5147_v29 }
0x1472   :  { %v11934_v22 = vsel %vm5165_vm7, %v8683_v58, 0.0 }
0x1473   :  { %v5209_v49 = vsel %vm3898_vm2, %v11934_v22, 0.0 }
0x1481   :  { %5210 = vadd.xlane.f32.xlu1 %v5209_v49 }
0x149a   :  { %6157 = vrot.lane.b32.xlu1 %v11330_v44, %s8736_s15 }
0x14a9   :  { %v5030_v21 = vpop.xlane.xlu1 %5029 }
0x14aa   :  { %vm5046_vm12 = vcmp.ge.f32.partialorder %v11888_v39, %v5030_v21 }
0x14c1   :  { %v6170_v31 = vpop.permute.xlu1 %6169 }
0x14c9   :  { %v6164_v45 = vpop.permute.xlu1 %6163 }
0x14cd   :  { %v5983_v34 = vpop.f32.mrf.mxu0  ;;  %v6005_v12 = vpop.f32.mrf.mxu1 }
0x14d2   :  { %v4833_v28 = vpop.xlane.xlu0 %4832  ;;  %v5911_v6 = vpop.f32.mrf.mxu3 }
0x14d3   :  { %vm4847_vm8 = vcmp.ge.f32.partialorder %v4815_v41, %v4833_v28 }
0x14d4   :  { %v4855_v11 = vsel %vm4847_vm8, -1e+30, %v4815_v41 }
0x14d5   :  { %v4871_v38 = vsel %vm3898_vm2, %v4855_v11, -inf }
0x14d6   :  { %4872 = vmax.xlane.f32.xlu0 %v4871_v38 }
0x14da   :  { %v5885_v24 = vpop.f32.mrf.mxu2  ;;  %v4836_v30 = vpop.xlane.xlu0 %4835 }
0x14db   :  { %v5912_v51 = vadd.f32 %v5911_v6, %v5885_v24  ;;  %v4679_v37 = vpop.xlane.xlu2 %4678  ;;  %vm4848_vm9 = vcmp.ge.f32.partialorder %v4816_v56, %v4836_v30  ;;  %v5959_v15 = vpop.f32.mrf.mxu3 }
0x14dc   :  { %vm4689_vm10 = vcmp.ge.f32.partialorder %v4657_v16, %v4679_v37  ;;  %v4856_v57 = vsel %vm4848_vm9, -1e+30, %v4816_v56  ;;  %v11958_v56 = vsel %vm5046_vm12, -1e+30, %v11888_v39 }
0x14dd   :  { %v4697_v17 = vsel %vm4689_vm10, -1e+30, %v4657_v16  ;;  %v4874_v59 = vsel %vm3898_vm2, %v4856_v57, -inf  ;;  %v5068_v16 = vsel %vm3898_vm2, %v11958_v56, -inf }
0x14de   :  { %v4717_v9 = vsel %vm3898_vm2, %v4697_v17, -inf  ;;  %4875 = vmax.xlane.f32.xlu0 %v4874_v59  ;;  %v11980_v59 = vand.u32 4294901760, %v6170_v31 }
0x14df   :  { %4718 = vmax.xlane.f32.xlu2 %v4717_v9 }
0x14e2   :  { %v5935_v48 = vpop.f32.mrf.mxu2 }
0x14e3   :  { %v5936_v25 = vadd.f32 %v5935_v48, %v5912_v51  ;;  %v4562_v7 = vpop.xlane.xlu2 %4561  ;;  %v6060_v5 = vpop.f32.mrf.mxu3 }
0x14e4   :  { %vm4570_vm11 = vcmp.ge.f32.partialorder %v4538_v10, %v4562_v7 }
0x14e5   :  { %v5960_v8 = vadd.f32 %v5959_v15, %v5936_v25  ;;  %v4578_v62 = vsel %vm4570_vm11, -1e+30, %v4538_v10 }
0x14e6   :  { %v4600_v13 = vsel %vm3898_vm2, %v4578_v62, -inf }
0x14e7   :  { %4601 = vmax.xlane.f32.xlu1 %v4600_v13  ;;  %v5984_v3 = vadd.f32 %v5983_v34, %v5960_v8  ;;  %v11985_v8 = vsub.f32 %v6170_v31, %v11980_v59 }
0x14e9   :  { %v6006_v41 = vadd.f32 %v6005_v12, %v5984_v3  ;;  %v6233_v12 = vand.u32 4294901760, %v11985_v8 }
0x14ea   :  { %v6034_v23 = vpop.f32.mrf.mxu2 }
0x14eb   :  { %v6035_v50 = vadd.f32 %v6034_v23, %v6006_v41  ;;  %v11994_v41 = vand.u32 4294901760, %v6164_v45  ;;  %v6234_v21 = vsub.f32 %v11985_v8, %v6233_v12 }
0x14ed   :  { %v11944_v26 = vadd.f32 %v6060_v5, %v6035_v50 }
0x14f2   :  { %6171 = vrot.lane.b32.xlu0 %v11220_v27, %s8736_s15 }
0x14f4   :  { %v5211_v61 = vpop.xlane.xlu1 %5210 }
0x14f5   :  { %8684 = vrcp.f32 %v5211_v61  ;;  %v5266_v30 = vand.u32 2147483648, %v5211_v61  ;;  %vm5260_vm5 = vweird.f32 %v5211_v61 }
0x14f7   :  { %6167 = vrot.lane.b32.xlu2 %v11243_v19, %s8736_s15  ;;  %v5267_v48 = vor.u32 1.1754944e-38, %v5266_v30 }
0x14fa   :  { %6165 = vrot.lane.b32.xlu0 %v11258_v40, %s8736_s15 }
0x14fb   :  { %v8685_v4 = vpop.eup %8684 }
0x14fc   :  { %v5256_v35 = vmul.f32 %v8685_v4, %v5211_v61  ;;  %vm5261_vm3 = vweird.f32 %v8685_v4 }
0x14fd   :  { %vm5262_vm6 = vmor %vm5260_vm5, %vm5261_vm3 }
0x14fe   :  { %v5257_v58 = vsub.f32 1.0, %v5256_v35 }
0x14ff   :  { %6159 = vrot.lane.b32.xlu2 %v13468_v53, %s8736_s15 }
0x1500   :  { %v5258_v6 = vmul.f32 %v8685_v4, %v5257_v58 }
0x1502   :  { %6161 = vrot.lane.b32.xlu0 %v11294_v47, %s8736_s15  ;;  %v5259_v51 = vadd.f32 %v8685_v4, %v5258_v6 }
0x1504   :  { %v5263_v9 = vsel %vm5262_vm6, %v8685_v4, %v5259_v51 }
0x150c   :  { %v11966_v39 = vpop.permute.xlu1 %6157 }
0x150d   :  { %v12035_v6 = vand.u32 4294901760, %v11966_v39 }
0x1528   :  { %5069 = vmax.xlane.f32.xlu2 %v5068_v16  ;;  %v12011_v16 = vsub.f32 %v6164_v45, %v11994_v41 }
0x1549   :  { %v4873_v42 = vpop.xlane.xlu0 %4872 }
0x154a   :  { %vm4887_vm13 = vcmp.ge.f32.partialorder %v4855_v11, %v4873_v42 }
0x154b   :  { %v11962_v60 = vsel %vm4887_vm13, -1e+30, %v4855_v11 }
0x154c   :  { %v4911_v10 = vsel %vm3898_vm2, %v11962_v60, -inf }
0x154d   :  { %4912 = vmax.xlane.f32.xlu0 %v4911_v10 }
0x1551   :  { %v4876_v18 = vpop.xlane.xlu0 %4875 }
0x1552   :  { %v4719_v29 = vpop.xlane.xlu2 %4718  ;;  %vm4888_vm14 = vcmp.ge.f32.partialorder %v4856_v57, %v4876_v18  ;;  %v6235_v18 = vand.u32 4294901760, %v6234_v21 }
0x1553   :  { %vm4729_vm15 = vcmp.ge.f32.partialorder %v4697_v17, %v4719_v29  ;;  %v11968_v49 = vsel %vm4888_vm14, -1e+30, %v4856_v57  ;;  %v5264_v57 = vand.u32 2147483647, %v5211_v61  ;;  %v6251_v29 = vand.u32 4294901760, %v12011_v16 }
0x1554   :  { %v11970_v28 = vsel %vm4729_vm15, -1e+30, %v4697_v17  ;;  %v4914_v11 = vsel %vm3898_vm2, %v11968_v49, -inf }
0x1555   :  { %v4757_v38 = vsel %vm3898_vm2, %v11970_v28, -inf  ;;  %4915 = vmax.xlane.f32.xlu0 %v4914_v11  ;;  %vm5265_vm7 = vcmp.eq.f32.partialorder %v5264_v57, 8.507059e+37 }
0x1556   :  { %4758 = vmax.xlane.f32.xlu2 %v4757_v38  ;;  %v5268_v25 = vsel %vm5265_vm7, %v5267_v48, %v5263_v9  ;;  %v6268_v48 = vsub.f32 %v11966_v39, %v12035_v6 }
0x155a   :  { %v4602_v24 = vpop.xlane.xlu1 %4601  ;;  %v6168_v15 = vpop.permute.xlu2 %6167 }
0x155b   :  { %vm4610_vm4 = vcmp.ge.f32.partialorder %v4578_v62, %v4602_v24  ;;  %v11982_v7 = vand.u32 4294901760, %v6168_v15 }
0x155c   :  { %v11976_v37 = vsel %vm4610_vm4, -1e+30, %v4578_v62  ;;  %v5341_v62 = vmul.f32 %v5268_v25, %v11934_v22 }
0x155d   :  { %v4640_v17 = vsel %vm3898_vm2, %v11976_v37, -inf  ;;  %v11989_v13 = vsub.f32 %v6168_v15, %v11982_v7 }
0x155e   :  { %4641 = vmax.xlane.f32.xlu2 %v4640_v17  ;;  %v6182_v50 = vsel %vm3898_vm2, %v5341_v62, 0  ;;  %v6252_v17 = vsub.f32 %v12011_v16, %v6251_v29 }
0x155f   :  { %v6239_v22 = vand.u32 4294901760, %v11989_v13  ;;  %v12013_v31 = vand.u32 4294901760, %v6182_v50 }
0x1560   :  { %v6253_v21 = vand.u32 4294901760, %v6252_v17 }
0x1561   :  { %v6240_v45 = vsub.f32 %v11989_v13, %v6239_v22  ;;  %v6209_v58 = vsub.f32 %v6182_v50, %v12013_v31 }
0x1562   :  { %v6160_v42 = vpop.permute.xlu2 %6159 }
0x1563   :  { %v12029_v11 = vand.u32 4294901760, %v6160_v42  ;;  %v6241_v51 = vand.u32 4294901760, %v6240_v45  ;;  %v6210_v9 = vand.u32 4294901760, %v6209_v58 }
0x1564   :  { %v6172_v34 = vpop.permute.xlu0 %6171 }
0x1565   :  { %v11991_v3 = vand.u32 4294901760, %v6172_v34  ;;  %v6262_v30 = vsub.f32 %v6160_v42, %v12029_v11  ;;  %v6269_v42 = vand.u32 4294901760, %v6268_v48 }
0x1567   :  { %v11997_v23 = vsub.f32 %v6172_v34, %v11991_v3  ;;  %6193 = vmatpush.msra.mxu0 %v11991_v3  ;;  %6325 = vmatpush.msrb.mxu3 %v11991_v3  ;;  %v6263_v34 = vand.u32 4294901760, %v6262_v30 }
0x1569   :  { %v6227_v5 = vand.u32 4294901760, %v11997_v23  ;;  %6195 = vmatpush.msra.mxu0 %v11980_v59  ;;  %6288 = vmatpush.msrb.mxu2 %v11997_v23 }
0x156a   :  { %6327 = vmatpush.msrb.mxu3 %v11980_v59 }
0x156b   :  { %v6228_v61 = vsub.f32 %v11997_v23, %v6227_v5  ;;  %6197 = vmatpush.msra.mxu0 %v11982_v7  ;;  %6291 = vmatpush.msrb.mxu2 %v11985_v8 }
0x156c   :  { %6329 = vmatpush.msrb.mxu3 %v11982_v7  ;;  %v6166_v4 = vpop.permute.xlu0 %6165 }
0x156d   :  { %v6229_v10 = vand.u32 4294901760, %v6228_v61  ;;  %v12021_v35 = vand.u32 4294901760, %v6166_v4  ;;  %6294 = vmatpush.msrb.mxu2 %v11989_v13  ;;  %v6211_v61 = vsub.f32 %v6209_v58, %v6210_v9 }
0x156f   :  { %v6244_v38 = vsub.f32 %v6166_v4, %v12021_v35  ;;  %6199 = vmatpush.msra.mxu0 %v12021_v35  ;;  %6230 = vmatpush.msra.mxu1 %v6229_v10  ;;  %v6212_v39 = vand.u32 4294901760, %v6211_v61  ;;  %v6264_v10 = vsub.f32 %v6262_v30, %v6263_v34 }
0x1570   :  { %6331 = vmatpush.msrb.mxu3 %v12021_v35 }
0x1571   :  { %v6245_v24 = vand.u32 4294901760, %v6244_v38  ;;  %6201 = vmatpush.msra.mxu0 %v11994_v41  ;;  %6236 = vmatpush.msra.mxu1 %v6235_v18  ;;  %v6270_v18 = vsub.f32 %v6268_v48, %v6269_v42 }
0x1572   :  { %6297 = vmatpush.msrb.mxu2 %v6244_v38  ;;  %6333 = vmatpush.msrb.mxu3 %v11994_v41 }
0x1573   :  { %6242 = vmatpush.msra.mxu1 %v6241_v51  ;;  %v6246_v57 = vsub.f32 %v6244_v38, %v6245_v24  ;;  %v6265_v38 = vand.u32 4294901760, %v6264_v10  ;;  %v6271_v51 = vand.u32 4294901760, %v6270_v18 }
0x1574   :  { %6300 = vmatpush.msrb.mxu2 %v12011_v16  ;;  %v6162_v15 = vpop.permute.xlu0 %6161 }
0x1575   :  { %v6202_v25 = vand.u32 4294901760, %v6162_v15  ;;  %v6247_v62 = vand.u32 4294901760, %v6246_v57  ;;  %v12116_v57 = vpop.f32.mrf.mxu2 }
0x1577   :  { %v6256_v50 = vsub.f32 %v6162_v15, %v6202_v25  ;;  %6203 = vmatpush.msra.mxu0 %v6202_v25  ;;  %6248 = vmatpush.msra.mxu1 %v6247_v62 }
0x1578   :  { %6335 = vmatpush.msrb.mxu3 %v6202_v25 }
0x1579   :  { %v6257_v4 = vand.u32 4294901760, %v6256_v50  ;;  %6205 = vmatpush.msra.mxu0 %v12029_v11  ;;  %6254 = vmatpush.msra.mxu1 %v6253_v21 }
0x157a   :  { %6303 = vmatpush.msrb.mxu2 %v6256_v50  ;;  %6337 = vmatpush.msrb.mxu3 %v12029_v11 }
0x157b   :  { %6207 = vmatpush.msra.mxu0 %v12035_v6  ;;  %v6258_v16 = vsub.f32 %v6256_v50, %v6257_v4 }
0x157c   :  { %6306 = vmatpush.msrb.mxu2 %v6262_v30  ;;  %6339 = vmatpush.msrb.mxu3 %v12035_v6  ;;  %v12114_v30 = vpop.f32.mrf.mxu0 }
0x157d   :  { %6213 = vmatmul.f32.vlgmr.msra.gmra.mxu0 %v6212_v39  ;;  %6343 = vmatmul.f32.vlgmr.msrb.gmra.mxu3 %v6210_v9  ;;  %v6259_v45 = vand.u32 4294901760, %v6258_v16  ;;  %v12118_v9 = vpop.f32.mrf.mxu3 }
0x157e   :  { %6358 = vmatpush.msrb.mxu0 %v6227_v5  ;;  %6309 = vmatpush.msrb.mxu2 %v6268_v48 }
0x157f   :  { %6312 = vmatmul.f32.vlgmr.msrb.gmra.mxu2 %v6209_v58  ;;  %6260 = vmatpush.msra.mxu1 %v6259_v45 }
0x1580   :  { %6362 = vmatpush.msrb.mxu0 %v6233_v12 }
0x1581   :  { %6266 = vmatpush.msra.mxu1 %v6265_v38 }
0x1582   :  { %6366 = vmatpush.msrb.mxu0 %v6239_v22 }
0x1583   :  { %6272 = vmatpush.msra.mxu1 %v6271_v51 }
0x1584   :  { %6370 = vmatpush.msrb.mxu0 %v6245_v24  ;;  %6274 = vmatmul.f32.vlgmr.msra.gmra.mxu1 %v12013_v31  ;;  %v12112_v24 = vpop.f32.mrf.mxu1 }
0x1585   :  { %6401 = vmatpush.msrb.mxu1 %v11991_v3 }
0x1586   :  { %6374 = vmatpush.msrb.mxu0 %v6251_v29 }
0x1587   :  { %6403 = vmatpush.msrb.mxu1 %v11980_v59 }
0x1588   :  { %6378 = vmatpush.msrb.mxu0 %v6257_v4 }
0x1589   :  { %6405 = vmatpush.msrb.mxu1 %v11982_v7 }
0x158a   :  { %6382 = vmatpush.msrb.mxu0 %v6263_v34 }
0x158b   :  { %6407 = vmatpush.msrb.mxu1 %v12021_v35 }
0x158c   :  { %6386 = vmatpush.msrb.mxu0 %v6269_v42 }
0x158d   :  { %6388 = vmatmul.f32.vlgmr.msrb.gmra.mxu0 %v12013_v31  ;;  %6409 = vmatpush.msrb.mxu1 %v11994_v41 }
0x158f   :  { %6411 = vmatpush.msrb.mxu1 %v6202_v25 }
0x1591   :  { %6413 = vmatpush.msrb.mxu1 %v12029_v11 }
0x1593   :  { %6415 = vmatpush.msrb.mxu1 %v12035_v6 }
0x1594   :  { %6417 = vmatmul.f32.vlgmr.msrb.gmra.mxu1 %v12013_v31 }
0x159b   :  { %v5070_v8 = vpop.xlane.xlu2 %5069 }
0x159c   :  { %vm5086_vm8 = vcmp.ge.f32.partialorder %v11958_v56, %v5070_v8 }
0x159d   :  { %v5094_v59 = vsel %vm5086_vm8, -1e+30, %v11958_v56 }
0x159e   :  { %v5108_v7 = vsel %vm3898_vm2, %v5094_v59, -inf }
0x159f   :  { %5109 = vmax.xlane.f32.xlu0 %v5108_v7 }
0x15c0   :  { %v4913_v13 = vpop.xlane.xlu0 %4912 }
0x15c1   :  { %vm4927_vm9 = vcmp.ge.f32.partialorder %v11962_v60, %v4913_v13 }
0x15c2   :  { %v12069_v3 = vsel %vm4927_vm9, -1e+30, %v11962_v60 }
0x15c3   :  { %v4951_v12 = vsel %vm3898_vm2, %v12069_v3, -inf }
0x15c4   :  { %4952 = vmax.xlane.f32.xlu1 %v4951_v12 }
0x15c8   :  { %v4916_v41 = vpop.xlane.xlu0 %4915 }
0x15c9   :  { %v4759_v23 = vpop.xlane.xlu2 %4758  ;;  %vm4928_vm10 = vcmp.ge.f32.partialorder %v11968_v49, %v4916_v41 }
0x15ca   :  { %vm4769_vm11 = vcmp.ge.f32.partialorder %v11970_v28, %v4759_v23  ;;  %v12076_v56 = vsel %vm4928_vm10, -1e+30, %v11968_v49 }
0x15cb   :  { %v12079_v22 = vsel %vm4769_vm11, -1e+30, %v11970_v28  ;;  %v4954_v60 = vsel %vm3898_vm2, %v12076_v56, -inf  ;;  %v8658_v28 = vld [vmem:[%s13045_s4 + $0x70] sm:$0xff] }
0x15cc   :  { %v4797_v5 = vsel %vm3898_vm2, %v12079_v22, -inf  ;;  %4955 = vmax.xlane.f32.xlu1 %v4954_v60  ;;  %v12094_v29 = vand.u32 4294901760, %v8658_v28 }
0x15cd   :  { %4798 = vmax.xlane.f32.xlu0 %v4797_v5 }
0x15ce   :  { %v12097_v58 = vsub.f32 %v8658_v28, %v12094_v29  ;;  %6564 = vmatpush.msra.mxu1 %v12094_v29  ;;  %6440 = vmatpush.msra.mxu2 %v12094_v29 }
0x15d0   :  { %6493 = vmatpush.msrb.mxu2 %v12097_v58 }
0x15d1   :  { %v4642_v31 = vpop.xlane.xlu2 %4641 }
0x15d2   :  { %vm4650_vm12 = vcmp.ge.f32.partialorder %v11976_v37, %v4642_v31 }
0x15d3   :  { %v12087_v35 = vsel %vm4650_vm12, -1e+30, %v11976_v37  ;;  %v12102_v37 = vand.u32 4294901760, %v12097_v58 }
0x15d4   :  { %v4680_v49 = vsel %vm3898_vm2, %v12087_v35, -inf }
0x15d5   :  { %4681 = vmax.xlane.f32.xlu0 %v4680_v49  ;;  %v6468_v11 = vsub.f32 %v12097_v58, %v12102_v37  ;;  %6542 = vmatpush.msra.mxu0 %v12102_v37 }
0x15d7   :  { %v12108_v6 = vand.u32 4294901760, %v6468_v11 }
0x15d9   :  { %6470 = vmatpush.msra.mxu3 %v12108_v6 }
0x15db   :  { %6516 = vmatpush.msrb.mxu3 %v12094_v29 }
0x15fa   :  { %v6214_v15 = vpop.f32.mrf.mxu0 }
0x1600   :  { %v6344_v34 = vpop.f32.mrf.mxu3 }
0x1601   :  { %v6275_v17 = vpop.f32.mrf.mxu1 }
0x1602   :  { %v6276_v48 = vadd.f32 %v6275_v17, %v6214_v15  ;;  %v6313_v25 = vpop.f32.mrf.mxu2 }
0x1604   :  { %v6314_v62 = vadd.f32 %v6313_v25, %v6276_v48 }
0x1606   :  { %v6345_v50 = vadd.f32 %v6344_v34, %v6314_v62 }
0x160a   :  { %v6389_v21 = vpop.f32.mrf.mxu0 }
0x160b   :  { %v6390_v61 = vadd.f32 %v6389_v21, %v6345_v50 }
0x1611   :  { %v6418_v42 = vpop.f32.mrf.mxu1 }
0x1612   :  { %v5110_v4 = vpop.xlane.xlu0 %5109  ;;  %v6419_v39 = vadd.f32 %v6418_v42, %v6390_v61 }
0x1613   :  { %vm5126_vm13 = vcmp.ge.f32.partialorder %v5094_v59, %v5110_v4 }
0x1614   :  { %v5134_v16 = vsel %vm5126_vm13, -1e+30, %v5094_v59  ;;  %v6422_v10 = vsel %vm1713_vm1, %v6419_v39, 0 }
0x1615   :  { %v5148_v45 = vsel %vm3898_vm2, %v5134_v16, -inf  ;;  %v6441_v18 = vand.u32 4294901760, %v6422_v10 }
0x1616   :  { %5149 = vmax.xlane.f32.xlu1 %v5148_v45 }
0x1617   :  { %v6442_v38 = vsub.f32 %v6422_v10, %v6441_v18  ;;  %6472 = vmatmul.f32.vlgmr.msra.gmra.mxu3 %v6441_v18  ;;  %6544 = vmatmul.f32.vlgmr.msra.gmra.mxu0 %v6441_v18 }
0x1618   :  { %6566 = vmatmul.f32.vlgmr.msra.gmra.mxu1 %v6441_v18 }
0x1619   :  { %v6443_v51 = vand.u32 4294901760, %v6442_v38 }
0x161b   :  { %v6444_v8 = vsub.f32 %v6442_v38, %v6443_v51 }
0x161d   :  { %v6445_v7 = vand.u32 4294901760, %v6444_v8 }
0x161f   :  { %6446 = vmatmul.f32.vlgmr.msra.gmra.mxu2 %v6445_v7  ;;  %6520 = vmatmul.f32.vlgmr.msrb.gmra.mxu3 %v6443_v51 }
0x1627   :  { %6496 = vmatmul.f32.vlgmr.msrb.gmra.mxu2 %v6442_v38 }
0x1637   :  { %v4953_v13 = vpop.xlane.xlu1 %4952 }
0x1638   :  { %vm4967_vm14 = vcmp.ge.f32.partialorder %v12069_v3, %v4953_v13 }
0x1639   :  { %v4975_v59 = vsel %vm4967_vm14, -1e+30, %v12069_v3 }
0x163a   :  { %v4991_v12 = vsel %vm3898_vm2, %v4975_v59, -inf }
0x163b   :  { %4992 = vmax.xlane.f32.xlu2 %v4991_v12 }
0x163f   :  { %v4956_v41 = vpop.xlane.xlu1 %4955 }
0x1640   :  { %v4799_v23 = vpop.xlane.xlu0 %4798  ;;  %vm4968_vm15 = vcmp.ge.f32.partialorder %v12076_v56, %v4956_v41 }
0x1641   :  { %vm4809_vm3 = vcmp.ge.f32.partialorder %v12079_v22, %v4799_v23  ;;  %v4976_v60 = vsel %vm4968_vm15, -1e+30, %v12076_v56  ;;  %v13471_v56 = vld [vmem:[#allocation33_spill] sm:$0xff] }
0x1642   :  { %v4817_v5 = vsel %vm4809_vm3, -1e+30, %v12079_v22  ;;  %v4994_v31 = vsel %vm3898_vm2, %v4976_v60, -inf  ;;  %v13472_v22 = vld [vmem:[#allocation31_spill] sm:$0xff] }
0x1643   :  { %v4837_v49 = vsel %vm3898_vm2, %v4817_v5, -inf  ;;  %4995 = vmax.xlane.f32.xlu2 %v4994_v31 }
0x1644   :  { %4838 = vmax.xlane.f32.xlu1 %v4837_v49 }
0x1648   :  { %v4682_v3 = vpop.xlane.xlu0 %4681 }
0x1649   :  { %vm4690_vm4 = vcmp.ge.f32.partialorder %v12087_v35, %v4682_v3 }
0x164a   :  { %v12133_v28 = vsel %vm4690_vm4, -1e+30, %v12087_v35  ;;  %v5174_v35 = vsub.f32 %v13472_v22, %v13471_v56 }
0x164b   :  { %v4720_v11 = vsel %vm3898_vm2, %v12133_v28, -inf }
0x164c   :  { %4721 = vmax.xlane.f32.xlu1 %v4720_v11  ;;  %v5185_v17 = vmul.f32 1.442695, %v5174_v35 }
0x164e   :  { %8686 = vpow2.f32 %v5185_v17 }
0x1654   :  { %v8687_v48 = vpop.eup %8686 }
0x165b   :  { %6585 = vrot.lane.b32.xlu2 %v11220_v27, %s8737_s18 }
0x1663   :  { %6579 = vrot.lane.b32.xlu2 %v11258_v40, %s8737_s18 }
0x1665   :  { %6583 = vrot.lane.b32.xlu1 %v11232_v46, %s8737_s18 }
0x166d   :  { %6577 = vrot.lane.b32.xlu1 %v11276_v52, %s8737_s18 }
0x1675   :  { %6571 = vrot.lane.b32.xlu1 %v11330_v44, %s8737_s18  ;;  %v6085_v44 = vadd.f32 %v12114_v30, %v11944_v26 }
0x1677   :  { %v6109_v62 = vadd.f32 %v12112_v24, %v6085_v44 }
0x1679   :  { %v6133_v61 = vadd.f32 %v12116_v57, %v6109_v62 }
0x167b   :  { %v6155_v18 = vadd.f32 %v12118_v9, %v6133_v61 }
0x1689   :  { %v5150_v15 = vpop.xlane.xlu1 %5149 }
0x168a   :  { %vm5166_vm5 = vcmp.ge.f32.partialorder %v13472_v22, %v5150_v15 }
0x168b   :  { %v12150_v27 = vsel %vm5166_vm5, %v8687_v48, 0.0 }
0x168c   :  { %v5212_v46 = vsel %vm3898_vm2, %v12150_v27, 0.0 }
0x168d   :  { %5213 = vadd.xlane.f32.xlu2 %v5212_v46 }
0x1694   :  { %v6545_v4 = vpop.f32.mrf.mxu0 }
0x1695   :  { %v6567_v10 = vpop.f32.mrf.mxu1 }
0x169a   :  { %v6473_v40 = vpop.f32.mrf.mxu3 }
0x16a2   :  { %v6447_v52 = vpop.f32.mrf.mxu2  ;;  %v6521_v21 = vpop.f32.mrf.mxu3 }
0x16a3   :  { %v6474_v25 = vadd.f32 %v6473_v40, %v6447_v52 }
0x16a5   :  { %6575 = vrot.lane.b32.xlu2 %v11294_v47, %s8737_s18 }
0x16aa   :  { %v6497_v34 = vpop.f32.mrf.mxu2 }
0x16ab   :  { %v6498_v50 = vadd.f32 %v6497_v34, %v6474_v25 }
0x16ad   :  { %v6522_v42 = vadd.f32 %v6521_v21, %v6498_v50 }
0x16ae   :  { %v4993_v39 = vpop.xlane.xlu2 %4992 }
0x16af   :  { %v6546_v16 = vadd.f32 %v6545_v4, %v6522_v42  ;;  %vm5007_vm6 = vcmp.ge.f32.partialorder %v4975_v59, %v4993_v39 }
0x16b0   :  { %v5015_v45 = vsel %vm5007_vm6, -1e+30, %v4975_v59 }
0x16b1   :  { %v6568_v47 = vadd.f32 %v6567_v10, %v6546_v16  ;;  %v5031_v38 = vsel %vm3898_vm2, %v5015_v45, -inf }
0x16b2   :  { %5032 = vmax.xlane.f32.xlu0 %v5031_v38 }
0x16b3   :  { %v12162_v26 = vadd.f32 %v6568_v47, %v6155_v18 }
0x16b6   :  { %v4996_v24 = vpop.xlane.xlu2 %4995 }
0x16b7   :  { %vm5008_vm7 = vcmp.ge.f32.partialorder %v4976_v60, %v4996_v24  ;;  %v4839_v30 = vpop.xlane.xlu1 %4838 }
0x16b8   :  { %v5016_v51 = vsel %vm5008_vm7, -1e+30, %v4976_v60  ;;  %vm4849_vm8 = vcmp.ge.f32.partialorder %v4817_v5, %v4839_v30 }
0x16b9   :  { %v5034_v57 = vsel %vm3898_vm2, %v5016_v51, -inf  ;;  %v4857_v8 = vsel %vm4849_vm8, -1e+30, %v4817_v5 }
0x16ba   :  { %5035 = vmax.xlane.f32.xlu0 %v5034_v57  ;;  %v4877_v59 = vsel %vm3898_vm2, %v4857_v8, -inf }
0x16be   :  { %v6586_v7 = vpop.permute.xlu2 %6585 }
0x16bf   :  { %v12165_v13 = vand.u32 4294901760, %v6586_v7  ;;  %v4722_v60 = vpop.xlane.xlu1 %4721 }
0x16c0   :  { %vm4730_vm9 = vcmp.ge.f32.partialorder %v12133_v28, %v4722_v60 }
0x16c1   :  { %v12168_v9 = vsub.f32 %v6586_v7, %v12165_v13  ;;  %6607 = vmatpush.msra.mxu2 %v12165_v13  ;;  %6739 = vmatpush.msrb.mxu1 %v12165_v13  ;;  %v12196_v56 = vsel %vm4730_vm9, -1e+30, %v12133_v28 }
0x16c2   :  { %4878 = vmax.xlane.f32.xlu0 %v4877_v59  ;;  %v4760_v22 = vsel %vm3898_vm2, %v12196_v56, -inf }
0x16c3   :  { %v6641_v12 = vand.u32 4294901760, %v12168_v9  ;;  %6702 = vmatpush.msrb.mxu0 %v12168_v9 }
0x16c5   :  { %v6642_v41 = vsub.f32 %v12168_v9, %v6641_v12 }
0x16c6   :  { %v6580_v35 = vpop.permute.xlu2 %6579 }
0x16c7   :  { %v6643_v23 = vand.u32 4294901760, %v6642_v41  ;;  %v12214_v38 = vand.u32 4294901760, %v6580_v35 }
0x16c9   :  { %6644 = vmatpush.msra.mxu3 %v6643_v23  ;;  %v12221_v57 = vsub.f32 %v6580_v35, %v12214_v38 }
0x16cb   :  { %v13135_v60 = vand.u32 4294901760, %v12221_v57 }
0x16d6   :  { %6581 = vrot.lane.b32.xlu0 %v11243_v19, %s8737_s18 }
0x16d7   :  { %v6584_v5 = vpop.permute.xlu1 %6583 }
0x16d8   :  { %v12180_v31 = vand.u32 4294901760, %v6584_v5 }
0x16da   :  { %v12183_v49 = vsub.f32 %v6584_v5, %v12180_v31  ;;  %6609 = vmatpush.msra.mxu2 %v12180_v31  ;;  %6741 = vmatpush.msrb.mxu1 %v12180_v31 }
0x16dc   :  { %v13138_v3 = vand.u32 4294901760, %v12183_v49  ;;  %6705 = vmatpush.msrb.mxu0 %v12183_v49 }
0x16de   :  { %v6648_v11 = vsub.f32 %v12183_v49, %v13138_v3  ;;  %6573 = vrot.lane.b32.xlu0 %v13468_v53, %s8737_s18 }
0x16df   :  { %v6578_v18 = vpop.permute.xlu1 %6577 }
0x16e0   :  { %v6649_v19 = vand.u32 4294901760, %v6648_v11  ;;  %v12218_v30 = vand.u32 4294901760, %v6578_v18 }
0x16e2   :  { %6650 = vmatpush.msra.mxu3 %v6649_v19  ;;  %v12231_v23 = vsub.f32 %v6578_v18, %v12218_v30  ;;  %v13475_v18 = vld [vmem:[#allocation53_spill] sm:$0xff] }
0x16e7   :  { %v6572_v7 = vpop.permute.xlu1 %6571 }
0x16e8   :  { %v12239_v11 = vand.u32 4294901760, %v6572_v7 }
0x1700   :  { %v5214_v17 = vpop.xlane.xlu2 %5213 }
0x1701   :  { %8688 = vrcp.f32 %v5214_v17  ;;  %v5280_v50 = vand.u32 2147483648, %v5214_v17  ;;  %vm5274_vm13 = vweird.f32 %v5214_v17  ;;  %v5278_v61 = vand.u32 2147483647, %v5214_v17 }
0x1703   :  { %v5281_v16 = vor.u32 1.1754944e-38, %v5280_v50  ;;  %vm5279_vm3 = vcmp.eq.f32.partialorder %v5278_v61, 8.507059e+37 }
0x1707   :  { %v8689_v15 = vpop.eup %8688 }
0x1708   :  { %4761 = vmax.xlane.f32.xlu0 %v4760_v22  ;;  %v5270_v53 = vmul.f32 %v8689_v15, %v5214_v17  ;;  %vm5275_vm12 = vweird.f32 %v8689_v15  ;;  %v13134_v17 = vand.u32 4294901760, %v12231_v23 }
0x1709   :  { %vm5276_vm15 = vmor %vm5274_vm13, %vm5275_vm12 }
0x170a   :  { %v5271_v52 = vsub.f32 1.0, %v5270_v53  ;;  %v12261_v53 = vld [vmem:[%s13046_s5 + $0x2] ss:$0 sm:$0xff]  ;;  %v6666_v61 = vsub.f32 %v12231_v23, %v13134_v17  ;;  %v13480_v17 = vld [vmem:[#allocation118_spill] sm:$0xff] }
0x170c   :  { %v5272_v44 = vmul.f32 %v8689_v15, %v5271_v52 }
0x170e   :  { %v5273_v34 = vadd.f32 %v8689_v15, %v5272_v44 }
0x1710   :  { %v5277_v4 = vsel %vm5276_vm15, %v8689_v15, %v5273_v34 }
0x1711   :  { %v5282_v10 = vsel %vm5279_vm3, %v5281_v16, %v5277_v4  ;;  %v13474_v4 = vld [vmem:[#allocation55_spill] sm:$0xff] }
0x1725   :  { %v5033_v48 = vpop.xlane.xlu0 %5032 }
0x1726   :  { %vm5047_vm10 = vcmp.ge.f32.partialorder %v5015_v45, %v5033_v48  ;;  %v6660_v48 = vsub.f32 %v12221_v57, %v13135_v60 }
0x1727   :  { %v12200_v46 = vsel %vm5047_vm10, -1e+30, %v5015_v45  ;;  %v5342_v45 = vmul.f32 %v5282_v10, %v12150_v27 }
0x1728   :  { %v5071_v40 = vsel %vm3898_vm2, %v12200_v46, -inf  ;;  %v6661_v10 = vand.u32 4294901760, %v6660_v48 }
0x1729   :  { %5072 = vmax.xlane.f32.xlu2 %v5071_v40  ;;  %v6596_v47 = vsel %vm3898_vm2, %v5342_v45, 0  ;;  %v13473_v40 = vld [vmem:[#allocation59_spill] sm:$0xff]  ;;  %v8659_v45 = vld [vmem:[%s13045_s4 + $0x78] sm:$0xff] }
0x172a   :  { %v12216_v24 = vand.u32 4294901760, %v6596_v47  ;;  %v1209_v52 = vadd.f32 %v12261_v53, %v13473_v40 }
0x172c   :  { %v12224_v59 = vsub.f32 %v6596_v47, %v12216_v24  ;;  %v1193_v47 = vadd.f32 %v12261_v53, %v13475_v18  ;;  %v13479_v18 = vld [vmem:[#allocation57_spill] sm:$0xff] }
0x172d   :  { %v5036_v28 = vpop.xlane.xlu0 %5035 }
0x172e   :  { %vm5048_vm11 = vcmp.ge.f32.partialorder %v5016_v51, %v5036_v28  ;;  %v6624_v35 = vand.u32 4294901760, %v12224_v59  ;;  %v12266_v28 = vsub.f32 %v6572_v7, %v12239_v11 }
0x172f   :  { %v12204_v25 = vsel %vm5048_vm11, -1e+30, %v5016_v51  ;;  %v6576_v51 = vpop.permute.xlu2 %6575 }
0x1730   :  { %v5074_v62 = vsel %vm3898_vm2, %v12204_v25, -inf  ;;  %v12226_v41 = vand.u32 4294901760, %v6576_v51  ;;  %v13139_v7 = vand.u32 4294901760, %v12266_v28 }
0x1731   :  { %5075 = vmax.xlane.f32.xlu1 %v5074_v62 }
0x1732   :  { %v12242_v19 = vsub.f32 %v6576_v51, %v12226_v41  ;;  %v13476_v51 = vld [vmem:[#allocation61_spill] sm:$0xff] }
0x1734   :  { %v13136_v62 = vand.u32 4294901760, %v12242_v19 }
0x1735   :  { %v4879_v21 = vpop.xlane.xlu0 %4878 }
0x1736   :  { %vm4889_vm14 = vcmp.ge.f32.partialorder %v4857_v8, %v4879_v21  ;;  %v6625_v21 = vsub.f32 %v12224_v59, %v6624_v35  ;;  %v6672_v40 = vsub.f32 %v12242_v19, %v13136_v62  ;;  %v13482_v62 = vld [vmem:[#allocation54_spill] sm:$0xff] }
0x1737   :  { %v12208_v42 = vsel %vm4889_vm14, -1e+30, %v4857_v8 }
0x1738   :  { %v4917_v39 = vsel %vm3898_vm2, %v12208_v42, -inf  ;;  %v6626_v48 = vand.u32 4294901760, %v6625_v21 }
0x1739   :  { %4918 = vmax.xlane.f32.xlu2 %v4917_v39  ;;  %v1201_v39 = vadd.f32 %v12261_v53, %v13474_v4  ;;  %v12303_v4 = vand.u32 4294901760, %v8659_v45 }
0x173b   :  { %13478 = vst [vmem:[#allocation26_spill] sm:$0xff] %v12303_v4  ;;  %v12326_v9 = vsub.f32 %v8659_v45, %v12303_v4  ;;  %v13493_v45 = vld [vmem:[#allocation105_spill] sm:$0xff] }
0x173d   :  { %13486 = vst [vmem:[#allocation29_spill] sm:$0xff] %v12326_v9 }
0x1748   :  { %v6582_v8 = vpop.permute.xlu0 %6581 }
0x1749   :  { %v12228_v27 = vand.u32 4294901760, %v6582_v8 }
0x174b   :  { %v12235_v5 = vsub.f32 %v6582_v8, %v12228_v27  ;;  %6611 = vmatpush.msra.mxu2 %v12228_v27  ;;  %6743 = vmatpush.msrb.mxu1 %v12228_v27  ;;  %v1310_v8 = vadd.f32 %v13476_v51, %v1209_v52  ;;  %v6667_v52 = vand.u32 4294901760, %v6666_v61  ;;  %v1306_v51 = vadd.f32 %v13479_v18, %v1201_v39  ;;  %v13483_v61 = vld [vmem:[#allocation114_spill] sm:$0xff]  ;;  %v13489_v18 = vld [vmem:[#allocation119_spill] sm:$0xff] }
0x174d   :  { %v13137_v22 = vand.u32 4294901760, %v12235_v5  ;;  %6613 = vmatpush.msra.mxu2 %v12214_v38  ;;  %6708 = vmatpush.msrb.mxu0 %v12235_v5  ;;  %v1415_v60 = vadd.f32 %v13480_v17, %v1310_v8  ;;  %v1410_v3 = vadd.f32 %v13483_v61, %v1306_v51  ;;  %v6673_v17 = vand.u32 4294901760, %v6672_v40  ;;  %v13484_v8 = vld [vmem:[#allocation50_spill] sm:$0xff]  ;;  %v13491_v61 = vld [vmem:[#allocation28_spill] sm:$0xff] }
0x174e   :  { %6745 = vmatpush.msrb.mxu1 %v12214_v38 }
0x174f   :  { %6615 = vmatpush.msra.mxu2 %v12218_v30  ;;  %6711 = vmatpush.msrb.mxu0 %v12221_v57  ;;  %v6654_v15 = vsub.f32 %v12235_v5, %v13137_v22  ;;  %v1302_v22 = vadd.f32 %v13482_v62, %v1193_v47  ;;  %v13485_v62 = vand.u32 4294901760, %v12183_v49  ;;  %v1532_v51 = vadd.f32 %v13489_v18, %v1415_v60  ;;  %v13497_v18 = vld [vmem:[#allocation16_spill] sm:$0xff] }
0x1750   :  { %6747 = vmatpush.msrb.mxu1 %v12218_v30  ;;  %v6574_v44 = vpop.permute.xlu0 %6573  ;;  %v13492_v49 = vand.u32 4294901760, %v12235_v5  ;;  %v13499_v5 = vld [vmem:[#allocation102_spill] sm:$0xff] }
0x1751   :  { %v12270_v34 = vand.u32 4294901760, %v6574_v44  ;;  %6617 = vmatpush.msra.mxu2 %v12226_v41  ;;  %6714 = vmatpush.msrb.mxu0 %v12231_v23  ;;  %v6655_v50 = vand.u32 4294901760, %v6654_v15 }
0x1752   :  { %6749 = vmatpush.msrb.mxu1 %v12226_v41 }
0x1753   :  { %v12282_v16 = vsub.f32 %v6574_v44, %v12270_v34  ;;  %6619 = vmatpush.msra.mxu2 %v12270_v34  ;;  %6656 = vmatpush.msra.mxu3 %v6655_v50  ;;  %v13477_v44 = vld [vmem:[#allocation20_spill] sm:$0xff] }
0x1754   :  { %6717 = vmatpush.msrb.mxu0 %v12242_v19  ;;  %6751 = vmatpush.msrb.mxu1 %v12270_v34  ;;  %v1185_v50 = vadd.f32 %v12261_v53, %v13477_v44 }
0x1755   :  { %v13140_v15 = vand.u32 4294901760, %v12282_v16  ;;  %6621 = vmatpush.msra.mxu2 %v12239_v11  ;;  %6662 = vmatpush.msra.mxu3 %v6661_v10  ;;  %v13481_v10 = vld [vmem:[#allocation51_spill] sm:$0xff] }
0x1756   :  { %6720 = vmatpush.msrb.mxu0 %v12282_v16  ;;  %6753 = vmatpush.msrb.mxu1 %v12239_v11  ;;  %v1177_v44 = vadd.f32 %v12261_v53, %v13481_v10 }
0x1757   :  { %6627 = vmatmul.f32.vlgmr.msra.gmra.mxu2 %v6626_v48  ;;  %6757 = vmatmul.f32.vlgmr.msrb.gmra.mxu1 %v6624_v35  ;;  %v6678_v21 = vsub.f32 %v12282_v16, %v13140_v15  ;;  %v6684_v35 = vsub.f32 %v12266_v28, %v13139_v7  ;;  %v1169_v48 = vadd.f32 %v12261_v53, %v13484_v8  ;;  %v13501_v15 = vld [vmem:[#allocation117_spill] sm:$0xff] }
0x1758   :  { %6772 = vmatpush.msrb.mxu2 %v6641_v12  ;;  %6668 = vmatpush.msra.mxu3 %v6667_v52  ;;  %v13487_v12 = vld [vmem:[#allocation52_spill] sm:$0xff]  ;;  %v13488_v52 = vld [vmem:[#allocation109_spill] sm:$0xff] }
0x1759   :  { %6723 = vmatpush.msrb.mxu0 %v12266_v28  ;;  %v6679_v39 = vand.u32 4294901760, %v6678_v21  ;;  %v1298_v47 = vadd.f32 %v13487_v12, %v1185_v50  ;;  %v1405_v40 = vadd.f32 %v13488_v52, %v1302_v22  ;;  %v13490_v21 = vld [vmem:[#allocation11_spill] sm:$0xff]  ;;  %v13495_v22 = vld [vmem:[#allocation121_spill] sm:$0xff]  ;;  %v6685_v60 = vand.u32 4294901760, %v6684_v35 }
0x175a   :  { %6726 = vmatmul.f32.vlgmr.msrb.gmra.mxu0 %v12224_v59  ;;  %6776 = vmatpush.msrb.mxu2 %v13485_v62  ;;  %v1161_v10 = vadd.f32 %v12261_v53, %v13490_v21  ;;  %v1294_v59 = vadd.f32 %v13491_v61, %v1177_v44  ;;  %v13494_v50 = vld [vmem:[#allocation115_spill] sm:$0xff]  ;;  %v1625_v12 = vadd.f32 %v13495_v22, %v1532_v51  ;;  %v13498_v44 = vand.u32 4294901760, %v12221_v57  ;;  %v13506_v51 = vld [vmem:[#allocation106_spill] sm:$0xff] }
0x175b   :  { %6674 = vmatpush.msra.mxu3 %v6673_v17  ;;  %6854 = vmatpush.msra.mxu0 %v12303_v4  ;;  %v1400_v8 = vadd.f32 %v13493_v45, %v1298_v47  ;;  %v1526_v62 = vadd.f32 %v13494_v50, %v1410_v3  ;;  %v13496_v17 = vld [vmem:[#allocation18_spill] sm:$0xff]  ;;  %v1290_v21 = vadd.f32 %v13497_v18, %v1169_v48 }
0x175c   :  { %6780 = vmatpush.msrb.mxu2 %v13492_v49  ;;  %v1153_v52 = vadd.f32 %v12261_v53, %v13496_v17  ;;  %v1395_v61 = vadd.f32 %v13499_v5, %v1294_v59  ;;  %v13500_v49 = vld [vmem:[#allocation111_spill] sm:$0xff]  ;;  %v13502_v45 = vld [vmem:[#allocation122_spill] sm:$0xff]  ;;  %v13504_v53 = vand.u32 4294901760, %v12231_v23  ;;  %v13507_v59 = vld [vmem:[#allocation113_spill] sm:$0xff] }
0x175d   :  { %6907 = vmatpush.msrb.mxu0 %v12326_v9  ;;  %6680 = vmatpush.msra.mxu3 %v6679_v39  ;;  %v1520_v7 = vadd.f32 %v13500_v49, %v1405_v40  ;;  %v1621_v47 = vadd.f32 %v13501_v15, %v1526_v62  ;;  %v12350_v3 = vadd.f32 %v13502_v45, %v1625_v12  ;;  %v13503_v39 = vld [vmem:[#allocation13_spill] sm:$0xff]  ;;  %v13505_v48 = vld [vmem:[#allocation98_spill] sm:$0xff]  ;;  %v13508_v40 = vld [vmem:[#allocation120_spill] sm:$0xff] }
0x175e   :  { %6784 = vmatpush.msrb.mxu2 %v13498_v44  ;;  %v1286_v35 = vadd.f32 %v13503_v39, %v1161_v10  ;;  %v1390_v57 = vadd.f32 %v13505_v48, %v1290_v21  ;;  %v1514_v50 = vadd.f32 %v13506_v51, %v1400_v8  ;;  %v13509_v15 = vld [vmem:[#allocation19_spill] sm:$0xff]  ;;  %v13510_v12 = vld [vmem:[#allocation94_spill] sm:$0xff]  ;;  %v13512_v23 = vld [vmem:[#allocation100_spill] sm:$0xff] }
0x175f   :  { %6686 = vmatpush.msra.mxu3 %v6685_v60  ;;  %v1617_v22 = vadd.f32 %v13507_v59, %v1520_v7  ;;  %v12360_v17 = vadd.f32 %v13508_v40, %v1621_v47  ;;  %v1282_v62 = vadd.f32 %v13509_v15, %v1153_v52  ;;  %v13511_v60 = vand.u32 4294901760, %v12242_v19  ;;  %v13513_v44 = vld [vmem:[#allocation110_spill] sm:$0xff]  ;;  %v13514_v5 = vld [vmem:[#allocation116_spill] sm:$0xff]  ;;  %v13519_v45 = vld [vmem:[#allocation107_spill] sm:$0xff] }
0x1760   :  { %6688 = vmatmul.f32.vlgmr.msra.gmra.mxu3 %v12216_v24  ;;  %6788 = vmatpush.msrb.mxu2 %v13504_v53  ;;  %v1385_v10 = vadd.f32 %v13510_v12, %v1286_v35  ;;  %v1508_v18 = vadd.f32 %v13512_v23, %v1395_v61  ;;  %v1613_v21 = vadd.f32 %v13513_v44, %v1514_v50  ;;  %v12373_v7 = vand.u32 4294901760, %v12350_v3  ;;  %v13518_v47 = vld [vmem:[#allocation96_spill] sm:$0xff]  ;;  %v13523_v50 = vld [vmem:[#allocation103_spill] sm:$0xff] }
0x1761   :  { %6815 = vmatpush.msrb.mxu3 %v12165_v13  ;;  %v12370_v8 = vadd.f32 %v13514_v5, %v1617_v22  ;;  %v13515_v13 = vld [vmem:[#allocation90_spill] sm:$0xff]  ;;  %v13516_v52 = vand.u32 4294901760, %v12282_v16  ;;  %v12380_v19 = vand.u32 4294901760, %v12326_v9  ;;  %v1502_v61 = vadd.f32 %v13518_v47, %v1390_v57  ;;  %v13520_v35 = vld [vmem:[#allocation112_spill] sm:$0xff] }
0x1762   :  { %6792 = vmatpush.msrb.mxu2 %v13511_v60  ;;  %v1380_v49 = vadd.f32 %v13515_v13, %v1282_v62  ;;  %v1609_v39 = vadd.f32 %v13519_v45, %v1508_v18  ;;  %v12385_v53 = vadd.f32 %v13520_v35, %v1613_v21  ;;  %v12389_v48 = vand.u32 4294901760, %v12360_v17  ;;  %v13524_v22 = vld [vmem:[#allocation108_spill] sm:$0xff]  ;;  %v13528_v18 = vld [vmem:[#allocation95_spill] sm:$0xff]  ;;  %v13529_v21 = vld [vmem:[#allocation101_spill] sm:$0xff] }
0x1763   :  { %6817 = vmatpush.msrb.mxu3 %v12180_v31  ;;  %13517 = vst [vmem:[#allocation22_spill] sm:$0xff] %v12380_v19  ;;  %v13521_v31 = vld [vmem:[#allocation92_spill] sm:$0xff]  ;;  %v13522_v16 = vand.u32 4294901760, %v12266_v28  ;;  %v1605_v59 = vadd.f32 %v13523_v50, %v1502_v61  ;;  %v12405_v57 = vand.u32 4294901760, %v12370_v8  ;;  %v13526_v28 = vld [vmem:[#allocation99_spill] sm:$0xff] }
0x1764   :  { %6796 = vmatpush.msrb.mxu2 %v13516_v52  ;;  %v1496_v51 = vadd.f32 %v13521_v31, %v1385_v10  ;;  %v12396_v40 = vadd.f32 %v13524_v22, %v1609_v39  ;;  %v13525_v15 = vld [vmem:[#allocation88_spill] sm:$0xff]  ;;  %v12420_v23 = vand.u32 4294901760, %v12385_v53 }
0x1765   :  { %6819 = vmatpush.msrb.mxu3 %v12228_v27  ;;  %v12402_v27 = vsub.f32 %v12350_v3, %v12373_v7  ;;  %v1490_v62 = vadd.f32 %v13525_v15, %v1380_v49  ;;  %v13527_v10 = vld [vmem:[#allocation104_spill] sm:$0xff]  ;;  %v13530_v49 = vld [vmem:[#allocation97_spill] sm:$0xff] }
0x1766   :  { %6800 = vmatpush.msrb.mxu2 %v13522_v16  ;;  %v1601_v12 = vadd.f32 %v13526_v28, %v1496_v51  ;;  %v12411_v60 = vadd.f32 %v13527_v10, %v1605_v59  ;;  %v12433_v13 = vand.u32 4294901760, %v12396_v40  ;;  %v12442_v47 = vsub.f32 %v12385_v53, %v12420_v23 }
0x1767   :  { %6821 = vmatpush.msrb.mxu3 %v12214_v38  ;;  %6802 = vmatmul.f32.vlgmr.msrb.gmra.mxu2 %v12216_v24  ;;  %v12417_v38 = vsub.f32 %v12360_v17, %v12389_v48  ;;  %v1597_v44 = vadd.f32 %v13528_v18, %v1490_v62 }
0x1768   :  { %6956 = vmatpush.msra.mxu2 %v12380_v19  ;;  %v12424_v5 = vadd.f32 %v13529_v21, %v1601_v12  ;;  %v12451_v61 = vsub.f32 %v12396_v40, %v12433_v13  ;;  %v6882_v12 = vsub.f32 %v12326_v9, %v12380_v19 }
0x1769   :  { %6823 = vmatpush.msrb.mxu3 %v12218_v30  ;;  %v12430_v30 = vsub.f32 %v12370_v8, %v12405_v57  ;;  %v12436_v52 = vadd.f32 %v13530_v49, %v1597_v44 }
0x176a   :  { %7097 = vmatpush.msrb.mxu2 %v12402_v27  ;;  %v12454_v45 = vand.u32 4294901760, %v12424_v5  ;;  %v12508_v10 = vand.u32 4294901760, %v6882_v12 }
0x176b   :  { %6825 = vmatpush.msrb.mxu3 %v12226_v41  ;;  %v12445_v41 = vand.u32 4294901760, %v12411_v60 }
0x176c   :  { %7100 = vmatpush.msrb.mxu2 %v12417_v38  ;;  %v12470_v39 = vsub.f32 %v12424_v5, %v12454_v45  ;;  %6884 = vmatpush.msra.mxu1 %v12508_v10 }
0x176d   :  { %6827 = vmatpush.msrb.mxu3 %v12270_v34  ;;  %v12461_v34 = vsub.f32 %v12411_v60, %v12445_v41 }
0x176e   :  { %7103 = vmatpush.msrb.mxu2 %v12430_v30  ;;  %6930 = vmatpush.msrb.mxu1 %v12303_v4 }
0x176f   :  { %6829 = vmatpush.msrb.mxu3 %v12239_v11  ;;  %v12464_v11 = vand.u32 4294901760, %v12436_v52 }
0x1770   :  { %7106 = vmatpush.msrb.mxu2 %v12442_v47  ;;  %6831 = vmatmul.f32.vlgmr.msrb.gmra.mxu3 %v12216_v24 }
0x1771   :  { %6978 = vmatpush.msra.mxu3 %v12303_v4  ;;  %v12476_v24 = vsub.f32 %v12436_v52, %v12464_v11 }
0x1772   :  { %7109 = vmatpush.msrb.mxu2 %v12451_v61 }
0x1773   :  { %7134 = vmatpush.msrb.mxu3 %v12373_v7 }
0x1774   :  { %7112 = vmatpush.msrb.mxu2 %v12461_v34 }
0x1775   :  { %7136 = vmatpush.msrb.mxu3 %v12389_v48 }
0x1776   :  { %7115 = vmatpush.msrb.mxu2 %v12470_v39 }
0x1777   :  { %7138 = vmatpush.msrb.mxu3 %v12405_v57 }
0x1778   :  { %7118 = vmatpush.msrb.mxu2 %v12476_v24 }
0x1779   :  { %7140 = vmatpush.msrb.mxu3 %v12420_v23 }
0x177b   :  { %7142 = vmatpush.msrb.mxu3 %v12433_v13  ;;  %v4762_v35 = vpop.xlane.xlu0 %4761 }
0x177c   :  { %vm4770_vm4 = vcmp.ge.f32.partialorder %v12196_v56, %v4762_v35 }
0x177d   :  { %7144 = vmatpush.msrb.mxu3 %v12445_v41  ;;  %v4778_v31 = vsel %vm4770_vm4, -1e+30, %v12196_v56 }
0x177e   :  { %v4800_v51 = vsel %vm3898_vm2, %v4778_v31, -inf }
0x177f   :  { %7146 = vmatpush.msrb.mxu3 %v12454_v45  ;;  %4801 = vmax.xlane.f32.xlu1 %v4800_v51 }
0x1781   :  { %7148 = vmatpush.msrb.mxu3 %v12464_v11 }
0x179c   :  { %v5073_v16 = vpop.xlane.xlu2 %5072 }
0x179d   :  { %vm5087_vm5 = vcmp.ge.f32.partialorder %v12200_v46, %v5073_v16  ;;  %v13141_v16 = vand.u32 4294901760, %v12402_v27 }
0x179e   :  { %v12490_v50 = vsel %vm5087_vm5, -1e+30, %v12200_v46 }
0x179f   :  { %v5111_v59 = vsel %vm3898_vm2, %v12490_v50, -inf }
0x17a0   :  { %5112 = vmax.xlane.f32.xlu0 %v5111_v59 }
0x17a4   :  { %v5076_v22 = vpop.xlane.xlu1 %5075 }
0x17a5   :  { %vm5088_vm6 = vcmp.ge.f32.partialorder %v12204_v25, %v5076_v22 }
0x17a6   :  { %v12496_v56 = vsel %vm5088_vm6, -1e+30, %v12204_v25 }
0x17a7   :  { %v5114_v15 = vsel %vm3898_vm2, %v12496_v56, -inf }
0x17a8   :  { %5115 = vmax.xlane.f32.xlu2 %v5114_v15  ;;  %v7042_v15 = vand.u32 4294901760, %v12417_v38 }
0x17ac   :  { %v4919_v62 = vpop.xlane.xlu2 %4918 }
0x17ad   :  { %vm4929_vm7 = vcmp.ge.f32.partialorder %v12208_v42, %v4919_v62 }
0x17ae   :  { %v12502_v46 = vsel %vm4929_vm7, -1e+30, %v12208_v42 }
0x17af   :  { %v4957_v28 = vsel %vm3898_vm2, %v12502_v46, -inf }
0x17b0   :  { %4958 = vmax.xlane.f32.xlu0 %v4957_v28 }
0x17d4   :  { %v6758_v42 = vpop.f32.mrf.mxu1 }
0x17d7   :  { %v6727_v21 = vpop.f32.mrf.mxu0 }
0x17da   :  { %v6628_v18 = vpop.f32.mrf.mxu2 }
0x17e3   :  { %v6689_v25 = vpop.f32.mrf.mxu3 }
0x17e4   :  { %v6690_v44 = vadd.f32 %v6689_v25, %v6628_v18  ;;  %v7037_v25 = vsub.f32 %v12402_v27, %v13141_v16  ;;  %v7048_v18 = vand.u32 4294901760, %v12430_v30 }
0x17e6   :  { %v6728_v49 = vadd.f32 %v6727_v21, %v6690_v44 }
0x17e8   :  { %v6759_v35 = vadd.f32 %v6758_v42, %v6728_v49  ;;  %v7043_v49 = vsub.f32 %v12417_v38, %v7042_v15  ;;  %v7054_v42 = vand.u32 4294901760, %v12442_v47 }
0x17ea   :  { %v6803_v51 = vpop.f32.mrf.mxu2  ;;  %v7055_v16 = vsub.f32 %v12442_v47, %v7054_v42 }
0x17eb   :  { %v6804_v59 = vadd.f32 %v6803_v51, %v6759_v35  ;;  %v7038_v51 = vand.u32 4294901760, %v7037_v25  ;;  %v7072_v25 = vand.u32 4294901760, %v12470_v39 }
0x17ec   :  { %v7056_v9 = vand.u32 4294901760, %v7055_v16 }
0x17ed   :  { %v7073_v47 = vsub.f32 %v12470_v39, %v7072_v25 }
0x17ef   :  { %v7074_v16 = vand.u32 4294901760, %v7073_v47 }
0x17f2   :  { %v4802_v22 = vpop.xlane.xlu1 %4801 }
0x17f3   :  { %v6832_v62 = vpop.f32.mrf.mxu3  ;;  %vm4810_vm8 = vcmp.ge.f32.partialorder %v4778_v31, %v4802_v22 }
0x17f4   :  { %v6833_v28 = vadd.f32 %v6832_v62, %v6804_v59  ;;  %v12514_v12 = vsel %vm4810_vm8, -1e+30, %v4778_v31  ;;  %v7049_v31 = vsub.f32 %v12430_v30, %v7048_v18  ;;  %v7060_v59 = vand.u32 4294901760, %v12451_v61 }
0x17f5   :  { %v4840_v44 = vsel %vm3898_vm2, %v12514_v12, -inf  ;;  %v7044_v62 = vand.u32 4294901760, %v7043_v49 }
0x17f6   :  { %v6836_v21 = vsel %vm1713_vm1, %v6833_v28, 0  ;;  %4841 = vmax.xlane.f32.xlu2 %v4840_v44  ;;  %v7066_v28 = vand.u32 4294901760, %v12461_v34  ;;  %v7050_v38 = vand.u32 4294901760, %v7049_v31  ;;  %v7061_v19 = vsub.f32 %v12451_v61, %v7060_v59 }
0x17f7   :  { %v6855_v35 = vand.u32 4294901760, %v6836_v21 }
0x17f8   :  { %v7062_v49 = vand.u32 4294901760, %v7061_v19 }
0x17f9   :  { %v6856_v22 = vsub.f32 %v6836_v21, %v6855_v35  ;;  %6886 = vmatmul.f32.vlgmr.msra.gmra.mxu1 %v6855_v35  ;;  %6958 = vmatmul.f32.vlgmr.msra.gmra.mxu2 %v6855_v35  ;;  %v7067_v21 = vsub.f32 %v12461_v34, %v7066_v28 }
0x17fa   :  { %6980 = vmatmul.f32.vlgmr.msra.gmra.mxu3 %v6855_v35  ;;  %7039 = vmatpush.msra.mxu1 %v7038_v51  ;;  %v7078_v35 = vand.u32 4294901760, %v12476_v24 }
0x17fb   :  { %v6857_v44 = vand.u32 4294901760, %v6856_v22  ;;  %v7068_v61 = vand.u32 4294901760, %v7067_v21  ;;  %v8673_v21 = vld [vmem:[%s13046_s5 + $0x3] ss:$0 sm:$0xff] }
0x17fc   :  { %7045 = vmatpush.msra.mxu1 %v7044_v62  ;;  %v7079_v31 = vsub.f32 %v12476_v24, %v7078_v35 }
0x17fd   :  { %v6858_v30 = vsub.f32 %v6856_v22, %v6857_v44 }
0x17fe   :  { %7051 = vmatpush.msra.mxu1 %v7050_v38  ;;  %v7080_v34 = vand.u32 4294901760, %v7079_v31 }
0x17ff   :  { %v6859_v51 = vand.u32 4294901760, %v6858_v30 }
0x1800   :  { %7057 = vmatpush.msra.mxu1 %v7056_v9  ;;  %v13531_v9 = vand.u32 4294901760, %v12402_v27 }
0x1801   :  { %6860 = vmatmul.f32.vlgmr.msra.gmra.mxu0 %v6859_v51  ;;  %6934 = vmatmul.f32.vlgmr.msrb.gmra.mxu1 %v6857_v44 }
0x1802   :  { %7002 = vmatpush.msra.mxu0 %v12373_v7  ;;  %7063 = vmatpush.msra.mxu1 %v7062_v49 }
0x1804   :  { %7004 = vmatpush.msra.mxu0 %v12389_v48  ;;  %7069 = vmatpush.msra.mxu1 %v7068_v61 }
0x1806   :  { %7006 = vmatpush.msra.mxu0 %v12405_v57  ;;  %7075 = vmatpush.msra.mxu1 %v7074_v16 }
0x1808   :  { %7008 = vmatpush.msra.mxu0 %v12420_v23  ;;  %7081 = vmatpush.msra.mxu1 %v7080_v34 }
0x1809   :  { %6910 = vmatmul.f32.vlgmr.msrb.gmra.mxu0 %v6856_v22 }
0x180a   :  { %7210 = vmatpush.msrb.mxu1 %v12373_v7  ;;  %7010 = vmatpush.msra.mxu0 %v12433_v13 }
0x180c   :  { %7212 = vmatpush.msrb.mxu1 %v12389_v48  ;;  %7012 = vmatpush.msra.mxu0 %v12445_v41 }
0x180e   :  { %7214 = vmatpush.msrb.mxu1 %v12405_v57  ;;  %7014 = vmatpush.msra.mxu0 %v12454_v45 }
0x1810   :  { %7216 = vmatpush.msrb.mxu1 %v12420_v23  ;;  %7016 = vmatpush.msra.mxu0 %v12464_v11 }
0x1812   :  { %7167 = vmatpush.msrb.mxu0 %v13531_v9  ;;  %7218 = vmatpush.msrb.mxu1 %v12433_v13 }
0x1813   :  { %v5113_v7 = vpop.xlane.xlu0 %5112 }
0x1814   :  { %7171 = vmatpush.msrb.mxu0 %v7042_v15  ;;  %7220 = vmatpush.msrb.mxu1 %v12445_v41  ;;  %vm5127_vm9 = vcmp.ge.f32.partialorder %v12490_v50, %v5113_v7  ;;  %v13533_v15 = vld [vmem:[#allocation30_spill] sm:$0xff] }
0x1815   :  { %v5135_v19 = vsel %vm5127_vm9, -1e+30, %v12490_v50  ;;  %v13534_v7 = vld [vmem:[#allocation34_spill] sm:$0xff] }
0x1816   :  { %7175 = vmatpush.msrb.mxu0 %v7048_v18  ;;  %7222 = vmatpush.msrb.mxu1 %v12454_v45  ;;  %v5151_v48 = vsel %vm3898_vm2, %v5135_v19, -inf  ;;  %v13535_v19 = vld [vmem:[#allocation27_spill] sm:$0xff] }
0x1817   :  { %5152 = vmax.xlane.f32.xlu1 %v5151_v48  ;;  %v5175_v48 = vsub.f32 %v13535_v19, %v13534_v7 }
0x1818   :  { %7179 = vmatpush.msrb.mxu0 %v7054_v42  ;;  %7224 = vmatpush.msrb.mxu1 %v12464_v11 }
0x181a   :  { %7183 = vmatpush.msrb.mxu0 %v7060_v59 }
0x181b   :  { %v5116_v27 = vpop.xlane.xlu2 %5115 }
0x181c   :  { %7187 = vmatpush.msrb.mxu0 %v7066_v28  ;;  %vm5128_vm10 = vcmp.ge.f32.partialorder %v12496_v56, %v5116_v27  ;;  %v5187_v27 = vmul.f32 1.442695, %v5175_v48 }
0x181d   :  { %v5136_v57 = vsel %vm5128_vm10, -1e+30, %v12496_v56 }
0x181e   :  { %7191 = vmatpush.msrb.mxu0 %v7072_v25  ;;  %v5154_v23 = vsel %vm3898_vm2, %v5136_v57, -inf }
0x181f   :  { %5155 = vmax.xlane.f32.xlu0 %v5154_v23 }
0x1820   :  { %7195 = vmatpush.msrb.mxu0 %v7078_v35 }
0x1823   :  { %v4959_v13 = vpop.xlane.xlu0 %4958 }
0x1824   :  { %vm4969_vm11 = vcmp.ge.f32.partialorder %v12502_v46, %v4959_v13 }
0x1825   :  { %v4977_v41 = vsel %vm4969_vm11, -1e+30, %v12502_v46  ;;  %v13532_v46 = vld [vmem:[#allocation32_spill] sm:$0xff] }
0x1826   :  { %v4997_v45 = vsel %vm3898_vm2, %v4977_v41, -inf  ;;  %v5176_v18 = vsub.f32 %v13533_v15, %v13532_v46 }
0x1827   :  { %4998 = vmax.xlane.f32.xlu1 %v4997_v45 }
0x1828   :  { %v5189_v28 = vmul.f32 1.442695, %v5176_v18 }
0x182a   :  { %8690 = vpow2.f32 %v5189_v28 }
0x182b   :  { %8692 = vpow2.f32 %v5187_v27 }
0x1830   :  { %v8691_v61 = vpop.eup %8690 }
0x1831   :  { %v8693_v57 = vpop.eup %8692 }
0x1840   :  { %7250 = vrot.lane.b32.xlu1 %v12360_v17, %s8735_s2 }
0x1869   :  { %v4842_v11 = vpop.xlane.xlu2 %4841 }
0x186a   :  { %vm4850_vm12 = vcmp.ge.f32.partialorder %v12514_v12, %v4842_v11 }
0x186b   :  { %v4858_v39 = vsel %vm4850_vm12, -1e+30, %v12514_v12 }
0x186c   :  { %v4880_v24 = vsel %vm3898_vm2, %v4858_v39, -inf }
0x186d   :  { %4881 = vmax.xlane.f32.xlu0 %v4880_v24 }
0x1876   :  { %v6887_v50 = vpop.f32.mrf.mxu1 }
0x187c   :  { %v6959_v12 = vpop.f32.mrf.mxu2 }
0x187d   :  { %v6981_v25 = vpop.f32.mrf.mxu3 }
0x187e   :  { %v6861_v56 = vpop.f32.mrf.mxu0  ;;  %v6935_v62 = vpop.f32.mrf.mxu1 }
0x187f   :  { %v6888_v42 = vadd.f32 %v6887_v50, %v6861_v56 }
0x1881   :  { %7252 = vrot.lane.b32.xlu0 %v12350_v3, %s8735_s2 }
0x1886   :  { %v6911_v59 = vpop.f32.mrf.mxu0 }
0x1887   :  { %v6912_v22 = vadd.f32 %v6911_v59, %v6888_v42 }
0x1889   :  { %v6936_v44 = vadd.f32 %v6935_v62, %v6912_v22  ;;  %7246 = vrot.lane.b32.xlu0 %v12385_v53, %s8735_s2 }
0x188a   :  { %v5153_v49 = vpop.xlane.xlu1 %5152 }
0x188b   :  { %v6960_v38 = vadd.f32 %v6959_v12, %v6936_v44  ;;  %vm5167_vm15 = vcmp.ge.f32.partialorder %v13535_v19, %v5153_v49 }
0x188c   :  { %v12595_v23 = vsel %vm5167_vm15, %v8693_v57, 0.0 }
0x188d   :  { %v6982_v30 = vadd.f32 %v6981_v25, %v6960_v38  ;;  %v5215_v13 = vsel %vm3898_vm2, %v12595_v23, 0.0 }
0x188f   :  { %v6984_v35 = vadd.f32 %v6982_v30, %v12162_v26 }
0x1891   :  { %v6988_v51 = vadd.f32 %v8673_v21, %v6984_v35  ;;  %7244 = vrot.lane.b32.xlu0 %v12396_v40, %s8735_s2 }
0x1892   :  { %v5156_v47 = vpop.xlane.xlu0 %5155 }
0x1893   :  { %6989 = vst.msk [vmem:[#allocation2] sm:$0xff] %vm55_vm0, %v6988_v51  ;;  %vm5168_vm13 = vcmp.ge.f32.partialorder %v13533_v15, %v5156_v47 }
0x1894   :  { %v12581_v31 = vsel %vm5168_vm13, %v8691_v61, 0.0 }
0x1895   :  { %v5218_v16 = vsel %vm3898_vm2, %v12581_v31, 0.0 }
0x1896   :  { %5219 = vadd.xlane.f32.xlu1 %v5218_v16 }
0x1899   :  { %7238 = vrot.lane.b32.xlu0 %v12436_v52, %s8735_s2 }
0x189a   :  { %v4999_v26 = vpop.xlane.xlu1 %4998 }
0x189b   :  { %vm5009_vm14 = vcmp.ge.f32.partialorder %v4977_v41, %v4999_v26 }
0x189c   :  { %v5017_v34 = vsel %vm5009_vm14, -1e+30, %v4977_v41 }
0x189d   :  { %v5037_v9 = vsel %vm3898_vm2, %v5017_v34, -inf }
0x189e   :  { %5038 = vmax.xlane.f32.xlu2 %v5037_v9 }
0x18af   :  { %7242 = vrot.lane.b32.xlu1 %v12411_v60, %s8735_s2 }
0x18b2   :  { %v7251_v24 = vpop.permute.xlu1 %7250 }
0x18b3   :  { %v12603_v50 = vand.u32 4294901760, %v7251_v24 }
0x18b5   :  { %v12606_v56 = vsub.f32 %v7251_v24, %v12603_v50 }
0x18b6   :  { %7248 = vrot.lane.b32.xlu2 %v12370_v8, %s8735_s2 }
0x18b7   :  { %v13148_v18 = vand.u32 4294901760, %v12606_v56 }
0x18b9   :  { %v7315_v22 = vsub.f32 %v12606_v56, %v13148_v18 }
0x18bb   :  { %v7316_v28 = vand.u32 4294901760, %v7315_v22 }
0x18df   :  { %5216 = vadd.xlane.f32.xlu2 %v5215_v13 }
0x18e0   :  { %v4882_v41 = vpop.xlane.xlu0 %4881 }
0x18e1   :  { %vm4890_vm3 = vcmp.ge.f32.partialorder %v4858_v39, %v4882_v41 }
0x18e2   :  { %v12599_v45 = vsel %vm4890_vm3, -1e+30, %v4858_v39 }
0x18e3   :  { %v4920_v11 = vsel %vm3898_vm2, %v12599_v45, -inf }
0x18e4   :  { %4921 = vmax.xlane.f32.xlu1 %v4920_v11 }
0x18f3   :  { %v7253_v46 = vpop.permute.xlu0 %7252 }
0x18f4   :  { %v12608_v15 = vand.u32 4294901760, %v7253_v46 }
0x18f6   :  { %v12612_v42 = vsub.f32 %v7253_v46, %v12608_v15  ;;  %7274 = vmatpush.msra.mxu2 %v12608_v15 }
0x18f7   :  { %7240 = vrot.lane.b32.xlu2 %v12424_v5, %s8735_s2 }
0x18f8   :  { %v13149_v39 = vand.u32 4294901760, %v12612_v42  ;;  %7276 = vmatpush.msra.mxu2 %v12603_v50 }
0x18fa   :  { %v7309_v59 = vsub.f32 %v12612_v42, %v13149_v39 }
0x18fb   :  { %v7247_v44 = vpop.permute.xlu0 %7246 }
0x18fc   :  { %v7310_v62 = vand.u32 4294901760, %v7309_v59  ;;  %v12625_v25 = vand.u32 4294901760, %v7247_v44 }
0x18fe   :  { %7311 = vmatpush.msra.mxu3 %v7310_v62  ;;  %v12630_v21 = vsub.f32 %v7247_v44, %v12625_v25 }
0x1900   :  { %7317 = vmatpush.msra.mxu3 %v7316_v28  ;;  %v13146_v61 = vand.u32 4294901760, %v12630_v21 }
0x1902   :  { %v7327_v48 = vsub.f32 %v12630_v21, %v13146_v61 }
0x1903   :  { %v7245_v38 = vpop.permute.xlu0 %7244 }
0x1904   :  { %v12627_v30 = vand.u32 4294901760, %v7245_v38  ;;  %v7328_v24 = vand.u32 4294901760, %v7327_v48 }
0x1906   :  { %v12633_v49 = vsub.f32 %v7245_v38, %v12627_v30 }
0x1908   :  { %v13145_v9 = vand.u32 4294901760, %v12633_v49 }
0x1909   :  { %v5220_v35 = vpop.xlane.xlu1 %5219 }
0x190a   :  { %v7333_v41 = vsub.f32 %v12633_v49, %v13145_v9  ;;  %8694 = vrcp.f32 %v5220_v35  ;;  %vm5302_vm6 = vweird.f32 %v5220_v35 }
0x190c   :  { %v7334_v59 = vand.u32 4294901760, %v7333_v41 }
0x1910   :  { %v8695_v28 = vpop.eup %8694 }
0x1911   :  { %v5039_v12 = vpop.xlane.xlu2 %5038  ;;  %v5298_v44 = vmul.f32 %v8695_v28, %v5220_v35  ;;  %vm5303_vm5 = vweird.f32 %v8695_v28 }
0x1912   :  { %vm5049_vm4 = vcmp.ge.f32.partialorder %v5017_v34, %v5039_v12  ;;  %vm5304_vm7 = vmor %vm5302_vm6, %vm5303_vm5 }
0x1913   :  { %v12638_v16 = vsel %vm5049_vm4, -1e+30, %v5017_v34  ;;  %v5299_v12 = vsub.f32 1.0, %v5298_v44 }
0x1914   :  { %v5077_v19 = vsel %vm3898_vm2, %v12638_v16, -inf }
0x1915   :  { %v5300_v38 = vmul.f32 %v8695_v28, %v5299_v12 }
0x1919   :  { %v7249_v51 = vpop.permute.xlu2 %7248 }
0x191a   :  { %v12635_v47 = vand.u32 4294901760, %v7249_v51 }
0x191c   :  { %v12641_v26 = vsub.f32 %v7249_v51, %v12635_v47  ;;  %7278 = vmatpush.msra.mxu2 %v12635_v47  ;;  %v5301_v51 = vadd.f32 %v8695_v28, %v5300_v38 }
0x191e   :  { %v13147_v7 = vand.u32 4294901760, %v12641_v26  ;;  %7280 = vmatpush.msra.mxu2 %v12625_v25 }
0x1920   :  { %5078 = vmax.xlane.f32.xlu2 %v5077_v19  ;;  %7282 = vmatpush.msra.mxu2 %v12627_v30  ;;  %v7321_v34 = vsub.f32 %v12641_v26, %v13147_v7  ;;  %v5308_v19 = vand.u32 2147483648, %v5220_v35 }
0x1921   :  { %v7243_v27 = vpop.permute.xlu1 %7242 }
0x1922   :  { %v12656_v57 = vand.u32 4294901760, %v7243_v27  ;;  %v7322_v13 = vand.u32 4294901760, %v7321_v34  ;;  %v7239_v34 = vpop.permute.xlu0 %7238 }
0x1923   :  { %v12669_v41 = vand.u32 4294901760, %v7239_v34 }
0x1924   :  { %v12662_v11 = vsub.f32 %v7243_v27, %v12656_v57  ;;  %7284 = vmatpush.msra.mxu2 %v12656_v57  ;;  %7323 = vmatpush.msra.mxu3 %v7322_v13  ;;  %v5306_v27 = vand.u32 2147483647, %v5220_v35  ;;  %v5305_v13 = vsel %vm5304_vm7, %v8695_v28, %v5301_v51 }
0x1925   :  { %v12673_v44 = vsub.f32 %v7239_v34, %v12669_v41 }
0x1926   :  { %v13144_v46 = vand.u32 4294901760, %v12662_v11  ;;  %7329 = vmatpush.msra.mxu3 %v7328_v24  ;;  %v5309_v24 = vor.u32 1.1754944e-38, %v5308_v19  ;;  %vm5307_vm8 = vcmp.eq.f32.partialorder %v5306_v27, 8.507059e+37 }
0x1928   :  { %7335 = vmatpush.msra.mxu3 %v7334_v59  ;;  %v7339_v22 = vsub.f32 %v12662_v11, %v13144_v46 }
0x192a   :  { %v7340_v62 = vand.u32 4294901760, %v7339_v22  ;;  %v5310_v22 = vsel %vm5307_vm8, %v5309_v24, %v5305_v13  ;;  %v13152_v13 = vand.u32 4294901760, %v12673_v44 }
0x192b   :  { %v5344_v51 = vmul.f32 %v5310_v22, %v12581_v31 }
0x192c   :  { %7341 = vmatpush.msra.mxu3 %v7340_v62 }
0x192d   :  { %v7263_v46 = vsel %vm3898_vm2, %v5344_v51, 0 }
0x1952   :  { %v5217_v48 = vpop.xlane.xlu2 %5216 }
0x1953   :  { %8696 = vrcp.f32 %v5217_v48  ;;  %v5294_v24 = vand.u32 2147483648, %v5217_v48  ;;  %vm5288_vm11 = vweird.f32 %v5217_v48 }
0x1955   :  { %v5295_v22 = vor.u32 1.1754944e-38, %v5294_v24 }
0x1957   :  { %v4922_v59 = vpop.xlane.xlu1 %4921 }
0x1958   :  { %vm4930_vm9 = vcmp.ge.f32.partialorder %v12599_v45, %v4922_v59  ;;  %v5292_v59 = vand.u32 2147483647, %v5217_v48 }
0x1959   :  { %v8697_v62 = vpop.eup %8696  ;;  %v12676_v12 = vsel %vm4930_vm9, -1e+30, %v12599_v45 }
0x195a   :  { %v5284_v38 = vmul.f32 %v8697_v62, %v5217_v48  ;;  %v7241_v35 = vpop.permute.xlu2 %7240  ;;  %v4960_v28 = vsel %vm3898_vm2, %v12676_v12, -inf  ;;  %vm5289_vm10 = vweird.f32 %v8697_v62  ;;  %vm5293_vm13 = vcmp.eq.f32.partialorder %v5292_v59, 8.507059e+37 }
0x195b   :  { %v12681_v19 = vand.u32 4294901760, %v7241_v35  ;;  %4961 = vmax.xlane.f32.xlu0 %v4960_v28  ;;  %vm5290_vm12 = vmor %vm5288_vm11, %vm5289_vm10  ;;  %v7289_v28 = vand.u32 4294901760, %v7263_v46  ;;  %v13539_v59 = vand.u32 4294901760, %v12630_v21 }
0x195c   :  { %v5285_v27 = vsub.f32 1.0, %v5284_v38 }
0x195d   :  { %v12685_v34 = vsub.f32 %v7241_v35, %v12681_v19  ;;  %7286 = vmatpush.msra.mxu2 %v12681_v19  ;;  %v7351_v35 = vsub.f32 %v12673_v44, %v13152_v13  ;;  %v7290_v39 = vsub.f32 %v7263_v46, %v7289_v28  ;;  %v13538_v46 = vand.u32 4294901760, %v12641_v26 }
0x195e   :  { %v5286_v45 = vmul.f32 %v8697_v62, %v5285_v27 }
0x195f   :  { %v7344_v9 = vand.u32 4294901760, %v12685_v34  ;;  %7288 = vmatpush.msra.mxu2 %v12669_v41  ;;  %v7352_v18 = vand.u32 4294901760, %v7351_v35  ;;  %v7291_v4 = vand.u32 4294901760, %v7290_v39 }
0x1960   :  { %v5287_v31 = vadd.f32 %v8697_v62, %v5286_v45 }
0x1961   :  { %v7345_v38 = vsub.f32 %v12685_v34, %v7344_v9 }
0x1962   :  { %v5291_v27 = vsel %vm5290_vm12, %v8697_v62, %v5287_v31  ;;  %v13536_v62 = vand.u32 4294901760, %v12612_v42 }
0x1963   :  { %v5296_v61 = vsel %vm5293_vm13, %v5295_v22, %v5291_v27  ;;  %v7346_v7 = vand.u32 4294901760, %v7345_v38 }
0x1964   :  { %v5343_v51 = vmul.f32 %v5296_v61, %v12595_v23  ;;  %v13537_v61 = vand.u32 4294901760, %v12606_v56 }
0x1965   :  { %7347 = vmatpush.msra.mxu3 %v7346_v7 }
0x1966   :  { %v6991_v48 = vsel %vm3898_vm2, %v5343_v51, 0 }
0x1967   :  { %7353 = vmatpush.msra.mxu3 %v7352_v18  ;;  %v7017_v24 = vand.u32 4294901760, %v6991_v48  ;;  %v7292_v18 = vsub.f32 %v7290_v39, %v7291_v4 }
0x1969   :  { %7083 = vmatmul.f32.vlgmr.msra.gmra.mxu1 %v7017_v24  ;;  %v7018_v45 = vsub.f32 %v6991_v48, %v7017_v24 }
0x196a   :  { %7406 = vmatpush.msra.mxu1 %v12608_v15 }
0x196b   :  { %7121 = vmatmul.f32.vlgmr.msrb.gmra.mxu2 %v7018_v45  ;;  %v7019_v13 = vand.u32 4294901760, %v7018_v45 }
0x196c   :  { %7408 = vmatpush.msra.mxu1 %v12603_v50  ;;  %7439 = vmatpush.msrb.mxu2 %v13536_v62 }
0x196d   :  { %7152 = vmatmul.f32.vlgmr.msrb.gmra.mxu3 %v7019_v13  ;;  %v7020_v23 = vsub.f32 %v7018_v45, %v7019_v13  ;;  %v7293_v13 = vand.u32 4294901760, %v7292_v18 }
0x196e   :  { %7410 = vmatpush.msra.mxu1 %v12635_v47  ;;  %7443 = vmatpush.msrb.mxu2 %v13537_v61 }
0x196f   :  { %7482 = vmatpush.msrb.mxu3 %v12608_v15  ;;  %v7021_v7 = vand.u32 4294901760, %v7020_v23  ;;  %v13540_v15 = vand.u32 4294901760, %v12633_v49 }
0x1970   :  { %7412 = vmatpush.msra.mxu1 %v12625_v25  ;;  %7447 = vmatpush.msrb.mxu2 %v13538_v46 }
0x1971   :  { %7484 = vmatpush.msrb.mxu3 %v12603_v50  ;;  %7022 = vmatmul.f32.vlgmr.msra.gmra.mxu0 %v7021_v7  ;;  %v13541_v50 = vand.u32 4294901760, %v12662_v11 }
0x1972   :  { %7226 = vmatmul.f32.vlgmr.msrb.gmra.mxu1 %v7017_v24  ;;  %7369 = vmatpush.msra.mxu0 %v12612_v42 }
0x1973   :  { %7414 = vmatpush.msra.mxu1 %v12627_v30  ;;  %7451 = vmatpush.msrb.mxu2 %v13539_v59 }
0x1974   :  { %7486 = vmatpush.msrb.mxu3 %v12635_v47  ;;  %7294 = vmatmul.f32.vlgmr.msra.gmra.mxu2 %v7293_v13 }
0x1975   :  { %7372 = vmatpush.msra.mxu0 %v12606_v56  ;;  %7416 = vmatpush.msra.mxu1 %v12656_v57  ;;  %v13542_v56 = vand.u32 4294901760, %v12673_v44 }
0x1976   :  { %7455 = vmatpush.msrb.mxu2 %v13540_v15  ;;  %7488 = vmatpush.msrb.mxu3 %v12625_v25 }
0x1977   :  { %7355 = vmatmul.f32.vlgmr.msra.gmra.mxu3 %v7289_v28  ;;  %7375 = vmatpush.msra.mxu0 %v12641_v26 }
0x1978   :  { %7418 = vmatpush.msra.mxu1 %v12681_v19  ;;  %7459 = vmatpush.msrb.mxu2 %v13541_v50 }
0x1979   :  { %7490 = vmatpush.msrb.mxu3 %v12627_v30  ;;  %7378 = vmatpush.msra.mxu0 %v12630_v21 }
0x197a   :  { %7420 = vmatpush.msra.mxu1 %v12669_v41  ;;  %7463 = vmatpush.msrb.mxu2 %v7344_v9 }
0x197b   :  { %7492 = vmatpush.msrb.mxu3 %v12656_v57  ;;  %7197 = vmatmul.f32.vlgmr.msrb.gmra.mxu0 %v7017_v24 }
0x197c   :  { %7381 = vmatpush.msra.mxu0 %v12633_v49  ;;  %7424 = vmatmul.f32.vlgmr.msra.gmra.mxu1 %v7291_v4 }
0x197d   :  { %7467 = vmatpush.msrb.mxu2 %v13542_v56  ;;  %7494 = vmatpush.msrb.mxu3 %v12681_v19  ;;  %v5177_v56 = vsub.f32 %v11195_v63, %v11487_v14 }
0x197e   :  { %7384 = vmatpush.msra.mxu0 %v12662_v11  ;;  %7469 = vmatmul.f32.vlgmr.msrb.gmra.mxu2 %v7289_v28 }
0x197f   :  { %7496 = vmatpush.msrb.mxu3 %v12669_v41  ;;  %7551 = vmatpush.msrb.mxu1 %v11884_v2 }
0x1980   :  { %7387 = vmatpush.msra.mxu0 %v12685_v34  ;;  %7498 = vmatmul.f32.vlgmr.msrb.gmra.mxu3 %v7289_v28 }
0x1981   :  { %7574 = vmatpush.msra.mxu2 %v11873_v43  ;;  %7597 = vmatpush.msra.mxu3 %v11870_v54 }
0x1982   :  { %7390 = vmatpush.msra.mxu0 %v12673_v44  ;;  %7645 = vmatpush.msra.mxu1 %v11870_v54 }
0x1983   :  { %7393 = vmatmul.f32.vlgmr.msra.gmra.mxu0 %v7290_v39  ;;  %7670 = vmatpush.msrb.mxu2 %v11895_v20 }
0x1984   :  { %7521 = vmatpush.msrb.mxu0 %v11870_v54  ;;  %7700 = vmatpush.msrb.mxu3 %v11909_v33 }
0x1986   :  { %7623 = vmatpush.msra.mxu0 %v11878_v1 }
0x1993   :  { %v5079_v2 = vpop.xlane.xlu2 %5078 }
0x1994   :  { %vm5089_vm14 = vcmp.ge.f32.partialorder %v12638_v16, %v5079_v2  ;;  %v5191_v2 = vmul.f32 1.442695, %v5177_v56 }
0x1995   :  { %v5097_v43 = vsel %vm5089_vm14, -1e+30, %v12638_v16 }
0x1996   :  { %v5117_v4 = vsel %vm3898_vm2, %v5097_v43, -inf  ;;  %8698 = vpow2.f32 %v5191_v2 }
0x1997   :  { %5118 = vmax.xlane.f32.xlu1 %v5117_v4 }
0x199c   :  { %v8699_v4 = vpop.eup %8698 }
0x19ce   :  { %v4962_v42 = vpop.xlane.xlu0 %4961 }
0x19cf   :  { %vm4970_vm15 = vcmp.ge.f32.partialorder %v12676_v12, %v4962_v42 }
0x19d0   :  { %v12748_v39 = vsel %vm4970_vm15, -1e+30, %v12676_v12 }
0x19d1   :  { %v5000_v54 = vsel %vm3898_vm2, %v12748_v39, -inf }
0x19d2   :  { %5001 = vmax.xlane.f32.xlu2 %v5000_v54 }
0x19e6   :  { %v7084_v1 = vpop.f32.mrf.mxu1 }
0x19ea   :  { %7810 = vrot.lane.b32.xlu2 %v12370_v8, %s8736_s15 }
0x19ee   :  { %v7023_v33 = vpop.f32.mrf.mxu0  ;;  %v7122_v30 = vpop.f32.mrf.mxu2 }
0x19ef   :  { %v7085_v25 = vadd.f32 %v7084_v1, %v7023_v33  ;;  %v7227_v16 = vpop.f32.mrf.mxu1 }
0x19f0   :  { %v7153_v21 = vpop.f32.mrf.mxu3 }
0x19f1   :  { %v7123_v49 = vadd.f32 %v7122_v30, %v7085_v25 }
0x19f2   :  { %7806 = vrot.lane.b32.xlu2 %v12396_v40, %s8736_s15 }
0x19f3   :  { %v7154_v47 = vadd.f32 %v7153_v21, %v7123_v49 }
0x19f7   :  { %v7295_v57 = vpop.f32.mrf.mxu2 }
0x19f8   :  { %v7198_v26 = vpop.f32.mrf.mxu0 }
0x19f9   :  { %v7199_v9 = vadd.f32 %v7198_v26, %v7154_v47  ;;  %v7425_v31 = vpop.f32.mrf.mxu1 }
0x19fa   :  { %v7356_v11 = vpop.f32.mrf.mxu3 }
0x19fb   :  { %v7228_v41 = vadd.f32 %v7227_v16, %v7199_v9  ;;  %v7357_v44 = vadd.f32 %v7356_v11, %v7295_v57 }
0x19fd   :  { %v7652_v19 = vsel %vm1713_vm1, %v7228_v41, 0 }
0x19fe   :  { %v7671_v38 = vand.u32 4294901760, %v7652_v19 }
0x1a00   :  { %v7394_v12 = vpop.f32.mrf.mxu0  ;;  %v7672_v48 = vsub.f32 %v7652_v19, %v7671_v38 }
0x1a01   :  { %v7395_v34 = vadd.f32 %v7394_v12, %v7357_v44  ;;  %v7470_v35 = vpop.f32.mrf.mxu2 }
0x1a02   :  { %v7673_v23 = vand.u32 4294901760, %v7672_v48 }
0x1a03   :  { %v7426_v22 = vadd.f32 %v7425_v31, %v7395_v34  ;;  %v7499_v27 = vpop.f32.mrf.mxu3 }
0x1a04   :  { %v7674_v13 = vsub.f32 %v7672_v48, %v7673_v23 }
0x1a05   :  { %v7471_v28 = vadd.f32 %v7470_v35, %v7426_v22 }
0x1a06   :  { %v7675_v50 = vand.u32 4294901760, %v7674_v13 }
0x1a07   :  { %v7500_v51 = vadd.f32 %v7499_v27, %v7471_v28 }
0x1a09   :  { %v7503_v24 = vsel %vm1713_vm1, %v7500_v51, 0 }
0x1a0a   :  { %v7522_v45 = vand.u32 4294901760, %v7503_v24  ;;  %v5119_v62 = vpop.xlane.xlu1 %5118 }
0x1a0b   :  { %vm5129_vm3 = vcmp.ge.f32.partialorder %v5097_v43, %v5119_v62 }
0x1a0c   :  { %v7523_v61 = vsub.f32 %v7503_v24, %v7522_v45  ;;  %7553 = vmatmul.f32.vlgmr.msrb.gmra.mxu1 %v7522_v45  ;;  %v5137_v18 = vsel %vm5129_vm3, -1e+30, %v5097_v43 }
0x1a0d   :  { %v5157_v7 = vsel %vm3898_vm2, %v5137_v18, -inf  ;;  %7746 = vmatpush.msrb.mxu1 %v11895_v20 }
0x1a0e   :  { %v7524_v46 = vand.u32 4294901760, %v7523_v61  ;;  %7577 = vmatmul.f32.vlgmr.msra.gmra.mxu2 %v7523_v61  ;;  %5158 = vmax.xlane.f32.xlu0 %v5157_v7 }
0x1a0f   :  { %7772 = vmatpush.msra.mxu2 %v11903_v0 }
0x1a10   :  { %v7525_v59 = vsub.f32 %v7523_v61, %v7524_v46  ;;  %7601 = vmatmul.f32.vlgmr.msra.gmra.mxu3 %v7524_v46 }
0x1a11   :  { %7794 = vmatpush.msra.mxu3 %v11895_v20 }
0x1a12   :  { %v7526_v15 = vand.u32 4294901760, %v7525_v59 }
0x1a14   :  { %7527 = vmatmul.f32.vlgmr.msrb.gmra.mxu0 %v7526_v15  ;;  %7647 = vmatmul.f32.vlgmr.msra.gmra.mxu1 %v7522_v45 }
0x1a15   :  { %7723 = vmatpush.msrb.mxu0 %v11898_v55 }
0x1a16   :  { %7676 = vmatmul.f32.vlgmr.msrb.gmra.mxu2 %v7675_v50 }
0x1a18   :  { %7702 = vmatmul.f32.vlgmr.msrb.gmra.mxu3 %v7671_v38 }
0x1a1c   :  { %7625 = vmatmul.f32.vlgmr.msra.gmra.mxu0 %v7522_v45  ;;  %7750 = vmatmul.f32.vlgmr.msrb.gmra.mxu1 %v7673_v23 }
0x1a1e   :  { %7774 = vmatmul.f32.vlgmr.msra.gmra.mxu2 %v7671_v38 }
0x1a20   :  { %7796 = vmatmul.f32.vlgmr.msra.gmra.mxu3 %v7671_v38 }
0x1a22   :  { %7814 = vrot.lane.b32.xlu0 %v12350_v3, %s8736_s15 }
0x1a24   :  { %7726 = vmatmul.f32.vlgmr.msrb.gmra.mxu0 %v7672_v48 }
0x1a2a   :  { %7808 = vrot.lane.b32.xlu0 %v12385_v53, %s8736_s15 }
0x1a32   :  { %7802 = vrot.lane.b32.xlu0 %v12424_v5, %s8736_s15 }
0x1a45   :  { %v5002_v20 = vpop.xlane.xlu2 %5001 }
0x1a46   :  { %vm5010_vm4 = vcmp.ge.f32.partialorder %v12748_v39, %v5002_v20 }
0x1a47   :  { %v5018_v55 = vsel %vm5010_vm4, -1e+30, %v12748_v39 }
0x1a48   :  { %v5040_v0 = vsel %vm3898_vm2, %v5018_v55, -inf }
0x1a49   :  { %5041 = vmax.xlane.f32.xlu1 %v5040_v0 }
0x1a4d   :  { %v7811_v28 = vpop.permute.xlu2 %7810 }
0x1a4e   :  { %v12803_v51 = vand.u32 4294901760, %v7811_v28 }
0x1a50   :  { %v12808_v45 = vsub.f32 %v7811_v28, %v12803_v51 }
0x1a52   :  { %v7882_v46 = vand.u32 4294901760, %v12808_v45 }
0x1a54   :  { %v7883_v2 = vsub.f32 %v12808_v45, %v7882_v46 }
0x1a55   :  { %v7807_v48 = vpop.permute.xlu2 %7806 }
0x1a56   :  { %v12810_v62 = vand.u32 4294901760, %v7807_v48 }
0x1a58   :  { %v12819_v13 = vsub.f32 %v7807_v48, %v12810_v62 }
0x1a62   :  { %7812 = vrot.lane.b32.xlu1 %v12360_v17, %s8736_s15 }
0x1a6a   :  { %7804 = vrot.lane.b32.xlu1 %v12411_v60, %s8736_s15 }
0x1a81   :  { %v5159_v43 = vpop.xlane.xlu0 %5158 }
0x1a82   :  { %vm5169_vm5 = vcmp.ge.f32.partialorder %v11195_v63, %v5159_v43 }
0x1a83   :  { %v12779_v42 = vsel %vm5169_vm5, %v8699_v4, 0.0 }
0x1a84   :  { %v5221_v39 = vsel %vm3898_vm2, %v12779_v42, 0.0 }
0x1a85   :  { %5222 = vadd.xlane.f32.xlu2 %v5221_v39 }
0x1a89   :  { %v7554_v54 = vpop.f32.mrf.mxu1 }
0x1a91   :  { %v7528_v1 = vpop.f32.mrf.mxu0  ;;  %v7578_v25 = vpop.f32.mrf.mxu2 }
0x1a92   :  { %v7555_v33 = vadd.f32 %v7554_v54, %v7528_v1  ;;  %v7648_v57 = vpop.f32.mrf.mxu1 }
0x1a93   :  { %v7602_v49 = vpop.f32.mrf.mxu3 }
0x1a94   :  { %v7579_v30 = vadd.f32 %v7578_v25, %v7555_v33  ;;  %v7815_v21 = vpop.permute.xlu0 %7814  ;;  %v7884_v33 = vand.u32 4294901760, %v7883_v2 }
0x1a95   :  { %v12783_v14 = vand.u32 4294901760, %v7815_v21 }
0x1a96   :  { %v7603_v47 = vadd.f32 %v7602_v49, %v7579_v30 }
0x1a97   :  { %v12786_v16 = vsub.f32 %v7815_v21, %v12783_v14  ;;  %7836 = vmatpush.msra.mxu0 %v12783_v14  ;;  %7968 = vmatpush.msrb.mxu3 %v12783_v14 }
0x1a99   :  { %v7870_v63 = vand.u32 4294901760, %v12786_v16  ;;  %v7626_v26 = vpop.f32.mrf.mxu0  ;;  %7931 = vmatpush.msrb.mxu2 %v12786_v16  ;;  %v7677_v12 = vpop.f32.mrf.mxu2 }
0x1a9a   :  { %v7627_v9 = vadd.f32 %v7626_v26, %v7603_v47 }
0x1a9b   :  { %v7871_v11 = vsub.f32 %v12786_v16, %v7870_v63  ;;  %v7703_v34 = vpop.f32.mrf.mxu3 }
0x1a9c   :  { %v7649_v41 = vadd.f32 %v7648_v57, %v7627_v9  ;;  %v7809_v27 = vpop.permute.xlu0 %7808 }
0x1a9d   :  { %v7872_v44 = vand.u32 4294901760, %v7871_v11  ;;  %7800 = vrot.lane.b32.xlu2 %v12436_v52, %s8736_s15  ;;  %v12805_v24 = vand.u32 4294901760, %v7809_v27  ;;  %s8739_s15 = smov 128  }
0x1a9e   :  { %v7678_v19 = vadd.f32 %v7677_v12, %v7649_v41 }
0x1a9f   :  { %7873 = vmatpush.msra.mxu1 %v7872_v44  ;;  %v12813_v18 = vsub.f32 %v7809_v27, %v12805_v24 }
0x1aa0   :  { %v12797_v31 = vadd.f32 %v7703_v34, %v7678_v19 }
0x1aa1   :  { %v7888_v50 = vand.u32 4294901760, %v12813_v18 }
0x1aa3   :  { %v7889_v39 = vsub.f32 %v12813_v18, %v7888_v50 }
0x1aa4   :  { %v7803_v23 = vpop.permute.xlu0 %7802 }
0x1aa5   :  { %v12821_v59 = vand.u32 4294901760, %v7803_v23  ;;  %v7890_v21 = vand.u32 4294901760, %v7889_v39 }
0x1aa7   :  { %v12837_v0 = vsub.f32 %v7803_v23, %v12821_v59 }
0x1aa9   :  { %v7906_v54 = vand.u32 4294901760, %v12837_v0 }
0x1aab   :  { %v7907_v26 = vsub.f32 %v12837_v0, %v7906_v54 }
0x1aad   :  { %v7908_v57 = vand.u32 4294901760, %v7907_v26 }
0x1abc   :  { %v5042_v22 = vpop.xlane.xlu1 %5041 }
0x1abd   :  { %vm5050_vm6 = vcmp.ge.f32.partialorder %v5018_v55, %v5042_v22 }
0x1abe   :  { %v12799_v38 = vsel %vm5050_vm6, -1e+30, %v5018_v55  ;;  %v7894_v55 = vand.u32 4294901760, %v12819_v13 }
0x1abf   :  { %v5080_v35 = vsel %vm3898_vm2, %v12799_v38, -inf }
0x1ac0   :  { %5081 = vmax.xlane.f32.xlu1 %v5080_v35  ;;  %v7895_v25 = vsub.f32 %v12819_v13, %v7894_v55 }
0x1ac2   :  { %v7896_v49 = vand.u32 4294901760, %v7895_v25 }
0x1ad4   :  { %v7813_v61 = vpop.permute.xlu1 %7812 }
0x1ad5   :  { %v12815_v7 = vand.u32 4294901760, %v7813_v61 }
0x1ad7   :  { %v12824_v15 = vsub.f32 %v7813_v61, %v12815_v7  ;;  %7838 = vmatpush.msra.mxu0 %v12815_v7  ;;  %7970 = vmatpush.msrb.mxu3 %v12815_v7 }
0x1ad9   :  { %v7876_v20 = vand.u32 4294901760, %v12824_v15  ;;  %8224 = vrot.lane.b32.xlu1 %v12370_v8, %s8737_s18  ;;  %7840 = vmatpush.msra.mxu0 %v12803_v51 }
0x1ada   :  { %7934 = vmatpush.msrb.mxu2 %v12824_v15  ;;  %7972 = vmatpush.msrb.mxu3 %v12803_v51 }
0x1adb   :  { %7842 = vmatpush.msra.mxu0 %v12805_v24  ;;  %v7877_v56 = vsub.f32 %v12824_v15, %v7876_v20 }
0x1adc   :  { %7937 = vmatpush.msrb.mxu2 %v12808_v45  ;;  %7974 = vmatpush.msrb.mxu3 %v12805_v24  ;;  %v7805_v8 = vpop.permute.xlu1 %7804 }
0x1add   :  { %v12846_v43 = vand.u32 4294901760, %v7805_v8  ;;  %7844 = vmatpush.msra.mxu0 %v12810_v62  ;;  %v7878_v4 = vand.u32 4294901760, %v7877_v56 }
0x1ade   :  { %7940 = vmatpush.msrb.mxu2 %v12813_v18  ;;  %7976 = vmatpush.msrb.mxu3 %v12810_v62 }
0x1adf   :  { %v7899_v1 = vsub.f32 %v7805_v8, %v12846_v43  ;;  %7846 = vmatpush.msra.mxu0 %v12846_v43  ;;  %7879 = vmatpush.msra.mxu1 %v7878_v4 }
0x1ae0   :  { %7943 = vmatpush.msrb.mxu2 %v12819_v13  ;;  %7978 = vmatpush.msrb.mxu3 %v12846_v43 }
0x1ae1   :  { %v7900_v30 = vand.u32 4294901760, %v7899_v1  ;;  %7848 = vmatpush.msra.mxu0 %v12821_v59  ;;  %7885 = vmatpush.msra.mxu1 %v7884_v33 }
0x1ae2   :  { %7946 = vmatpush.msrb.mxu2 %v7899_v1  ;;  %7980 = vmatpush.msrb.mxu3 %v12821_v59 }
0x1ae3   :  { %7891 = vmatpush.msra.mxu1 %v7890_v21  ;;  %v7901_v47 = vsub.f32 %v7899_v1, %v7900_v30 }
0x1ae4   :  { %7949 = vmatpush.msrb.mxu2 %v12837_v0 }
0x1ae5   :  { %7897 = vmatpush.msra.mxu1 %v7896_v49  ;;  %v7902_v9 = vand.u32 4294901760, %v7901_v47 }
0x1ae7   :  { %7903 = vmatpush.msra.mxu1 %v7902_v9 }
0x1ae9   :  { %7909 = vmatpush.msra.mxu1 %v7908_v57 }
0x1af8   :  { %v5223_v11 = vpop.xlane.xlu2 %5222 }
0x1af9   :  { %8700 = vrcp.f32 %v5223_v11  ;;  %v5322_v22 = vand.u32 2147483648, %v5223_v11  ;;  %v5320_v27 = vand.u32 2147483647, %v5223_v11  ;;  %vm5316_vm8 = vweird.f32 %v5223_v11 }
0x1afb   :  { %v5323_v61 = vor.u32 1.1754944e-38, %v5322_v22  ;;  %vm5321_vm10 = vcmp.eq.f32.partialorder %v5320_v27, 8.507059e+37 }
0x1aff   :  { %v8701_v41 = vpop.eup %8700 }
0x1b00   :  { %v5312_v44 = vmul.f32 %v8701_v41, %v5223_v11  ;;  %v7801_v12 = vpop.permute.xlu2 %7800  ;;  %vm5317_vm7 = vweird.f32 %v8701_v41 }
0x1b01   :  { %v7849_v19 = vand.u32 4294901760, %v7801_v12  ;;  %vm5318_vm9 = vmor %vm5316_vm8, %vm5317_vm7 }
0x1b02   :  { %v5313_v34 = vsub.f32 1.0, %v5312_v44 }
0x1b03   :  { %v7911_v35 = vsub.f32 %v7801_v12, %v7849_v19  ;;  %7850 = vmatpush.msra.mxu0 %v7849_v19  ;;  %7982 = vmatpush.msrb.mxu3 %v7849_v19 }
0x1b04   :  { %v5314_v28 = vmul.f32 %v8701_v41, %v5313_v34 }
0x1b05   :  { %8001 = vmatpush.msrb.mxu0 %v7870_v63  ;;  %8113 = vmatpush.msra.mxu3 %v12108_v6  ;;  %v7912_v48 = vand.u32 4294901760, %v7911_v35 }
0x1b06   :  { %7952 = vmatpush.msrb.mxu2 %v7911_v35  ;;  %v5315_v23 = vadd.f32 %v8701_v41, %v5314_v28 }
0x1b07   :  { %8005 = vmatpush.msrb.mxu0 %v7876_v20  ;;  %v7913_v15 = vsub.f32 %v7911_v35, %v7912_v48 }
0x1b08   :  { %8083 = vmatpush.msra.mxu2 %v12094_v29  ;;  %v5319_v56 = vsel %vm5318_vm9, %v8701_v41, %v5315_v23  ;;  %v5178_v41 = vsub.f32 %v11517_v36, %v11530_v32 }
0x1b09   :  { %8009 = vmatpush.msrb.mxu0 %v7882_v46  ;;  %v5324_v2 = vsel %vm5321_vm10, %v5323_v61, %v5319_v56  ;;  %v7914_v16 = vand.u32 4294901760, %v7913_v15 }
0x1b0a   :  { %v5345_v63 = vmul.f32 %v5324_v2, %v12779_v42  ;;  %v5193_v44 = vmul.f32 1.442695, %v5178_v41 }
0x1b0b   :  { %8013 = vmatpush.msrb.mxu0 %v7888_v50  ;;  %7915 = vmatpush.msra.mxu1 %v7914_v16 }
0x1b0c   :  { %v7825_v6 = vsel %vm3898_vm2, %v5345_v63, 0  ;;  %8702 = vpow2.f32 %v5193_v44 }
0x1b0d   :  { %8017 = vmatpush.msrb.mxu0 %v7894_v55  ;;  %8044 = vmatpush.msrb.mxu1 %v12783_v14  ;;  %v7851_v20 = vand.u32 4294901760, %v7825_v6 }
0x1b0f   :  { %8021 = vmatpush.msrb.mxu0 %v7900_v30  ;;  %8046 = vmatpush.msrb.mxu1 %v12815_v7  ;;  %v7852_v45 = vsub.f32 %v7825_v6, %v7851_v20  ;;  %v12908_v7 = vpop.f32.mrf.mxu3 }
0x1b10   :  { %7917 = vmatmul.f32.vlgmr.msra.gmra.mxu1 %v7851_v20 }
0x1b11   :  { %8025 = vmatpush.msrb.mxu0 %v7906_v54  ;;  %8048 = vmatpush.msrb.mxu1 %v12803_v51  ;;  %v7853_v42 = vand.u32 4294901760, %v7852_v45 }
0x1b12   :  { %7955 = vmatmul.f32.vlgmr.msrb.gmra.mxu2 %v7852_v45  ;;  %v8703_v22 = vpop.eup %8702 }
0x1b13   :  { %8029 = vmatpush.msrb.mxu0 %v7912_v48  ;;  %8050 = vmatpush.msrb.mxu1 %v12805_v24  ;;  %v7854_v14 = vsub.f32 %v7852_v45, %v7853_v42 }
0x1b14   :  { %7986 = vmatmul.f32.vlgmr.msrb.gmra.mxu3 %v7853_v42  ;;  %8136 = vmatpush.msrb.mxu2 %v12097_v58 }
0x1b15   :  { %8052 = vmatpush.msrb.mxu1 %v12810_v62  ;;  %8159 = vmatpush.msrb.mxu3 %v12094_v29  ;;  %v7855_v18 = vand.u32 4294901760, %v7854_v14  ;;  %v12906_v62 = vpop.f32.mrf.mxu2 }
0x1b17   :  { %8054 = vmatpush.msrb.mxu1 %v12846_v43  ;;  %7856 = vmatmul.f32.vlgmr.msra.gmra.mxu0 %v7855_v18 }
0x1b18   :  { %8185 = vmatpush.msra.mxu0 %v12102_v37  ;;  %v12902_v37 = vpop.f32.mrf.mxu1 }
0x1b19   :  { %8056 = vmatpush.msrb.mxu1 %v12821_v59 }
0x1b1b   :  { %8058 = vmatpush.msrb.mxu1 %v7849_v19 }
0x1b1c   :  { %8060 = vmatmul.f32.vlgmr.msrb.gmra.mxu1 %v7851_v20 }
0x1b1d   :  { %8207 = vmatpush.msra.mxu1 %v12094_v29  ;;  %v12904_v29 = vpop.f32.mrf.mxu0 }
0x1b1e   :  { %v7728_v18 = vadd.f32 %v12904_v29, %v12797_v31 }
0x1b1f   :  { %8031 = vmatmul.f32.vlgmr.msrb.gmra.mxu0 %v7851_v20 }
0x1b20   :  { %v7752_v31 = vadd.f32 %v12902_v37, %v7728_v18 }
0x1b33   :  { %v5082_v51 = vpop.xlane.xlu1 %5081 }
0x1b34   :  { %vm5090_vm11 = vcmp.ge.f32.partialorder %v12799_v38, %v5082_v51 }
0x1b35   :  { %v5098_v58 = vsel %vm5090_vm11, -1e+30, %v12799_v38 }
0x1b36   :  { %v5120_v24 = vsel %vm3898_vm2, %v5098_v58, -inf }
0x1b37   :  { %5121 = vmax.xlane.f32.xlu0 %v5120_v24 }
0x1b4b   :  { %8228 = vrot.lane.b32.xlu0 %v12350_v3, %s8737_s18  ;;  %v8225_v19 = vpop.permute.xlu1 %8224 }
0x1b4c   :  { %v12933_v35 = vand.u32 4294901760, %v8225_v19 }
0x1b4e   :  { %v12942_v32 = vsub.f32 %v8225_v19, %v12933_v35 }
0x1b53   :  { %8222 = vrot.lane.b32.xlu0 %v12385_v53, %s8737_s18 }
0x1b5b   :  { %8218 = vrot.lane.b32.xlu0 %v12411_v60, %s8737_s18 }
0x1b8d   :  { %v7918_v38 = vpop.f32.mrf.mxu1 }
0x1b94   :  { %v7857_v46 = vpop.f32.mrf.mxu0 }
0x1b95   :  { %v7919_v13 = vadd.f32 %v7918_v38, %v7857_v46  ;;  %v7956_v59 = vpop.f32.mrf.mxu2 }
0x1b97   :  { %v7957_v50 = vadd.f32 %v7956_v59, %v7919_v13  ;;  %v7987_v3 = vpop.f32.mrf.mxu3 }
0x1b99   :  { %v7988_v55 = vadd.f32 %v7987_v3, %v7957_v50  ;;  %v8061_v8 = vpop.f32.mrf.mxu1 }
0x1b9c   :  { %v8032_v0 = vpop.f32.mrf.mxu0 }
0x1b9d   :  { %v8033_v53 = vadd.f32 %v8032_v0, %v7988_v55 }
0x1b9f   :  { %v8062_v43 = vadd.f32 %v8061_v8, %v8033_v53  ;;  %v7776_v53 = vadd.f32 %v12906_v62, %v7752_v31 }
0x1ba1   :  { %v8065_v60 = vsel %vm1713_vm1, %v8062_v43, 0 }
0x1ba2   :  { %v8084_v4 = vand.u32 4294901760, %v8065_v60 }
0x1ba4   :  { %v8085_v39 = vsub.f32 %v8065_v60, %v8084_v4  ;;  %8115 = vmatmul.f32.vlgmr.msra.gmra.mxu3 %v8084_v4  ;;  %8187 = vmatmul.f32.vlgmr.msra.gmra.mxu0 %v8084_v4 }
0x1ba5   :  { %8209 = vmatmul.f32.vlgmr.msra.gmra.mxu1 %v8084_v4 }
0x1ba6   :  { %v8086_v54 = vand.u32 4294901760, %v8085_v39 }
0x1ba8   :  { %v8087_v1 = vsub.f32 %v8085_v39, %v8086_v54 }
0x1baa   :  { %v8088_v33 = vand.u32 4294901760, %v8087_v1  ;;  %v5122_v25 = vpop.xlane.xlu0 %5121  ;;  %v7798_v1 = vadd.f32 %v12908_v7, %v7776_v53 }
0x1bab   :  { %vm5130_vm12 = vcmp.ge.f32.partialorder %v5098_v58, %v5122_v25 }
0x1bac   :  { %v5138_v30 = vsel %vm5130_vm12, -1e+30, %v5098_v58  ;;  %8089 = vmatmul.f32.vlgmr.msra.gmra.mxu2 %v8088_v33  ;;  %8163 = vmatmul.f32.vlgmr.msrb.gmra.mxu3 %v8086_v54 }
0x1bad   :  { %v5160_v21 = vsel %vm3898_vm2, %v5138_v30, -inf }
0x1bae   :  { %5161 = vmax.xlane.f32.xlu2 %v5160_v21 }
0x1bb4   :  { %8139 = vmatmul.f32.vlgmr.msrb.gmra.mxu2 %v8085_v39 }
0x1bbd   :  { %v8229_v49 = vpop.permute.xlu0 %8228 }
0x1bbe   :  { %v12912_v47 = vand.u32 4294901760, %v8229_v49 }
0x1bc0   :  { %v12915_v26 = vsub.f32 %v8229_v49, %v12912_v47  ;;  %8250 = vmatpush.msra.mxu2 %v12912_v47  ;;  %8382 = vmatpush.msrb.mxu1 %v12912_v47 }
0x1bc2   :  { %v8284_v9 = vand.u32 4294901760, %v12915_v26  ;;  %8345 = vmatpush.msrb.mxu0 %v12915_v26 }
0x1bc4   :  { %v8285_v57 = vsub.f32 %v12915_v26, %v8284_v9 }
0x1bc5   :  { %v8223_v12 = vpop.permute.xlu0 %8222 }
0x1bc6   :  { %v8286_v11 = vand.u32 4294901760, %v8285_v57  ;;  %8226 = vrot.lane.b32.xlu2 %v12360_v17, %s8737_s18 }
0x1bc8   :  { %8287 = vmatpush.msra.mxu3 %v8286_v11 }
0x1bcd   :  { %v8219_v28 = vpop.permute.xlu0 %8218 }
0x1bce   :  { %8220 = vrot.lane.b32.xlu2 %v12396_v40, %s8737_s18  ;;  %v12950_v61 = vand.u32 4294901760, %v8219_v28 }
0x1bd0   :  { %v12966_v20 = vsub.f32 %v8219_v28, %v12950_v61 }
0x1bd2   :  { %v8314_v38 = vand.u32 4294901760, %v12966_v20 }
0x1bd4   :  { %v8315_v37 = vsub.f32 %v12966_v20, %v8314_v38 }
0x1bd6   :  { %8214 = vrot.lane.b32.xlu2 %v12436_v52, %s8737_s18  ;;  %v12939_v52 = vand.u32 4294901760, %v8223_v12  ;;  %v8316_v39 = vand.u32 4294901760, %v8315_v37 }
0x1bd8   :  { %v12945_v48 = vsub.f32 %v8223_v12, %v12939_v52 }
0x1bda   :  { %v8302_v56 = vand.u32 4294901760, %v12945_v48 }
0x1bdc   :  { %v8303_v24 = vsub.f32 %v12945_v48, %v8302_v56 }
0x1bde   :  { %v8304_v59 = vand.u32 4294901760, %v8303_v24 }
0x1c21   :  { %v5162_v34 = vpop.xlane.xlu2 %5161  ;;  %v8188_v60 = vpop.f32.mrf.mxu0 }
0x1c22   :  { %vm5170_vm13 = vcmp.ge.f32.partialorder %v11517_v36, %v5162_v34  ;;  %v8296_v36 = vand.u32 4294901760, %v12942_v32  ;;  %v8210_v54 = vpop.f32.mrf.mxu1 }
0x1c23   :  { %v12935_v17 = vsel %vm5170_vm13, %v8703_v22, 0.0 }
0x1c24   :  { %v5224_v40 = vsel %vm3898_vm2, %v12935_v17, 0.0  ;;  %v8297_v6 = vsub.f32 %v12942_v32, %v8296_v36 }
0x1c25   :  { %5225 = vadd.xlane.f32.xlu1 %v5224_v40 }
0x1c26   :  { %v8298_v13 = vand.u32 4294901760, %v8297_v6 }
0x1c27   :  { %v8116_v16 = vpop.f32.mrf.mxu3 }
0x1c29   :  { %v8227_v27 = vpop.permute.xlu2 %8226 }
0x1c2a   :  { %v12947_v23 = vand.u32 4294901760, %v8227_v27 }
0x1c2c   :  { %v12953_v15 = vsub.f32 %v8227_v27, %v12947_v23  ;;  %8252 = vmatpush.msra.mxu2 %v12947_v23  ;;  %8384 = vmatpush.msrb.mxu1 %v12947_v23 }
0x1c2e   :  { %v8290_v2 = vand.u32 4294901760, %v12953_v15  ;;  %8254 = vmatpush.msra.mxu2 %v12933_v35  ;;  %8348 = vmatpush.msrb.mxu0 %v12953_v15 }
0x1c2f   :  { %8386 = vmatpush.msrb.mxu1 %v12933_v35  ;;  %v8090_v63 = vpop.f32.mrf.mxu2  ;;  %v8164_v0 = vpop.f32.mrf.mxu3 }
0x1c30   :  { %v8117_v45 = vadd.f32 %v8116_v16, %v8090_v63  ;;  %8256 = vmatpush.msra.mxu2 %v12939_v52  ;;  %8351 = vmatpush.msrb.mxu0 %v12942_v32  ;;  %v8291_v42 = vsub.f32 %v12953_v15, %v8290_v2 }
0x1c31   :  { %8388 = vmatpush.msrb.mxu1 %v12939_v52  ;;  %v8221_v14 = vpop.permute.xlu2 %8220 }
0x1c32   :  { %v12976_v51 = vand.u32 4294901760, %v8221_v14  ;;  %8354 = vmatpush.msrb.mxu0 %v12945_v48  ;;  %v8292_v58 = vand.u32 4294901760, %v8291_v42 }
0x1c34   :  { %v12984_v46 = vsub.f32 %v8221_v14, %v12976_v51  ;;  %8258 = vmatpush.msra.mxu2 %v12976_v51  ;;  %8293 = vmatpush.msra.mxu3 %v8292_v58 }
0x1c35   :  { %8390 = vmatpush.msrb.mxu1 %v12976_v51 }
0x1c36   :  { %v8308_v29 = vand.u32 4294901760, %v12984_v46  ;;  %8260 = vmatpush.msra.mxu2 %v12950_v61  ;;  %8299 = vmatpush.msra.mxu3 %v8298_v13 }
0x1c37   :  { %8357 = vmatpush.msrb.mxu0 %v12984_v46  ;;  %8392 = vmatpush.msrb.mxu1 %v12950_v61  ;;  %v8140_v50 = vpop.f32.mrf.mxu2 }
0x1c38   :  { %v8141_v3 = vadd.f32 %v8140_v50, %v8117_v45  ;;  %8305 = vmatpush.msra.mxu3 %v8304_v59  ;;  %v8309_v55 = vsub.f32 %v12984_v46, %v8308_v29  ;;  %v13543_v59 = vld [vmem:[#allocation26_spill] sm:$0xff] }
0x1c39   :  { %8360 = vmatpush.msrb.mxu0 %v12966_v20  ;;  %v8215_v12 = vpop.permute.xlu2 %8214 }
0x1c3a   :  { %v8165_v8 = vadd.f32 %v8164_v0, %v8141_v3  ;;  %v8310_v43 = vand.u32 4294901760, %v8309_v55  ;;  %v8263_v22 = vand.u32 4294901760, %v8215_v12 }
0x1c3c   :  { %v8189_v4 = vadd.f32 %v8188_v60, %v8165_v8  ;;  %8311 = vmatpush.msra.mxu3 %v8310_v43  ;;  %v8325_v27 = vsub.f32 %v8215_v12, %v8263_v22 }
0x1c3e   :  { %v8211_v33 = vadd.f32 %v8210_v54, %v8189_v4  ;;  %8216 = vrot.lane.b32.xlu1 %v12424_v5, %s8737_s18  ;;  %8317 = vmatpush.msra.mxu3 %v8316_v39  ;;  %v8326_v42 = vand.u32 4294901760, %v8325_v27 }
0x1c40   :  { %v13004_v25 = vadd.f32 %v8211_v33, %v7798_v1  ;;  %v8327_v13 = vsub.f32 %v8325_v27, %v8326_v42  ;;  %v8708_v33 = vld [vmem:[%s13046_s5 + $0x3] ss:$0 sm:$0xff] }
0x1c42   :  { %v8328_v26 = vand.u32 4294901760, %v8327_v13 }
0x1c98   :  { %v5226_v30 = vpop.xlane.xlu1 %5225 }
0x1c99   :  { %8704 = vrcp.f32 %v5226_v30  ;;  %v5336_v57 = vand.u32 2147483648, %v5226_v30  ;;  %v5334_v41 = vand.u32 2147483647, %v5226_v30  ;;  %vm5330_vm15 = vweird.f32 %v5226_v30 }
0x1c9b   :  { %v5337_v7 = vor.u32 1.1754944e-38, %v5336_v57  ;;  %vm5335_vm4 = vcmp.eq.f32.partialorder %v5334_v41, 8.507059e+37 }
0x1c9f   :  { %v8705_v21 = vpop.eup %8704 }
0x1ca0   :  { %v5326_v62 = vmul.f32 %v8705_v21, %v5226_v30  ;;  %vm5331_vm14 = vweird.f32 %v8705_v21 }
0x1ca1   :  { %vm5332_vm3 = vmor %vm5330_vm15, %vm5331_vm14 }
0x1ca2   :  { %v5327_v49 = vsub.f32 1.0, %v5326_v62 }
0x1ca4   :  { %v5328_v11 = vmul.f32 %v8705_v21, %v5327_v49 }
0x1ca6   :  { %v5329_v44 = vadd.f32 %v8705_v21, %v5328_v11 }
0x1ca8   :  { %v5333_v19 = vsel %vm5332_vm3, %v8705_v21, %v5329_v44 }
0x1ca9   :  { %v5338_v5 = vsel %vm5335_vm4, %v5337_v7, %v5333_v19 }
0x1caa   :  { %v5346_v34 = vmul.f32 %v5338_v5, %v12935_v17 }
0x1cac   :  { %v8239_v40 = vsel %vm3898_vm2, %v5346_v34, 0 }
0x1cad   :  { %v8265_v28 = vand.u32 4294901760, %v8239_v40 }
0x1caf   :  { %v8266_v16 = vsub.f32 %v8239_v40, %v8265_v28 }
0x1cb0   :  { %v8217_v63 = vpop.permute.xlu1 %8216 }
0x1cb1   :  { %v8261_v6 = vand.u32 4294901760, %v8217_v63  ;;  %v8267_v45 = vand.u32 4294901760, %v8266_v16 }
0x1cb3   :  { %v8319_v14 = vsub.f32 %v8217_v63, %v8261_v6  ;;  %8262 = vmatpush.msra.mxu2 %v8261_v6  ;;  %8394 = vmatpush.msrb.mxu1 %v8261_v6  ;;  %v8268_v18 = vsub.f32 %v8266_v16, %v8267_v45 }
0x1cb5   :  { %v8320_v58 = vand.u32 4294901760, %v8319_v14  ;;  %8264 = vmatpush.msra.mxu2 %v8263_v22  ;;  %8363 = vmatpush.msrb.mxu0 %v8319_v14  ;;  %v8269_v24 = vand.u32 4294901760, %v8268_v18 }
0x1cb6   :  { %8396 = vmatpush.msrb.mxu1 %v8263_v22 }
0x1cb7   :  { %8415 = vmatpush.msrb.mxu2 %v8284_v9  ;;  %8400 = vmatmul.f32.vlgmr.msrb.gmra.mxu1 %v8267_v45  ;;  %v8321_v17 = vsub.f32 %v8319_v14, %v8320_v58  ;;  %v13544_v9 = vld [vmem:[#allocation29_spill] sm:$0xff] }
0x1cb8   :  { %8270 = vmatmul.f32.vlgmr.msra.gmra.mxu2 %v8269_v24  ;;  %8366 = vmatpush.msrb.mxu0 %v8325_v27 }
0x1cb9   :  { %8419 = vmatpush.msrb.mxu2 %v8290_v2  ;;  %8369 = vmatmul.f32.vlgmr.msrb.gmra.mxu0 %v8266_v16  ;;  %v8322_v31 = vand.u32 4294901760, %v8321_v17 }
0x1cba   :  { %8527 = vmatpush.msra.mxu1 %v12508_v10  ;;  %8497 = vmatpush.msra.mxu0 %v13543_v59  ;;  %v13545_v10 = vld [vmem:[#allocation22_spill] sm:$0xff] }
0x1cbb   :  { %8423 = vmatpush.msrb.mxu2 %v8296_v36  ;;  %8323 = vmatpush.msra.mxu3 %v8322_v31 }
0x1cbc   :  { %8573 = vmatpush.msrb.mxu1 %v13543_v59  ;;  %8550 = vmatpush.msrb.mxu0 %v13544_v9 }
0x1cbd   :  { %8427 = vmatpush.msrb.mxu2 %v8302_v56  ;;  %8329 = vmatpush.msra.mxu3 %v8328_v26 }
0x1cbe   :  { %8331 = vmatmul.f32.vlgmr.msra.gmra.mxu3 %v8265_v28 }
0x1cbf   :  { %8431 = vmatpush.msrb.mxu2 %v8308_v29  ;;  %8458 = vmatpush.msrb.mxu3 %v12912_v47 }
0x1cc1   :  { %8435 = vmatpush.msrb.mxu2 %v8314_v38  ;;  %8460 = vmatpush.msrb.mxu3 %v12947_v23 }
0x1cc3   :  { %8439 = vmatpush.msrb.mxu2 %v8320_v58  ;;  %8462 = vmatpush.msrb.mxu3 %v12933_v35 }
0x1cc5   :  { %8443 = vmatpush.msrb.mxu2 %v8326_v42  ;;  %8464 = vmatpush.msrb.mxu3 %v12939_v52 }
0x1cc6   :  { %8445 = vmatmul.f32.vlgmr.msrb.gmra.mxu2 %v8265_v28 }
0x1cc7   :  { %8599 = vmatpush.msra.mxu2 %v13545_v10  ;;  %8466 = vmatpush.msrb.mxu3 %v12976_v51 }
0x1cc9   :  { %8468 = vmatpush.msrb.mxu3 %v12950_v61 }
0x1ccb   :  { %8470 = vmatpush.msrb.mxu3 %v8261_v6 }
0x1ccd   :  { %8472 = vmatpush.msrb.mxu3 %v8263_v22 }
0x1cce   :  { %8474 = vmatmul.f32.vlgmr.msrb.gmra.mxu3 %v8265_v28 }
0x1ccf   :  { %8621 = vmatpush.msra.mxu3 %v13543_v59 }
0x1d34   :  { %v8401_v36 = vpop.f32.mrf.mxu1 }
0x1d36   :  { %v8370_v23 = vpop.f32.mrf.mxu0 }
0x1d3b   :  { %v8271_v32 = vpop.f32.mrf.mxu2 }
0x1d41   :  { %v8332_v47 = vpop.f32.mrf.mxu3 }
0x1d42   :  { %v8333_v48 = vadd.f32 %v8332_v47, %v8271_v32 }
0x1d44   :  { %v8371_v35 = vadd.f32 %v8370_v23, %v8333_v48 }
0x1d46   :  { %v8402_v15 = vadd.f32 %v8401_v36, %v8371_v35 }
0x1d49   :  { %v8446_v52 = vpop.f32.mrf.mxu2 }
0x1d4a   :  { %v8447_v56 = vadd.f32 %v8446_v52, %v8402_v15 }
0x1d51   :  { %v8475_v2 = vpop.f32.mrf.mxu3 }
0x1d52   :  { %v8476_v20 = vadd.f32 %v8475_v2, %v8447_v56 }
0x1d54   :  { %v8479_v51 = vsel %vm1713_vm1, %v8476_v20, 0 }
0x1d55   :  { %v8498_v38 = vand.u32 4294901760, %v8479_v51 }
0x1d57   :  { %v8499_v61 = vsub.f32 %v8479_v51, %v8498_v38  ;;  %8529 = vmatmul.f32.vlgmr.msra.gmra.mxu1 %v8498_v38  ;;  %8601 = vmatmul.f32.vlgmr.msra.gmra.mxu2 %v8498_v38 }
0x1d58   :  { %8623 = vmatmul.f32.vlgmr.msra.gmra.mxu3 %v8498_v38 }
0x1d59   :  { %v8500_v46 = vand.u32 4294901760, %v8499_v61 }
0x1d5b   :  { %v8501_v29 = vsub.f32 %v8499_v61, %v8500_v46 }
0x1d5d   :  { %v8502_v50 = vand.u32 4294901760, %v8501_v29 }
0x1d5f   :  { %8503 = vmatmul.f32.vlgmr.msra.gmra.mxu0 %v8502_v50  ;;  %8577 = vmatmul.f32.vlgmr.msrb.gmra.mxu1 %v8500_v46 }
0x1d67   :  { %8553 = vmatmul.f32.vlgmr.msrb.gmra.mxu0 %v8499_v61 }
0x1dd4   :  { %v8530_v3 = vpop.f32.mrf.mxu1 }
0x1dda   :  { %v8602_v60 = vpop.f32.mrf.mxu2 }
0x1ddb   :  { %v8624_v39 = vpop.f32.mrf.mxu3 }
0x1ddc   :  { %v8504_v55 = vpop.f32.mrf.mxu0  ;;  %v8578_v8 = vpop.f32.mrf.mxu1 }
0x1ddd   :  { %v8531_v37 = vadd.f32 %v8530_v3, %v8504_v55 }
0x1de4   :  { %v8554_v0 = vpop.f32.mrf.mxu0 }
0x1de5   :  { %v8555_v53 = vadd.f32 %v8554_v0, %v8531_v37 }
0x1de7   :  { %v8579_v43 = vadd.f32 %v8578_v8, %v8555_v53 }
0x1de9   :  { %v8603_v4 = vadd.f32 %v8602_v60, %v8579_v43 }
0x1deb   :  { %v8625_v54 = vadd.f32 %v8624_v39, %v8603_v4 }
0x1ded   :  { %v8627_v1 = vadd.f32 %v8625_v54, %v13004_v25 }
0x1def   :  { %v8628_v30 = vadd.f32 %v8708_v33, %v8627_v1 }
0x1df1   :  { %8629 = vst.msk [vmem:[#allocation2 + $0x8] sm:$0xff] %vm55_vm0, %v8628_v30 }
0x1df2   :  { %8642 = dma.vmem_to_hbm [thread:$0]  %s8635_s11, 256, %s8637_s13, [#allocation3], %s8739_s15, %s8739_s15, %s8740_s16  }
0x1df3   :  { %8733 = dma.done.wait [#allocation3], 256  }
0x1df4   :  { %8734 = vsyncadd [#allocation3], 4294967040 }
0x1df5   :  { %8647 = vsyncpa [#allocation3], 1 }

</bundles_post_ra>
